<compile_context>
chip_gen: v7x
topology: tpu7x:2x2x1
jax: 0.10.0
libtpu: 0.0.40
codegen_flags: <defaults>
</compile_context>

<pallas_src>
import jax
import jax.numpy as jnp
from jax.experimental import pallas as pl
from jax.experimental.pallas import tpu as pltpu


B_PAD = 8  # sublane-friendly padded batch for the tiny real batch


# ----------------------------------------------------------------------------
# Kernel 1: big streaming linear  y = relu(x @ w + b),  K- and N-tiled.
# ----------------------------------------------------------------------------
def _big_linear_kernel(x_ref, w_ref, b_ref, o_ref, acc_ref):
    k = pl.program_id(1)

    @pl.when(k == 0)
    def _():
        acc_ref[...] = jnp.zeros_like(acc_ref)

    acc_ref[...] += jnp.dot(
        x_ref[...], w_ref[...], preferred_element_type=jnp.float32
    )

    @pl.when(k == pl.num_programs(1) - 1)
    def _():
        y = acc_ref[...] + b_ref[...]
        o_ref[...] = jnp.maximum(y, 0.0).astype(o_ref.dtype)


def _pick_tk(K):
    if K <= 8192:
        return K
    for tk in (6400, 5120, 4096, 3200, 2048, 1600, 1280, 1024, 512, 256, 128):
        if K % tk == 0:
            return tk
    return K


def big_linear_pallas(x, w, b):
    """x: (Bp, K) bf16, w: (K, N) bf16, b: (1, N) f32 -> (Bp, N) f32."""
    Bp, K = x.shape
    Kw, N = w.shape
    assert K == Kw, (K, Kw)
    tk = _pick_tk(K)
    tn = 512 if (N > 512 and N % 512 == 0) else N
    nk, nn = K // tk, N // tn

    return pl.pallas_call(
        _big_linear_kernel,
        out_shape=jax.ShapeDtypeStruct((Bp, N), jnp.float32),
        grid_spec=pltpu.PrefetchScalarGridSpec(
            num_scalar_prefetch=0,
            grid=(nn, nk),
            in_specs=[
                pl.BlockSpec((Bp, tk), lambda n, k: (0, k)),
                pl.BlockSpec((tk, tn), lambda n, k: (k, n)),
                pl.BlockSpec((1, tn), lambda n, k: (0, n)),
            ],
            out_specs=pl.BlockSpec((Bp, tn), lambda n, k: (0, n)),
            scratch_shapes=[pltpu.VMEM((Bp, tn), jnp.float32)],
        ),
        compiler_params=pltpu.CompilerParams(
            dimension_semantics=("parallel", "arbitrary"),
            vmem_limit_bytes=48 << 20,
        ),
    )(x, w, b)


# ----------------------------------------------------------------------------
# Kernel 2: fused "everything else" kernel (all small weights VMEM-resident).
# ----------------------------------------------------------------------------
def _tail_kernel(
    h1_ref, l_ref, c_ref,
    w_gl2, b_gl2, w_gl3, b_gl3,
    w_lab1, b_lab1, w_lab2, b_lab2,
    w_cor1, b_cor1, w_cor2, b_cor2,
    w_cmb1, b_cmb1, w_cmb2, b_cmb2, w_cmb3, b_cmb3, w_cmb4, b_cmb4,
    o_ref,
):
    def lin_relu(x, w_ref, b_ref):
        y = jnp.dot(x, w_ref[...], preferred_element_type=jnp.float32) + b_ref[...]
        return jnp.maximum(y, 0.0)

    # grads_linear tail: 1024 -> 512 -> 128
    h2 = lin_relu(h1_ref[...], w_gl2, b_gl2)
    out_g = lin_relu(h2, w_gl3, b_gl3)                        # (Bp, 128)

    # labels: nc -> 128 -> 64
    out_l = lin_relu(lin_relu(l_ref[...], w_lab1, b_lab1), w_lab2, b_lab2)

    # correct: 1 -> nc -> 64  (in_features=1: rank-1 matmul == broadcast mul)
    hc = jnp.maximum(c_ref[...] * w_cor1[...] + b_cor1[...], 0.0)
    out_c = lin_relu(hc, w_cor2, b_cor2)                      # (Bp, 64)

    # combine(cat(out_g, out_c, out_l)): the concat is fused away by splitting
    # the first combine weight into its three row blocks.
    y = (
        jnp.dot(out_g, w_cmb1[0:128, :], preferred_element_type=jnp.float32)
        + jnp.dot(out_c, w_cmb1[128:192, :], preferred_element_type=jnp.float32)
        + jnp.dot(out_l, w_cmb1[192:256, :], preferred_element_type=jnp.float32)
        + b_cmb1[...]
    )
    x = jnp.maximum(y, 0.0)
    x = lin_relu(x, w_cmb2, b_cmb2)
    x = lin_relu(x, w_cmb3, b_cmb3)
    out = jnp.dot(x, w_cmb4[...], preferred_element_type=jnp.float32) + b_cmb4[...]
    o_ref[...] = jax.nn.sigmoid(out).astype(o_ref.dtype)


def tail_pallas(h1, l, c, params):
    Bp = h1.shape[0]
    args = (
        h1, l, c,
        *params["gl2"], *params["gl3"],
        *params["lab1"], *params["lab2"],
        *params["cor1"], *params["cor2"],
        *params["cmb1"], *params["cmb2"], *params["cmb3"], *params["cmb4"],
    )
    # Single invocation, no grid: every operand is a whole-array VMEM block.
    return pl.pallas_call(
        _tail_kernel,
        out_shape=jax.ShapeDtypeStruct((Bp, 1), jnp.float32),
    )(*args)


# ----------------------------------------------------------------------------
# Parameter init (matches nn.init.normal(std=0.01) weights, zero biases).
# ----------------------------------------------------------------------------
def _init_linear(key, in_f, out_f, dtype=jnp.float32):
    # PyTorch stores Linear weight as (out, in); we keep (in, out).
    w = jax.random.normal(key, (out_f, in_f), jnp.float32) * 0.01
    b = jnp.zeros((1, out_f), jnp.float32)
    return w.T.astype(dtype), b


def init_params(key, num_classes):
    shapes = {
        # grads_linear (Dropout layers are identity in eval)
        "gl1": (256 * 100, 1024),
        "gl2": (1024, 512),
        "gl3": (512, 128),
        # labels
        "lab1": (num_classes, 128),
        "lab2": (128, 64),
        # correct
        "cor1": (1, num_classes),
        "cor2": (num_classes, 64),
        # combine
        "cmb1": (64 * 4, 256),
        "cmb2": (256, 128),
        "cmb3": (128, 64),
        "cmb4": (64, 1),
    }
    params = {}
    keys = jax.random.split(key, len(shapes))
    for k_rng, (name, (fi, fo)) in zip(keys, shapes.items()):
        # The huge gl1 weight is stored in bf16: the whole model is HBM-bound
        # on streaming it, so halving its bytes ~halves end-to-end time.
        dtype = jnp.bfloat16 if name == "gl1" else jnp.float32
        params[name] = _init_linear(k_rng, fi, fo, dtype=dtype)
    return params


# ----------------------------------------------------------------------------
# Forward pass (mirrors InferenceAttack_HZ.forward's observable output)
# ----------------------------------------------------------------------------
def inference_attack_forward(params, g, l, c, o):
    del o  # preds branch never feeds the module output (dead compute).
    B = g.shape[0]
    gf = g.reshape(B, -1)  # g.view([B, -1])

    Bp = max(B_PAD, ((B + 7) // 8) * 8)
    pad = Bp - B
    gf_p = jnp.pad(gf, ((0, pad), (0, 0))).astype(jnp.bfloat16)
    l_p = jnp.pad(l, ((0, pad), (0, 0)))
    c_p = jnp.pad(c, ((0, pad), (0, 0)))

    # Big streaming layer: 25600 -> 1024 (bf16 weights, f32 accum, fused ReLU)
    h1 = big_linear_pallas(gf_p, *params["gl1"])         # (Bp, 1024) f32

    # Everything else fused into one kernel (gl2, gl3, labels, correct,
    # combine, sigmoid).
    out = tail_pallas(h1, l_p, c_p, params)              # (Bp, 1)
    return out[:B]


if __name__ == "__main__":
    num_classes = 10
    B = 2

    key = jax.random.PRNGKey(0)
    kp, kg, kl, kc, ko = jax.random.split(key, 5)

    params = init_params(kp, num_classes)

    # g is the per-example gradient block (B, 1, 256, 100)
    g = jax.random.normal(kg, (B, 1, 256, 100), jnp.float32)
    l = jax.random.normal(kl, (B, num_classes), jnp.float32)
    c = jax.random.normal(kc, (B, 1), jnp.float32)
    o = jax.random.normal(ko, (B, num_classes), jnp.float32)

    fwd = jax.jit(inference_attack_forward)
    out = fwd(params, g, l, c, o)
    out = jax.block_until_ready(out)
    assert out.shape == (B, 1), out.shape
    assert bool(jnp.all(jnp.isfinite(out)))
    print("KERNEL_OK")
</pallas_src>

<mosaic_0001>
module attributes {stable_mosaic.version = 11 : i64} {
  func.func @_big_linear_kernel(%arg0: i32, %arg1: i32, %arg2: memref<8x6400xbf16, #tpu.memory_space<vmem>>, %arg3: memref<6400x512xbf16, #tpu.memory_space<vmem>>, %arg4: memref<1x512xf32, #tpu.memory_space<vmem>>, %arg5: memref<8x512xf32, #tpu.memory_space<vmem>>, %arg6: memref<8x512xf32, #tpu.memory_space<vmem>>) attributes {dimension_semantics = [#tpu.dimension_semantics<parallel>, #tpu.dimension_semantics<arbitrary>], iteration_bounds = array<i64: 2, 4>, scalar_prefetch = 0 : i64, scratch_operands = 1 : i64, tpu.core_type = #tpu.core_type<tc>, window_params = [{transform_indices = @transform_0, window_bounds = array<i64: 8, 6400>}, {transform_indices = @transform_1, window_bounds = array<i64: 6400, 512>}, {transform_indices = @transform_2, window_bounds = array<i64: 1, 512>}, {transform_indices = @transform_3, window_bounds = array<i64: 8, 512>}]} {
    %c0_i32 = arith.constant 0 : i32
    %0 = arith.cmpi eq, %arg1, %c0_i32 : i32
    %1 = arith.extui %0 : i1 to i32
    %c0_i32_0 = arith.constant 0 : i32
    %2 = arith.cmpi ne, %1, %c0_i32_0 : i32
    scf.if %2 {
      %cst_9 = arith.constant 0.000000e+00 : f32
      %12 = vector.broadcast %cst_9 : f32 to vector<8x512xf32>
      %c0_10 = arith.constant 0 : index
      %c0_11 = arith.constant 0 : index
      %13 = vector.load %arg6[%c0_10, %c0_11] : memref<8x512xf32, #tpu.memory_space<vmem>>, vector<8x512xf32>
      tpu.vector_store %arg6[%c0_10, %c0_11], %12 {strides = array<i32>} : memref<8x512xf32, #tpu.memory_space<vmem>>, vector<8x512xf32>,
    } else {
    }
    %c0 = arith.constant 0 : index
    %c0_1 = arith.constant 0 : index
    %3 = vector.load %arg6[%c0, %c0_1] : memref<8x512xf32, #tpu.memory_space<vmem>>, vector<8x512xf32>
    %c0_2 = arith.constant 0 : index
    %c0_3 = arith.constant 0 : index
    %4 = vector.load %arg2[%c0_2, %c0_3] : memref<8x6400xbf16, #tpu.memory_space<vmem>>, vector<8x6400xbf16>
    %c0_4 = arith.constant 0 : index
    %c0_5 = arith.constant 0 : index
    %5 = vector.load %arg3[%c0_4, %c0_5] : memref<6400x512xbf16, #tpu.memory_space<vmem>>, vector<6400x512xbf16>
    %cst = arith.constant dense<0.000000e+00> : vector<8x512xf32>
    %6 = tpu.matmul %4, %5, %cst {dimension_numbers = #tpu.dot_dimension_numbers<[1], [0], [0], [1], [0, 0, 1, 1], [], []>} : vector<8x6400xbf16>, vector<6400x512xbf16>, vector<8x512xf32> -> vector<8x512xf32>
    %7 = arith.addf %3, %6 : vector<8x512xf32>
    %c0_6 = arith.constant 0 : index
    %c0_7 = arith.constant 0 : index
    %8 = vector.load %arg6[%c0_6, %c0_7] : memref<8x512xf32, #tpu.memory_space<vmem>>, vector<8x512xf32>
    tpu.vector_store %arg6[%c0_6, %c0_7], %7 {strides = array<i32>} : memref<8x512xf32, #tpu.memory_space<vmem>>, vector<8x512xf32>,
    %c3_i32 = arith.constant 3 : i32
    %9 = arith.cmpi eq, %arg1, %c3_i32 : i32
    %10 = arith.extui %9 : i1 to i32
    %c0_i32_8 = arith.constant 0 : i32
    %11 = arith.cmpi ne, %10, %c0_i32_8 : i32
    scf.if %11 {
      %c0_9 = arith.constant 0 : index
      %c0_10 = arith.constant 0 : index
      %12 = vector.load %arg6[%c0_9, %c0_10] : memref<8x512xf32, #tpu.memory_space<vmem>>, vector<8x512xf32>
      %c0_11 = arith.constant 0 : index
      %c0_12 = arith.constant 0 : index
      %13 = vector.load %arg4[%c0_11, %c0_12] : memref<1x512xf32, #tpu.memory_space<vmem>>, vector<1x512xf32>
      %14 = vector.broadcast %13 : vector<1x512xf32> to vector<8x512xf32>
      %15 = arith.addf %12, %14 : vector<8x512xf32>
      %cst_13 = arith.constant 0.000000e+00 : f32
      %16 = vector.broadcast %cst_13 : f32 to vector<8x512xf32>
      %17 = arith.maximumf %15, %16 : vector<8x512xf32>
      %c0_14 = arith.constant 0 : index
      %c0_15 = arith.constant 0 : index
      %18 = vector.load %arg5[%c0_14, %c0_15] : memref<8x512xf32, #tpu.memory_space<vmem>>, vector<8x512xf32>
      tpu.vector_store %arg5[%c0_14, %c0_15], %17 {strides = array<i32>} : memref<8x512xf32, #tpu.memory_space<vmem>>, vector<8x512xf32>,
    } else {
    }
    return
  }
  func.func @transform_0(%arg0: i32, %arg1: i32) -> (i32, i32) {
    %c0_i32 = arith.constant 0 : i32
    %c0_i32_0 = arith.constant 0 : i32
    return %c0_i32, %arg1 : i32, i32
  }
  func.func @transform_1(%arg0: i32, %arg1: i32) -> (i32, i32) {
    %c0_i32 = arith.constant 0 : i32
    return %arg1, %arg0 : i32, i32
  }
  func.func @transform_2(%arg0: i32, %arg1: i32) -> (i32, i32) {
    %c0_i32 = arith.constant 0 : i32
    %c0_i32_0 = arith.constant 0 : i32
    return %c0_i32, %arg0 : i32, i32
  }
  func.func @transform_3(%arg0: i32, %arg1: i32) -> (i32, i32) {
    %c0_i32 = arith.constant 0 : i32
    %c0_i32_0 = arith.constant 0 : i32
    return %c0_i32, %arg0 : i32, i32
  }
}

module attributes {stable_mosaic.version = 11 : i64} {
  func.func @_tail_kernel(%arg0: memref<8x1024xf32, #tpu.memory_space<vmem>>, %arg1: memref<8x10xf32, #tpu.memory_space<vmem>>, %arg2: memref<8x1xf32, #tpu.memory_space<vmem>>, %arg3: memref<1024x512xf32, #tpu.memory_space<vmem>>, %arg4: memref<1x512xf32, #tpu.memory_space<vmem>>, %arg5: memref<512x128xf32, #tpu.memory_space<vmem>>, %arg6: memref<1x128xf32, #tpu.memory_space<vmem>>, %arg7: memref<10x128xf32, #tpu.memory_space<vmem>>, %arg8: memref<1x128xf32, #tpu.memory_space<vmem>>, %arg9: memref<128x64xf32, #tpu.memory_space<vmem>>, %arg10: memref<1x64xf32, #tpu.memory_space<vmem>>, %arg11: memref<1x10xf32, #tpu.memory_space<vmem>>, %arg12: memref<1x10xf32, #tpu.memory_space<vmem>>, %arg13: memref<10x64xf32, #tpu.memory_space<vmem>>, %arg14: memref<1x64xf32, #tpu.memory_space<vmem>>, %arg15: memref<256x256xf32, #tpu.memory_space<vmem>>, %arg16: memref<1x256xf32, #tpu.memory_space<vmem>>, %arg17: memref<256x128xf32, #tpu.memory_space<vmem>>, %arg18: memref<1x128xf32, #tpu.memory_space<vmem>>, %arg19: memref<128x64xf32, #tpu.memory_space<vmem>>, %arg20: memref<1x64xf32, #tpu.memory_space<vmem>>, %arg21: memref<64x1xf32, #tpu.memory_space<vmem>>, %arg22: memref<1x1xf32, #tpu.memory_space<vmem>>, %arg23: memref<8x1xf32, #tpu.memory_space<vmem>>) attributes {dimension_semantics = [], scalar_prefetch = 0 : i64, scratch_operands = 0 : i64, tpu.core_type = #tpu.core_type<tc>} {
    %c0 = arith.constant 0 : index
    %c0_0 = arith.constant 0 : index
    %0 = vector.load %arg0[%c0, %c0_0] : memref<8x1024xf32, #tpu.memory_space<vmem>>, vector<8x1024xf32>
    %c0_1 = arith.constant 0 : index
    %c0_2 = arith.constant 0 : index
    %1 = vector.load %arg3[%c0_1, %c0_2] : memref<1024x512xf32, #tpu.memory_space<vmem>>, vector<1024x512xf32>
    %cst = arith.constant dense<0.000000e+00> : vector<8x512xf32>
    %2 = tpu.matmul %0, %1, %cst {dimension_numbers = #tpu.dot_dimension_numbers<[1], [0], [0], [1], [0, 0, 1, 1], [], []>} : vector<8x1024xf32>, vector<1024x512xf32>, vector<8x512xf32> -> vector<8x512xf32>
    %c0_3 = arith.constant 0 : index
    %c0_4 = arith.constant 0 : index
    %3 = vector.load %arg4[%c0_3, %c0_4] : memref<1x512xf32, #tpu.memory_space<vmem>>, vector<1x512xf32>
    %4 = vector.broadcast %3 : vector<1x512xf32> to vector<8x512xf32>
    %5 = arith.addf %2, %4 : vector<8x512xf32>
    %cst_5 = arith.constant 0.000000e+00 : f32
    %6 = vector.broadcast %cst_5 : f32 to vector<8x512xf32>
    %7 = arith.maximumf %5, %6 : vector<8x512xf32>
    %c0_6 = arith.constant 0 : index
    %c0_7 = arith.constant 0 : index
    %8 = vector.load %arg5[%c0_6, %c0_7] : memref<512x128xf32, #tpu.memory_space<vmem>>, vector<512x128xf32>
    %cst_8 = arith.constant dense<0.000000e+00> : vector<8x128xf32>
    %9 = tpu.matmul %7, %8, %cst_8 {dimension_numbers = #tpu.dot_dimension_numbers<[1], [0], [0], [1], [0, 0, 1, 1], [], []>} : vector<8x512xf32>, vector<512x128xf32>, vector<8x128xf32> -> vector<8x128xf32>
    %c0_9 = arith.constant 0 : index
    %c0_10 = arith.constant 0 : index
    %10 = vector.load %arg6[%c0_9, %c0_10] : memref<1x128xf32, #tpu.memory_space<vmem>>, vector<1x128xf32>
    %11 = vector.broadcast %10 : vector<1x128xf32> to vector<8x128xf32>
    %12 = arith.addf %9, %11 : vector<8x128xf32>
    %cst_11 = arith.constant 0.000000e+00 : f32
    %13 = vector.broadcast %cst_11 : f32 to vector<8x128xf32>
    %14 = arith.maximumf %12, %13 : vector<8x128xf32>
    %c0_12 = arith.constant 0 : index
    %c0_13 = arith.constant 0 : index
    %15 = vector.load %arg1[%c0_12, %c0_13] : memref<8x10xf32, #tpu.memory_space<vmem>>, vector<8x10xf32>
    %c0_14 = arith.constant 0 : index
    %c0_15 = arith.constant 0 : index
    %16 = vector.load %arg7[%c0_14, %c0_15] : memref<10x128xf32, #tpu.memory_space<vmem>>, vector<10x128xf32>
    %cst_16 = arith.constant dense<0.000000e+00> : vector<8x128xf32>
    %17 = tpu.matmul %15, %16, %cst_16 {dimension_numbers = #tpu.dot_dimension_numbers<[1], [0], [0], [1], [0, 0, 1, 1], [], []>} : vector<8x10xf32>, vector<10x128xf32>, vector<8x128xf32> -> vector<8x128xf32>
    %c0_17 = arith.constant 0 : index
    %c0_18 = arith.constant 0 : index
    %18 = vector.load %arg8[%c0_17, %c0_18] : memref<1x128xf32, #tpu.memory_space<vmem>>, vector<1x128xf32>
    %19 = vector.broadcast %18 : vector<1x128xf32> to vector<8x128xf32>
    %20 = arith.addf %17, %19 : vector<8x128xf32>
    %cst_19 = arith.constant 0.000000e+00 : f32
    %21 = vector.broadcast %cst_19 : f32 to vector<8x128xf32>
    %22 = arith.maximumf %20, %21 : vector<8x128xf32>
    %c0_20 = arith.constant 0 : index
    %c0_21 = arith.constant 0 : index
    %23 = vector.load %arg9[%c0_20, %c0_21] : memref<128x64xf32, #tpu.memory_space<vmem>>, vector<128x64xf32>
    %cst_22 = arith.constant dense<0.000000e+00> : vector<8x64xf32>
    %24 = tpu.matmul %22, %23, %cst_22 {dimension_numbers = #tpu.dot_dimension_numbers<[1], [0], [0], [1], [0, 0, 1, 1], [], []>} : vector<8x128xf32>, vector<128x64xf32>, vector<8x64xf32> -> vector<8x64xf32>
    %c0_23 = arith.constant 0 : index
    %c0_24 = arith.constant 0 : index
    %25 = vector.load %arg10[%c0_23, %c0_24] : memref<1x64xf32, #tpu.memory_space<vmem>>, vector<1x64xf32>
    %26 = vector.broadcast %25 : vector<1x64xf32> to vector<8x64xf32>
    %27 = arith.addf %24, %26 : vector<8x64xf32>
    %cst_25 = arith.constant 0.000000e+00 : f32
    %28 = vector.broadcast %cst_25 : f32 to vector<8x64xf32>
    %29 = arith.maximumf %27, %28 : vector<8x64xf32>
    %c0_26 = arith.constant 0 : index
    %c0_27 = arith.constant 0 : index
    %30 = vector.load %arg2[%c0_26, %c0_27] : memref<8x1xf32, #tpu.memory_space<vmem>>, vector<8x1xf32>
    %c0_28 = arith.constant 0 : index
    %c0_29 = arith.constant 0 : index
    %31 = vector.load %arg11[%c0_28, %c0_29] : memref<1x10xf32, #tpu.memory_space<vmem>>, vector<1x10xf32>
    %32 = vector.broadcast %30 : vector<8x1xf32> to vector<8x10xf32>
    %33 = vector.broadcast %31 : vector<1x10xf32> to vector<8x10xf32>
    %34 = arith.mulf %32, %33 : vector<8x10xf32>
    %c0_30 = arith.constant 0 : index
    %c0_31 = arith.constant 0 : index
    %35 = vector.load %arg12[%c0_30, %c0_31] : memref<1x10xf32, #tpu.memory_space<vmem>>, vector<1x10xf32>
    %36 = vector.broadcast %35 : vector<1x10xf32> to vector<8x10xf32>
    %37 = arith.addf %34, %36 : vector<8x10xf32>
    %cst_32 = arith.constant 0.000000e+00 : f32
    %38 = vector.broadcast %cst_32 : f32 to vector<8x10xf32>
    %39 = arith.maximumf %37, %38 : vector<8x10xf32>
    %c0_33 = arith.constant 0 : index
    %c0_34 = arith.constant 0 : index
    %40 = vector.load %arg13[%c0_33, %c0_34] : memref<10x64xf32, #tpu.memory_space<vmem>>, vector<10x64xf32>
    %cst_35 = arith.constant dense<0.000000e+00> : vector<8x64xf32>
    %41 = tpu.matmul %39, %40, %cst_35 {dimension_numbers = #tpu.dot_dimension_numbers<[1], [0], [0], [1], [0, 0, 1, 1], [], []>} : vector<8x10xf32>, vector<10x64xf32>, vector<8x64xf32> -> vector<8x64xf32>
    %c0_36 = arith.constant 0 : index
    %c0_37 = arith.constant 0 : index
    %42 = vector.load %arg14[%c0_36, %c0_37] : memref<1x64xf32, #tpu.memory_space<vmem>>, vector<1x64xf32>
    %43 = vector.broadcast %42 : vector<1x64xf32> to vector<8x64xf32>
    %44 = arith.addf %41, %43 : vector<8x64xf32>
    %cst_38 = arith.constant 0.000000e+00 : f32
    %45 = vector.broadcast %cst_38 : f32 to vector<8x64xf32>
    %46 = arith.maximumf %44, %45 : vector<8x64xf32>
    %c0_39 = arith.constant 0 : index
    %c0_40 = arith.constant 0 : index
    %47 = vector.load %arg15[%c0_39, %c0_40] : memref<256x256xf32, #tpu.memory_space<vmem>>, vector<128x256xf32>
    %cst_41 = arith.constant dense<0.000000e+00> : vector<8x256xf32>
    %48 = tpu.matmul %14, %47, %cst_41 {dimension_numbers = #tpu.dot_dimension_numbers<[1], [0], [0], [1], [0, 0, 1, 1], [], []>} : vector<8x128xf32>, vector<128x256xf32>, vector<8x256xf32> -> vector<8x256xf32>
    %c128 = arith.constant 128 : index
    %c0_42 = arith.constant 0 : index
    %49 = vector.load %arg15[%c128, %c0_42] : memref<256x256xf32, #tpu.memory_space<vmem>>, vector<64x256xf32>
    %cst_43 = arith.constant dense<0.000000e+00> : vector<8x256xf32>
    %50 = tpu.matmul %46, %49, %cst_43 {dimension_numbers = #tpu.dot_dimension_numbers<[1], [0], [0], [1], [0, 0, 1, 1], [], []>} : vector<8x64xf32>, vector<64x256xf32>, vector<8x256xf32> -> vector<8x256xf32>
    %51 = arith.addf %48, %50 : vector<8x256xf32>
    %c192 = arith.constant 192 : index
    %c0_44 = arith.constant 0 : index
    %52 = vector.load %arg15[%c192, %c0_44] : memref<256x256xf32, #tpu.memory_space<vmem>>, vector<64x256xf32>
    %cst_45 = arith.constant dense<0.000000e+00> : vector<8x256xf32>
    %53 = tpu.matmul %29, %52, %cst_45 {dimension_numbers = #tpu.dot_dimension_numbers<[1], [0], [0], [1], [0, 0, 1, 1], [], []>} : vector<8x64xf32>, vector<64x256xf32>, vector<8x256xf32> -> vector<8x256xf32>
    %54 = arith.addf %51, %53 : vector<8x256xf32>
    %c0_46 = arith.constant 0 : index
    %c0_47 = arith.constant 0 : index
    %55 = vector.load %arg16[%c0_46, %c0_47] : memref<1x256xf32, #tpu.memory_space<vmem>>, vector<1x256xf32>
    %56 = vector.broadcast %55 : vector<1x256xf32> to vector<8x256xf32>
    %57 = arith.addf %54, %56 : vector<8x256xf32>
    %cst_48 = arith.constant 0.000000e+00 : f32
    %58 = vector.broadcast %cst_48 : f32 to vector<8x256xf32>
    %59 = arith.maximumf %57, %58 : vector<8x256xf32>
    %c0_49 = arith.constant 0 : index
    %c0_50 = arith.constant 0 : index
    %60 = vector.load %arg17[%c0_49, %c0_50] : memref<256x128xf32, #tpu.memory_space<vmem>>, vector<256x128xf32>
    %cst_51 = arith.constant dense<0.000000e+00> : vector<8x128xf32>
    %61 = tpu.matmul %59, %60, %cst_51 {dimension_numbers = #tpu.dot_dimension_numbers<[1], [0], [0], [1], [0, 0, 1, 1], [], []>} : vector<8x256xf32>, vector<256x128xf32>, vector<8x128xf32> -> vector<8x128xf32>
    %c0_52 = arith.constant 0 : index
    %c0_53 = arith.constant 0 : index
    %62 = vector.load %arg18[%c0_52, %c0_53] : memref<1x128xf32, #tpu.memory_space<vmem>>, vector<1x128xf32>
    %63 = vector.broadcast %62 : vector<1x128xf32> to vector<8x128xf32>
    %64 = arith.addf %61, %63 : vector<8x128xf32>
    %cst_54 = arith.constant 0.000000e+00 : f32
    %65 = vector.broadcast %cst_54 : f32 to vector<8x128xf32>
    %66 = arith.maximumf %64, %65 : vector<8x128xf32>
    %c0_55 = arith.constant 0 : index
    %c0_56 = arith.constant 0 : index
    %67 = vector.load %arg19[%c0_55, %c0_56] : memref<128x64xf32, #tpu.memory_space<vmem>>, vector<128x64xf32>
    %cst_57 = arith.constant dense<0.000000e+00> : vector<8x64xf32>
    %68 = tpu.matmul %66, %67, %cst_57 {dimension_numbers = #tpu.dot_dimension_numbers<[1], [0], [0], [1], [0, 0, 1, 1], [], []>} : vector<8x128xf32>, vector<128x64xf32>, vector<8x64xf32> -> vector<8x64xf32>
    %c0_58 = arith.constant 0 : index
    %c0_59 = arith.constant 0 : index
    %69 = vector.load %arg20[%c0_58, %c0_59] : memref<1x64xf32, #tpu.memory_space<vmem>>, vector<1x64xf32>
    %70 = vector.broadcast %69 : vector<1x64xf32> to vector<8x64xf32>
    %71 = arith.addf %68, %70 : vector<8x64xf32>
    %cst_60 = arith.constant 0.000000e+00 : f32
    %72 = vector.broadcast %cst_60 : f32 to vector<8x64xf32>
    %73 = arith.maximumf %71, %72 : vector<8x64xf32>
    %c0_61 = arith.constant 0 : index
    %c0_62 = arith.constant 0 : index
    %74 = vector.load %arg21[%c0_61, %c0_62] : memref<64x1xf32, #tpu.memory_space<vmem>>, vector<64x1xf32>
    %cst_63 = arith.constant dense<0.000000e+00> : vector<8x1xf32>
    %75 = tpu.matmul %73, %74, %cst_63 {dimension_numbers = #tpu.dot_dimension_numbers<[1], [0], [0], [1], [0, 0, 1, 1], [], []>} : vector<8x64xf32>, vector<64x1xf32>, vector<8x1xf32> -> vector<8x1xf32>
    %c0_64 = arith.constant 0 : index
    %c0_65 = arith.constant 0 : index
    %76 = vector.load %arg22[%c0_64, %c0_65] : memref<1x1xf32, #tpu.memory_space<vmem>>, vector<1x1xf32>
    %77 = vector.broadcast %76 : vector<1x1xf32> to vector<8x1xf32>
    %78 = arith.addf %75, %77 : vector<8x1xf32>
    %79 = arith.negf %78 : vector<8x1xf32>
    %80 = math.exp %79 : vector<8x1xf32>
    %cst_66 = arith.constant 1.000000e+00 : f32
    %81 = vector.broadcast %cst_66 : f32 to vector<8x1xf32>
    %82 = arith.addf %81, %80 : vector<8x1xf32>
    %83 = arith.divf %81, %82 : vector<8x1xf32>
    %c0_67 = arith.constant 0 : index
    %c0_68 = arith.constant 0 : index
    %84 = vector.load %arg23[%c0_67, %c0_68] : memref<8x1xf32, #tpu.memory_space<vmem>>, vector<8x1xf32>
    tpu.vector_store %arg23[%c0_67, %c0_68], %83 {strides = array<i32>} : memref<8x1xf32, #tpu.memory_space<vmem>>, vector<8x1xf32>,
    return
  }
}

</mosaic_0001>

<bundles_post_ra>
// kernel: inference_attack_forward.3
= control target key start
LH: loop header
LB: loop body
LE: loop exit
PB: predicated region body
PF: predicated region fallthrough
CT: control target
= control target key end

     0   :  { %vm1416_vm0 = vcmask 1041408   ;;  %vm3346_vm1 = vmmov 1   ;;  %vm1412_vm3 = vcmask 80896   ;;  %vm3347_vm4 = vmmov 0   ;;  %s5748_s3 = inlined_call_operand.vmem [shape: f32[1024,512], index: 3, kind: input, shape index: {}]   ;;  %s5749_s0 = inlined_call_operand.vmem [shape: f32[8,1024], index: 0, kind: input, shape index: {}]   ;;  %s5750_s2 = inlined_call_operand.vmem [shape: f32[8,1], index: 2, kind: input, shape index: {}]   ;;  %s5751_s5 = inlined_call_operand.vmem [shape: f32[512,128], index: 5, kind: input, shape index: {}]   ;;  %s5752_s4 = inlined_call_operand.vmem [shape: f32[1,512], index: 4, kind: input, shape index: {}]   ;;  %s5753_s11 = inlined_call_operand.vmem [shape: f32[1,10], index: 11, kind: input, shape index: {}]   ;;  %s5754_s7 = inlined_call_operand.vmem [shape: f32[10,128], index: 7, kind: input, shape index: {}]   ;;  %s5755_s9 = inlined_call_operand.vmem [shape: f32[128,64], index: 9, kind: input, shape index: {}]   ;;  %s5756_s12 = inlined_call_operand.vmem [shape: f32[1,10], index: 12, kind: input, shape index: {}]   ;;  %s5757_s13 = inlined_call_operand.vmem [shape: f32[10,64], index: 13, kind: input, shape index: {}]   ;;  %s5758_s15 = inlined_call_operand.vmem [shape: f32[256,256], index: 15, kind: input, shape index: {}]   ;;  %s5759_s1 = inlined_call_operand.vmem [shape: f32[8,10], index: 1, kind: input, shape index: {}]   ;;  %s5760_s6 = inlined_call_operand.vmem [shape: f32[1,128], index: 6, kind: input, shape index: {}]   ;;  %s5761_s8 = inlined_call_operand.vmem [shape: f32[1,128], index: 8, kind: input, shape index: {}]   ;;  %s5762_s14 = inlined_call_operand.vmem [shape: f32[1,64], index: 14, kind: input, shape index: {}]   ;;  %s5763_s17 = inlined_call_operand.vmem [shape: f32[256,128], index: 17, kind: input, shape index: {}]   ;;  %s5764_s10 = inlined_call_operand.vmem [shape: f32[1,64], index: 10, kind: input, shape index: {}]   ;;  %s5765_s16 = inlined_call_operand.vmem [shape: f32[1,256], index: 16, kind: input, shape index: {}]   ;;  %s5766_s19 = inlined_call_operand.vmem [shape: f32[128,64], index: 19, kind: input, shape index: {}]   ;;  %s5767_s21 = inlined_call_operand.vmem [shape: f32[64,1], index: 21, kind: input, shape index: {}]   ;;  %s5768_s18 = inlined_call_operand.vmem [shape: f32[1,128], index: 18, kind: input, shape index: {}]   ;;  %s5769_s22 = inlined_call_operand.<no memory space> [shape: f32[1,1], index: 22, kind: input, shape index: {}]   ;;  %s5770_s20 = inlined_call_operand.vmem [shape: f32[1,64], index: 20, kind: input, shape index: {}]   ;;  %s5771_s23 = inlined_call_operand.vmem [shape: f32[8,1], index: 23, kind: output, shape index: {}]  }
   0x1   :  { %5777 = sst [smem:[#allocation3_spill]] %s5748_s3  ;;  %vm5257_vm2 = vmpackc.low %vm1416_vm0, %vm3346_vm1  ;;  %vm1742_vm5 = vcmask 523264   ;;  %vm2294_vm6 = vcmask 7168  }
   0x2   :  { %5778 = sst [smem:[#allocation4_spill]] %s5749_s0  ;;  %s5785_s24 = sld [smem:[#allocation3_spill]] }
   0x3   :  { %5779 = sst [smem:[#allocation5_spill]] %s5750_s2  ;;  %s5786_s25 = sld [smem:[#allocation4_spill]] }
   0x4   :  { %5780 = sst [smem:[#allocation6_spill]] %s5751_s5  ;;  %s5787_s30 = sld [smem:[#allocation5_spill]] }
   0x5   :  { %5781 = sst [smem:[#allocation7_spill]] %s5752_s4 }
   0x6   :  { %5782 = sst [smem:[#allocation8_spill]] %s5753_s11  ;;  %s5788_s11 = sld [smem:[#allocation6_spill]] }
   0x7   :  { %5783 = sst [smem:[#allocation9_spill]] %s5754_s7  ;;  %s5790_s28 = sld [smem:[#allocation8_spill]] }
   0x8   :  { %5784 = sst [smem:[#allocation10_spill]] %s5755_s9  ;;  %v85_v0 = vld [vmem:[%s5785_s24 + $0x8] sm:$0xff]  ;;  %v87_v2 = vld [vmem:[%s5785_s24 + $0x18] sm:$0xff]  ;;  %v84_v5 = vld [vmem:[%s5785_s24] sm:$0xff]  ;;  %s5789_s9 = sld [smem:[#allocation7_spill]] }
   0x9   :  { %v89_v1 = vld [vmem:[%s5785_s24 + $0x28] sm:$0xff]  ;;  %v91_v4 = vld [vmem:[%s5785_s24 + $0x38] sm:$0xff]  ;;  %v88_v6 = vld [vmem:[%s5785_s24 + $0x20] sm:$0xff]  ;;  %s5791_s3 = sld [smem:[#allocation9_spill]]  ;;  %s5792_s2 = sld [smem:[#allocation10_spill]] }
   0xa   :  { %v2574_v3 = vpack.c.bf16 %v89_v1, %v85_v0  ;;  %v2830_v7 = vpack.c.bf16 %v91_v4, %v87_v2  ;;  %v2576_v8 = vpack.c.bf16 %v88_v6, %v84_v5  ;;  %v86_v9 = vld [vmem:[%s5785_s24 + $0x10] sm:$0xff]  ;;  %v93_v11 = vld [vmem:[%s5785_s24 + $0x48] sm:$0xff]  ;;  %v95_v14 = vld [vmem:[%s5785_s24 + $0x58] sm:$0xff] }
   0xb   :  { %v90_v10 = vld [vmem:[%s5785_s24 + $0x30] sm:$0xff]  ;;  %v97_v13 = vld [vmem:[%s5785_s24 + $0x68] sm:$0xff]  ;;  %v99_v15 = vld [vmem:[%s5785_s24 + $0x78] sm:$0xff] }
   0xc   :  { %2575 = vmatprep.subr.bf16.mxu0 %v2574_v3  ;;  %v2832_v12 = vpack.c.bf16 %v90_v10, %v86_v9  ;;  %2831 = vmatprep.subr.bf16.mxu1 %v2830_v7  ;;  %v2578_v16 = vpack.c.bf16 %v97_v13, %v93_v11  ;;  %v2834_v17 = vpack.c.bf16 %v99_v15, %v95_v14  ;;  %v92_v18 = vld [vmem:[%s5785_s24 + $0x40] sm:$0xff]  ;;  %v94_v20 = vld [vmem:[%s5785_s24 + $0x50] sm:$0xff]  ;;  %v101_v23 = vld [vmem:[%s5785_s24 + $0x88] sm:$0xff] }
   0xd   :  { %2577 = vmatpush1.bf16.msra.mxu0 %v2576_v8  ;;  %v96_v19 = vld [vmem:[%s5785_s24 + $0x60] sm:$0xff]  ;;  %v98_v22 = vld [vmem:[%s5785_s24 + $0x70] sm:$0xff]  ;;  %v105_v24 = vld [vmem:[%s5785_s24 + $0xa8] sm:$0xff] }
   0xe   :  { %2833 = vmatpush1.bf16.msra.mxu1 %v2832_v12  ;;  %v2580_v21 = vpack.c.bf16 %v96_v19, %v92_v18  ;;  %2579 = vmatprep.subr.bf16.mxu0 %v2578_v16  ;;  %v2836_v25 = vpack.c.bf16 %v98_v22, %v94_v20  ;;  %v2582_v26 = vpack.c.bf16 %v105_v24, %v101_v23  ;;  %v103_v27 = vld [vmem:[%s5785_s24 + $0x98] sm:$0xff]  ;;  %v100_v29 = vld [vmem:[%s5785_s24 + $0x80] sm:$0xff]  ;;  %v102_v32 = vld [vmem:[%s5785_s24 + $0x90] sm:$0xff] }
   0xf   :  { %2835 = vmatprep.subr.bf16.mxu1 %v2834_v17  ;;  %v107_v28 = vld [vmem:[%s5785_s24 + $0xb8] sm:$0xff]  ;;  %v104_v31 = vld [vmem:[%s5785_s24 + $0xa0] sm:$0xff]  ;;  %v106_v33 = vld [vmem:[%s5785_s24 + $0xb0] sm:$0xff] }
  0x10   :  { %v2838_v30 = vpack.c.bf16 %v107_v28, %v103_v27  ;;  %v2584_v34 = vpack.c.bf16 %v104_v31, %v100_v29  ;;  %v109_v35 = vld [vmem:[%s5785_s24 + $0xc8] sm:$0xff]  ;;  %v111_v37 = vld [vmem:[%s5785_s24 + $0xd8] sm:$0xff]  ;;  %v2840_v38 = vpack.c.bf16 %v106_v33, %v102_v32  ;;  %v108_v41 = vld [vmem:[%s5785_s24 + $0xc0] sm:$0xff] }
  0x11   :  { %2581 = vmatpush1.bf16.msra.mxu0 %v2580_v21  ;;  %v113_v36 = vld [vmem:[%s5785_s24 + $0xe8] sm:$0xff]  ;;  %v115_v40 = vld [vmem:[%s5785_s24 + $0xf8] sm:$0xff]  ;;  %v112_v42 = vld [vmem:[%s5785_s24 + $0xe0] sm:$0xff] }
  0x12   :  { %2837 = vmatpush1.bf16.msra.mxu1 %v2836_v25  ;;  %2583 = vmatprep.subr.bf16.mxu0 %v2582_v26  ;;  %v2586_v39 = vpack.c.bf16 %v113_v36, %v109_v35  ;;  %v2842_v43 = vpack.c.bf16 %v115_v40, %v111_v37  ;;  %v110_v44 = vld [vmem:[%s5785_s24 + $0xd0] sm:$0xff]  ;;  %v117_v46 = vld [vmem:[%s5785_s24 + $0x108] sm:$0xff]  ;;  %v119_v48 = vld [vmem:[%s5785_s24 + $0x118] sm:$0xff]  ;;  %v2588_v50 = vpack.c.bf16 %v112_v42, %v108_v41 }
  0x13   :  { %2839 = vmatprep.subr.bf16.mxu1 %v2838_v30  ;;  %v114_v45 = vld [vmem:[%s5785_s24 + $0xf0] sm:$0xff]  ;;  %v121_v47 = vld [vmem:[%s5785_s24 + $0x128] sm:$0xff]  ;;  %v123_v49 = vld [vmem:[%s5785_s24 + $0x138] sm:$0xff] }
  0x14   :  { %v2844_v51 = vpack.c.bf16 %v114_v45, %v110_v44  ;;  %v2590_v52 = vpack.c.bf16 %v121_v47, %v117_v46  ;;  %v116_v53 = vld [vmem:[%s5785_s24 + $0x100] sm:$0xff]  ;;  %v118_v55 = vld [vmem:[%s5785_s24 + $0x110] sm:$0xff]  ;;  %v2846_v56 = vpack.c.bf16 %v123_v49, %v119_v48  ;;  %v125_v58 = vld [vmem:[%s5785_s24 + $0x148] sm:$0xff] }
  0x15   :  { %2585 = vmatpush1.bf16.msra.mxu0 %v2584_v34  ;;  %v120_v54 = vld [vmem:[%s5785_s24 + $0x120] sm:$0xff]  ;;  %v122_v57 = vld [vmem:[%s5785_s24 + $0x130] sm:$0xff]  ;;  %v129_v59 = vld [vmem:[%s5785_s24 + $0x168] sm:$0xff] }
  0x16   :  { %2841 = vmatpush1.bf16.msra.mxu1 %v2840_v38  ;;  %2587 = vmatprep.subr.bf16.mxu0 %v2586_v39  ;;  %v127_v60 = vld [vmem:[%s5785_s24 + $0x158] sm:$0xff]  ;;  %v2592_v62 = vpack.c.bf16 %v120_v54, %v116_v53  ;;  %v2848_v63 = vpack.c.bf16 %v122_v57, %v118_v55  ;;  %v2594_v0 = vpack.c.bf16 %v129_v59, %v125_v58  ;;  %v124_v1 = vld [vmem:[%s5785_s24 + $0x140] sm:$0xff]  ;;  %v126_v3 = vld [vmem:[%s5785_s24 + $0x150] sm:$0xff] }
  0x17   :  { %2843 = vmatprep.subr.bf16.mxu1 %v2842_v43  ;;  %v131_v61 = vld [vmem:[%s5785_s24 + $0x178] sm:$0xff]  ;;  %v128_v2 = vld [vmem:[%s5785_s24 + $0x160] sm:$0xff]  ;;  %v130_v5 = vld [vmem:[%s5785_s24 + $0x170] sm:$0xff] }
  0x18   :  { %v2850_v4 = vpack.c.bf16 %v131_v61, %v127_v60  ;;  %v133_v6 = vld [vmem:[%s5785_s24 + $0x188] sm:$0xff]  ;;  %v135_v8 = vld [vmem:[%s5785_s24 + $0x198] sm:$0xff]  ;;  %v2596_v10 = vpack.c.bf16 %v128_v2, %v124_v1  ;;  %v2852_v11 = vpack.c.bf16 %v130_v5, %v126_v3  ;;  %v132_v13 = vld [vmem:[%s5785_s24 + $0x180] sm:$0xff] }
  0x19   :  { %2589 = vmatpush1.bf16.msra.mxu0 %v2588_v50  ;;  %v137_v7 = vld [vmem:[%s5785_s24 + $0x1a8] sm:$0xff]  ;;  %v139_v9 = vld [vmem:[%s5785_s24 + $0x1b8] sm:$0xff]  ;;  %v136_v14 = vld [vmem:[%s5785_s24 + $0x1a0] sm:$0xff] }
  0x1a   :  { %2845 = vmatpush1.bf16.msra.mxu1 %v2844_v51  ;;  %2591 = vmatprep.subr.bf16.mxu0 %v2590_v52  ;;  %v2598_v12 = vpack.c.bf16 %v137_v7, %v133_v6  ;;  %v134_v15 = vld [vmem:[%s5785_s24 + $0x190] sm:$0xff]  ;;  %v2854_v16 = vpack.c.bf16 %v139_v9, %v135_v8  ;;  %v141_v18 = vld [vmem:[%s5785_s24 + $0x1c8] sm:$0xff]  ;;  %v143_v20 = vld [vmem:[%s5785_s24 + $0x1d8] sm:$0xff]  ;;  %v2600_v22 = vpack.c.bf16 %v136_v14, %v132_v13 }
  0x1b   :  { %2847 = vmatprep.subr.bf16.mxu1 %v2846_v56  ;;  %v138_v17 = vld [vmem:[%s5785_s24 + $0x1b0] sm:$0xff]  ;;  %v145_v19 = vld [vmem:[%s5785_s24 + $0x1e8] sm:$0xff]  ;;  %v147_v21 = vld [vmem:[%s5785_s24 + $0x1f8] sm:$0xff] }
  0x1c   :  { %v2856_v23 = vpack.c.bf16 %v138_v17, %v134_v15  ;;  %v2602_v24 = vpack.c.bf16 %v145_v19, %v141_v18  ;;  %v140_v25 = vld [vmem:[%s5785_s24 + $0x1c0] sm:$0xff]  ;;  %v142_v27 = vld [vmem:[%s5785_s24 + $0x1d0] sm:$0xff]  ;;  %v2858_v28 = vpack.c.bf16 %v147_v21, %v143_v20  ;;  %v149_v30 = vld [vmem:[%s5785_s24 + $0x208] sm:$0xff] }
  0x1d   :  { %2593 = vmatpush1.bf16.msra.mxu0 %v2592_v62  ;;  %v144_v26 = vld [vmem:[%s5785_s24 + $0x1e0] sm:$0xff]  ;;  %v146_v29 = vld [vmem:[%s5785_s24 + $0x1f0] sm:$0xff]  ;;  %v153_v31 = vld [vmem:[%s5785_s24 + $0x228] sm:$0xff] }
  0x1e   :  { %2849 = vmatpush1.bf16.msra.mxu1 %v2848_v63  ;;  %2595 = vmatprep.subr.bf16.mxu0 %v2594_v0  ;;  %v151_v32 = vld [vmem:[%s5785_s24 + $0x218] sm:$0xff]  ;;  %v2604_v34 = vpack.c.bf16 %v144_v26, %v140_v25  ;;  %v2860_v35 = vpack.c.bf16 %v146_v29, %v142_v27  ;;  %v2606_v36 = vpack.c.bf16 %v153_v31, %v149_v30  ;;  %v148_v37 = vld [vmem:[%s5785_s24 + $0x200] sm:$0xff]  ;;  %v150_v39 = vld [vmem:[%s5785_s24 + $0x210] sm:$0xff] }
  0x1f   :  { %2851 = vmatprep.subr.bf16.mxu1 %v2850_v4  ;;  %v155_v33 = vld [vmem:[%s5785_s24 + $0x238] sm:$0xff]  ;;  %v152_v38 = vld [vmem:[%s5785_s24 + $0x220] sm:$0xff]  ;;  %v154_v41 = vld [vmem:[%s5785_s24 + $0x230] sm:$0xff] }
  0x20   :  { %v2862_v40 = vpack.c.bf16 %v155_v33, %v151_v32  ;;  %v157_v42 = vld [vmem:[%s5785_s24 + $0x248] sm:$0xff]  ;;  %v159_v44 = vld [vmem:[%s5785_s24 + $0x258] sm:$0xff]  ;;  %v2608_v46 = vpack.c.bf16 %v152_v38, %v148_v37  ;;  %v2864_v47 = vpack.c.bf16 %v154_v41, %v150_v39  ;;  %v156_v49 = vld [vmem:[%s5785_s24 + $0x240] sm:$0xff] }
  0x21   :  { %2597 = vmatpush1.bf16.msra.mxu0 %v2596_v10  ;;  %v161_v43 = vld [vmem:[%s5785_s24 + $0x268] sm:$0xff]  ;;  %v163_v45 = vld [vmem:[%s5785_s24 + $0x278] sm:$0xff]  ;;  %v160_v50 = vld [vmem:[%s5785_s24 + $0x260] sm:$0xff] }
  0x22   :  { %2853 = vmatpush1.bf16.msra.mxu1 %v2852_v11  ;;  %2599 = vmatprep.subr.bf16.mxu0 %v2598_v12  ;;  %v2610_v48 = vpack.c.bf16 %v161_v43, %v157_v42  ;;  %v158_v51 = vld [vmem:[%s5785_s24 + $0x250] sm:$0xff]  ;;  %v2866_v52 = vpack.c.bf16 %v163_v45, %v159_v44  ;;  %v165_v54 = vld [vmem:[%s5785_s24 + $0x288] sm:$0xff]  ;;  %v167_v56 = vld [vmem:[%s5785_s24 + $0x298] sm:$0xff]  ;;  %v2612_v58 = vpack.c.bf16 %v160_v50, %v156_v49 }
  0x23   :  { %2855 = vmatprep.subr.bf16.mxu1 %v2854_v16  ;;  %v162_v53 = vld [vmem:[%s5785_s24 + $0x270] sm:$0xff]  ;;  %v169_v55 = vld [vmem:[%s5785_s24 + $0x2a8] sm:$0xff]  ;;  %v171_v57 = vld [vmem:[%s5785_s24 + $0x2b8] sm:$0xff] }
  0x24   :  { %v2868_v59 = vpack.c.bf16 %v162_v53, %v158_v51  ;;  %v2614_v60 = vpack.c.bf16 %v169_v55, %v165_v54  ;;  %v164_v61 = vld [vmem:[%s5785_s24 + $0x280] sm:$0xff]  ;;  %v166_v63 = vld [vmem:[%s5785_s24 + $0x290] sm:$0xff]  ;;  %v2870_v0 = vpack.c.bf16 %v171_v57, %v167_v56  ;;  %v173_v2 = vld [vmem:[%s5785_s24 + $0x2c8] sm:$0xff] }
  0x25   :  { %2601 = vmatpush1.bf16.msra.mxu0 %v2600_v22  ;;  %v168_v62 = vld [vmem:[%s5785_s24 + $0x2a0] sm:$0xff]  ;;  %v170_v1 = vld [vmem:[%s5785_s24 + $0x2b0] sm:$0xff]  ;;  %v177_v3 = vld [vmem:[%s5785_s24 + $0x2e8] sm:$0xff] }
  0x26   :  { %2857 = vmatpush1.bf16.msra.mxu1 %v2856_v23  ;;  %2603 = vmatprep.subr.bf16.mxu0 %v2602_v24  ;;  %v175_v4 = vld [vmem:[%s5785_s24 + $0x2d8] sm:$0xff]  ;;  %v2616_v6 = vpack.c.bf16 %v168_v62, %v164_v61  ;;  %v172_v7 = vld [vmem:[%s5785_s24 + $0x2c0] sm:$0xff]  ;;  %v2872_v8 = vpack.c.bf16 %v170_v1, %v166_v63  ;;  %v2618_v9 = vpack.c.bf16 %v177_v3, %v173_v2  ;;  %v174_v11 = vld [vmem:[%s5785_s24 + $0x2d0] sm:$0xff] }
  0x27   :  { %2859 = vmatprep.subr.bf16.mxu1 %v2858_v28  ;;  %v179_v5 = vld [vmem:[%s5785_s24 + $0x2f8] sm:$0xff]  ;;  %v176_v10 = vld [vmem:[%s5785_s24 + $0x2e0] sm:$0xff]  ;;  %v178_v12 = vld [vmem:[%s5785_s24 + $0x2f0] sm:$0xff] }
  0x28   :  { %v2874_v13 = vpack.c.bf16 %v179_v5, %v175_v4  ;;  %v181_v14 = vld [vmem:[%s5785_s24 + $0x308] sm:$0xff]  ;;  %v183_v17 = vld [vmem:[%s5785_s24 + $0x318] sm:$0xff]  ;;  %v2620_v19 = vpack.c.bf16 %v176_v10, %v172_v7  ;;  %v2876_v20 = vpack.c.bf16 %v178_v12, %v174_v11  ;;  %v180_v22 = vld [vmem:[%s5785_s24 + $0x300] sm:$0xff] }
  0x29   :  { %2605 = vmatpush1.bf16.msra.mxu0 %v2604_v34  ;;  %v185_v15 = vld [vmem:[%s5785_s24 + $0x328] sm:$0xff]  ;;  %v187_v18 = vld [vmem:[%s5785_s24 + $0x338] sm:$0xff]  ;;  %v184_v23 = vld [vmem:[%s5785_s24 + $0x320] sm:$0xff] }
  0x2a   :  { %2861 = vmatpush1.bf16.msra.mxu1 %v2860_v35  ;;  %2607 = vmatprep.subr.bf16.mxu0 %v2606_v36  ;;  %v77_v16 = vld [vmem:[%s5786_s25 + $0x8] sm:$0xff]  ;;  %v2622_v21 = vpack.c.bf16 %v185_v15, %v181_v14  ;;  %v182_v24 = vld [vmem:[%s5785_s24 + $0x310] sm:$0xff]  ;;  %v2878_v25 = vpack.c.bf16 %v187_v18, %v183_v17  ;;  %v191_v29 = vld [vmem:[%s5785_s24 + $0x358] sm:$0xff]  ;;  %v2624_v31 = vpack.c.bf16 %v184_v23, %v180_v22 }
  0x2b   :  { %2863 = vmatprep.subr.bf16.mxu1 %v2862_v40  ;;  %682 = vmatprep.mubr.f32.mxu0 %v77_v16  ;;  %v186_v26 = vld [vmem:[%s5785_s24 + $0x330] sm:$0xff]  ;;  %v189_v27 = vld [vmem:[%s5785_s24 + $0x348] sm:$0xff]  ;;  %v195_v30 = vld [vmem:[%s5785_s24 + $0x378] sm:$0xff] }
  0x2c   :  { %966 = vmatprep.mubr.f32.mxu1 %v77_v16  ;;  %v193_v28 = vld [vmem:[%s5785_s24 + $0x368] sm:$0xff]  ;;  %v2880_v32 = vpack.c.bf16 %v186_v26, %v182_v24  ;;  %v188_v34 = vld [vmem:[%s5785_s24 + $0x340] sm:$0xff]  ;;  %v190_v36 = vld [vmem:[%s5785_s24 + $0x350] sm:$0xff]  ;;  %v2882_v37 = vpack.c.bf16 %v195_v30, %v191_v29 }
  0x2d   :  { %2609 = vmatpush1.bf16.msra.mxu0 %v2608_v46  ;;  %v2626_v33 = vpack.c.bf16 %v193_v28, %v189_v27  ;;  %v192_v35 = vld [vmem:[%s5785_s24 + $0x360] sm:$0xff]  ;;  %v194_v38 = vld [vmem:[%s5785_s24 + $0x370] sm:$0xff]  ;;  %v197_v39 = vld [vmem:[%s5785_s24 + $0x388] sm:$0xff] }
  0x2e   :  { %2865 = vmatpush1.bf16.msra.mxu1 %v2864_v47  ;;  %2611 = vmatprep.subr.bf16.mxu0 %v2610_v48  ;;  %v201_v40 = vld [vmem:[%s5785_s24 + $0x3a8] sm:$0xff]  ;;  %v199_v41 = vld [vmem:[%s5785_s24 + $0x398] sm:$0xff]  ;;  %v2628_v43 = vpack.c.bf16 %v192_v35, %v188_v34  ;;  %v2884_v44 = vpack.c.bf16 %v194_v38, %v190_v36  ;;  %v196_v46 = vld [vmem:[%s5785_s24 + $0x380] sm:$0xff] }
  0x2f   :  { %2867 = vmatprep.subr.bf16.mxu1 %v2866_v52  ;;  %v203_v42 = vld [vmem:[%s5785_s24 + $0x3b8] sm:$0xff]  ;;  %v2630_v45 = vpack.c.bf16 %v201_v40, %v197_v39  ;;  %v200_v47 = vld [vmem:[%s5785_s24 + $0x3a0] sm:$0xff]  ;;  %v198_v48 = vld [vmem:[%s5785_s24 + $0x390] sm:$0xff] }
  0x30   :  { %v2886_v49 = vpack.c.bf16 %v203_v42, %v199_v41  ;;  %v202_v50 = vld [vmem:[%s5785_s24 + $0x3b0] sm:$0xff]  ;;  %v205_v51 = vld [vmem:[%s5785_s24 + $0x3c8] sm:$0xff]  ;;  %v207_v53 = vld [vmem:[%s5785_s24 + $0x3d8] sm:$0xff]  ;;  %v2632_v55 = vpack.c.bf16 %v200_v47, %v196_v46 }
  0x31   :  { %2613 = vmatpush1.bf16.msra.mxu0 %v2612_v58  ;;  %v209_v52 = vld [vmem:[%s5785_s24 + $0x3e8] sm:$0xff]  ;;  %v211_v54 = vld [vmem:[%s5785_s24 + $0x3f8] sm:$0xff]  ;;  %v2888_v56 = vpack.c.bf16 %v202_v50, %v198_v48  ;;  %v204_v58 = vld [vmem:[%s5785_s24 + $0x3c0] sm:$0xff] }
  0x32   :  { %2869 = vmatpush1.bf16.msra.mxu1 %v2868_v59  ;;  %2615 = vmatprep.subr.bf16.mxu0 %v2614_v60  ;;  %v2634_v57 = vpack.c.bf16 %v209_v52, %v205_v51  ;;  %v208_v59 = vld [vmem:[%s5785_s24 + $0x3e0] sm:$0xff]  ;;  %v206_v60 = vld [vmem:[%s5785_s24 + $0x3d0] sm:$0xff]  ;;  %v2890_v61 = vpack.c.bf16 %v211_v54, %v207_v53  ;;  %v213_v63 = vld [vmem:[%s5785_s24 + $0x408] sm:$0xff] }
  0x33   :  { %2871 = vmatprep.subr.bf16.mxu1 %v2870_v0  ;;  %v210_v62 = vld [vmem:[%s5785_s24 + $0x3f0] sm:$0xff]  ;;  %v217_v0 = vld [vmem:[%s5785_s24 + $0x428] sm:$0xff]  ;;  %v215_v1 = vld [vmem:[%s5785_s24 + $0x418] sm:$0xff]  ;;  %v2636_v3 = vpack.c.bf16 %v208_v59, %v204_v58 }
  0x34   :  { %v219_v2 = vld [vmem:[%s5785_s24 + $0x438] sm:$0xff]  ;;  %v2892_v4 = vpack.c.bf16 %v210_v62, %v206_v60  ;;  %v2638_v5 = vpack.c.bf16 %v217_v0, %v213_v63  ;;  %v216_v7 = vld [vmem:[%s5785_s24 + $0x420] sm:$0xff]  ;;  %v218_v10 = vld [vmem:[%s5785_s24 + $0x430] sm:$0xff] }
  0x35   :  { %2617 = vmatpush1.bf16.msra.mxu0 %v2616_v6  ;;  %v212_v6 = vld [vmem:[%s5785_s24 + $0x400] sm:$0xff]  ;;  %v221_v11 = vld [vmem:[%s5785_s24 + $0x448] sm:$0xff]  ;;  %v227_v14 = vld [vmem:[%s5785_s24 + $0x478] sm:$0xff] }
  0x36   :  { %2873 = vmatpush1.bf16.msra.mxu1 %v2872_v8  ;;  %2619 = vmatprep.subr.bf16.mxu0 %v2618_v9  ;;  %v214_v8 = vld [vmem:[%s5785_s24 + $0x410] sm:$0xff]  ;;  %v2894_v9 = vpack.c.bf16 %v219_v2, %v215_v1  ;;  %v225_v12 = vld [vmem:[%s5785_s24 + $0x468] sm:$0xff]  ;;  %v76_v15 = vld [vmem:[%s5786_s25] sm:$0xff]  ;;  %v2640_v16 = vpack.c.bf16 %v216_v7, %v212_v6 }
  0x37   :  { %2875 = vmatprep.subr.bf16.mxu1 %v2874_v13  ;;  %v223_v13 = vld [vmem:[%s5785_s24 + $0x458] sm:$0xff]  ;;  %v2896_v17 = vpack.c.bf16 %v218_v10, %v214_v8  ;;  %v2642_v18 = vpack.c.bf16 %v225_v12, %v221_v11  ;;  %v226_v23 = vld [vmem:[%s5785_s24 + $0x470] sm:$0xff]  ;;  %v229_v24 = vld [vmem:[%s5785_s24 + $0x488] sm:$0xff] }
  0x38   :  { %v2898_v22 = vpack.c.bf16 %v227_v14, %v223_v13  ;;  %v231_v26 = vld [vmem:[%s5785_s24 + $0x498] sm:$0xff]  ;;  %v234_v35 = vld [vmem:[%s5785_s24 + $0x4b0] sm:$0xff]  ;;  %v237_v36 = vld [vmem:[%s5785_s24 + $0x4c8] sm:$0xff] }
  0x39   :  { %2621 = vmatpush1.bf16.msra.mxu0 %v2620_v19  ;;  %v220_v19 = vld [vmem:[%s5785_s24 + $0x440] sm:$0xff]  ;;  %v235_v27 = vld [vmem:[%s5785_s24 + $0x4b8] sm:$0xff]  ;;  %v242_v47 = vld [vmem:[%s5785_s24 + $0x4f0] sm:$0xff] }
  0x3a   :  { %2877 = vmatpush1.bf16.msra.mxu1 %v2876_v20  ;;  %2623 = vmatprep.subr.bf16.mxu0 %v2622_v21  ;;  %v224_v20 = vld [vmem:[%s5785_s24 + $0x460] sm:$0xff]  ;;  %v222_v21 = vld [vmem:[%s5785_s24 + $0x450] sm:$0xff]  ;;  %v2902_v34 = vpack.c.bf16 %v235_v27, %v231_v26  ;;  %v239_v38 = vld [vmem:[%s5785_s24 + $0x4d8] sm:$0xff] }
  0x3b   :  { %2879 = vmatprep.subr.bf16.mxu1 %v2878_v25  ;;  %v233_v25 = vld [vmem:[%s5785_s24 + $0x4a8] sm:$0xff]  ;;  %v2644_v28 = vpack.c.bf16 %v224_v20, %v220_v19  ;;  %v2900_v29 = vpack.c.bf16 %v226_v23, %v222_v21  ;;  %v243_v39 = vld [vmem:[%s5785_s24 + $0x4f8] sm:$0xff]  ;;  %v250_v59 = vld [vmem:[%s5785_s24 + $0x530] sm:$0xff] }
  0x3c   :  { %v2646_v30 = vpack.c.bf16 %v233_v25, %v229_v24  ;;  %v2906_v46 = vpack.c.bf16 %v243_v39, %v239_v38  ;;  %v245_v48 = vld [vmem:[%s5785_s24 + $0x508] sm:$0xff]  ;;  %v247_v50 = vld [vmem:[%s5785_s24 + $0x518] sm:$0xff]  ;;  %v258_v7 = vld [vmem:[%s5785_s24 + $0x570] sm:$0xff] }
  0x3d   :  { %2625 = vmatpush1.bf16.msra.mxu0 %v2624_v31  ;;  %v228_v31 = vld [vmem:[%s5785_s24 + $0x480] sm:$0xff]  ;;  %v251_v51 = vld [vmem:[%s5785_s24 + $0x538] sm:$0xff]  ;;  %v253_v60 = vld [vmem:[%s5785_s24 + $0x548] sm:$0xff] }
  0x3e   :  { %2881 = vmatpush1.bf16.msra.mxu1 %v2880_v32  ;;  %2627 = vmatprep.subr.bf16.mxu0 %v2626_v33  ;;  %v232_v32 = vld [vmem:[%s5785_s24 + $0x4a0] sm:$0xff]  ;;  %v230_v33 = vld [vmem:[%s5785_s24 + $0x490] sm:$0xff]  ;;  %v2910_v58 = vpack.c.bf16 %v251_v51, %v247_v50  ;;  %v255_v62 = vld [vmem:[%s5785_s24 + $0x558] sm:$0xff] }
  0x3f   :  { %2883 = vmatprep.subr.bf16.mxu1 %v2882_v37  ;;  %v241_v37 = vld [vmem:[%s5785_s24 + $0x4e8] sm:$0xff]  ;;  %v2648_v40 = vpack.c.bf16 %v232_v32, %v228_v31  ;;  %v2904_v41 = vpack.c.bf16 %v234_v35, %v230_v33  ;;  %v259_v63 = vld [vmem:[%s5785_s24 + $0x578] sm:$0xff]  ;;  %v260_v13 = vld [vmem:[%s5785_s24 + $0x580] sm:$0xff] }
  0x40   :  { %v2650_v42 = vpack.c.bf16 %v241_v37, %v237_v36  ;;  %v2914_v6 = vpack.c.bf16 %v259_v63, %v255_v62  ;;  %v261_v8 = vld [vmem:[%s5785_s24 + $0x588] sm:$0xff]  ;;  %v263_v10 = vld [vmem:[%s5785_s24 + $0x598] sm:$0xff]  ;;  %v274_v32 = vld [vmem:[%s5785_s24 + $0x5f0] sm:$0xff] }
  0x41   :  { %2629 = vmatpush1.bf16.msra.mxu0 %v2628_v43  ;;  %v236_v43 = vld [vmem:[%s5785_s24 + $0x4c0] sm:$0xff]  ;;  %v267_v11 = vld [vmem:[%s5785_s24 + $0x5b8] sm:$0xff]  ;;  %v269_v20 = vld [vmem:[%s5785_s24 + $0x5c8] sm:$0xff] }
  0x42   :  { %2885 = vmatpush1.bf16.msra.mxu1 %v2884_v44  ;;  %2631 = vmatprep.subr.bf16.mxu0 %v2630_v45  ;;  %v240_v44 = vld [vmem:[%s5785_s24 + $0x4e0] sm:$0xff]  ;;  %v238_v45 = vld [vmem:[%s5785_s24 + $0x4d0] sm:$0xff]  ;;  %v2918_v19 = vpack.c.bf16 %v267_v11, %v263_v10  ;;  %v273_v21 = vld [vmem:[%s5785_s24 + $0x5e8] sm:$0xff] }
  0x43   :  { %2887 = vmatprep.subr.bf16.mxu1 %v2886_v49  ;;  %v249_v49 = vld [vmem:[%s5785_s24 + $0x528] sm:$0xff]  ;;  %v2652_v52 = vpack.c.bf16 %v240_v44, %v236_v43  ;;  %v2908_v53 = vpack.c.bf16 %v242_v47, %v238_v45  ;;  %v271_v23 = vld [vmem:[%s5785_s24 + $0x5d8] sm:$0xff]  ;;  %v2666_v27 = vpack.c.bf16 %v273_v21, %v269_v20  ;;  %v282_v44 = vld [vmem:[%s5785_s24 + $0x630] sm:$0xff] }
  0x44   :  { %v2654_v54 = vpack.c.bf16 %v249_v49, %v245_v48  ;;  %v275_v24 = vld [vmem:[%s5785_s24 + $0x5f8] sm:$0xff]  ;;  %v277_v33 = vld [vmem:[%s5785_s24 + $0x608] sm:$0xff] }
  0x45   :  { %2633 = vmatpush1.bf16.msra.mxu0 %v2632_v55  ;;  %v244_v55 = vld [vmem:[%s5785_s24 + $0x500] sm:$0xff]  ;;  %v2922_v31 = vpack.c.bf16 %v275_v24, %v271_v23  ;;  %v279_v35 = vld [vmem:[%s5785_s24 + $0x618] sm:$0xff]  ;;  %v285_v45 = vld [vmem:[%s5785_s24 + $0x648] sm:$0xff] }
  0x46   :  { %2889 = vmatpush1.bf16.msra.mxu1 %v2888_v56  ;;  %2635 = vmatprep.subr.bf16.mxu0 %v2634_v57  ;;  %v248_v56 = vld [vmem:[%s5785_s24 + $0x520] sm:$0xff]  ;;  %v246_v57 = vld [vmem:[%s5785_s24 + $0x510] sm:$0xff]  ;;  %v283_v36 = vld [vmem:[%s5785_s24 + $0x638] sm:$0xff] }
  0x47   :  { %2891 = vmatprep.subr.bf16.mxu1 %v2890_v61  ;;  %v257_v61 = vld [vmem:[%s5785_s24 + $0x568] sm:$0xff]  ;;  %v2656_v0 = vpack.c.bf16 %v248_v56, %v244_v55  ;;  %v2912_v1 = vpack.c.bf16 %v250_v59, %v246_v57  ;;  %v2926_v43 = vpack.c.bf16 %v283_v36, %v279_v35  ;;  %v287_v47 = vld [vmem:[%s5785_s24 + $0x658] sm:$0xff]  ;;  %v290_v56 = vld [vmem:[%s5785_s24 + $0x670] sm:$0xff] }
  0x48   :  { %v2658_v2 = vpack.c.bf16 %v257_v61, %v253_v60  ;;  %v291_v48 = vld [vmem:[%s5785_s24 + $0x678] sm:$0xff]  ;;  %v293_v57 = vld [vmem:[%s5785_s24 + $0x688] sm:$0xff]  ;;  %v308_v24 = vld [vmem:[%s5785_s24 + $0x700] sm:$0xff] }
  0x49   :  { %2637 = vmatpush1.bf16.msra.mxu0 %v2636_v3  ;;  %v252_v3 = vld [vmem:[%s5785_s24 + $0x540] sm:$0xff]  ;;  %v2930_v55 = vpack.c.bf16 %v291_v48, %v287_v47  ;;  %v295_v59 = vld [vmem:[%s5785_s24 + $0x698] sm:$0xff] }
  0x4a   :  { %2893 = vmatpush1.bf16.msra.mxu1 %v2892_v4  ;;  %2639 = vmatprep.subr.bf16.mxu0 %v2638_v5  ;;  %v256_v4 = vld [vmem:[%s5785_s24 + $0x560] sm:$0xff]  ;;  %v254_v5 = vld [vmem:[%s5785_s24 + $0x550] sm:$0xff]  ;;  %v299_v60 = vld [vmem:[%s5785_s24 + $0x6b8] sm:$0xff] }
  0x4b   :  { %2895 = vmatprep.subr.bf16.mxu1 %v2894_v9  ;;  %v265_v9 = vld [vmem:[%s5785_s24 + $0x5a8] sm:$0xff]  ;;  %v2660_v12 = vpack.c.bf16 %v256_v4, %v252_v3  ;;  %v2916_v14 = vpack.c.bf16 %v258_v7, %v254_v5  ;;  %v2934_v3 = vpack.c.bf16 %v299_v60, %v295_v59  ;;  %v298_v4 = vld [vmem:[%s5785_s24 + $0x6b0] sm:$0xff]  ;;  %v303_v7 = vld [vmem:[%s5785_s24 + $0x6d8] sm:$0xff] }
  0x4c   :  { %683 = vmatmul.mubr.f32.vlgmr.msra.gmra.mrb[0].mxu0 %v76_v15  ;;  %v301_v5 = vld [vmem:[%s5785_s24 + $0x6c8] sm:$0xff]  ;;  %v315_v20 = vld [vmem:[%s5785_s24 + $0x738] sm:$0xff]  ;;  %v316_v36 = vld [vmem:[%s5785_s24 + $0x740] sm:$0xff] }
  0x4d   :  { %2641 = vmatpush1.bf16.msra.mxu0 %v2640_v16  ;;  %967 = vmatmul.mubr.f32.vlgmr.msra.gmra.mrb[0].mxu1 %v76_v15  ;;  %v2662_v15 = vpack.c.bf16 %v265_v9, %v261_v8  ;;  %v264_v16 = vld [vmem:[%s5785_s24 + $0x5a0] sm:$0xff]  ;;  %v307_v8 = vld [vmem:[%s5785_s24 + $0x6f8] sm:$0xff] }
  0x4e   :  { %2897 = vmatpush1.bf16.msra.mxu1 %v2896_v17  ;;  %2643 = vmatprep.subr.bf16.mxu0 %v2642_v18  ;;  %v262_v17 = vld [vmem:[%s5785_s24 + $0x590] sm:$0xff]  ;;  %v2664_v25 = vpack.c.bf16 %v264_v16, %v260_v13  ;;  %v304_v13 = vld [vmem:[%s5785_s24 + $0x6e0] sm:$0xff] }
  0x4f   :  { %2899 = vmatprep.subr.bf16.mxu1 %v2898_v22  ;;  %v266_v18 = vld [vmem:[%s5785_s24 + $0x5b0] sm:$0xff]  ;;  %v79_v22 = vld [vmem:[%s5786_s25 + $0x18] sm:$0xff]  ;;  %v324_v48 = vld [vmem:[%s5785_s24 + $0x780] sm:$0xff] }
  0x50   :  { %753 = vmatprep.mubr.f32.mxu0 %v79_v22  ;;  %1037 = vmatprep.mubr.f32.mxu1 %v79_v22  ;;  %v2920_v26 = vpack.c.bf16 %v266_v18, %v262_v17  ;;  %v306_v16 = vld [vmem:[%s5785_s24 + $0x6f0] sm:$0xff]  ;;  %v309_v17 = vld [vmem:[%s5785_s24 + $0x708] sm:$0xff]  ;;  %v332_v60 = vld [vmem:[%s5785_s24 + $0x7c0] sm:$0xff] }
  0x51   :  { %2645 = vmatpush1.bf16.msra.mxu0 %v2644_v28  ;;  %v268_v28 = vld [vmem:[%s5785_s24 + $0x5c0] sm:$0xff]  ;;  %v313_v18 = vld [vmem:[%s5785_s24 + $0x728] sm:$0xff] }
  0x52   :  { %2901 = vmatpush1.bf16.msra.mxu1 %v2900_v29  ;;  %2647 = vmatprep.subr.bf16.mxu0 %v2646_v30  ;;  %v272_v29 = vld [vmem:[%s5785_s24 + $0x5e0] sm:$0xff]  ;;  %v270_v30 = vld [vmem:[%s5785_s24 + $0x5d0] sm:$0xff]  ;;  %v2686_v23 = vpack.c.bf16 %v313_v18, %v309_v17 }
  0x53   :  { %2903 = vmatprep.subr.bf16.mxu1 %v2902_v34  ;;  %v281_v34 = vld [vmem:[%s5785_s24 + $0x628] sm:$0xff]  ;;  %v2668_v37 = vpack.c.bf16 %v272_v29, %v268_v28  ;;  %v2924_v38 = vpack.c.bf16 %v274_v32, %v270_v30  ;;  %v314_v28 = vld [vmem:[%s5785_s24 + $0x730] sm:$0xff]  ;;  %v323_v32 = vld [vmem:[%s5785_s24 + $0x778] sm:$0xff] }
  0x54   :  { %v2670_v39 = vpack.c.bf16 %v281_v34, %v277_v33  ;;  %v317_v29 = vld [vmem:[%s5785_s24 + $0x748] sm:$0xff]  ;;  %v78_v17 = vld [vmem:[%s5786_s25 + $0x10] sm:$0xff] }
  0x55   :  { %2649 = vmatpush1.bf16.msra.mxu0 %v2648_v40  ;;  %v276_v40 = vld [vmem:[%s5785_s24 + $0x600] sm:$0xff]  ;;  %v321_v30 = vld [vmem:[%s5785_s24 + $0x768] sm:$0xff] }
  0x56   :  { %2905 = vmatpush1.bf16.msra.mxu1 %v2904_v41  ;;  %2651 = vmatprep.subr.bf16.mxu0 %v2650_v42  ;;  %v280_v41 = vld [vmem:[%s5785_s24 + $0x620] sm:$0xff]  ;;  %v278_v42 = vld [vmem:[%s5785_s24 + $0x610] sm:$0xff]  ;;  %v2690_v35 = vpack.c.bf16 %v321_v30, %v317_v29  ;;  %v363_v29 = vld [vmem:[%s5785_s24 + $0x8b8] sm:$0xff] }
  0x57   :  { %2907 = vmatprep.subr.bf16.mxu1 %v2906_v46  ;;  %v289_v46 = vld [vmem:[%s5785_s24 + $0x668] sm:$0xff]  ;;  %v2672_v49 = vpack.c.bf16 %v280_v41, %v276_v40  ;;  %v2928_v50 = vpack.c.bf16 %v282_v44, %v278_v42  ;;  %v322_v40 = vld [vmem:[%s5785_s24 + $0x770] sm:$0xff]  ;;  %v331_v44 = vld [vmem:[%s5785_s24 + $0x7b8] sm:$0xff] }
  0x58   :  { %v2674_v51 = vpack.c.bf16 %v289_v46, %v285_v45  ;;  %v325_v41 = vld [vmem:[%s5785_s24 + $0x788] sm:$0xff] }
  0x59   :  { %2653 = vmatpush1.bf16.msra.mxu0 %v2652_v52  ;;  %v284_v52 = vld [vmem:[%s5785_s24 + $0x640] sm:$0xff]  ;;  %v329_v42 = vld [vmem:[%s5785_s24 + $0x7a8] sm:$0xff] }
  0x5a   :  { %2909 = vmatpush1.bf16.msra.mxu1 %v2908_v53  ;;  %2655 = vmatprep.subr.bf16.mxu0 %v2654_v54  ;;  %v288_v53 = vld [vmem:[%s5785_s24 + $0x660] sm:$0xff]  ;;  %v286_v54 = vld [vmem:[%s5785_s24 + $0x650] sm:$0xff]  ;;  %v2694_v47 = vpack.c.bf16 %v329_v42, %v325_v41  ;;  %v81_v30 = vld [vmem:[%s5786_s25 + $0x28] sm:$0xff] }
  0x5b   :  { %2911 = vmatprep.subr.bf16.mxu1 %v2910_v58  ;;  %v297_v58 = vld [vmem:[%s5785_s24 + $0x6a8] sm:$0xff]  ;;  %v2676_v61 = vpack.c.bf16 %v288_v53, %v284_v52  ;;  %v2932_v62 = vpack.c.bf16 %v290_v56, %v286_v54  ;;  %v330_v52 = vld [vmem:[%s5785_s24 + $0x7b0] sm:$0xff]  ;;  %v339_v56 = vld [vmem:[%s5785_s24 + $0x7f8] sm:$0xff] }
  0x5c   :  { %v2678_v63 = vpack.c.bf16 %v297_v58, %v293_v57  ;;  %v333_v53 = vld [vmem:[%s5785_s24 + $0x7c8] sm:$0xff]  ;;  %v367_v41 = vld [vmem:[%s5785_s24 + $0x8d8] sm:$0xff] }
  0x5d   :  { %2657 = vmatpush1.bf16.msra.mxu0 %v2656_v0  ;;  %v292_v0 = vld [vmem:[%s5785_s24 + $0x680] sm:$0xff]  ;;  %v337_v54 = vld [vmem:[%s5785_s24 + $0x7e8] sm:$0xff]  ;;  %v371_v42 = vld [vmem:[%s5785_s24 + $0x8f8] sm:$0xff] }
  0x5e   :  { %2913 = vmatpush1.bf16.msra.mxu1 %v2912_v1  ;;  %2659 = vmatprep.subr.bf16.mxu0 %v2658_v2  ;;  %v296_v1 = vld [vmem:[%s5785_s24 + $0x6a0] sm:$0xff]  ;;  %v294_v2 = vld [vmem:[%s5785_s24 + $0x690] sm:$0xff]  ;;  %v2698_v59 = vpack.c.bf16 %v337_v54, %v333_v53  ;;  %v377_v53 = vld [vmem:[%s5785_s24 + $0x928] sm:$0xff] }
  0x5f   :  { %2915 = vmatprep.subr.bf16.mxu1 %v2914_v6  ;;  %v305_v6 = vld [vmem:[%s5785_s24 + $0x6e8] sm:$0xff]  ;;  %v2680_v9 = vpack.c.bf16 %v296_v1, %v292_v0  ;;  %v2936_v10 = vpack.c.bf16 %v298_v4, %v294_v2  ;;  %v338_v0 = vld [vmem:[%s5785_s24 + $0x7f0] sm:$0xff]  ;;  %v347_v4 = vld [vmem:[%s5785_s24 + $0x838] sm:$0xff] }
  0x60   :  { %v2682_v11 = vpack.c.bf16 %v305_v6, %v301_v5  ;;  %v341_v1 = vld [vmem:[%s5785_s24 + $0x808] sm:$0xff]  ;;  %v375_v54 = vld [vmem:[%s5785_s24 + $0x918] sm:$0xff] }
  0x61   :  { %2661 = vmatpush1.bf16.msra.mxu0 %v2660_v12  ;;  %v300_v12 = vld [vmem:[%s5785_s24 + $0x6c0] sm:$0xff]  ;;  %v345_v2 = vld [vmem:[%s5785_s24 + $0x828] sm:$0xff] }
  0x62   :  { %2917 = vmatpush1.bf16.msra.mxu1 %v2916_v14  ;;  %2663 = vmatprep.subr.bf16.mxu0 %v2662_v15  ;;  %v302_v14 = vld [vmem:[%s5785_s24 + $0x6d0] sm:$0xff]  ;;  %v2938_v15 = vpack.c.bf16 %v307_v8, %v303_v7  ;;  %v2684_v21 = vpack.c.bf16 %v304_v13, %v300_v12  ;;  %v2702_v7 = vpack.c.bf16 %v345_v2, %v341_v1  ;;  %v340_v8 = vld [vmem:[%s5785_s24 + $0x800] sm:$0xff]  ;;  %v349_v13 = vld [vmem:[%s5785_s24 + $0x848] sm:$0xff] }
  0x63   :  { %2919 = vmatprep.subr.bf16.mxu1 %v2918_v19  ;;  %v311_v19 = vld [vmem:[%s5785_s24 + $0x718] sm:$0xff]  ;;  %v2940_v22 = vpack.c.bf16 %v306_v16, %v302_v14  ;;  %v346_v12 = vld [vmem:[%s5785_s24 + $0x830] sm:$0xff]  ;;  %v353_v14 = vld [vmem:[%s5785_s24 + $0x868] sm:$0xff] }
  0x64   :  { %v355_v16 = vld [vmem:[%s5785_s24 + $0x878] sm:$0xff]  ;;  %v385_v1 = vld [vmem:[%s5785_s24 + $0x968] sm:$0xff] }
  0x65   :  { %2665 = vmatpush1.bf16.msra.mxu0 %v2664_v25  ;;  %v312_v25 = vld [vmem:[%s5785_s24 + $0x720] sm:$0xff]  ;;  %v383_v2 = vld [vmem:[%s5785_s24 + $0x958] sm:$0xff] }
  0x66   :  { %2921 = vmatpush1.bf16.msra.mxu1 %v2920_v26  ;;  %2667 = vmatprep.subr.bf16.mxu0 %v2666_v27  ;;  %v310_v26 = vld [vmem:[%s5785_s24 + $0x710] sm:$0xff]  ;;  %v2942_v27 = vpack.c.bf16 %v315_v20, %v311_v19  ;;  %v2688_v33 = vpack.c.bf16 %v312_v25, %v308_v24  ;;  %v2706_v20 = vpack.c.bf16 %v353_v14, %v349_v13  ;;  %v393_v13 = vld [vmem:[%s5785_s24 + $0x9a8] sm:$0xff]  ;;  %v391_v14 = vld [vmem:[%s5785_s24 + $0x998] sm:$0xff] }
  0x67   :  { %2923 = vmatprep.subr.bf16.mxu1 %v2922_v31  ;;  %v319_v31 = vld [vmem:[%s5785_s24 + $0x758] sm:$0xff]  ;;  %v2944_v34 = vpack.c.bf16 %v314_v28, %v310_v26  ;;  %v354_v25 = vld [vmem:[%s5785_s24 + $0x870] sm:$0xff]  ;;  %v357_v26 = vld [vmem:[%s5785_s24 + $0x888] sm:$0xff] }
  0x68   :  { %v359_v28 = vld [vmem:[%s5785_s24 + $0x898] sm:$0xff] }
  0x69   :  { %2669 = vmatpush1.bf16.msra.mxu0 %v2668_v37  ;;  %v320_v37 = vld [vmem:[%s5785_s24 + $0x760] sm:$0xff] }
  0x6a   :  { %2925 = vmatpush1.bf16.msra.mxu1 %v2924_v38  ;;  %2671 = vmatprep.subr.bf16.mxu0 %v2670_v39  ;;  %v318_v38 = vld [vmem:[%s5785_s24 + $0x750] sm:$0xff]  ;;  %v2946_v39 = vpack.c.bf16 %v323_v32, %v319_v31  ;;  %v2692_v45 = vpack.c.bf16 %v320_v37, %v316_v36  ;;  %v2966_v37 = vpack.c.bf16 %v363_v29, %v359_v28 }
  0x6b   :  { %2927 = vmatprep.subr.bf16.mxu1 %v2926_v43  ;;  %v327_v43 = vld [vmem:[%s5785_s24 + $0x798] sm:$0xff]  ;;  %v2948_v46 = vpack.c.bf16 %v322_v40, %v318_v38  ;;  %v358_v36 = vld [vmem:[%s5785_s24 + $0x890] sm:$0xff]  ;;  %v369_v40 = vld [vmem:[%s5785_s24 + $0x8e8] sm:$0xff] }
  0x6c   :  { %v362_v38 = vld [vmem:[%s5785_s24 + $0x8b0] sm:$0xff] }
  0x6d   :  { %2673 = vmatpush1.bf16.msra.mxu0 %v2672_v49  ;;  %v328_v49 = vld [vmem:[%s5785_s24 + $0x7a0] sm:$0xff] }
  0x6e   :  { %2929 = vmatpush1.bf16.msra.mxu1 %v2928_v50  ;;  %2675 = vmatprep.subr.bf16.mxu0 %v2674_v51  ;;  %v326_v50 = vld [vmem:[%s5785_s24 + $0x790] sm:$0xff]  ;;  %v2950_v51 = vpack.c.bf16 %v331_v44, %v327_v43  ;;  %v2696_v57 = vpack.c.bf16 %v328_v49, %v324_v48  ;;  %v3344_v43 = vmov 0   ;;  %v368_v48 = vld [vmem:[%s5785_s24 + $0x8e0] sm:$0xff] }
  0x6f   :  { %2931 = vmatprep.subr.bf16.mxu1 %v2930_v55  ;;  %v335_v55 = vld [vmem:[%s5785_s24 + $0x7d8] sm:$0xff]  ;;  %v2952_v58 = vpack.c.bf16 %v330_v52, %v326_v50  ;;  %3339 = vset.pattern.permute.xlu0 %v3344_v43  ;;  %v366_v49 = vld [vmem:[%s5785_s24 + $0x8d0] sm:$0xff]  ;;  %v2970_v50 = vpack.c.bf16 %v371_v42, %v367_v41  ;;  %v373_v52 = vld [vmem:[%s5785_s24 + $0x908] sm:$0xff] }
  0x70   :  { %v404_v43 = vld [vmem:[%s5785_s24 + $0xa00] sm:$0xff] }
  0x71   :  { %2677 = vmatpush1.bf16.msra.mxu0 %v2676_v61  ;;  %v336_v61 = vld [vmem:[%s5785_s24 + $0x7e0] sm:$0xff] }
  0x72   :  { %2933 = vmatpush1.bf16.msra.mxu1 %v2932_v62  ;;  %2679 = vmatprep.subr.bf16.mxu0 %v2678_v63  ;;  %v334_v62 = vld [vmem:[%s5785_s24 + $0x7d0] sm:$0xff]  ;;  %v2954_v63 = vpack.c.bf16 %v339_v56, %v335_v55  ;;  %v2700_v5 = vpack.c.bf16 %v336_v61, %v332_v60  ;;  %v379_v55 = vld [vmem:[%s5785_s24 + $0x938] sm:$0xff]  ;;  %v376_v60 = vld [vmem:[%s5785_s24 + $0x920] sm:$0xff] }
  0x73   :  { %2935 = vmatprep.subr.bf16.mxu1 %v2934_v3  ;;  %v343_v3 = vld [vmem:[%s5785_s24 + $0x818] sm:$0xff]  ;;  %v2956_v6 = vpack.c.bf16 %v338_v0, %v334_v62  ;;  %v374_v61 = vld [vmem:[%s5785_s24 + $0x910] sm:$0xff]  ;;  %v2974_v62 = vpack.c.bf16 %v379_v55, %v375_v54  ;;  %v381_v0 = vld [vmem:[%s5785_s24 + $0x948] sm:$0xff] }
  0x74   :  { %v412_v55 = vld [vmem:[%s5785_s24 + $0xa40] sm:$0xff] }
  0x75   :  { %2681 = vmatpush1.bf16.msra.mxu0 %v2680_v9  ;;  %v344_v9 = vld [vmem:[%s5785_s24 + $0x820] sm:$0xff] }
  0x76   :  { %2937 = vmatpush1.bf16.msra.mxu1 %v2936_v10  ;;  %2683 = vmatprep.subr.bf16.mxu0 %v2682_v11  ;;  %v342_v10 = vld [vmem:[%s5785_s24 + $0x810] sm:$0xff]  ;;  %v2958_v11 = vpack.c.bf16 %v347_v4, %v343_v3  ;;  %v2704_v18 = vpack.c.bf16 %v344_v9, %v340_v8  ;;  %v387_v3 = vld [vmem:[%s5785_s24 + $0x978] sm:$0xff]  ;;  %v384_v8 = vld [vmem:[%s5785_s24 + $0x960] sm:$0xff] }
  0x77   :  { %2939 = vmatprep.subr.bf16.mxu1 %v2938_v15  ;;  %v351_v15 = vld [vmem:[%s5785_s24 + $0x858] sm:$0xff]  ;;  %v2960_v19 = vpack.c.bf16 %v346_v12, %v342_v10  ;;  %v382_v9 = vld [vmem:[%s5785_s24 + $0x950] sm:$0xff]  ;;  %v2978_v10 = vpack.c.bf16 %v387_v3, %v383_v2  ;;  %v389_v12 = vld [vmem:[%s5785_s24 + $0x988] sm:$0xff] }
  0x78   :  { %v2962_v24 = vpack.c.bf16 %v355_v16, %v351_v15  ;;  %v395_v15 = vld [vmem:[%s5785_s24 + $0x9b8] sm:$0xff]  ;;  %v420_v3 = vld [vmem:[%s5785_s24 + $0xa80] sm:$0xff] }
  0x79   :  { %2685 = vmatpush1.bf16.msra.mxu0 %v2684_v21  ;;  %v348_v21 = vld [vmem:[%s5785_s24 + $0x840] sm:$0xff] }
  0x7a   :  { %2941 = vmatpush1.bf16.msra.mxu1 %v2940_v22  ;;  %2687 = vmatprep.subr.bf16.mxu0 %v2686_v23  ;;  %v352_v22 = vld [vmem:[%s5785_s24 + $0x860] sm:$0xff]  ;;  %v350_v23 = vld [vmem:[%s5785_s24 + $0x850] sm:$0xff] }
  0x7b   :  { %2943 = vmatprep.subr.bf16.mxu1 %v2942_v27  ;;  %v361_v27 = vld [vmem:[%s5785_s24 + $0x8a8] sm:$0xff]  ;;  %v2708_v31 = vpack.c.bf16 %v352_v22, %v348_v21  ;;  %v2964_v32 = vpack.c.bf16 %v354_v25, %v350_v23  ;;  %v390_v21 = vld [vmem:[%s5785_s24 + $0x990] sm:$0xff]  ;;  %v2982_v22 = vpack.c.bf16 %v395_v15, %v391_v14  ;;  %v428_v15 = vld [vmem:[%s5785_s24 + $0xac0] sm:$0xff] }
  0x7c   :  { %v394_v23 = vld [vmem:[%s5785_s24 + $0x9b0] sm:$0xff]  ;;  %v401_v25 = vld [vmem:[%s5785_s24 + $0x9e8] sm:$0xff] }
  0x7d   :  { %2689 = vmatpush1.bf16.msra.mxu0 %v2688_v33  ;;  %v2710_v33 = vpack.c.bf16 %v361_v27, %v357_v26  ;;  %v399_v26 = vld [vmem:[%s5785_s24 + $0x9d8] sm:$0xff]  ;;  %v2984_v29 = vpack.c.bf16 %v394_v23, %v390_v21  ;;  %v441_v21 = vld [vmem:[%s5785_s24 + $0xb28] sm:$0xff] }
  0x7e   :  { %2945 = vmatpush1.bf16.msra.mxu1 %v2944_v34  ;;  %2691 = vmatprep.subr.bf16.mxu0 %v2690_v35  ;;  %v356_v34 = vld [vmem:[%s5785_s24 + $0x880] sm:$0xff]  ;;  %v403_v27 = vld [vmem:[%s5785_s24 + $0x9f8] sm:$0xff] }
  0x7f   :  { %2947 = vmatprep.subr.bf16.mxu1 %v2946_v39  ;;  %v360_v35 = vld [vmem:[%s5785_s24 + $0x8a0] sm:$0xff]  ;;  %v365_v39 = vld [vmem:[%s5785_s24 + $0x8c8] sm:$0xff]  ;;  %v443_v23 = vld [vmem:[%s5785_s24 + $0xb38] sm:$0xff] }
  0x80   :  { %v2712_v44 = vpack.c.bf16 %v360_v35, %v356_v34  ;;  %v2986_v34 = vpack.c.bf16 %v403_v27, %v399_v26  ;;  %v402_v35 = vld [vmem:[%s5785_s24 + $0x9f0] sm:$0xff] }
  0x81   :  { %2693 = vmatpush1.bf16.msra.mxu0 %v2692_v45  ;;  %v2968_v45 = vpack.c.bf16 %v362_v38, %v358_v36  ;;  %v405_v36 = vld [vmem:[%s5785_s24 + $0xa08] sm:$0xff]  ;;  %v407_v38 = vld [vmem:[%s5785_s24 + $0xa18] sm:$0xff] }
  0x82   :  { %2949 = vmatpush1.bf16.msra.mxu1 %v2948_v46  ;;  %2695 = vmatprep.subr.bf16.mxu0 %v2694_v47  ;;  %v2714_v46 = vpack.c.bf16 %v369_v40, %v365_v39  ;;  %v364_v47 = vld [vmem:[%s5785_s24 + $0x8c0] sm:$0xff]  ;;  %v411_v39 = vld [vmem:[%s5785_s24 + $0xa38] sm:$0xff] }
  0x83   :  { %2951 = vmatprep.subr.bf16.mxu1 %v2950_v51  ;;  %v370_v51 = vld [vmem:[%s5785_s24 + $0x8f0] sm:$0xff]  ;;  %v2716_v56 = vpack.c.bf16 %v368_v48, %v364_v47  ;;  %v413_v48 = vld [vmem:[%s5785_s24 + $0xa48] sm:$0xff] }
  0x84   :  { %v410_v47 = vld [vmem:[%s5785_s24 + $0xa30] sm:$0xff] }
  0x85   :  { %2697 = vmatpush1.bf16.msra.mxu0 %v2696_v57  ;;  %v2972_v57 = vpack.c.bf16 %v370_v51, %v366_v49  ;;  %v417_v49 = vld [vmem:[%s5785_s24 + $0xa68] sm:$0xff]  ;;  %v419_v51 = vld [vmem:[%s5785_s24 + $0xa78] sm:$0xff] }
  0x86   :  { %2953 = vmatpush1.bf16.msra.mxu1 %v2952_v58  ;;  %2699 = vmatprep.subr.bf16.mxu0 %v2698_v59  ;;  %v2718_v58 = vpack.c.bf16 %v377_v53, %v373_v52  ;;  %v372_v59 = vld [vmem:[%s5785_s24 + $0x900] sm:$0xff]  ;;  %v2738_v54 = vpack.c.bf16 %v417_v49, %v413_v48  ;;  %v459_v48 = vld [vmem:[%s5785_s24 + $0xbb8] sm:$0xff] }
  0x87   :  { %2955 = vmatprep.subr.bf16.mxu1 %v2954_v63  ;;  %v378_v63 = vld [vmem:[%s5785_s24 + $0x930] sm:$0xff]  ;;  %v2720_v4 = vpack.c.bf16 %v376_v60, %v372_v59  ;;  %v421_v60 = vld [vmem:[%s5785_s24 + $0xa88] sm:$0xff] }
  0x88   :  { %v418_v59 = vld [vmem:[%s5785_s24 + $0xa70] sm:$0xff] }
  0x89   :  { %2701 = vmatpush1.bf16.msra.mxu0 %v2700_v5  ;;  %v2976_v5 = vpack.c.bf16 %v378_v63, %v374_v61  ;;  %v425_v61 = vld [vmem:[%s5785_s24 + $0xaa8] sm:$0xff]  ;;  %v427_v63 = vld [vmem:[%s5785_s24 + $0xab8] sm:$0xff] }
  0x8a   :  { %2957 = vmatpush1.bf16.msra.mxu1 %v2956_v6  ;;  %2703 = vmatprep.subr.bf16.mxu0 %v2702_v7  ;;  %v2722_v6 = vpack.c.bf16 %v385_v1, %v381_v0  ;;  %v380_v7 = vld [vmem:[%s5785_s24 + $0x940] sm:$0xff]  ;;  %v2742_v2 = vpack.c.bf16 %v425_v61, %v421_v60  ;;  %v467_v60 = vld [vmem:[%s5785_s24 + $0xbf8] sm:$0xff] }
  0x8b   :  { %2959 = vmatprep.subr.bf16.mxu1 %v2958_v11  ;;  %v386_v11 = vld [vmem:[%s5785_s24 + $0x970] sm:$0xff]  ;;  %v2724_v16 = vpack.c.bf16 %v384_v8, %v380_v7  ;;  %v429_v8 = vld [vmem:[%s5785_s24 + $0xac8] sm:$0xff] }
  0x8c   :  { %754 = vmatmul.mubr.f32.vlgmr.msra.gmra.mrb[0].mxu0 %v78_v17  ;;  %v426_v7 = vld [vmem:[%s5785_s24 + $0xab0] sm:$0xff] }
  0x8d   :  { %2705 = vmatpush1.bf16.msra.mxu0 %v2704_v18  ;;  %1038 = vmatmul.mubr.f32.vlgmr.msra.gmra.mrb[0].mxu1 %v78_v17  ;;  %v2980_v17 = vpack.c.bf16 %v386_v11, %v382_v9  ;;  %v2726_v18 = vpack.c.bf16 %v393_v13, %v389_v12  ;;  %v433_v9 = vld [vmem:[%s5785_s24 + $0xae8] sm:$0xff]  ;;  %v435_v11 = vld [vmem:[%s5785_s24 + $0xaf8] sm:$0xff] }
  0x8e   :  { %2961 = vmatpush1.bf16.msra.mxu1 %v2960_v19  ;;  %2707 = vmatprep.subr.bf16.mxu0 %v2706_v20  ;;  %v388_v19 = vld [vmem:[%s5785_s24 + $0x980] sm:$0xff]  ;;  %v2746_v14 = vpack.c.bf16 %v433_v9, %v429_v8  ;;  %v475_v8 = vld [vmem:[%s5785_s24 + $0xc38] sm:$0xff] }
  0x8f   :  { %2963 = vmatprep.subr.bf16.mxu1 %v2962_v24  ;;  %824 = vmatprep.mubr.f32.mxu0 %v81_v30  ;;  %v392_v20 = vld [vmem:[%s5785_s24 + $0x9a0] sm:$0xff]  ;;  %v397_v24 = vld [vmem:[%s5785_s24 + $0x9c8] sm:$0xff] }
  0x90   :  { %1108 = vmatprep.mubr.f32.mxu1 %v81_v30  ;;  %v2728_v28 = vpack.c.bf16 %v392_v20, %v388_v19  ;;  %v2730_v30 = vpack.c.bf16 %v401_v25, %v397_v24  ;;  %v434_v19 = vld [vmem:[%s5785_s24 + $0xaf0] sm:$0xff]  ;;  %v437_v20 = vld [vmem:[%s5785_s24 + $0xb08] sm:$0xff]  ;;  %v436_v25 = vld [vmem:[%s5785_s24 + $0xb00] sm:$0xff] }
  0x91   :  { %2709 = vmatpush1.bf16.msra.mxu0 %v2708_v31  ;;  %v396_v31 = vld [vmem:[%s5785_s24 + $0x9c0] sm:$0xff]  ;;  %v2750_v27 = vpack.c.bf16 %v441_v21, %v437_v20  ;;  %v483_v20 = vld [vmem:[%s5785_s24 + $0xc78] sm:$0xff] }
  0x92   :  { %2965 = vmatpush1.bf16.msra.mxu1 %v2964_v32  ;;  %2711 = vmatprep.subr.bf16.mxu0 %v2710_v33  ;;  %v400_v32 = vld [vmem:[%s5785_s24 + $0x9e0] sm:$0xff]  ;;  %v398_v33 = vld [vmem:[%s5785_s24 + $0x9d0] sm:$0xff] }
  0x93   :  { %2967 = vmatprep.subr.bf16.mxu1 %v2966_v37  ;;  %v409_v37 = vld [vmem:[%s5785_s24 + $0xa28] sm:$0xff]  ;;  %v2732_v40 = vpack.c.bf16 %v400_v32, %v396_v31  ;;  %v2988_v41 = vpack.c.bf16 %v402_v35, %v398_v33  ;;  %v442_v32 = vld [vmem:[%s5785_s24 + $0xb30] sm:$0xff]  ;;  %v447_v35 = vld [vmem:[%s5785_s24 + $0xb58] sm:$0xff] }
  0x94   :  { %v2734_v42 = vpack.c.bf16 %v409_v37, %v405_v36  ;;  %v445_v33 = vld [vmem:[%s5785_s24 + $0xb48] sm:$0xff]  ;;  %v451_v36 = vld [vmem:[%s5785_s24 + $0xb78] sm:$0xff]  ;;  %v80_v21 = vld [vmem:[%s5786_s25 + $0x20] sm:$0xff] }
  0x95   :  { %2713 = vmatpush1.bf16.msra.mxu0 %v2712_v44  ;;  %v408_v44 = vld [vmem:[%s5785_s24 + $0xa20] sm:$0xff] }
  0x96   :  { %2969 = vmatpush1.bf16.msra.mxu1 %v2968_v45  ;;  %2715 = vmatprep.subr.bf16.mxu0 %v2714_v46  ;;  %v406_v45 = vld [vmem:[%s5785_s24 + $0xa10] sm:$0xff]  ;;  %v2990_v46 = vpack.c.bf16 %v411_v39, %v407_v38  ;;  %v2736_v52 = vpack.c.bf16 %v408_v44, %v404_v43  ;;  %v3010_v43 = vpack.c.bf16 %v451_v36, %v447_v35 }
  0x97   :  { %2971 = vmatprep.subr.bf16.mxu1 %v2970_v50  ;;  %v415_v50 = vld [vmem:[%s5785_s24 + $0xa58] sm:$0xff]  ;;  %v2992_v53 = vpack.c.bf16 %v410_v47, %v406_v45  ;;  %v450_v44 = vld [vmem:[%s5785_s24 + $0xb70] sm:$0xff]  ;;  %v453_v45 = vld [vmem:[%s5785_s24 + $0xb88] sm:$0xff] }
  0x98   :  { %v455_v47 = vld [vmem:[%s5785_s24 + $0xb98] sm:$0xff] }
  0x99   :  { %2717 = vmatpush1.bf16.msra.mxu0 %v2716_v56  ;;  %v416_v56 = vld [vmem:[%s5785_s24 + $0xa60] sm:$0xff] }
  0x9a   :  { %2973 = vmatpush1.bf16.msra.mxu1 %v2972_v57  ;;  %2719 = vmatprep.subr.bf16.mxu0 %v2718_v58  ;;  %v414_v57 = vld [vmem:[%s5785_s24 + $0xa50] sm:$0xff]  ;;  %v2994_v58 = vpack.c.bf16 %v419_v51, %v415_v50  ;;  %v2740_v0 = vpack.c.bf16 %v416_v56, %v412_v55  ;;  %v3014_v55 = vpack.c.bf16 %v459_v48, %v455_v47 }
  0x9b   :  { %2975 = vmatprep.subr.bf16.mxu1 %v2974_v62  ;;  %v423_v62 = vld [vmem:[%s5785_s24 + $0xa98] sm:$0xff]  ;;  %v2996_v1 = vpack.c.bf16 %v418_v59, %v414_v57  ;;  %v458_v56 = vld [vmem:[%s5785_s24 + $0xbb0] sm:$0xff]  ;;  %v461_v57 = vld [vmem:[%s5785_s24 + $0xbc8] sm:$0xff] }
  0x9c   :  { %v463_v59 = vld [vmem:[%s5785_s24 + $0xbd8] sm:$0xff] }
  0x9d   :  { %2721 = vmatpush1.bf16.msra.mxu0 %v2720_v4  ;;  %v424_v4 = vld [vmem:[%s5785_s24 + $0xaa0] sm:$0xff] }
  0x9e   :  { %2977 = vmatpush1.bf16.msra.mxu1 %v2976_v5  ;;  %2723 = vmatprep.subr.bf16.mxu0 %v2722_v6  ;;  %v422_v5 = vld [vmem:[%s5785_s24 + $0xa90] sm:$0xff]  ;;  %v2998_v6 = vpack.c.bf16 %v427_v63, %v423_v62  ;;  %v2744_v12 = vpack.c.bf16 %v424_v4, %v420_v3  ;;  %v3018_v3 = vpack.c.bf16 %v467_v60, %v463_v59 }
  0x9f   :  { %2979 = vmatprep.subr.bf16.mxu1 %v2978_v10  ;;  %v431_v10 = vld [vmem:[%s5785_s24 + $0xad8] sm:$0xff]  ;;  %v3000_v13 = vpack.c.bf16 %v426_v7, %v422_v5  ;;  %v466_v4 = vld [vmem:[%s5785_s24 + $0xbf0] sm:$0xff]  ;;  %v469_v5 = vld [vmem:[%s5785_s24 + $0xc08] sm:$0xff] }
  0xa0   :  { %v471_v7 = vld [vmem:[%s5785_s24 + $0xc18] sm:$0xff] }
  0xa1   :  { %2725 = vmatpush1.bf16.msra.mxu0 %v2724_v16  ;;  %v432_v16 = vld [vmem:[%s5785_s24 + $0xae0] sm:$0xff] }
  0xa2   :  { %2981 = vmatpush1.bf16.msra.mxu1 %v2980_v17  ;;  %2727 = vmatprep.subr.bf16.mxu0 %v2726_v18  ;;  %v430_v17 = vld [vmem:[%s5785_s24 + $0xad0] sm:$0xff]  ;;  %v3002_v18 = vpack.c.bf16 %v435_v11, %v431_v10  ;;  %v2748_v24 = vpack.c.bf16 %v432_v16, %v428_v15  ;;  %v3022_v15 = vpack.c.bf16 %v475_v8, %v471_v7 }
  0xa3   :  { %2983 = vmatprep.subr.bf16.mxu1 %v2982_v22  ;;  %v439_v22 = vld [vmem:[%s5785_s24 + $0xb18] sm:$0xff]  ;;  %v3004_v26 = vpack.c.bf16 %v434_v19, %v430_v17  ;;  %v474_v16 = vld [vmem:[%s5785_s24 + $0xc30] sm:$0xff]  ;;  %v477_v17 = vld [vmem:[%s5785_s24 + $0xc48] sm:$0xff] }
  0xa4   :  { %v3006_v31 = vpack.c.bf16 %v443_v23, %v439_v22  ;;  %v479_v19 = vld [vmem:[%s5785_s24 + $0xc58] sm:$0xff] }
  0xa5   :  { %2729 = vmatpush1.bf16.msra.mxu0 %v2728_v28  ;;  %v440_v28 = vld [vmem:[%s5785_s24 + $0xb20] sm:$0xff] }
  0xa6   :  { %2985 = vmatpush1.bf16.msra.mxu1 %v2984_v29  ;;  %2731 = vmatprep.subr.bf16.mxu0 %v2730_v30  ;;  %v438_v29 = vld [vmem:[%s5785_s24 + $0xb10] sm:$0xff]  ;;  %v1585_v30 = vld [vmem:[%s5787_s30] sm:$0xff]  ;;  %v2752_v37 = vpack.c.bf16 %v440_v28, %v436_v25  ;;  %v3026_v28 = vpack.c.bf16 %v483_v20, %v479_v19 }
  0xa7   :  { %2987 = vmatprep.subr.bf16.mxu1 %v2986_v34  ;;  %v449_v34 = vld [vmem:[%s5785_s24 + $0xb68] sm:$0xff]  ;;  %1589 = vperm.xlu0 %3339, %v1585_v30   ;;  %v3008_v38 = vpack.c.bf16 %v442_v32, %v438_v29  ;;  %v476_v25 = vld [vmem:[%s5785_s24 + $0xc40] sm:$0xff]  ;;  %v482_v29 = vld [vmem:[%s5785_s24 + $0xc70] sm:$0xff] }
  0xa8   :  { %v2754_v39 = vpack.c.bf16 %v449_v34, %v445_v33  ;;  %v485_v30 = vld [vmem:[%s5785_s24 + $0xc88] sm:$0xff]  ;;  %v487_v32 = vld [vmem:[%s5785_s24 + $0xc98] sm:$0xff] }
  0xa9   :  { %2733 = vmatpush1.bf16.msra.mxu0 %v2732_v40  ;;  %v444_v40 = vld [vmem:[%s5785_s24 + $0xb40] sm:$0xff]  ;;  %v491_v33 = vld [vmem:[%s5785_s24 + $0xcb8] sm:$0xff] }
  0xaa   :  { %2989 = vmatpush1.bf16.msra.mxu1 %v2988_v41  ;;  %2735 = vmatprep.subr.bf16.mxu0 %v2734_v42  ;;  %v448_v41 = vld [vmem:[%s5785_s24 + $0xb60] sm:$0xff]  ;;  %v446_v42 = vld [vmem:[%s5785_s24 + $0xb50] sm:$0xff]  ;;  %v83_v34 = vld [vmem:[%s5786_s25 + $0x38] sm:$0xff] }
  0xab   :  { %2991 = vmatprep.subr.bf16.mxu1 %v2990_v46  ;;  %v457_v46 = vld [vmem:[%s5785_s24 + $0xba8] sm:$0xff]  ;;  %v2756_v49 = vpack.c.bf16 %v448_v41, %v444_v40  ;;  %v3012_v50 = vpack.c.bf16 %v450_v44, %v446_v42  ;;  %v486_v40 = vld [vmem:[%s5785_s24 + $0xc90] sm:$0xff]  ;;  %v3030_v41 = vpack.c.bf16 %v491_v33, %v487_v32 }
  0xac   :  { %v2758_v51 = vpack.c.bf16 %v457_v46, %v453_v45  ;;  %v490_v42 = vld [vmem:[%s5785_s24 + $0xcb0] sm:$0xff]  ;;  %v497_v44 = vld [vmem:[%s5785_s24 + $0xce8] sm:$0xff]  ;;  %v495_v45 = vld [vmem:[%s5785_s24 + $0xcd8] sm:$0xff] }
  0xad   :  { %2737 = vmatpush1.bf16.msra.mxu0 %v2736_v52  ;;  %v452_v52 = vld [vmem:[%s5785_s24 + $0xb80] sm:$0xff]  ;;  %v499_v46 = vld [vmem:[%s5785_s24 + $0xcf8] sm:$0xff]  ;;  %v3032_v48 = vpack.c.bf16 %v490_v42, %v486_v40  ;;  %v537_v40 = vld [vmem:[%s5785_s24 + $0xe28] sm:$0xff] }
  0xae   :  { %2993 = vmatpush1.bf16.msra.mxu1 %v2992_v53  ;;  %2739 = vmatprep.subr.bf16.mxu0 %v2738_v54  ;;  %v456_v53 = vld [vmem:[%s5785_s24 + $0xba0] sm:$0xff]  ;;  %v454_v54 = vld [vmem:[%s5785_s24 + $0xb90] sm:$0xff]  ;;  %v539_v42 = vld [vmem:[%s5785_s24 + $0xe38] sm:$0xff] }
  0xaf   :  { %2995 = vmatprep.subr.bf16.mxu1 %v2994_v58  ;;  %v465_v58 = vld [vmem:[%s5785_s24 + $0xbe8] sm:$0xff]  ;;  %v2760_v61 = vpack.c.bf16 %v456_v53, %v452_v52  ;;  %v3016_v62 = vpack.c.bf16 %v458_v56, %v454_v54  ;;  %v494_v52 = vld [vmem:[%s5785_s24 + $0xcd0] sm:$0xff]  ;;  %v3034_v53 = vpack.c.bf16 %v499_v46, %v495_v45  ;;  %v532_v46 = vld [vmem:[%s5785_s24 + $0xe00] sm:$0xff] }
  0xb0   :  { %v2762_v63 = vpack.c.bf16 %v465_v58, %v461_v57  ;;  %v498_v54 = vld [vmem:[%s5785_s24 + $0xcf0] sm:$0xff]  ;;  %v505_v56 = vld [vmem:[%s5785_s24 + $0xd28] sm:$0xff]  ;;  %v503_v57 = vld [vmem:[%s5785_s24 + $0xd18] sm:$0xff] }
  0xb1   :  { %2741 = vmatpush1.bf16.msra.mxu0 %v2740_v0  ;;  %v460_v0 = vld [vmem:[%s5785_s24 + $0xbc0] sm:$0xff]  ;;  %v507_v58 = vld [vmem:[%s5785_s24 + $0xd38] sm:$0xff]  ;;  %v3036_v60 = vpack.c.bf16 %v498_v54, %v494_v52  ;;  %v545_v52 = vld [vmem:[%s5785_s24 + $0xe68] sm:$0xff] }
  0xb2   :  { %2997 = vmatpush1.bf16.msra.mxu1 %v2996_v1  ;;  %2743 = vmatprep.subr.bf16.mxu0 %v2742_v2  ;;  %v464_v1 = vld [vmem:[%s5785_s24 + $0xbe0] sm:$0xff]  ;;  %v462_v2 = vld [vmem:[%s5785_s24 + $0xbd0] sm:$0xff]  ;;  %v547_v54 = vld [vmem:[%s5785_s24 + $0xe78] sm:$0xff] }
  0xb3   :  { %2999 = vmatprep.subr.bf16.mxu1 %v2998_v6  ;;  %v473_v6 = vld [vmem:[%s5785_s24 + $0xc28] sm:$0xff]  ;;  %v2764_v9 = vpack.c.bf16 %v464_v1, %v460_v0  ;;  %v3020_v10 = vpack.c.bf16 %v466_v4, %v462_v2  ;;  %v502_v0 = vld [vmem:[%s5785_s24 + $0xd10] sm:$0xff]  ;;  %v3038_v1 = vpack.c.bf16 %v507_v58, %v503_v57  ;;  %v540_v58 = vld [vmem:[%s5785_s24 + $0xe40] sm:$0xff] }
  0xb4   :  { %v2766_v11 = vpack.c.bf16 %v473_v6, %v469_v5  ;;  %v506_v2 = vld [vmem:[%s5785_s24 + $0xd30] sm:$0xff]  ;;  %v513_v4 = vld [vmem:[%s5785_s24 + $0xd68] sm:$0xff]  ;;  %v511_v5 = vld [vmem:[%s5785_s24 + $0xd58] sm:$0xff] }
  0xb5   :  { %2745 = vmatpush1.bf16.msra.mxu0 %v2744_v12  ;;  %v468_v12 = vld [vmem:[%s5785_s24 + $0xc00] sm:$0xff]  ;;  %v515_v6 = vld [vmem:[%s5785_s24 + $0xd78] sm:$0xff]  ;;  %v3040_v8 = vpack.c.bf16 %v506_v2, %v502_v0  ;;  %v553_v0 = vld [vmem:[%s5785_s24 + $0xea8] sm:$0xff] }
  0xb6   :  { %3001 = vmatpush1.bf16.msra.mxu1 %v3000_v13  ;;  %2747 = vmatprep.subr.bf16.mxu0 %v2746_v14  ;;  %v472_v13 = vld [vmem:[%s5785_s24 + $0xc20] sm:$0xff]  ;;  %v470_v14 = vld [vmem:[%s5785_s24 + $0xc10] sm:$0xff]  ;;  %v555_v2 = vld [vmem:[%s5785_s24 + $0xeb8] sm:$0xff] }
  0xb7   :  { %3003 = vmatprep.subr.bf16.mxu1 %v3002_v18  ;;  %v481_v18 = vld [vmem:[%s5785_s24 + $0xc68] sm:$0xff]  ;;  %v2768_v22 = vpack.c.bf16 %v472_v13, %v468_v12  ;;  %v3024_v23 = vpack.c.bf16 %v474_v16, %v470_v14  ;;  %v510_v12 = vld [vmem:[%s5785_s24 + $0xd50] sm:$0xff]  ;;  %v3042_v13 = vpack.c.bf16 %v515_v6, %v511_v5  ;;  %v548_v6 = vld [vmem:[%s5785_s24 + $0xe80] sm:$0xff] }
  0xb8   :  { %v514_v14 = vld [vmem:[%s5785_s24 + $0xd70] sm:$0xff]  ;;  %v521_v16 = vld [vmem:[%s5785_s24 + $0xda8] sm:$0xff] }
  0xb9   :  { %2749 = vmatpush1.bf16.msra.mxu0 %v2748_v24  ;;  %v2770_v24 = vpack.c.bf16 %v481_v18, %v477_v17  ;;  %v519_v17 = vld [vmem:[%s5785_s24 + $0xd98] sm:$0xff]  ;;  %v3044_v20 = vpack.c.bf16 %v514_v14, %v510_v12  ;;  %v561_v12 = vld [vmem:[%s5785_s24 + $0xee8] sm:$0xff] }
  0xba   :  { %3005 = vmatpush1.bf16.msra.mxu1 %v3004_v26  ;;  %2751 = vmatprep.subr.bf16.mxu0 %v2750_v27  ;;  %v480_v26 = vld [vmem:[%s5785_s24 + $0xc60] sm:$0xff]  ;;  %v478_v27 = vld [vmem:[%s5785_s24 + $0xc50] sm:$0xff]  ;;  %v523_v18 = vld [vmem:[%s5785_s24 + $0xdb8] sm:$0xff] }
  0xbb   :  { %3007 = vmatprep.subr.bf16.mxu1 %v3006_v31  ;;  %v489_v31 = vld [vmem:[%s5785_s24 + $0xca8] sm:$0xff]  ;;  %v2772_v35 = vpack.c.bf16 %v480_v26, %v476_v25  ;;  %v3028_v36 = vpack.c.bf16 %v482_v29, %v478_v27  ;;  %v3046_v25 = vpack.c.bf16 %v523_v18, %v519_v17  ;;  %v522_v26 = vld [vmem:[%s5785_s24 + $0xdb0] sm:$0xff]  ;;  %v527_v29 = vld [vmem:[%s5785_s24 + $0xdd8] sm:$0xff] }
  0xbc   :  { %v525_v27 = vld [vmem:[%s5785_s24 + $0xdc8] sm:$0xff]  ;;  %v563_v14 = vld [vmem:[%s5785_s24 + $0xef8] sm:$0xff]  ;;  %v556_v18 = vld [vmem:[%s5785_s24 + $0xec0] sm:$0xff] }
  0xbd   :  { %2753 = vmatpush1.bf16.msra.mxu0 %v2752_v37  ;;  %v2774_v37 = vpack.c.bf16 %v489_v31, %v485_v30  ;;  %v531_v30 = vld [vmem:[%s5785_s24 + $0xdf8] sm:$0xff] }
  0xbe   :  { %3009 = vmatpush1.bf16.msra.mxu1 %v3008_v38  ;;  %2755 = vmatprep.subr.bf16.mxu0 %v2754_v39  ;;  %v484_v38 = vld [vmem:[%s5785_s24 + $0xc80] sm:$0xff] }
  0xbf   :  { %3011 = vmatprep.subr.bf16.mxu1 %v3010_v43  ;;  %v488_v39 = vld [vmem:[%s5785_s24 + $0xca0] sm:$0xff]  ;;  %v493_v43 = vld [vmem:[%s5785_s24 + $0xcc8] sm:$0xff] }
  0xc0   :  { %v2776_v47 = vpack.c.bf16 %v488_v39, %v484_v38  ;;  %v530_v38 = vld [vmem:[%s5785_s24 + $0xdf0] sm:$0xff]  ;;  %v533_v39 = vld [vmem:[%s5785_s24 + $0xe08] sm:$0xff] }
  0xc1   :  { %2757 = vmatpush1.bf16.msra.mxu0 %v2756_v49  ;;  %v2778_v49 = vpack.c.bf16 %v497_v44, %v493_v43  ;;  %v2798_v45 = vpack.c.bf16 %v537_v40, %v533_v39 }
  0xc2   :  { %3013 = vmatpush1.bf16.msra.mxu1 %v3012_v50  ;;  %2759 = vmatprep.subr.bf16.mxu0 %v2758_v51  ;;  %v492_v50 = vld [vmem:[%s5785_s24 + $0xcc0] sm:$0xff] }
  0xc3   :  { %3015 = vmatprep.subr.bf16.mxu1 %v3014_v55  ;;  %v496_v51 = vld [vmem:[%s5785_s24 + $0xce0] sm:$0xff]  ;;  %v501_v55 = vld [vmem:[%s5785_s24 + $0xd08] sm:$0xff] }
  0xc4   :  { %v2780_v59 = vpack.c.bf16 %v496_v51, %v492_v50  ;;  %v538_v50 = vld [vmem:[%s5785_s24 + $0xe30] sm:$0xff]  ;;  %v541_v51 = vld [vmem:[%s5785_s24 + $0xe48] sm:$0xff] }
  0xc5   :  { %2761 = vmatpush1.bf16.msra.mxu0 %v2760_v61  ;;  %v2782_v61 = vpack.c.bf16 %v505_v56, %v501_v55  ;;  %v2802_v57 = vpack.c.bf16 %v545_v52, %v541_v51 }
  0xc6   :  { %3017 = vmatpush1.bf16.msra.mxu1 %v3016_v62  ;;  %2763 = vmatprep.subr.bf16.mxu0 %v2762_v63  ;;  %v500_v62 = vld [vmem:[%s5785_s24 + $0xd00] sm:$0xff] }
  0xc7   :  { %3019 = vmatprep.subr.bf16.mxu1 %v3018_v3  ;;  %v504_v63 = vld [vmem:[%s5785_s24 + $0xd20] sm:$0xff]  ;;  %v509_v3 = vld [vmem:[%s5785_s24 + $0xd48] sm:$0xff] }
  0xc8   :  { %v2784_v7 = vpack.c.bf16 %v504_v63, %v500_v62  ;;  %v546_v62 = vld [vmem:[%s5785_s24 + $0xe70] sm:$0xff]  ;;  %v549_v63 = vld [vmem:[%s5785_s24 + $0xe88] sm:$0xff] }
  0xc9   :  { %2765 = vmatpush1.bf16.msra.mxu0 %v2764_v9  ;;  %v2786_v9 = vpack.c.bf16 %v513_v4, %v509_v3  ;;  %v2806_v5 = vpack.c.bf16 %v553_v0, %v549_v63 }
  0xca   :  { %3021 = vmatpush1.bf16.msra.mxu1 %v3020_v10  ;;  %2767 = vmatprep.subr.bf16.mxu0 %v2766_v11  ;;  %v508_v10 = vld [vmem:[%s5785_s24 + $0xd40] sm:$0xff] }
  0xcb   :  { %3023 = vmatprep.subr.bf16.mxu1 %v3022_v15  ;;  %v512_v11 = vld [vmem:[%s5785_s24 + $0xd60] sm:$0xff]  ;;  %v517_v15 = vld [vmem:[%s5785_s24 + $0xd88] sm:$0xff] }
  0xcc   :  { %825 = vmatmul.mubr.f32.vlgmr.msra.gmra.mrb[0].mxu0 %v80_v21  ;;  %v2788_v19 = vpack.c.bf16 %v512_v11, %v508_v10  ;;  %v554_v10 = vld [vmem:[%s5785_s24 + $0xeb0] sm:$0xff]  ;;  %v557_v11 = vld [vmem:[%s5785_s24 + $0xec8] sm:$0xff] }
  0xcd   :  { %2769 = vmatpush1.bf16.msra.mxu0 %v2768_v22  ;;  %1109 = vmatmul.mubr.f32.vlgmr.msra.gmra.mrb[0].mxu1 %v80_v21  ;;  %v2790_v21 = vpack.c.bf16 %v521_v16, %v517_v15  ;;  %v516_v22 = vld [vmem:[%s5785_s24 + $0xd80] sm:$0xff]  ;;  %v2810_v17 = vpack.c.bf16 %v561_v12, %v557_v11 }
  0xce   :  { %3025 = vmatpush1.bf16.msra.mxu1 %v3024_v23  ;;  %2771 = vmatprep.subr.bf16.mxu0 %v2770_v24  ;;  %v520_v23 = vld [vmem:[%s5785_s24 + $0xda0] sm:$0xff]  ;;  %v518_v24 = vld [vmem:[%s5785_s24 + $0xd90] sm:$0xff] }
  0xcf   :  { %3027 = vmatprep.subr.bf16.mxu1 %v3026_v28  ;;  %895 = vmatprep.mubr.f32.mxu0 %v83_v34  ;;  %v529_v28 = vld [vmem:[%s5785_s24 + $0xde8] sm:$0xff]  ;;  %v2792_v31 = vpack.c.bf16 %v520_v23, %v516_v22  ;;  %v3048_v32 = vpack.c.bf16 %v522_v26, %v518_v24  ;;  %v562_v22 = vld [vmem:[%s5785_s24 + $0xef0] sm:$0xff]  ;;  %v571_v26 = vld [vmem:[%s5785_s24 + $0xf38] sm:$0xff] }
  0xd0   :  { %1179 = vmatprep.mubr.f32.mxu1 %v83_v34  ;;  %v2794_v33 = vpack.c.bf16 %v529_v28, %v525_v27  ;;  %v524_v34 = vld [vmem:[%s5785_s24 + $0xdc0] sm:$0xff]  ;;  %v565_v23 = vld [vmem:[%s5785_s24 + $0xf08] sm:$0xff] }
  0xd1   :  { %2773 = vmatpush1.bf16.msra.mxu0 %v2772_v35  ;;  %v528_v35 = vld [vmem:[%s5785_s24 + $0xde0] sm:$0xff]  ;;  %v569_v24 = vld [vmem:[%s5785_s24 + $0xf28] sm:$0xff] }
  0xd2   :  { %3029 = vmatpush1.bf16.msra.mxu1 %v3028_v36  ;;  %2775 = vmatprep.subr.bf16.mxu0 %v2774_v37  ;;  %v526_v36 = vld [vmem:[%s5785_s24 + $0xdd0] sm:$0xff]  ;;  %v3050_v37 = vpack.c.bf16 %v531_v30, %v527_v29  ;;  %v2796_v43 = vpack.c.bf16 %v528_v35, %v524_v34  ;;  %v2814_v29 = vpack.c.bf16 %v569_v24, %v565_v23  ;;  %v564_v30 = vld [vmem:[%s5785_s24 + $0xf00] sm:$0xff]  ;;  %v573_v35 = vld [vmem:[%s5785_s24 + $0xf48] sm:$0xff] }
  0xd3   :  { %3031 = vmatprep.subr.bf16.mxu1 %v3030_v41  ;;  %v535_v41 = vld [vmem:[%s5785_s24 + $0xe18] sm:$0xff]  ;;  %v3052_v44 = vpack.c.bf16 %v530_v38, %v526_v36  ;;  %v570_v34 = vld [vmem:[%s5785_s24 + $0xf30] sm:$0xff]  ;;  %v577_v36 = vld [vmem:[%s5785_s24 + $0xf68] sm:$0xff] }
  0xd4   :  { %v579_v38 = vld [vmem:[%s5785_s24 + $0xf78] sm:$0xff]  ;;  %v82_v23 = vld [vmem:[%s5786_s25 + $0x30] sm:$0xff] }
  0xd5   :  { %2777 = vmatpush1.bf16.msra.mxu0 %v2776_v47  ;;  %v536_v47 = vld [vmem:[%s5785_s24 + $0xe20] sm:$0xff] }
  0xd6   :  { %3033 = vmatpush1.bf16.msra.mxu1 %v3032_v48  ;;  %2779 = vmatprep.subr.bf16.mxu0 %v2778_v49  ;;  %v534_v48 = vld [vmem:[%s5785_s24 + $0xe10] sm:$0xff]  ;;  %v3054_v49 = vpack.c.bf16 %v539_v42, %v535_v41  ;;  %v2800_v55 = vpack.c.bf16 %v536_v47, %v532_v46  ;;  %v2818_v41 = vpack.c.bf16 %v577_v36, %v573_v35  ;;  %v572_v42 = vld [vmem:[%s5785_s24 + $0xf40] sm:$0xff]  ;;  %v581_v47 = vld [vmem:[%s5785_s24 + $0xf88] sm:$0xff] }
  0xd7   :  { %3035 = vmatprep.subr.bf16.mxu1 %v3034_v53  ;;  %v543_v53 = vld [vmem:[%s5785_s24 + $0xe58] sm:$0xff]  ;;  %v3056_v56 = vpack.c.bf16 %v538_v50, %v534_v48  ;;  %v578_v46 = vld [vmem:[%s5785_s24 + $0xf70] sm:$0xff]  ;;  %v585_v48 = vld [vmem:[%s5785_s24 + $0xfa8] sm:$0xff] }
  0xd8   :  { %v587_v50 = vld [vmem:[%s5785_s24 + $0xfb8] sm:$0xff]  ;;  %v1243_v35 = vld [vmem:[%s5788_s11 + $0x1a8] sm:$0xff] }
  0xd9   :  { %2781 = vmatpush1.bf16.msra.mxu0 %v2780_v59  ;;  %v544_v59 = vld [vmem:[%s5785_s24 + $0xe60] sm:$0xff] }
  0xda   :  { %3037 = vmatpush1.bf16.msra.mxu1 %v3036_v60  ;;  %2783 = vmatprep.subr.bf16.mxu0 %v2782_v61  ;;  %v542_v60 = vld [vmem:[%s5785_s24 + $0xe50] sm:$0xff]  ;;  %v3058_v61 = vpack.c.bf16 %v547_v54, %v543_v53  ;;  %v2804_v3 = vpack.c.bf16 %v544_v59, %v540_v58  ;;  %v2822_v53 = vpack.c.bf16 %v585_v48, %v581_v47  ;;  %v580_v54 = vld [vmem:[%s5785_s24 + $0xf80] sm:$0xff]  ;;  %v589_v59 = vld [vmem:[%s5785_s24 + $0xfc8] sm:$0xff] }
  0xdb   :  { %3039 = vmatprep.subr.bf16.mxu1 %v3038_v1  ;;  %v551_v1 = vld [vmem:[%s5785_s24 + $0xe98] sm:$0xff]  ;;  %v3060_v4 = vpack.c.bf16 %v546_v62, %v542_v60  ;;  %v586_v58 = vld [vmem:[%s5785_s24 + $0xfb0] sm:$0xff]  ;;  %v593_v60 = vld [vmem:[%s5785_s24 + $0xfe8] sm:$0xff] }
  0xdc   :  { %v595_v62 = vld [vmem:[%s5785_s24 + $0xff8] sm:$0xff] }
  0xdd   :  { %2785 = vmatpush1.bf16.msra.mxu0 %v2784_v7  ;;  %v552_v7 = vld [vmem:[%s5785_s24 + $0xea0] sm:$0xff]  ;;  %v1245_v47 = vld [vmem:[%s5788_s11 + $0x1b8] sm:$0xff] }
  0xde   :  { %3041 = vmatpush1.bf16.msra.mxu1 %v3040_v8  ;;  %2787 = vmatprep.subr.bf16.mxu0 %v2786_v9  ;;  %v550_v8 = vld [vmem:[%s5785_s24 + $0xe90] sm:$0xff]  ;;  %v3062_v9 = vpack.c.bf16 %v555_v2, %v551_v1  ;;  %v2808_v15 = vpack.c.bf16 %v552_v7, %v548_v6  ;;  %v2826_v1 = vpack.c.bf16 %v593_v60, %v589_v59  ;;  %v588_v2 = vld [vmem:[%s5785_s24 + $0xfc0] sm:$0xff]  ;;  %v1247_v59 = vld [vmem:[%s5788_s11 + $0x1c8] sm:$0xff] }
  0xdf   :  { %3043 = vmatprep.subr.bf16.mxu1 %v3042_v13  ;;  %v559_v13 = vld [vmem:[%s5785_s24 + $0xed8] sm:$0xff]  ;;  %v3064_v16 = vpack.c.bf16 %v554_v10, %v550_v8  ;;  %v594_v6 = vld [vmem:[%s5785_s24 + $0xff0] sm:$0xff]  ;;  %v1206_v7 = vld [vmem:[%s5788_s11 + $0x80] sm:$0xff] }
  0xe0   :  { %v1207_v8 = vld [vmem:[%s5788_s11 + $0x88] sm:$0xff] }
  0xe1   :  { %2789 = vmatpush1.bf16.msra.mxu0 %v2788_v19  ;;  %v560_v19 = vld [vmem:[%s5785_s24 + $0xee0] sm:$0xff]  ;;  %v1239_v10 = vld [vmem:[%s5788_s11 + $0x188] sm:$0xff] }
  0xe2   :  { %3045 = vmatpush1.bf16.msra.mxu1 %v3044_v20  ;;  %2791 = vmatprep.subr.bf16.mxu0 %v2790_v21  ;;  %v558_v20 = vld [vmem:[%s5785_s24 + $0xed0] sm:$0xff]  ;;  %v3066_v21 = vpack.c.bf16 %v563_v14, %v559_v13  ;;  %v2812_v27 = vpack.c.bf16 %v560_v19, %v556_v18  ;;  %v3086_v13 = vpack.c.bf16 %v1207_v8, %v1206_v7  ;;  %v1190_v14 = vld [vmem:[%s5788_s11] sm:$0xff]  ;;  %v1223_v18 = vld [vmem:[%s5788_s11 + $0x108] sm:$0xff] }
  0xe3   :  { %3047 = vmatprep.subr.bf16.mxu1 %v3046_v25  ;;  %v567_v25 = vld [vmem:[%s5785_s24 + $0xf18] sm:$0xff]  ;;  %v3068_v28 = vpack.c.bf16 %v562_v22, %v558_v20  ;;  %v1208_v19 = vld [vmem:[%s5788_s11 + $0x90] sm:$0xff] }
  0xe4   :  { %v1209_v20 = vld [vmem:[%s5788_s11 + $0x98] sm:$0xff] }
  0xe5   :  { %2793 = vmatpush1.bf16.msra.mxu0 %v2792_v31  ;;  %v568_v31 = vld [vmem:[%s5785_s24 + $0xf20] sm:$0xff]  ;;  %v1241_v22 = vld [vmem:[%s5788_s11 + $0x198] sm:$0xff] }
  0xe6   :  { %3049 = vmatpush1.bf16.msra.mxu1 %v3048_v32  ;;  %2795 = vmatprep.subr.bf16.mxu0 %v2794_v33  ;;  %v566_v32 = vld [vmem:[%s5785_s24 + $0xf10] sm:$0xff]  ;;  %v3070_v33 = vpack.c.bf16 %v571_v26, %v567_v25  ;;  %v2816_v39 = vpack.c.bf16 %v568_v31, %v564_v30  ;;  %v3090_v26 = vpack.c.bf16 %v1209_v20, %v1208_v19  ;;  %v1225_v31 = vld [vmem:[%s5788_s11 + $0x118] sm:$0xff]  ;;  %v1251_v19 = vld [vmem:[%s5788_s11 + $0x1e8] sm:$0xff] }
  0xe7   :  { %3051 = vmatprep.subr.bf16.mxu1 %v3050_v37  ;;  %v575_v37 = vld [vmem:[%s5785_s24 + $0xf58] sm:$0xff]  ;;  %v3072_v40 = vpack.c.bf16 %v570_v34, %v566_v32  ;;  %v1210_v32 = vld [vmem:[%s5788_s11 + $0xa0] sm:$0xff] }
  0xe8   :  { %v1242_v34 = vld [vmem:[%s5788_s11 + $0x1a0] sm:$0xff]  ;;  %v1249_v7 = vld [vmem:[%s5788_s11 + $0x1d8] sm:$0xff] }
  0xe9   :  { %2797 = vmatpush1.bf16.msra.mxu0 %v2796_v43  ;;  %v576_v43 = vld [vmem:[%s5785_s24 + $0xf60] sm:$0xff] }
  0xea   :  { %3053 = vmatpush1.bf16.msra.mxu1 %v3052_v44  ;;  %2799 = vmatprep.subr.bf16.mxu0 %v2798_v45  ;;  %v574_v44 = vld [vmem:[%s5785_s24 + $0xf50] sm:$0xff]  ;;  %v3074_v45 = vpack.c.bf16 %v579_v38, %v575_v37  ;;  %v2820_v51 = vpack.c.bf16 %v576_v43, %v572_v42  ;;  %v3126_v42 = vpack.c.bf16 %v1243_v35, %v1242_v34  ;;  %v1227_v43 = vld [vmem:[%s5788_s11 + $0x128] sm:$0xff]  ;;  %v1205_v35 = vld [vmem:[%s5788_s11 + $0x78] sm:$0xff] }
  0xeb   :  { %3055 = vmatprep.subr.bf16.mxu1 %v3054_v49  ;;  %v583_v49 = vld [vmem:[%s5785_s24 + $0xf98] sm:$0xff]  ;;  %v3076_v52 = vpack.c.bf16 %v578_v46, %v574_v44  ;;  %v1212_v44 = vld [vmem:[%s5788_s11 + $0xb0] sm:$0xff] }
  0xec   :  { %v1244_v46 = vld [vmem:[%s5788_s11 + $0x1b0] sm:$0xff] }
  0xed   :  { %2801 = vmatpush1.bf16.msra.mxu0 %v2800_v55  ;;  %v584_v55 = vld [vmem:[%s5785_s24 + $0xfa0] sm:$0xff]  ;;  %v1204_v34 = vld [vmem:[%s5788_s11 + $0x70] sm:$0xff] }
  0xee   :  { %3057 = vmatpush1.bf16.msra.mxu1 %v3056_v56  ;;  %2803 = vmatprep.subr.bf16.mxu0 %v2802_v57  ;;  %v582_v56 = vld [vmem:[%s5785_s24 + $0xf90] sm:$0xff]  ;;  %v3078_v57 = vpack.c.bf16 %v587_v50, %v583_v49  ;;  %v2824_v63 = vpack.c.bf16 %v584_v55, %v580_v54  ;;  %v3130_v54 = vpack.c.bf16 %v1245_v47, %v1244_v46  ;;  %v1229_v55 = vld [vmem:[%s5788_s11 + $0x138] sm:$0xff]  ;;  %v596_v46 = vld [vmem:[%s5789_s9] sm:$0xf] }
  0xef   :  { %3059 = vmatprep.subr.bf16.mxu1 %v3058_v61  ;;  %v591_v61 = vld [vmem:[%s5785_s24 + $0xfd8] sm:$0xff]  ;;  %v3080_v0 = vpack.c.bf16 %v586_v58, %v582_v56  ;;  %v1214_v56 = vld [vmem:[%s5788_s11 + $0xc0] sm:$0xff] }
  0xf0   :  { %v1246_v58 = vld [vmem:[%s5788_s11 + $0x1c0] sm:$0xff] }
  0xf1   :  { %2805 = vmatpush1.bf16.msra.mxu0 %v2804_v3  ;;  %v592_v3 = vld [vmem:[%s5785_s24 + $0xfe0] sm:$0xff] }
  0xf2   :  { %3061 = vmatpush1.bf16.msra.mxu1 %v3060_v4  ;;  %2807 = vmatprep.subr.bf16.mxu0 %v2806_v5  ;;  %v590_v4 = vld [vmem:[%s5785_s24 + $0xfd0] sm:$0xff]  ;;  %v3082_v5 = vpack.c.bf16 %v595_v62, %v591_v61  ;;  %v2828_v11 = vpack.c.bf16 %v592_v3, %v588_v2  ;;  %v3134_v2 = vpack.c.bf16 %v1247_v59, %v1246_v58  ;;  %v1231_v3 = vld [vmem:[%s5788_s11 + $0x148] sm:$0xff] }
  0xf3   :  { %3063 = vmatprep.subr.bf16.mxu1 %v3062_v9  ;;  %v1238_v9 = vld [vmem:[%s5788_s11 + $0x180] sm:$0xff]  ;;  %v3084_v12 = vpack.c.bf16 %v594_v6, %v590_v4  ;;  %v1216_v4 = vld [vmem:[%s5788_s11 + $0xd0] sm:$0xff] }
  0xf4   :  { %v1248_v6 = vld [vmem:[%s5788_s11 + $0x1d0] sm:$0xff] }
  0xf5   :  { %2809 = vmatpush1.bf16.msra.mxu0 %v2808_v15  ;;  %v1191_v15 = vld [vmem:[%s5788_s11 + $0x8] sm:$0xff] }
  0xf6   :  { %3065 = vmatpush1.bf16.msra.mxu1 %v3064_v16  ;;  %2811 = vmatprep.subr.bf16.mxu0 %v2810_v17  ;;  %v1222_v16 = vld [vmem:[%s5788_s11 + $0x100] sm:$0xff]  ;;  %v3118_v17 = vpack.c.bf16 %v1239_v10, %v1238_v9  ;;  %v3088_v24 = vpack.c.bf16 %v1191_v15, %v1190_v14  ;;  %v3138_v14 = vpack.c.bf16 %v1249_v7, %v1248_v6  ;;  %v1233_v15 = vld [vmem:[%s5788_s11 + $0x158] sm:$0xff] }
  0xf7   :  { %3067 = vmatprep.subr.bf16.mxu1 %v3066_v21  ;;  %v1240_v21 = vld [vmem:[%s5788_s11 + $0x190] sm:$0xff]  ;;  %v3120_v25 = vpack.c.bf16 %v1223_v18, %v1222_v16  ;;  %v1218_v16 = vld [vmem:[%s5788_s11 + $0xe0] sm:$0xff] }
  0xf8   :  { %v3122_v30 = vpack.c.bf16 %v1241_v22, %v1240_v21  ;;  %v1250_v18 = vld [vmem:[%s5788_s11 + $0x1e0] sm:$0xff] }
  0xf9   :  { %2813 = vmatpush1.bf16.msra.mxu0 %v2812_v27  ;;  %v1192_v27 = vld [vmem:[%s5788_s11 + $0x10] sm:$0xff]  ;;  %v2306_v7 = vld [vmem:[%s5756_s12] ss:$0 sm:$0xff] }
  0xfa   :  { %3069 = vmatpush1.bf16.msra.mxu1 %v3068_v28  ;;  %2815 = vmatprep.subr.bf16.mxu0 %v2814_v29  ;;  %v1193_v28 = vld [vmem:[%s5788_s11 + $0x18] sm:$0xff]  ;;  %v1224_v29 = vld [vmem:[%s5788_s11 + $0x110] sm:$0xff] }
  0xfb   :  { %3071 = vmatprep.subr.bf16.mxu1 %v3070_v33  ;;  %v1211_v33 = vld [vmem:[%s5788_s11 + $0xa8] sm:$0xff]  ;;  %v3092_v36 = vpack.c.bf16 %v1193_v28, %v1192_v27  ;;  %v3124_v37 = vpack.c.bf16 %v1225_v31, %v1224_v29  ;;  %v1234_v27 = vld [vmem:[%s5788_s11 + $0x160] sm:$0xff]  ;;  %v1221_v31 = vld [vmem:[%s5788_s11 + $0xf8] sm:$0xff] }
  0xfc   :  { %v3094_v38 = vpack.c.bf16 %v1211_v33, %v1210_v32  ;;  %v1235_v28 = vld [vmem:[%s5788_s11 + $0x168] sm:$0xff]  ;;  %v1252_v32 = vld [vmem:[%s5788_s11 + $0x1f0] sm:$0xff] }
  0xfd   :  { %2817 = vmatpush1.bf16.msra.mxu0 %v2816_v39  ;;  %v1194_v39 = vld [vmem:[%s5788_s11 + $0x20] sm:$0xff]  ;;  %v3144_v29 = vpack.c.bf16 %v1235_v28, %v1234_v27 }
  0xfe   :  { %3073 = vmatpush1.bf16.msra.mxu1 %v3072_v40  ;;  %2819 = vmatprep.subr.bf16.mxu0 %v2818_v41  ;;  %v1195_v40 = vld [vmem:[%s5788_s11 + $0x28] sm:$0xff]  ;;  %v1226_v41 = vld [vmem:[%s5788_s11 + $0x120] sm:$0xff] }
  0xff   :  { %3075 = vmatprep.subr.bf16.mxu1 %v3074_v45  ;;  %v1213_v45 = vld [vmem:[%s5788_s11 + $0xb8] sm:$0xff]  ;;  %v3096_v48 = vpack.c.bf16 %v1195_v40, %v1194_v39  ;;  %v3128_v49 = vpack.c.bf16 %v1227_v43, %v1226_v41  ;;  %v1236_v39 = vld [vmem:[%s5788_s11 + $0x170] sm:$0xff]  ;;  %v598_v43 = vlaneseq  ;;  %v1495_v28 = vld [vmem:[%s5792_s2 + $0x20] sm:$0xff] }
 0x100   :  { %v3098_v50 = vpack.c.bf16 %v1213_v45, %v1212_v44  ;;  %v1237_v40 = vld [vmem:[%s5788_s11 + $0x178] sm:$0xff] }
 0x101   :  { %2821 = vmatpush1.bf16.msra.mxu0 %v2820_v51  ;;  %v1196_v51 = vld [vmem:[%s5788_s11 + $0x30] sm:$0xff]  ;;  %v3148_v41 = vpack.c.bf16 %v1237_v40, %v1236_v39  ;;  %v5226_v44 = vshrl.u32 %v598_v43, 7  ;;  %v1502_v39 = vld [vmem:[%s5792_s2 + $0x58] sm:$0xff] }
 0x102   :  { %3077 = vmatpush1.bf16.msra.mxu1 %v3076_v52  ;;  %2823 = vmatprep.subr.bf16.mxu0 %v2822_v53  ;;  %v1197_v52 = vld [vmem:[%s5788_s11 + $0x38] sm:$0xff]  ;;  %v1228_v53 = vld [vmem:[%s5788_s11 + $0x130] sm:$0xff] }
 0x103   :  { %3079 = vmatprep.subr.bf16.mxu1 %v3078_v57  ;;  %v1215_v57 = vld [vmem:[%s5788_s11 + $0xc8] sm:$0xff]  ;;  %v3100_v60 = vpack.c.bf16 %v1197_v52, %v1196_v51  ;;  %v3132_v61 = vpack.c.bf16 %v1229_v55, %v1228_v53  ;;  %v600_v45 = vsub.s32 0, %v5226_v44  ;;  %v608_v47 = vsub.s32 2, %v5226_v44  ;;  %v2305_v55 = vld [vmem:[%s5790_s28] ss:$0 sm:$0xff]  ;;  %v1733_v43 = vld [vmem:[%s5758_s15 + $0x138] sm:$0xff] }
 0x104   :  { %v3102_v62 = vpack.c.bf16 %v1215_v57, %v1214_v56 }
 0x105   :  { %2825 = vmatpush1.bf16.msra.mxu0 %v2824_v63  ;;  %v1198_v63 = vld [vmem:[%s5788_s11 + $0x40] sm:$0xff]  ;;  %v609_v51 = vrot.slane %v596_v46, %v608_v47 }
 0x106   :  { %3081 = vmatpush1.bf16.msra.mxu1 %v3080_v0  ;;  %2827 = vmatprep.subr.bf16.mxu0 %v2826_v1  ;;  %v1199_v0 = vld [vmem:[%s5788_s11 + $0x48] sm:$0xff]  ;;  %v1230_v1 = vld [vmem:[%s5788_s11 + $0x140] sm:$0xff] }
 0x107   :  { %3083 = vmatprep.subr.bf16.mxu1 %v3082_v5  ;;  %v1217_v5 = vld [vmem:[%s5788_s11 + $0xd8] sm:$0xff]  ;;  %v3104_v8 = vpack.c.bf16 %v1199_v0, %v1198_v63  ;;  %v3136_v9 = vpack.c.bf16 %v1231_v3, %v1230_v1  ;;  %v1491_v3 = vld [vmem:[%s5792_s2] sm:$0xff] }
 0x108   :  { %v3106_v10 = vpack.c.bf16 %v1217_v5, %v1216_v4  ;;  %v1492_v4 = vld [vmem:[%s5792_s2 + $0x8] sm:$0xff]  ;;  %v1730_v47 = vld [vmem:[%s5758_s15 + $0x120] sm:$0xff] }
 0x109   :  { %2829 = vmatpush1.bf16.msra.mxu0 %v2828_v11  ;;  %v1200_v11 = vld [vmem:[%s5788_s11 + $0x50] sm:$0xff] }
 0x10a   :  { %3085 = vmatpush1.bf16.msra.mxu1 %v3084_v12  ;;  %3087 = vmatprep.subr.bf16.mxu0 %v3086_v13  ;;  %v1201_v12 = vld [vmem:[%s5788_s11 + $0x58] sm:$0xff]  ;;  %v1232_v13 = vld [vmem:[%s5788_s11 + $0x150] sm:$0xff] }
 0x10b   :  { %3119 = vmatprep.subr.bf16.mxu1 %v3118_v17  ;;  %v1219_v17 = vld [vmem:[%s5788_s11 + $0xe8] sm:$0xff]  ;;  %v3108_v20 = vpack.c.bf16 %v1201_v12, %v1200_v11  ;;  %v3140_v21 = vpack.c.bf16 %v1233_v15, %v1232_v13  ;;  %v1608_v11 = vld [vmem:[%s5757_s13] sm:$0xff] }
 0x10c   :  { %896 = vmatmul.mubr.f32.vlgmr.msra.gmra.mrb[0].mxu0 %v82_v23  ;;  %v3110_v22 = vpack.c.bf16 %v1219_v17, %v1218_v16  ;;  %v1609_v12 = vld [vmem:[%s5757_s13 + $0x8] sm:$0x3]  ;;  %v1729_v16 = vld [vmem:[%s5758_s15 + $0x118] sm:$0xff] }
 0x10d   :  { %1180 = vmatmul.mubr.f32.vlgmr.msra.gmra.mrb[0].mxu1 %v82_v23  ;;  %3089 = vmatpush3.bf16.msra.mxu0 %v3088_v24  ;;  %v1202_v23 = vld [vmem:[%s5788_s11 + $0x60] sm:$0xff]  ;;  %v1203_v24 = vld [vmem:[%s5788_s11 + $0x68] sm:$0xff] }
 0x10e   :  { %3121 = vmatpush3.bf16.msra.mxu1 %v3120_v25  ;;  %3091 = vmatprep.subr.bf16.mxu0 %v3090_v26  ;;  %v3142_v25 = vpack.c.bf16 %v1251_v19, %v1250_v18  ;;  %v3112_v26 = vpack.c.bf16 %v1203_v24, %v1202_v23  ;;  %v1727_v15 = vld [vmem:[%s5758_s15 + $0x108] sm:$0xff]  ;;  %v1493_v18 = vld [vmem:[%s5792_s2 + $0x10] sm:$0xff]  ;;  %v1494_v19 = vld [vmem:[%s5792_s2 + $0x18] sm:$0xff] }
 0x10f   :  { %3123 = vmatprep.subr.bf16.mxu1 %v3122_v30  ;;  %v1220_v30 = vld [vmem:[%s5788_s11 + $0xf0] sm:$0xff]  ;;  %v3182_v23 = vpack.c.bf16 %v1729_v16, %v1727_v15  ;;  %v1726_v24 = vld [vmem:[%s5758_s15 + $0x100] sm:$0xff] }
 0x110   :  { %v3114_v33 = vpack.c.bf16 %v1221_v31, %v1220_v30 }
 0x111   :  { %3093 = vmatpush3.bf16.msra.mxu0 %v3092_v36  ;;  %v1253_v36 = vld [vmem:[%s5788_s11 + $0x1f8] sm:$0xff] }
 0x112   :  { %3125 = vmatpush3.bf16.msra.mxu1 %v3124_v37  ;;  %3095 = vmatprep.subr.bf16.mxu0 %v3094_v38  ;;  %v3116_v37 = vpack.c.bf16 %v1205_v35, %v1204_v34  ;;  %v3146_v38 = vpack.c.bf16 %v1253_v36, %v1252_v32  ;;  %v1497_v32 = vld [vmem:[%s5792_s2 + $0x30] sm:$0xff]  ;;  %v1499_v35 = vld [vmem:[%s5792_s2 + $0x40] sm:$0xff]  ;;  %v1500_v36 = vld [vmem:[%s5792_s2 + $0x48] sm:$0xff] }
 0x113   :  { %3127 = vmatprep.subr.bf16.mxu1 %v3126_v42  ;;  %v3345_v42 = vmov 0.0|0.0  }
 0x115   :  { %3097 = vmatpush3.bf16.msra.mxu0 %v3096_v48  ;;  %v604_v48 = vsub.s32 1, %v5226_v44 }
 0x116   :  { %3129 = vmatpush3.bf16.msra.mxu1 %v3128_v49  ;;  %3099 = vmatprep.subr.bf16.mxu0 %v3098_v50  ;;  %v612_v49 = vsub.s32 3, %v5226_v44  ;;  %v601_v50 = vrot.slane %v596_v46, %v600_v45  ;;  %v2108_v44 = vld [vmem:[%s5766_s19 + $0x10] sm:$0xff] }
 0x117   :  { %3131 = vmatprep.subr.bf16.mxu1 %v3130_v54  ;;  %v605_v52 = vrot.slane %v596_v46, %v604_v48 }
 0x118   :  { %v613_v53 = vrot.slane %v596_v46, %v612_v49  ;;  %v1732_v49 = vld [vmem:[%s5758_s15 + $0x130] sm:$0xff] }
 0x119   :  { %3101 = vmatpush3.bf16.msra.mxu0 %v3100_v60  ;;  %v1403_v60 = vld [vmem:[%s5791_s3] sm:$0xff] }
 0x11a   :  { %3133 = vmatpush3.bf16.msra.mxu1 %v3132_v61  ;;  %3103 = vmatprep.subr.bf16.mxu0 %v3102_v62  ;;  %v1404_v61 = vld [vmem:[%s5791_s3 + $0x8] sm:$0x3] }
 0x11b   :  { %3135 = vmatprep.subr.bf16.mxu1 %v3134_v2  ;;  %v3151_v6 = vpack.c.bf16 %v1404_v61, %v1403_v60  ;;  %v1505_v60 = vld [vmem:[%s5792_s2 + $0x70] sm:$0xff]  ;;  %v1506_v61 = vld [vmem:[%s5792_s2 + $0x78] sm:$0xff] }
 0x11d   :  { %3105 = vmatpush3.bf16.msra.mxu0 %v3104_v8 }
 0x11e   :  { %3137 = vmatpush3.bf16.msra.mxu1 %v3136_v9  ;;  %3107 = vmatprep.subr.bf16.mxu0 %v3106_v10  ;;  %v2300_v10 = vld [vmem:[%s5760_s6] ss:$0 sm:$0xff] }
 0x11f   :  { %3139 = vmatprep.subr.bf16.mxu1 %v3138_v14  ;;  %v3155_v14 = vpack.c.bf16 %v1492_v4, %v1491_v3  ;;  %v1740_v3 = vld [vmem:[%s5758_s15 + $0x170] sm:$0xff] }
 0x121   :  { %3109 = vmatpush3.bf16.msra.mxu0 %v3108_v20  ;;  %v1402_v20 = vld [vmem:[%s5759_s1] sm:$0xff] }
 0x122   :  { %3141 = vmatpush3.bf16.msra.mxu1 %v3140_v21  ;;  %3111 = vmatprep.subr.bf16.mxu0 %v3110_v22  ;;  %v3179_v21 = vpack.c.bf16 %v1609_v12, %v1608_v11  ;;  %v3348_v22 = vmov 0.0  }
 0x123   :  { %3143 = vmatprep.subr.bf16.mxu1 %v3142_v25  ;;  %v1728_v25 = vld [vmem:[%s5758_s15 + $0x110] sm:$0xff] }
 0x124   :  { %v3184_v30 = vpack.c.bf16 %v1728_v25, %v1726_v24  ;;  %v1694_v24 = vld [vmem:[%s5758_s15] sm:$0xff]  ;;  %v1696_v25 = vld [vmem:[%s5758_s15 + $0x10] sm:$0xff] }
 0x125   :  { %3113 = vmatpush3.bf16.msra.mxu0 %v3112_v26  ;;  %v3158_v26 = vpack.c.bf16 %v1494_v19, %v1493_v18 }
 0x126   :  { %3145 = vmatpush3.bf16.msra.mxu1 %v3144_v29  ;;  %3115 = vmatprep.subr.bf16.mxu0 %v3114_v33  ;;  %v1590_v56 = vpop.permute.xlu0 %1589  ;;  %v1496_v29 = vld [vmem:[%s5792_s2 + $0x28] sm:$0xff]  ;;  %v1498_v33 = vld [vmem:[%s5792_s2 + $0x38] sm:$0xff] }
 0x127   :  { %3147 = vmatprep.subr.bf16.mxu1 %v3146_v38  ;;  %v1598_v2 = vmul.f32 %v2305_v55, %v1590_v56  ;;  %v3161_v31 = vpack.c.bf16 %v1496_v29, %v1495_v28  ;;  %v3164_v34 = vpack.c.bf16 %v1498_v33, %v1497_v32  ;;  %v1501_v38 = vld [vmem:[%s5792_s2 + $0x50] sm:$0xff]  ;;  %v1737_v55 = vld [vmem:[%s5758_s15 + $0x158] sm:$0xff] }
 0x128   :  { %v3170_v40 = vpack.c.bf16 %v1502_v39, %v1501_v38  ;;  %v1701_v28 = vld [vmem:[%s5758_s15 + $0x38] sm:$0xff] }
 0x129   :  { %3117 = vmatpush3.bf16.msra.mxu0 %v3116_v37  ;;  %v1606_v17 = vadd.f32 %v2306_v7, %v1598_v2  ;;  %v3167_v37 = vpack.c.bf16 %v1500_v36, %v1499_v35  ;;  %v1738_v2 = vld [vmem:[%s5758_s15 + $0x160] sm:$0xff]  ;;  %v1700_v35 = vld [vmem:[%s5758_s15 + $0x30] sm:$0xff]  ;;  %v1703_v36 = vld [vmem:[%s5758_s15 + $0x48] sm:$0xff] }
 0x12a   :  { %3149 = vmatpush3.bf16.msra.mxu1 %v3148_v41  ;;  %3150 = vmatprep.subr.bf16.mxu0 %v3345_v42  ;;  %v1731_v41 = vld [vmem:[%s5758_s15 + $0x128] sm:$0xff]  ;;  %v3196_v4 = vpack.c.bf16 %v1740_v3, %v1738_v2 }
 0x12b   :  { %3154 = vmatprep.subr.bf16.mxu1 %v3345_v42  ;;  %v1607_v27 = vmax.f32 %v1606_v17, 0.0  ;;  %v3186_v46 = vpack.c.bf16 %v1733_v43, %v1731_v41  ;;  %v1704_v41 = vld [vmem:[%s5758_s15 + $0x50] sm:$0xff]  ;;  %v1707_v43 = vld [vmem:[%s5758_s15 + $0x68] sm:$0xff] }
 0x1df   :  { %v897_v54 = vpop.f32.mrb[0].mxu0 }
 0x1e0   :  { %v3314_v57 = vadd.f32 %v897_v54, %v601_v50  ;;  %v1181_v58 = vpop.f32.mrb[0].mxu1  ;;  %v899_v59 = vpop.f32.mrb[1].mxu0  ;;  %v3188_v50 = vpack.c.bf16 %v1732_v49, %v1730_v47  ;;  %v1735_v54 = vld [vmem:[%s5758_s15 + $0x148] sm:$0xff] }
 0x1e1   :  { %v3316_v62 = vadd.f32 %v1181_v58, %v609_v51  ;;  %v3315_v63 = vadd.f32 %v899_v59, %v605_v52  ;;  %v1183_v0 = vpop.f32.mrb[1].mxu1  ;;  %v1503_v51 = vld [vmem:[%s5792_s2 + $0x60] sm:$0xff]  ;;  %v1504_v52 = vld [vmem:[%s5792_s2 + $0x68] sm:$0xff]  ;;  %v3190_v56 = vpack.c.bf16 %v1737_v55, %v1735_v54  ;;  %v1736_v58 = vld [vmem:[%s5758_s15 + $0x150] sm:$0xff] }
 0x1e2   :  { %v3317_v1 = vadd.f32 %v1183_v0, %v613_v53  ;;  %v1186_v8 = vmax.f32 %v3314_v57, 0.0  ;;  %v3173_v53 = vpack.c.bf16 %v1504_v52, %v1503_v51  ;;  %v1734_v57 = vld [vmem:[%s5758_s15 + $0x140] sm:$0xff]  ;;  %v1741_v0 = vld [vmem:[%s5758_s15 + $0x178] sm:$0xff]  ;;  %v1708_v51 = vld [vmem:[%s5758_s15 + $0x70] sm:$0xff] }
 0x1e3   :  { %v1187_v5 = vmax.f32 %v3315_v63, 0.0  ;;  %v1188_v13 = vmax.f32 %v3316_v62, 0.0  ;;  %v3192_v59 = vpack.c.bf16 %v1736_v58, %v1734_v57  ;;  %v3176_v62 = vpack.c.bf16 %v1506_v61, %v1505_v60  ;;  %v1739_v63 = vld [vmem:[%s5758_s15 + $0x168] sm:$0xff]  ;;  %v1712_v57 = vld [vmem:[%s5758_s15 + $0x90] sm:$0xff] }
 0x1e4   :  { %v1189_v9 = vmax.f32 %v3317_v1, 0.0  ;;  %v3194_v1 = vpack.c.bf16 %v1741_v0, %v1739_v63  ;;  %v1711_v52 = vld [vmem:[%s5758_s15 + $0x88] sm:$0xff]  ;;  %v1716_v63 = vld [vmem:[%s5758_s15 + $0xb0] sm:$0xff] }
 0x1e5   :  { %1325 = vmatprep.mubr.f32.mxu0 %v1187_v5  ;;  %v1695_v5 = vld [vmem:[%s5758_s15 + $0x8] sm:$0xff] }
 0x1e6   :  { %1395 = vmatprep.mubr.f32.mxu1 %v1189_v9  ;;  %1326 = vmatmul.mubr.f32.vlgmr.msra.gmra.mrb[2].mxu0 %v1186_v8  ;;  %v1715_v58 = vld [vmem:[%s5758_s15 + $0xa8] sm:$0xff] }
 0x1e7   :  { %1396 = vmatmul.mubr.f32.vlgmr.msra.gmra.mrb[2].mxu1 %v1188_v13  ;;  %3153 = vmatpush3.bf16.msk.msra.mxu0 %vm5257_vm2, %v3151_v6  ;;  %v1697_v6 = vld [vmem:[%s5758_s15 + $0x18] sm:$0xff]  ;;  %v1719_v0 = vld [vmem:[%s5758_s15 + $0xc8] sm:$0xff] }
 0x1e8   :  { %2475 = vmatprep.mubr.msk.f32.mxu0 %vm3347_vm4, %v3348_v22  ;;  %3178 = vmatprep.subr.bf16.mxu0 %v3345_v42  ;;  %v3198_v7 = vpack.c.bf16 %v1697_v6, %v1695_v5  ;;  %v1720_v5 = vld [vmem:[%s5758_s15 + $0xd0] sm:$0xff]  ;;  %v1723_v6 = vld [vmem:[%s5758_s15 + $0xe8] sm:$0xff] }
 0x1e9   :  { %3156 = vmatpush3.bf16.msra.mxu1 %v3155_v14  ;;  %2510 = vmatprep.mubr.msk.f32.mxu1 %vm3347_vm4, %v3348_v22  ;;  %v2301_v14 = vld [vmem:[%s5761_s8] ss:$0 sm:$0xff] }
 0x1ea   :  { %2476 = vmatmul.mubr.msk.f32.vlgmr.msra.gmra.mrb[4].mxu0 %vm1412_vm3, %v1402_v20  ;;  %3157 = vmatprep.subr.bf16.mxu1 %v3345_v42 }
 0x1eb   :  { %3181 = vmatpush3.bf16.msk.msra.mxu0 %vm5257_vm2, %v3179_v21  ;;  %2517 = vmatprep.mubr.msk.f32.mxu0 %vm3347_vm4, %v3348_v22  ;;  %v2307_v21 = vld [vmem:[%s5762_s14] ss:$0 sm:$0xff] }
 0x1ec   :  { %3183 = vmatprep.subr.bf16.mxu0 %v3182_v23 }
 0x1ed   :  { %3159 = vmatpush3.bf16.msra.mxu1 %v3158_v26 }
 0x1ee   :  { %2518 = vmatmul.mubr.msk.f32.vlgmr.msra.gmra.mrb[6].mxu0 %vm1412_vm3, %v1607_v27  ;;  %3160 = vmatprep.subr.bf16.mxu1 %v3345_v42  ;;  %v1699_v27 = vld [vmem:[%s5758_s15 + $0x28] sm:$0xff] }
 0x1ef   :  { %3185 = vmatpush1.bf16.msra.mxu0 %v3184_v30  ;;  %1810 = vmatprep.mubr.f32.mxu0 %v3348_v22  ;;  %v3202_v33 = vpack.c.bf16 %v1701_v28, %v1699_v27  ;;  %v1897_v27 = vld [vmem:[%s5758_s15 + $0x1c8] sm:$0xff]  ;;  %v1899_v28 = vld [vmem:[%s5758_s15 + $0x1d8] sm:$0xff] }
 0x1f0   :  { %3187 = vmatprep.subr.bf16.mxu0 %v3186_v46  ;;  %v1709_v46 = vld [vmem:[%s5758_s15 + $0x78] sm:$0xff] }
 0x1f1   :  { %3162 = vmatpush3.bf16.msra.mxu1 %v3161_v31  ;;  %v3200_v31 = vpack.c.bf16 %v1696_v25, %v1694_v24  ;;  %v3210_v49 = vpack.c.bf16 %v1709_v46, %v1707_v43  ;;  %v1892_v25 = vld [vmem:[%s5758_s15 + $0x1a0] sm:$0xff]  ;;  %v1997_v46 = vld [vmem:[%s5763_s17 + $0x8] sm:$0xff] }
 0x1f2   :  { %3163 = vmatprep.subr.bf16.mxu1 %v3345_v42 }
 0x1f3   :  { %3189 = vmatpush1.bf16.msra.mxu0 %v3188_v50  ;;  %v1706_v50 = vld [vmem:[%s5758_s15 + $0x60] sm:$0xff] }
 0x1f4   :  { %3191 = vmatprep.subr.bf16.mxu0 %v3190_v56  ;;  %v3212_v54 = vpack.c.bf16 %v1708_v51, %v1706_v50  ;;  %v1710_v56 = vld [vmem:[%s5758_s15 + $0x80] sm:$0xff] }
 0x1f5   :  { %3165 = vmatpush3.bf16.msra.mxu1 %v3164_v34  ;;  %v1698_v34 = vld [vmem:[%s5758_s15 + $0x20] sm:$0xff]  ;;  %v3216_v60 = vpack.c.bf16 %v1712_v57, %v1710_v56 }
 0x1f6   :  { %3166 = vmatprep.subr.bf16.mxu1 %v3345_v42  ;;  %v3204_v38 = vpack.c.bf16 %v1700_v35, %v1698_v34  ;;  %v1903_v34 = vld [vmem:[%s5758_s15 + $0x1f8] sm:$0xff] }
 0x1f7   :  { %3193 = vmatpush1.bf16.msra.mxu0 %v3192_v59  ;;  %v1717_v59 = vld [vmem:[%s5758_s15 + $0xb8] sm:$0xff] }
 0x1f8   :  { %3195 = vmatprep.subr.bf16.mxu0 %v3194_v1  ;;  %v3218_v61 = vpack.c.bf16 %v1717_v59, %v1715_v58  ;;  %v1721_v1 = vld [vmem:[%s5758_s15 + $0xd8] sm:$0xff]  ;;  %v2000_v58 = vld [vmem:[%s5763_s17 + $0x20] sm:$0xff]  ;;  %v2001_v59 = vld [vmem:[%s5763_s17 + $0x28] sm:$0xff] }
 0x1f9   :  { %3168 = vmatpush3.bf16.msra.mxu1 %v3167_v37  ;;  %v1705_v37 = vld [vmem:[%s5758_s15 + $0x58] sm:$0xff]  ;;  %v3222_v3 = vpack.c.bf16 %v1721_v1, %v1719_v0  ;;  %v2002_v0 = vld [vmem:[%s5763_s17 + $0x30] sm:$0xff] }
 0x1fa   :  { %3169 = vmatprep.subr.bf16.mxu1 %v3345_v42  ;;  %v3206_v39 = vpack.c.bf16 %v1705_v37, %v1703_v36  ;;  %v1900_v36 = vld [vmem:[%s5758_s15 + $0x1e0] sm:$0xff]  ;;  %v1902_v37 = vld [vmem:[%s5758_s15 + $0x1f0] sm:$0xff]  ;;  %v2003_v1 = vld [vmem:[%s5763_s17 + $0x38] sm:$0xff] }
 0x1fb   :  { %3197 = vmatpush1.bf16.msra.mxu0 %v3196_v4  ;;  %v1718_v4 = vld [vmem:[%s5758_s15 + $0xc0] sm:$0xff] }
 0x1fc   :  { %3199 = vmatprep.subr.bf16.mxu0 %v3198_v7  ;;  %v1725_v7 = vld [vmem:[%s5758_s15 + $0xf8] sm:$0xff] }
 0x1fd   :  { %3171 = vmatpush3.bf16.msra.mxu1 %v3170_v40  ;;  %v1702_v40 = vld [vmem:[%s5758_s15 + $0x40] sm:$0xff] }
 0x1fe   :  { %3172 = vmatprep.subr.bf16.mxu1 %v3345_v42  ;;  %v3208_v47 = vpack.c.bf16 %v1704_v41, %v1702_v40  ;;  %v2013_v40 = vld [vmem:[%s5763_s17 + $0x88] sm:$0xff]  ;;  %v1996_v41 = vld [vmem:[%s5763_s17] sm:$0xff] }
 0x1ff   :  { %v3248_v50 = vpack.c.bf16 %v1997_v46, %v1996_v41 }
 0x201   :  { %3174 = vmatpush3.bf16.msra.mxu1 %v3173_v53  ;;  %v1713_v53 = vld [vmem:[%s5758_s15 + $0x98] sm:$0xff] }
 0x202   :  { %3175 = vmatprep.subr.bf16.mxu1 %v3345_v42  ;;  %v3214_v55 = vpack.c.bf16 %v1713_v53, %v1711_v52  ;;  %v1998_v52 = vld [vmem:[%s5763_s17 + $0x10] sm:$0xff]  ;;  %v1999_v53 = vld [vmem:[%s5763_s17 + $0x18] sm:$0xff] }
 0x203   :  { %v3252_v56 = vpack.c.bf16 %v1999_v53, %v1998_v52  ;;  %v2112_v52 = vld [vmem:[%s5766_s19 + $0x30] sm:$0xff] }
 0x205   :  { %3177 = vmatpush3.bf16.msra.mxu1 %v3176_v62  ;;  %v1714_v62 = vld [vmem:[%s5758_s15 + $0xa0] sm:$0xff] }
 0x206   :  { %v3220_v2 = vpack.c.bf16 %v1716_v63, %v1714_v62  ;;  %v3256_v62 = vpack.c.bf16 %v2001_v59, %v2000_v58  ;;  %v2117_v58 = vld [vmem:[%s5766_s19 + $0x58] sm:$0xff] }
 0x2b9   :  { %v2349_v8 = vpop.f32.mrb[2].mxu0 }
 0x2ba   :  { %v2384_v9 = vpop.f32.mrb[2].mxu1  ;;  %v2350_v11 = vpop.f32.mrb[3].mxu0 }
 0x2bb   :  { %v2351_v12 = vadd.f32 %v2350_v11, %v2349_v8  ;;  %v2385_v13 = vpop.f32.mrb[3].mxu1  ;;  %v3224_v8 = vpack.c.bf16 %v1720_v5, %v1718_v4  ;;  %v1724_v11 = vld [vmem:[%s5758_s15 + $0xf0] sm:$0xff]  ;;  %v3260_v4 = vpack.c.bf16 %v2003_v1, %v2002_v0  ;;  %v2121_v0 = vld [vmem:[%s5766_s19 + $0x78] sm:$0xff] }
 0x2bc   :  { %v2386_v15 = vadd.f32 %v2385_v13, %v2384_v9  ;;  %v3226_v9 = vpack.c.bf16 %v1725_v7, %v1723_v6  ;;  %v1891_v13 = vld [vmem:[%s5758_s15 + $0x198] sm:$0xff]  ;;  %v2004_v6 = vld [vmem:[%s5763_s17 + $0x40] sm:$0xff]  ;;  %v2005_v7 = vld [vmem:[%s5763_s17 + $0x48] sm:$0xff] }
 0x2bd   :  { %v1328_v16 = vadd.f32 %v2351_v12, %v2300_v10  ;;  %v1486_v17 = vpop.f32.mrb[4].mxu0  ;;  %v1722_v10 = vld [vmem:[%s5758_s15 + $0xe0] sm:$0xff]  ;;  %v1889_v12 = vld [vmem:[%s5758_s15 + $0x188] sm:$0xff] }
 0x2be   :  { %v1487_v18 = vadd.f32 %v2301_v14, %v1486_v17  ;;  %v2477_v19 = vpop.f32.mrb[5].mxu0  ;;  %v3228_v14 = vpack.c.bf16 %v1724_v11, %v1722_v10  ;;  %v1890_v17 = vld [vmem:[%s5758_s15 + $0x190] sm:$0xff]  ;;  %v3264_v10 = vpack.c.bf16 %v2005_v7, %v2004_v6  ;;  %v2203_v6 = vld [vmem:[%s5767_s21 + $0x18] sm:$0xff] }
 0x2bf   :  { %v5393_v20 = vadd.f32 %v2386_v15, %v1328_v16  ;;  %v3230_v15 = vpack.c.bf16 %v1891_v13, %v1889_v12  ;;  %v1888_v16 = vld [vmem:[%s5758_s15 + $0x180] sm:$0xff]  ;;  %v1895_v19 = vld [vmem:[%s5758_s15 + $0x1b8] sm:$0xff]  ;;  %v2006_v12 = vld [vmem:[%s5763_s17 + $0x50] sm:$0xff] }
 0x2c0   :  { %v1490_v23 = vmax.f32 %v1487_v18, 0.0  ;;  %v1893_v18 = vld [vmem:[%s5758_s15 + $0x1a8] sm:$0xff]  ;;  %v2007_v13 = vld [vmem:[%s5763_s17 + $0x58] sm:$0xff] }
 0x2c1   :  { %v1689_v26 = vpop.f32.mrb[6].mxu0  ;;  %v3234_v24 = vpack.c.bf16 %v1895_v19, %v1893_v18  ;;  %v2304_v18 = vld [vmem:[%s5764_s10] ss:$0 sm:$0xff] }
 0x2c2   :  { %v1690_v29 = vadd.f32 %v2307_v21, %v1689_v26  ;;  %2511 = vmatmul.mubr.f32.vlgmr.msra.gmra.mrb[4].mxu1 %v1490_v23  ;;  %v2519_v30 = vpop.f32.mrb[7].mxu0  ;;  %v3232_v21 = vpack.c.bf16 %v1890_v17, %v1888_v16  ;;  %v1401_v23 = vmax.f32 %v5393_v20, 0.0  ;;  %v1894_v26 = vld [vmem:[%s5758_s15 + $0x1b0] sm:$0xff]  ;;  %v3268_v16 = vpack.c.bf16 %v2007_v13, %v2006_v12  ;;  %v2312_v12 = vld [vmem:[%s5768_s18] ss:$0 sm:$0xff] }
 0x2c3   :  { %v3236_v20 = vpack.c.bf16 %v1894_v26, %v1892_v25  ;;  %v1896_v30 = vld [vmem:[%s5758_s15 + $0x1c0] sm:$0xff]  ;;  %v2009_v26 = vld [vmem:[%s5763_s17 + $0x68] sm:$0xff] }
 0x2c4   :  { %v1693_v32 = vmax.f32 %v1690_v29, 0.0  ;;  %v3238_v29 = vpack.c.bf16 %v1899_v28, %v1897_v27  ;;  %v2008_v25 = vld [vmem:[%s5763_s17 + $0x60] sm:$0xff]  ;;  %v2026_v28 = vld [vmem:[%s5763_s17 + $0xf0] sm:$0xff] }
 0x2c5   :  { %v3272_v27 = vpack.c.bf16 %v2009_v26, %v2008_v25 }
 0x2c6   :  { %2310 = vmatmul.mubr.msk.f32.vlgmr.msra.gmra.mrb[8].mxu0 %vm1742_vm5, %v1693_v32 }
 0x2c7   :  { %3201 = vmatpush1.bf16.msra.mxu0 %v3200_v31  ;;  %1881 = vmatprep.mubr.f32.mxu0 %v3348_v22  ;;  %v1898_v31 = vld [vmem:[%s5758_s15 + $0x1d0] sm:$0xff] }
 0x2c8   :  { %3203 = vmatprep.subr.bf16.mxu0 %v3202_v33  ;;  %v3240_v32 = vpack.c.bf16 %v1898_v31, %v1896_v30  ;;  %v1901_v33 = vld [vmem:[%s5758_s15 + $0x1e8] sm:$0xff]  ;;  %v2010_v30 = vld [vmem:[%s5763_s17 + $0x70] sm:$0xff]  ;;  %v2011_v31 = vld [vmem:[%s5763_s17 + $0x78] sm:$0xff] }
 0x2c9   :  { %v3242_v35 = vpack.c.bf16 %v1903_v34, %v1901_v33  ;;  %v1980_v33 = vld [vmem:[%s5765_s16] sm:$0x3] }
 0x2ca   :  { %v1985_v34 = vrot.slane %v1980_v33, %v600_v45  ;;  %v2109_v45 = vld [vmem:[%s5766_s19 + $0x18] sm:$0xff] }
 0x2cb   :  { %3205 = vmatpush1.bf16.msra.mxu0 %v3204_v38  ;;  %v3244_v38 = vpack.c.bf16 %v1902_v37, %v1900_v36 }
 0x2cc   :  { %3207 = vmatprep.subr.bf16.mxu0 %v3206_v39  ;;  %v2012_v39 = vld [vmem:[%s5763_s17 + $0x80] sm:$0xff] }
 0x2cd   :  { %v3246_v43 = vpack.c.bf16 %v2013_v40, %v2012_v39  ;;  %v2106_v39 = vld [vmem:[%s5766_s19] sm:$0xff]  ;;  %v2107_v40 = vld [vmem:[%s5766_s19 + $0x8] sm:$0xff] }
 0x2ce   :  { %v3279_v46 = vpack.c.bf16 %v2107_v40, %v2106_v39 }
 0x2cf   :  { %3209 = vmatpush1.bf16.msra.mxu0 %v3208_v47  ;;  %v2014_v47 = vld [vmem:[%s5763_s17 + $0x90] sm:$0xff]  ;;  %3247 = vmatprep.subr.bf16.mxu1 %v3246_v43 }
 0x2d0   :  { %3211 = vmatprep.subr.bf16.mxu0 %v3210_v49  ;;  %v2015_v49 = vld [vmem:[%s5763_s17 + $0x98] sm:$0xff]  ;;  %3249 = vmatpush3.bf16.msra.mxu1 %v3248_v50  ;;  %v2111_v50 = vld [vmem:[%s5766_s19 + $0x28] sm:$0xff] }
 0x2d1   :  { %v3250_v51 = vpack.c.bf16 %v2015_v49, %v2014_v47  ;;  %v2110_v49 = vld [vmem:[%s5766_s19 + $0x20] sm:$0xff] }
 0x2d3   :  { %3213 = vmatpush1.bf16.msra.mxu0 %v3212_v54  ;;  %v2016_v54 = vld [vmem:[%s5763_s17 + $0xa0] sm:$0xff]  ;;  %3251 = vmatprep.subr.bf16.mxu1 %v3250_v51  ;;  %v3285_v51 = vpack.c.bf16 %v2111_v50, %v2110_v49 }
 0x2d4   :  { %3215 = vmatprep.subr.bf16.mxu0 %v3214_v55  ;;  %v2017_v55 = vld [vmem:[%s5763_s17 + $0xa8] sm:$0xff]  ;;  %3253 = vmatpush3.bf16.msra.mxu1 %v3252_v56 }
 0x2d5   :  { %v3254_v57 = vpack.c.bf16 %v2017_v55, %v2016_v54  ;;  %v2114_v54 = vld [vmem:[%s5766_s19 + $0x40] sm:$0xff]  ;;  %v2115_v55 = vld [vmem:[%s5766_s19 + $0x48] sm:$0xff] }
 0x2d6   :  { %v3291_v56 = vpack.c.bf16 %v2115_v55, %v2114_v54 }
 0x2d7   :  { %3217 = vmatpush1.bf16.msra.mxu0 %v3216_v60  ;;  %v2018_v60 = vld [vmem:[%s5763_s17 + $0xb0] sm:$0xff]  ;;  %3255 = vmatprep.subr.bf16.mxu1 %v3254_v57 }
 0x2d8   :  { %3219 = vmatprep.subr.bf16.mxu0 %v3218_v61  ;;  %v2019_v61 = vld [vmem:[%s5763_s17 + $0xb8] sm:$0xff]  ;;  %3257 = vmatpush3.bf16.msra.mxu1 %v3256_v62  ;;  %v2116_v57 = vld [vmem:[%s5766_s19 + $0x50] sm:$0xff] }
 0x2d9   :  { %v3258_v63 = vpack.c.bf16 %v2019_v61, %v2018_v60  ;;  %v3294_v59 = vpack.c.bf16 %v2117_v58, %v2116_v57  ;;  %v2118_v60 = vld [vmem:[%s5766_s19 + $0x60] sm:$0xff]  ;;  %v2119_v61 = vld [vmem:[%s5766_s19 + $0x68] sm:$0xff] }
 0x2da   :  { %v3297_v62 = vpack.c.bf16 %v2119_v61, %v2118_v60 }
 0x2db   :  { %3221 = vmatpush1.bf16.msra.mxu0 %v3220_v2  ;;  %v2020_v2 = vld [vmem:[%s5763_s17 + $0xc0] sm:$0xff]  ;;  %3259 = vmatprep.subr.bf16.mxu1 %v3258_v63  ;;  %v2120_v63 = vld [vmem:[%s5766_s19 + $0x70] sm:$0xff] }
 0x2dc   :  { %3223 = vmatprep.subr.bf16.mxu0 %v3222_v3  ;;  %v2021_v3 = vld [vmem:[%s5763_s17 + $0xc8] sm:$0xff]  ;;  %3261 = vmatpush3.bf16.msra.mxu1 %v3260_v4  ;;  %v3300_v1 = vpack.c.bf16 %v2121_v0, %v2120_v63  ;;  %v2202_v4 = vld [vmem:[%s5767_s21 + $0x10] sm:$0xff] }
 0x2dd   :  { %v3262_v5 = vpack.c.bf16 %v2021_v3, %v2020_v2  ;;  %v2200_v2 = vld [vmem:[%s5767_s21] sm:$0xff]  ;;  %v2201_v3 = vld [vmem:[%s5767_s21 + $0x8] sm:$0xff]  ;;  %v3306_v7 = vpack.c.bf16 %v2203_v6, %v2202_v4 }
 0x2df   :  { %3225 = vmatpush1.bf16.msra.mxu0 %v3224_v8  ;;  %v2022_v8 = vld [vmem:[%s5763_s17 + $0xd0] sm:$0xff]  ;;  %3263 = vmatprep.subr.bf16.mxu1 %v3262_v5  ;;  %v3303_v5 = vpack.c.bf16 %v2201_v3, %v2200_v2 }
 0x2e0   :  { %3227 = vmatprep.subr.bf16.mxu0 %v3226_v9  ;;  %v2023_v9 = vld [vmem:[%s5763_s17 + $0xd8] sm:$0xff]  ;;  %3265 = vmatpush3.bf16.msra.mxu1 %v3264_v10 }
 0x2e1   :  { %v3266_v11 = vpack.c.bf16 %v2023_v9, %v2022_v8  ;;  %v2204_v8 = vld [vmem:[%s5767_s21 + $0x20] sm:$0xff]  ;;  %v2205_v9 = vld [vmem:[%s5767_s21 + $0x28] sm:$0xff] }
 0x2e2   :  { %v3309_v10 = vpack.c.bf16 %v2205_v9, %v2204_v8 }
 0x2e3   :  { %3229 = vmatpush1.bf16.msra.mxu0 %v3228_v14  ;;  %v2024_v14 = vld [vmem:[%s5763_s17 + $0xe0] sm:$0xff]  ;;  %3267 = vmatprep.subr.bf16.mxu1 %v3266_v11 }
 0x2e4   :  { %3231 = vmatprep.subr.bf16.mxu0 %v3230_v15  ;;  %v2025_v15 = vld [vmem:[%s5763_s17 + $0xe8] sm:$0xff]  ;;  %3269 = vmatpush3.bf16.msra.mxu1 %v3268_v16 }
 0x2e5   :  { %v3270_v17 = vpack.c.bf16 %v2025_v15, %v2024_v14 }
 0x2e6   :  { %1882 = vmatmul.mubr.f32.vlgmr.msra.gmra.mrb[8].mxu0 %v1401_v23 }
 0x2e7   :  { %3233 = vmatpush1.bf16.msra.mxu0 %v3232_v21  ;;  %1971 = vmatprep.mubr.f32.mxu0 %v3348_v22 }
 0x2e8   :  { %3235 = vmatprep.subr.bf16.mxu0 %v3234_v24  ;;  %3271 = vmatprep.subr.bf16.mxu1 %v3270_v17  ;;  %v2206_v17 = vld [vmem:[%s5767_s21 + $0x30] sm:$0xff] }
 0x2e9   :  { %3273 = vmatpush3.bf16.msra.mxu1 %v3272_v27 }
 0x2eb   :  { %3237 = vmatpush1.bf16.msra.mxu0 %v3236_v20  ;;  %v2027_v20 = vld [vmem:[%s5763_s17 + $0xf8] sm:$0xff] }
 0x2ec   :  { %3239 = vmatprep.subr.bf16.mxu0 %v3238_v29  ;;  %v3274_v29 = vpack.c.bf16 %v2027_v20, %v2026_v28 }
 0x2ee   :  { %3275 = vmatprep.subr.bf16.mxu1 %v3274_v29 }
 0x2ef   :  { %3241 = vmatpush1.bf16.msra.mxu0 %v3240_v32  ;;  %v3276_v32 = vpack.c.bf16 %v2011_v31, %v2010_v30 }
 0x2f0   :  { %3243 = vmatprep.subr.bf16.mxu0 %v3242_v35  ;;  %v1989_v35 = vrot.slane %v1980_v33, %v604_v48  ;;  %v3282_v48 = vpack.c.bf16 %v2109_v45, %v2108_v44 }
 0x2f1   :  { %3277 = vmatpush3.bf16.msra.mxu1 %v3276_v32 }
 0x2f2   :  { %3278 = vmatprep.subr.bf16.mxu1 %v3345_v42 }
 0x2f3   :  { %3245 = vmatpush1.bf16.msra.mxu0 %v3244_v38 }
 0x2f4   :  { %3302 = vmatprep.subr.bf16.mxu0 %v3345_v42 }
 0x395   :  { %v1580_v19 = vpop.f32.mrb[4].mxu1 }
 0x396   :  { %v1581_v21 = vadd.f32 %v2304_v18, %v1580_v19  ;;  %v2512_v23 = vpop.f32.mrb[5].mxu1  ;;  %v2207_v18 = vld [vmem:[%s5767_s21 + $0x38] sm:$0xff] }
 0x397   :  { %v3312_v19 = vpack.c.bf16 %v2207_v18, %v2206_v17 }
 0x398   :  { %v1584_v24 = vmax.f32 %v1581_v21, 0.0  ;;  %v2313_v21 = vld [vmem:[%s5770_s20] ss:$0 sm:$0xff] }
 0x39a   :  { %2311 = vmatmul.mubr.msk.f32.vlgmr.msra.gmra.mrb[8].mxu0 %vm1742_vm5, %v1584_v24 }
 0x39b   :  { %2571 = vmatprep.mubr.msk.f32.mxu0 %vm3347_vm4, %v3348_v22  ;;  %3304 = vmatpush3.bf16.msra.mxu0 %v3303_v5 }
 0x39c   :  { %3305 = vmatprep.subr.bf16.mxu0 %v3345_v42 }
 0x39f   :  { %3307 = vmatpush3.bf16.msra.mxu0 %v3306_v7 }
 0x3a0   :  { %3308 = vmatprep.subr.bf16.mxu0 %v3345_v42 }
 0x3a3   :  { %3310 = vmatpush3.bf16.msra.mxu0 %v3309_v10 }
 0x3a4   :  { %3311 = vmatprep.subr.bf16.mxu0 %v3345_v42 }
 0x3a7   :  { %3313 = vmatpush3.bf16.msra.mxu0 %v3312_v19 }
 0x46d   :  { %v1973_v36 = vpop.f32.mrb[8].mxu0 }
 0x46e   :  { %v1992_v37 = vadd.f32 %v1985_v34, %v1973_v36  ;;  %v1975_v38 = vpop.f32.mrb[9].mxu0 }
 0x46f   :  { %v1993_v41 = vadd.f32 %v1989_v35, %v1975_v38 }
 0x470   :  { %v1994_v47 = vmax.f32 %v1992_v37, 0.0 }
 0x471   :  { %v1995_v43 = vmax.f32 %v1993_v41, 0.0 }
 0x473   :  { %2099 = vmatprep.mubr.f32.mxu1 %v1995_v43 }
 0x474   :  { %2100 = vmatmul.mubr.f32.vlgmr.msra.gmra.mrb[6].mxu1 %v1994_v47 }
 0x475   :  { %3280 = vmatpush3.bf16.msra.mxu1 %v3279_v46  ;;  %2552 = vmatprep.mubr.msk.f32.mxu1 %vm3347_vm4, %v3348_v22  ;;  %v2113_v22 = vld [vmem:[%s5766_s19 + $0x38] sm:$0xff] }
 0x476   :  { %3281 = vmatprep.subr.bf16.mxu1 %v3345_v42  ;;  %v3288_v53 = vpack.c.bf16 %v2113_v22, %v2112_v52 }
 0x479   :  { %3283 = vmatpush3.bf16.msra.mxu1 %v3282_v48 }
 0x47a   :  { %3284 = vmatprep.subr.bf16.mxu1 %v3345_v42 }
 0x47d   :  { %3286 = vmatpush3.bf16.msra.mxu1 %v3285_v51 }
 0x47e   :  { %3287 = vmatprep.subr.bf16.mxu1 %v3345_v42 }
 0x481   :  { %3289 = vmatpush3.bf16.msra.mxu1 %v3288_v53 }
 0x482   :  { %3290 = vmatprep.subr.bf16.mxu1 %v3345_v42 }
 0x485   :  { %3292 = vmatpush3.bf16.msra.mxu1 %v3291_v56 }
 0x486   :  { %3293 = vmatprep.subr.bf16.mxu1 %v3345_v42 }
 0x489   :  { %3295 = vmatpush3.bf16.msra.mxu1 %v3294_v59 }
 0x48a   :  { %3296 = vmatprep.subr.bf16.mxu1 %v3345_v42 }
 0x48d   :  { %3298 = vmatpush3.bf16.msra.mxu1 %v3297_v62 }
 0x48e   :  { %3299 = vmatprep.subr.bf16.mxu1 %v3345_v42  ;;  %v28_v42 = vstv %s5769_s22 }
 0x48f   :  { %29 = vst [vmem:[#allocation2] sm:$0x1] %v28_v42 }
 0x491   :  { %3301 = vmatpush3.bf16.msra.mxu1 %v3300_v1 }
 0x496   :  { %v2314_v27 = vld [vmem:[#allocation2] ss:$0 sm:$0xff] }
 0x547   :  { %v2442_v11 = vpop.f32.mrb[6].mxu1 }
 0x548   :  { %v2443_v13 = vpop.f32.mrb[7].mxu1 }
 0x549   :  { %v2444_v14 = vadd.f32 %v2443_v13, %v2442_v11 }
 0x54b   :  { %v2102_v15 = vadd.f32 %v2444_v14, %v2312_v12 }
 0x54d   :  { %v2105_v16 = vmax.f32 %v2102_v15, 0.0 }
 0x54f   :  { %2553 = vmatmul.mubr.f32.vlgmr.msra.gmra.mrb[8].mxu1 %v2105_v16 }
 0x622   :  { %v2195_v23 = vpop.f32.mrb[8].mxu1 }
 0x623   :  { %v2196_v24 = vadd.f32 %v2313_v21, %v2195_v23  ;;  %v2554_v25 = vpop.f32.mrb[9].mxu1 }
 0x625   :  { %v2199_v26 = vmax.f32 %v2196_v24, 0.0 }
 0x627   :  { %2572 = vmatmul.mubr.msk.f32.vlgmr.msra.gmra.mrb[10].mxu0 %vm1742_vm5, %v2199_v26 }
 0x6fa   :  { %v2284_v28 = vpop.f32.mrb[10].mxu0 }
 0x6fb   :  { %v2285_v20 = vadd.f32 %v2314_v27, %v2284_v28  ;;  %v2573_v29 = vpop.f32.mrb[11].mxu0 }
 0x6fd   :  { %v2316_v30 = vmul.f32 -1.442695, %v2285_v20 }
 0x6ff   :  { %3340 = vpow2.f32 %v2316_v30 }
 0x709   :  { %v3341_v31 = vpop.eup %3340 }
 0x70a   :  { %v2291_v32 = vadd.f32 1.0, %v3341_v31 }
 0x70c   :  { %3342 = vrcp.f32 %v2291_v32 }
 0x716   :  { %v3343_v33 = vpop.eup %3342 }
 0x717   :  { %2295 = vst.msk [vmem:[%s5771_s23] sm:$0xff] %vm2294_vm6, %v3343_v33 }

// kernel: inference_attack_forward.2
= control target key start
LH: loop header
LB: loop body
LE: loop exit
PB: predicated region body
PF: predicated region fallthrough
CT: control target
= control target key end

     0   :  { %s19085_s0 = inlined_call_operand.vmem [shape: bf16[8,25600], index: 0, kind: input, shape index: {}]   ;;  %s19086_s1 = inlined_call_operand.hbm [shape: bf16[25600,1024], index: 1, kind: input, shape index: {}]   ;;  %s19087_s2 = inlined_call_operand.hbm [shape: f32[1,1024], index: 2, kind: input, shape index: {}]   ;;  %s19088_s3 = inlined_call_operand.vmem [shape: f32[8,1024], index: 3, kind: output, shape index: {}]  }
   0x1   :  { %19099 = sst [smem:[#allocation15_spill]] %s19086_s1 }
   0x2   :  { %8 = vsyncpa [#allocation4], 0 }
   0x3   :  { %10 = vsyncpa [#allocation4 + $0x1], 0 }
   0x4   :  { %11 = vsyncpa [#allocation6], 0 }
   0x5   :  { %13 = vsyncpa [#allocation6 + $0x1], 0  ;;  %s16710_s12 = smov 0   ;;  %s16712_s13 = smov 0  }
   0x6   :  { %s16714_s14 = smov 0   ;;  %s16716_s15 = smov 0  }
   0x7   :  { %s16718_s16 = smov 0   ;;  %s16720_s17 = smov 0  }
   0x8   :  { %s16722_s18 = smov 0   ;;  %s16724_s19 = smov 0  }
   0x9   :  { %s16726_s20 = smov 0   ;;  %s16728_s21 = smov 0  }
   0xa   :  { %s16730_s22 = smov 0  }
   0xb LB: > { %s28_s23 = sadd.s32 1, %s16674_s20  ;;  %p73_p1 = scmp.ne.s32.totalorder %s16662_s17, %s16658_s16  ;;  %s16682_s22 = sphi %s16730_s22, %s19_s22   ;;  %s16678_s21 = sphi %s16728_s21, %s19137_s21   ;;  %s16674_s20 = sphi %s16726_s20, %s19136_s20   ;;  %s16670_s19 = sphi %s16724_s19, %s19135_s19   ;;  %s16666_s18 = sphi %s16722_s18, %s19134_s18   ;;  %s16662_s17 = sphi %s16720_s17, %s19133_s17   ;;  %s16658_s16 = sphi %s16718_s16, %s19132_s16   ;;  %s16654_s15 = sphi %s16716_s15, %s19131_s15   ;;  %s16650_s14 = sphi %s16714_s14, %s19130_s14   ;;  %s16646_s13 = sphi %s16712_s13, %s19129_s13   ;;  %s16642_s12 = sphi %s16710_s12, %s19128_s12  }
   0xc   : > { %p16767_p0 = scmp.ge.s32.totalorder %s28_s23, 4  ;;  %p19090_p2 = scmp.eq.s32.totalorder %s16682_s22, 0 }
   0xd   : > { %p19089_p4 = scmp.lt.s32.totalorder %s16682_s22, 8  ;;  %s164_s27 = sand.u32 1, %s16662_s17  }
   0xe   : > { %s19139_s23 = smov (%p16767_p0, %s28_s23), 0  ;;  %p75_p3 = por %p19090_p2, %p73_p1 }
   0xf   : > { %s13972_s28 = smul.u32 12800, %s164_s27  ;;  %s12305_s29 = sshll.u32 %s16678_s21, 2 }
  0x10   : > { %s13970_s30 = smul.u32 6400, %s16674_s20  ;;  %p16788_p5 = pnand %p19089_p4, %p75_p3 }
  0x11   : > { %s168_s6 = scalar_lea.vmem [#allocation3], %s13972_s28  ;;  %s19102_s1 = sld [smem:[#allocation15_spill]] }
  0x12   : > { %s175_s5 = sadd.s32 %s13970_s30, %s12305_s29  ;;  %s178_s7 = sshll.u32 %s168_s6, 4  ;;  %s16792_s7 = int_to_ptr.vmem [resolvable:$true] %s178_s7 }
  0x13   : > { %s12307_s8 = sshll.u32 %s175_s5, 6  ;;  %s16800_s24 = scalar_lea.sflag [#allocation4], %s164_s27 }
  0x14   : > { %p16530_p8 = pneg %p16788_p5 }
  0x17   : > { %s16797_s11 = scalar_lea.hbm %s19102_s1, %s12307_s8  ;;  %s16533_s30 = scalar_lea.hbm %s19102_s1, 1638400 }
  0x18   : > { %s16528_s26 = scalar_lea.hbm %s16797_s11, 204800  ;;  %p16534_p11 = scmp.lt.u32.totalorder %s16797_s11, %s19102_s1 }
  0x19   : > { %p16529_p7 = scmp.ne.s32.totalorder %s16797_s11, %s16528_s26  ;;  %p16535_p12 = scmp.lt.u32.totalorder %s16533_s30, %s16528_s26 }
  0x1a   : > { %p16537_p1 = scmp.lt.u32.totalorder %s16528_s26, %s16797_s11 }
  0x1b   : > { %p16531_p9 = pnand %p16530_p8, %p16529_p7  ;;  %p16536_p13 = por %p16535_p12, %p16534_p11 }
  0x1d   : > { %p16532_p10 = pneg %p16531_p9  ;;  %p16538_p3 = por %p16537_p1, %p16536_p13 }
  0x1f   : > { %p16539_p4 = pnand %p16538_p3, %p16532_p10 }
  0x21   : > { %16542 = shalt.err (!%p16539_p4)
}
  0x22   : > { %s16543_s27 = scalar_lea.vmem %s16792_s7, 204800  ;;  %s16684_s8 = smov [#allocation3]  }
  0x23   : > { %p16544_p7 = scmp.ne.s32.totalorder %s16792_s7, %s16543_s27  ;;  %s16548_s9 = sshll.u32 %s16684_s8, 4  ;;  %s16549_s9 = int_to_ptr.vmem [resolvable:$false] %s16548_s9 }
  0x24   : > { %s16550_s10 = scalar_lea.vmem %s16549_s9, 409600  ;;  %p16551_p6 = scmp.lt.s32.totalorder %s16792_s7, %s16549_s9 }
  0x25   : > { %p16546_p9 = pnand %p16544_p7, %p16530_p8  ;;  %p16552_p11 = scmp.lt.s32.totalorder %s16550_s10, %s16543_s27 }
  0x27   : > { %p16547_p2 = pneg %p16546_p9  ;;  %p16553_p12 = por %p16552_p11, %p16551_p6 }
  0x29   : > { %p16554_p13 = pnand %p16553_p12, %p16547_p2 }
  0x2b   : > { %16557 = shalt.err (!%p16554_p13)
}
  0x2c   : > { %s16685_s26 = smov 512   ;;  %s16686_s28 = smov 256  }
  0x2d   : > { %s16687_s29 = smov 16   ;;  %p205_p2 = scmp.lt.s32.totalorder %s16682_s22, 9 }
  0x2e   : > { %13981 = dma.hbm_to_vmem [thread:$0]  (!%p16788_p5), %s16797_s11, 204800, %s16792_s7, %s16800_s24, %s16685_s26, %s16686_s28, %s16687_s29  }
  0x2f   : > { %p19103_p4 = scmp.ge.s32.totalorder %s16682_s22, 1  ;;  %s12301_s5 = sadd.s32 4294967295, %s16682_s22  }
  0x30   : > { %s31_s6 = sadd.s32 1, %s16678_s21  ;;  %p79_p8 = scmp.ne.s32.totalorder %s16658_s16, %s16654_s15 }
  0x31   : > { %p16831_p6 = pnand %p19103_p4, %p205_p2  ;;  %s19141_s6 = smov (!%p16767_p0, %s31_s6), %s16678_s21 }
  0x32   : > { %p16842_p10 = scmp.eq.s32.totalorder %s12301_s5, 0  ;;  %p33_p5 = scmp.ge.s32.totalorder %s19141_s6, 2 }
  0x33   : > { %s92_s24 = sadd.s32 1, %s16650_s14  ;;  %p99_p3 = scmp.ne.s32.totalorder %s16650_s14, %s16646_s13 }
  0x34   : > { %p16849_p1 = por %p16842_p10, %p79_p8  ;;  %s19143_s6 = smov (%p33_p5, %s19141_s6), 0 }
  0x35   : > { %19107 = sst [smem:[#allocation9_spill]] %s19143_s6  ;;  %p19108_p0 = scmp.eq.s32.totalorder %s16682_s22, 0 }
  0x36   : > { %s19106_s7 = scalar_select %p16849_p1, 1, 0 }
  0x37   : > { %p16859_p7 = por %p99_p3, %p19108_p0  ;;  %p105_p9 = scmp.ne.s32.totalorder %s16646_s13, %s16642_s12 }
  0x38   : > { %s62_s25 = ssub.s32 %s16678_s21, %s19143_s6  ;;  %s188_s11 = sand.u32 1, %s16650_s14  }
  0x39   : > { %s19110_s27 = ssub.s32 %s16674_s20, %s19139_s23  ;;  %p90_p11 = scmp.eq.s32.totalorder %s62_s25, 0 }
  0x3a   : > { %s63_s8 = sor.u32 %s62_s25, %s19110_s27  ;;  %p16873_p13 = por %p105_p9, %p16842_p10 }
  0x3b   : > { %p64_p12 = scmp.eq.s32.totalorder %s63_s8, 0  ;;  %s19112_s26 = sadd.s32 1, %s16662_s17 }
  0x3c   : > { %s19111_s9 = scalar_select %p16873_p13, 1, 0 }
  0x3d   : > { %s16878_s10 = scalar_select %p90_p11, %s16650_s14, %s92_s24  }
  0x3e   : > { %s16883_s28 = scalar_select %p64_p12, %s16662_s17, %s19112_s26  }
  0x3f   : > { %s12308_s29 = sshll.u32 %s188_s11, 2  ;;  %s13971_s5 = sshll.u32 %s16678_s21, 6 }
  0x40   : > { %s16889_s6 = scalar_lea.hbm %s19087_s2, %s13971_s5  ;;  %s192_s4 = scalar_lea.vmem [#allocation5], %s12308_s29 }
  0x41   : > { %s200_s25 = sshll.u32 %s192_s4, 4  ;;  %p19113_p2 = scmp.lt.s32.totalorder %s16682_s22, 8  ;;  %s16891_s25 = int_to_ptr.vmem [resolvable:$true] %s200_s25 }
  0x42   : > { %s189_s27 = scalar_lea.sflag [#allocation6], %s188_s11  ;;  %s16558_s1 = scalar_lea.hbm %s16889_s6, 64 }
  0x43   : > { %p16897_p4 = pnand %p19113_p2, %p16859_p7  ;;  %p16559_p8 = scmp.ne.s32.totalorder %s16889_s6, %s16558_s1 }
  0x44   : > { %s16563_s15 = scalar_lea.hbm %s19087_s2, 128  ;;  %p16564_p0 = scmp.lt.u32.totalorder %s16889_s6, %s19087_s2 }
  0x45   : > { %p16560_p10 = pneg %p16897_p4  ;;  %p16565_p7 = scmp.lt.u32.totalorder %s16563_s15, %s16558_s1 }
  0x46   : > { %p16567_p11 = scmp.lt.u32.totalorder %s16558_s1, %s16889_s6 }
  0x47   : > { %p16561_p5 = pnand %p16560_p10, %p16559_p8  ;;  %p16566_p9 = por %p16565_p7, %p16564_p0 }
  0x49   : > { %p16562_p3 = pneg %p16561_p5  ;;  %p16568_p12 = por %p16567_p11, %p16566_p9 }
  0x4b   : > { %p16569_p2 = pnand %p16568_p12, %p16562_p3 }
  0x4d   : > { %16572 = shalt.err (!%p16569_p2)
}
  0x4e   : > { %s16573_s11 = scalar_lea.vmem %s16891_s25, 64  ;;  %s16688_s12 = smov [#allocation5]  }
  0x4f   : > { %p16574_p8 = scmp.ne.s32.totalorder %s16891_s25, %s16573_s11  ;;  %s16578_s4 = sshll.u32 %s16688_s12, 4  ;;  %s16579_s4 = int_to_ptr.vmem [resolvable:$false] %s16578_s4 }
  0x50   : > { %s16580_s8 = scalar_lea.vmem %s16579_s4, 128  ;;  %p16581_p1 = scmp.lt.s32.totalorder %s16891_s25, %s16579_s4 }
  0x51   : > { %p16576_p5 = pnand %p16574_p8, %p16560_p10  ;;  %p16582_p0 = scmp.lt.s32.totalorder %s16580_s8, %s16573_s11 }
  0x53   : > { %p16577_p13 = pneg %p16576_p5  ;;  %p16583_p7 = por %p16582_p0, %p16581_p1 }
  0x55   : > { %p16584_p9 = pnand %p16583_p7, %p16577_p13 }
  0x57   : > { %16587 = shalt.err (!%p16584_p9)
}
  0x58   : > { %13984 = dma.hbm_to_vmem [thread:$0]  (!%p16897_p4), %s16889_s6, 64, %s16891_s25, %s189_s27  }
  0x59   : > { %209 = sbr.rel (%p16831_p6) target bundleno = 1948 (0x79c), region = 32 }
  0x60   : > { %s211_s1 = sand.u32 1, %s16658_s16   ;;  %p19115_p10 = scmp.ne.s32.totalorder %s19106_s7, 0 }
  0x61   : > { %s13973_s26 = smul.u32 12800, %s211_s1  ;;  %s212_s15 = scalar_lea.sflag [#allocation4], %s211_s1 }
  0x63   : > { %s16929_s29 = scalar_lea.vmem [#allocation3], %s13973_s26 }
  0x64   : > { %16633 = dma.done.wait (%p19115_p10), %s212_s15, 204800  }
  0x65   : > { %16635 = vsyncadd (%p19115_p10), %s212_s15, 4294762496  ;;  %s220_s24 = sand.u32 1, %s16646_s13   ;;  %p19116_p6 = scmp.ne.s32.totalorder %s19111_s9, 0 }
  0x66   : > { %s16936_s5 = sshll.u32 %s220_s24, 2  ;;  %s221_s30 = scalar_lea.sflag [#allocation6], %s220_s24 }
  0x67   : > { %s224_s6 = scalar_lea.vmem [#allocation5], %s16936_s5 }
  0x68   : > { %16637 = dma.done.wait (%p19116_p6), %s221_s30, 64  }
  0x69   : > { %16639 = vsyncadd (%p19116_p6), %s221_s30, 4294967232  ;;  %s257_s25 = smul.u32 50, %s16666_s18  ;;  %s12314_s27 = sshll.u32 %s16670_s19, 2 }
  0x6a   : > { %p267_p1 = scmp.lt.s32.totalorder %s12314_s27, 7  ;;  %p12316_p4 = scmp.ne.s32.totalorder %s16666_s18, 0 }
  0x6b   : > { %p258_p13 = scmp.lt.s32.totalorder %s257_s25, 199  ;;  %v16689_v0 = vmov (!%p12316_p4), 0.0  }
  0x6c   : > { %s19145_s27 = smov (!%p267_p1, %s12314_s27), 7  ;;  %275 = sbr.rel (%p12316_p4) target bundleno = 115 (0x73), region = 44 }
  0x6d   : > { %s19147_s25 = smov (!%p258_p13, %s257_s25), 199  ;;  %s12315_s7 = sshll.u32 %s19145_s27, 3  ;;  %276 = vst [vmem:[#allocation2] sm:$0xff] (!%p12316_p4), %v16689_v0  ;;  %277 = vst [vmem:[#allocation2 + $0x8] sm:$0xff] (!%p12316_p4), %v16689_v0 }
  0x6e   : > { %s12313_s11 = sshll.u32 %s19147_s25, 2  ;;  %s16948_s8 = scalar_lea.vmem %s19088_s3, %s12315_s7  ;;  %278 = vst [vmem:[#allocation2 + $0x10] sm:$0xff] (!%p12316_p4), %v16689_v0  ;;  %279 = vst [vmem:[#allocation2 + $0x18] sm:$0xff] (!%p12316_p4), %v16689_v0 }
  0x6f   : > { %s16953_s9 = scalar_lea.vmem %s19085_s0, %s12313_s11 }
  0x73 PF: > { %v14078_v1 = vld [vmem:[%s16929_s29 + $0x4] ss:$16 sps:$4 sm:$0xff]   ;;  %v14082_v3 = vld [vmem:[%s16929_s29] ss:$16 sps:$4 sm:$0xff]   ;;  %v285_v49 = vld [vmem:[%s16953_s9 + $0x8] sm:$0xff]  ;;  %p13967_p3 = scmp.ne.s32.totalorder %s16666_s18, 3 }
  0x74   : > { %v14080_v2 = vld [vmem:[%s16929_s29 + $0x204] ss:$16 sps:$4 sm:$0xff]   ;;  %10084 = vmatprep.subr.bf16.mxu0 %v14078_v1  ;;  %v14083_v4 = vld [vmem:[%s16929_s29 + $0x200] ss:$16 sps:$4 sm:$0xff]   ;;  %v17008_v52 = vcombine.high %v285_v49, %v285_v49 }
  0x75   : > { %10125 = vmatprep.subr.bf16.mxu1 %v14080_v2  ;;  %v14084_v5 = vld [vmem:[%s16929_s29 + $0x24] ss:$16 sps:$4 sm:$0xff]   ;;  %10085 = vmatpush1.bf16.msra.mxu0 %v14082_v3  ;;  %v14088_v7 = vld [vmem:[%s16929_s29 + $0x20] ss:$16 sps:$4 sm:$0xff]  }
  0x76   : > { %10126 = vmatpush1.bf16.msra.mxu1 %v14083_v4  ;;  %v14086_v6 = vld [vmem:[%s16929_s29 + $0x224] ss:$16 sps:$4 sm:$0xff]   ;;  %10086 = vmatprep.subr.bf16.mxu0 %v14084_v5  ;;  %v14089_v8 = vld [vmem:[%s16929_s29 + $0x220] ss:$16 sps:$4 sm:$0xff]  }
  0x77   : > { %10127 = vmatprep.subr.bf16.mxu1 %v14086_v6  ;;  %v14090_v9 = vld [vmem:[%s16929_s29 + $0x44] ss:$16 sps:$4 sm:$0xff]   ;;  %v14094_v11 = vld [vmem:[%s16929_s29 + $0x40] ss:$16 sps:$4 sm:$0xff]   ;;  %10157 = vmatprep.mubr.bf16.mxu1 %v17008_v52 }
  0x78   : > { %v14092_v10 = vld [vmem:[%s16929_s29 + $0x244] ss:$16 sps:$4 sm:$0xff]   ;;  %v14095_v12 = vld [vmem:[%s16929_s29 + $0x240] ss:$16 sps:$4 sm:$0xff]  }
  0x79   : > { %10087 = vmatpush1.bf16.msra.mxu0 %v14088_v7  ;;  %v14096_v13 = vld [vmem:[%s16929_s29 + $0x64] ss:$16 sps:$4 sm:$0xff]   ;;  %v14100_v15 = vld [vmem:[%s16929_s29 + $0x60] ss:$16 sps:$4 sm:$0xff]  }
  0x7a   : > { %10128 = vmatpush1.bf16.msra.mxu1 %v14089_v8  ;;  %10088 = vmatprep.subr.bf16.mxu0 %v14090_v9  ;;  %v14098_v14 = vld [vmem:[%s16929_s29 + $0x264] ss:$16 sps:$4 sm:$0xff]   ;;  %v14101_v16 = vld [vmem:[%s16929_s29 + $0x260] ss:$16 sps:$4 sm:$0xff]   ;;  %v17032_v8 = vcombine.low %v285_v49, %v285_v49 }
  0x7b   : > { %10129 = vmatprep.subr.bf16.mxu1 %v14092_v10  ;;  %v14102_v17 = vld [vmem:[%s16929_s29 + $0x84] ss:$16 sps:$4 sm:$0xff]   ;;  %v14106_v19 = vld [vmem:[%s16929_s29 + $0x80] ss:$16 sps:$4 sm:$0xff]  }
  0x7c   : > { %v14104_v18 = vld [vmem:[%s16929_s29 + $0x284] ss:$16 sps:$4 sm:$0xff]   ;;  %v14107_v20 = vld [vmem:[%s16929_s29 + $0x280] ss:$16 sps:$4 sm:$0xff]  }
  0x7d   : > { %10089 = vmatpush1.bf16.msra.mxu0 %v14094_v11  ;;  %v14108_v21 = vld [vmem:[%s16929_s29 + $0xa4] ss:$16 sps:$4 sm:$0xff]   ;;  %v14112_v23 = vld [vmem:[%s16929_s29 + $0xa0] ss:$16 sps:$4 sm:$0xff]  }
  0x7e   : > { %10130 = vmatpush1.bf16.msra.mxu1 %v14095_v12  ;;  %10090 = vmatprep.subr.bf16.mxu0 %v14096_v13  ;;  %v14110_v22 = vld [vmem:[%s16929_s29 + $0x2a4] ss:$16 sps:$4 sm:$0xff]   ;;  %v14113_v24 = vld [vmem:[%s16929_s29 + $0x2a0] ss:$16 sps:$4 sm:$0xff]  }
  0x7f   : > { %10131 = vmatprep.subr.bf16.mxu1 %v14098_v14  ;;  %v14114_v25 = vld [vmem:[%s16929_s29 + $0xc4] ss:$16 sps:$4 sm:$0xff]   ;;  %v14118_v27 = vld [vmem:[%s16929_s29 + $0xc0] ss:$16 sps:$4 sm:$0xff]  }
  0x80   : > { %v14116_v26 = vld [vmem:[%s16929_s29 + $0x2c4] ss:$16 sps:$4 sm:$0xff]   ;;  %v14119_v28 = vld [vmem:[%s16929_s29 + $0x2c0] ss:$16 sps:$4 sm:$0xff]  }
  0x81   : > { %10091 = vmatpush1.bf16.msra.mxu0 %v14100_v15  ;;  %v14120_v29 = vld [vmem:[%s16929_s29 + $0xe4] ss:$16 sps:$4 sm:$0xff]   ;;  %v14124_v31 = vld [vmem:[%s16929_s29 + $0xe0] ss:$16 sps:$4 sm:$0xff]  }
  0x82   : > { %10132 = vmatpush1.bf16.msra.mxu1 %v14101_v16  ;;  %10092 = vmatprep.subr.bf16.mxu0 %v14102_v17  ;;  %v14122_v30 = vld [vmem:[%s16929_s29 + $0x2e4] ss:$16 sps:$4 sm:$0xff]   ;;  %v14125_v32 = vld [vmem:[%s16929_s29 + $0x2e0] ss:$16 sps:$4 sm:$0xff]  }
  0x83   : > { %10133 = vmatprep.subr.bf16.mxu1 %v14104_v18  ;;  %v14126_v33 = vld [vmem:[%s16929_s29 + $0x104] ss:$16 sps:$4 sm:$0xff]   ;;  %v14130_v35 = vld [vmem:[%s16929_s29 + $0x100] ss:$16 sps:$4 sm:$0xff]  }
  0x84   : > { %v14128_v34 = vld [vmem:[%s16929_s29 + $0x304] ss:$16 sps:$4 sm:$0xff]   ;;  %v14131_v36 = vld [vmem:[%s16929_s29 + $0x300] ss:$16 sps:$4 sm:$0xff]  }
  0x85   : > { %10093 = vmatpush1.bf16.msra.mxu0 %v14106_v19  ;;  %v14132_v37 = vld [vmem:[%s16929_s29 + $0x124] ss:$16 sps:$4 sm:$0xff]   ;;  %v14136_v39 = vld [vmem:[%s16929_s29 + $0x120] ss:$16 sps:$4 sm:$0xff]  }
  0x86   : > { %10134 = vmatpush1.bf16.msra.mxu1 %v14107_v20  ;;  %10094 = vmatprep.subr.bf16.mxu0 %v14108_v21  ;;  %v14134_v38 = vld [vmem:[%s16929_s29 + $0x324] ss:$16 sps:$4 sm:$0xff]   ;;  %v14137_v40 = vld [vmem:[%s16929_s29 + $0x320] ss:$16 sps:$4 sm:$0xff]  }
  0x87   : > { %10135 = vmatprep.subr.bf16.mxu1 %v14110_v22  ;;  %v14138_v41 = vld [vmem:[%s16929_s29 + $0x144] ss:$16 sps:$4 sm:$0xff]   ;;  %v14142_v43 = vld [vmem:[%s16929_s29 + $0x140] ss:$16 sps:$4 sm:$0xff]  }
  0x88   : > { %v14140_v42 = vld [vmem:[%s16929_s29 + $0x344] ss:$16 sps:$4 sm:$0xff]   ;;  %v14143_v44 = vld [vmem:[%s16929_s29 + $0x340] ss:$16 sps:$4 sm:$0xff]  }
  0x89   : > { %10095 = vmatpush1.bf16.msra.mxu0 %v14112_v23  ;;  %v14144_v45 = vld [vmem:[%s16929_s29 + $0x164] ss:$16 sps:$4 sm:$0xff]   ;;  %v14148_v50 = vld [vmem:[%s16929_s29 + $0x160] ss:$16 sps:$4 sm:$0xff]  }
  0x8a   : > { %10136 = vmatpush1.bf16.msra.mxu1 %v14113_v24  ;;  %10096 = vmatprep.subr.bf16.mxu0 %v14114_v25  ;;  %v14146_v46 = vld [vmem:[%s16929_s29 + $0x364] ss:$16 sps:$4 sm:$0xff]   ;;  %v14149_v51 = vld [vmem:[%s16929_s29 + $0x360] ss:$16 sps:$4 sm:$0xff]  }
  0x8b   : > { %10137 = vmatprep.subr.bf16.mxu1 %v14116_v26  ;;  %v284_v47 = vld [vmem:[%s16953_s9] sm:$0xff] }
  0x8c   : > { %v17003_v48 = vcombine.high %v284_v47, %v284_v47  ;;  %v14150_v53 = vld [vmem:[%s16929_s29 + $0x184] ss:$16 sps:$4 sm:$0xff]   ;;  %v14154_v55 = vld [vmem:[%s16929_s29 + $0x180] ss:$16 sps:$4 sm:$0xff]   ;;  %v17030_v7 = vcombine.low %v284_v47, %v284_v47 }
  0x8d   : > { %10097 = vmatpush1.bf16.msra.mxu0 %v14118_v27  ;;  %v14152_v54 = vld [vmem:[%s16929_s29 + $0x384] ss:$16 sps:$4 sm:$0xff]   ;;  %v14155_v56 = vld [vmem:[%s16929_s29 + $0x380] ss:$16 sps:$4 sm:$0xff]  }
  0x8e   : > { %10138 = vmatpush1.bf16.msra.mxu1 %v14119_v28  ;;  %10098 = vmatprep.subr.bf16.mxu0 %v14120_v29  ;;  %v14156_v57 = vld [vmem:[%s16929_s29 + $0x1a4] ss:$16 sps:$4 sm:$0xff]   ;;  %v14160_v59 = vld [vmem:[%s16929_s29 + $0x1a0] ss:$16 sps:$4 sm:$0xff]  }
  0x8f   : > { %10139 = vmatprep.subr.bf16.mxu1 %v14122_v30  ;;  %10116 = vmatprep.mubr.bf16.mxu0 %v17003_v48  ;;  %v14158_v58 = vld [vmem:[%s16929_s29 + $0x3a4] ss:$16 sps:$4 sm:$0xff]   ;;  %v14161_v60 = vld [vmem:[%s16929_s29 + $0x3a0] ss:$16 sps:$4 sm:$0xff]  }
  0x90   : > { %v14162_v61 = vld [vmem:[%s16929_s29 + $0x1c4] ss:$16 sps:$4 sm:$0xff]   ;;  %v14166_v63 = vld [vmem:[%s16929_s29 + $0x1c0] ss:$16 sps:$4 sm:$0xff]  }
  0x91   : > { %10099 = vmatpush1.bf16.msra.mxu0 %v14124_v31  ;;  %v14164_v62 = vld [vmem:[%s16929_s29 + $0x3c4] ss:$16 sps:$4 sm:$0xff]   ;;  %v14167_v0 = vld [vmem:[%s16929_s29 + $0x3c0] ss:$16 sps:$4 sm:$0xff]  }
  0x92   : > { %10140 = vmatpush1.bf16.msra.mxu1 %v14125_v32  ;;  %10100 = vmatprep.subr.bf16.mxu0 %v14126_v33  ;;  %v14168_v1 = vld [vmem:[%s16929_s29 + $0x1e4] ss:$16 sps:$4 sm:$0xff]   ;;  %v14172_v3 = vld [vmem:[%s16929_s29 + $0x1e0] ss:$16 sps:$4 sm:$0xff]  }
  0x93   : > { %10141 = vmatprep.subr.bf16.mxu1 %v14128_v34  ;;  %v14170_v2 = vld [vmem:[%s16929_s29 + $0x3e4] ss:$16 sps:$4 sm:$0xff]   ;;  %v14173_v4 = vld [vmem:[%s16929_s29 + $0x3e0] ss:$16 sps:$4 sm:$0xff]   ;;  %v17064_v34 = vld [vmem:[%s16953_s9 + $0x18] sm:$0xff] }
  0x94   : > { %v14180_v5 = vld [vmem:[%s16929_s29 + $0x404] ss:$16 sps:$4 sm:$0xff]   ;;  %v14178_v9 = vld [vmem:[%s16929_s29 + $0x400] ss:$16 sps:$4 sm:$0xff]  }
  0x95   : > { %10101 = vmatpush1.bf16.msra.mxu0 %v14130_v35  ;;  %v14183_v6 = vld [vmem:[%s16929_s29 + $0x604] ss:$16 sps:$4 sm:$0xff]   ;;  %v14181_v10 = vld [vmem:[%s16929_s29 + $0x600] ss:$16 sps:$4 sm:$0xff]  }
  0x96   : > { %10142 = vmatpush1.bf16.msra.mxu1 %v14131_v36  ;;  %10102 = vmatprep.subr.bf16.mxu0 %v14132_v37  ;;  %v14186_v11 = vld [vmem:[%s16929_s29 + $0x424] ss:$16 sps:$4 sm:$0xff]   ;;  %v14184_v13 = vld [vmem:[%s16929_s29 + $0x420] ss:$16 sps:$4 sm:$0xff]  }
  0x97   : > { %10143 = vmatprep.subr.bf16.mxu1 %v14134_v38  ;;  %v14189_v12 = vld [vmem:[%s16929_s29 + $0x624] ss:$16 sps:$4 sm:$0xff]   ;;  %v14187_v14 = vld [vmem:[%s16929_s29 + $0x620] ss:$16 sps:$4 sm:$0xff]   ;;  %v17074_v38 = vcombine.high %v17064_v34, %v17064_v34 }
  0x98   : > { %v14192_v15 = vld [vmem:[%s16929_s29 + $0x444] ss:$16 sps:$4 sm:$0xff]   ;;  %v14190_v17 = vld [vmem:[%s16929_s29 + $0x440] ss:$16 sps:$4 sm:$0xff]  }
  0x99   : > { %10103 = vmatpush1.bf16.msra.mxu0 %v14136_v39  ;;  %v14195_v16 = vld [vmem:[%s16929_s29 + $0x644] ss:$16 sps:$4 sm:$0xff]   ;;  %v14193_v18 = vld [vmem:[%s16929_s29 + $0x640] ss:$16 sps:$4 sm:$0xff]  }
  0x9a   : > { %10144 = vmatpush1.bf16.msra.mxu1 %v14137_v40  ;;  %10104 = vmatprep.subr.bf16.mxu0 %v14138_v41  ;;  %v14198_v19 = vld [vmem:[%s16929_s29 + $0x464] ss:$16 sps:$4 sm:$0xff]   ;;  %v14196_v21 = vld [vmem:[%s16929_s29 + $0x460] ss:$16 sps:$4 sm:$0xff]  }
  0x9b   : > { %10145 = vmatprep.subr.bf16.mxu1 %v14140_v42  ;;  %v14201_v20 = vld [vmem:[%s16929_s29 + $0x664] ss:$16 sps:$4 sm:$0xff]   ;;  %v14199_v22 = vld [vmem:[%s16929_s29 + $0x660] ss:$16 sps:$4 sm:$0xff]  }
  0x9c   : > { %v14204_v23 = vld [vmem:[%s16929_s29 + $0x484] ss:$16 sps:$4 sm:$0xff]   ;;  %v14202_v25 = vld [vmem:[%s16929_s29 + $0x480] ss:$16 sps:$4 sm:$0xff]  }
  0x9d   : > { %10105 = vmatpush1.bf16.msra.mxu0 %v14142_v43  ;;  %v14207_v24 = vld [vmem:[%s16929_s29 + $0x684] ss:$16 sps:$4 sm:$0xff]   ;;  %v14205_v26 = vld [vmem:[%s16929_s29 + $0x680] ss:$16 sps:$4 sm:$0xff]  }
  0x9e   : > { %10146 = vmatpush1.bf16.msra.mxu1 %v14143_v44  ;;  %10106 = vmatprep.subr.bf16.mxu0 %v14144_v45  ;;  %v14210_v27 = vld [vmem:[%s16929_s29 + $0x4a4] ss:$16 sps:$4 sm:$0xff]   ;;  %v14208_v29 = vld [vmem:[%s16929_s29 + $0x4a0] ss:$16 sps:$4 sm:$0xff]  }
  0x9f   : > { %10147 = vmatprep.subr.bf16.mxu1 %v14146_v46  ;;  %v14213_v28 = vld [vmem:[%s16929_s29 + $0x6a4] ss:$16 sps:$4 sm:$0xff]   ;;  %v14211_v30 = vld [vmem:[%s16929_s29 + $0x6a0] ss:$16 sps:$4 sm:$0xff]  }
  0xa0   : > { %v14216_v31 = vld [vmem:[%s16929_s29 + $0x4c4] ss:$16 sps:$4 sm:$0xff]   ;;  %v14214_v35 = vld [vmem:[%s16929_s29 + $0x4c0] ss:$16 sps:$4 sm:$0xff]  }
  0xa1   : > { %10107 = vmatpush1.bf16.msra.mxu0 %v14148_v50  ;;  %v14219_v32 = vld [vmem:[%s16929_s29 + $0x6c4] ss:$16 sps:$4 sm:$0xff]   ;;  %v14217_v36 = vld [vmem:[%s16929_s29 + $0x6c0] ss:$16 sps:$4 sm:$0xff]  }
  0xa2   : > { %10148 = vmatpush1.bf16.msra.mxu1 %v14149_v51  ;;  %10108 = vmatprep.subr.bf16.mxu0 %v14150_v53  ;;  %v17061_v33 = vld [vmem:[%s16953_s9 + $0x10] sm:$0xff] }
  0xa3   : > { %10149 = vmatprep.subr.bf16.mxu1 %v14152_v54  ;;  %v17070_v37 = vcombine.high %v17061_v33, %v17061_v33  ;;  %v14222_v39 = vld [vmem:[%s16929_s29 + $0x4e4] ss:$16 sps:$4 sm:$0xff]   ;;  %v14220_v41 = vld [vmem:[%s16929_s29 + $0x4e0] ss:$16 sps:$4 sm:$0xff]  }
  0xa4   : > { %v14225_v40 = vld [vmem:[%s16929_s29 + $0x6e4] ss:$16 sps:$4 sm:$0xff]   ;;  %v14223_v42 = vld [vmem:[%s16929_s29 + $0x6e0] ss:$16 sps:$4 sm:$0xff]  }
  0xa5   : > { %10109 = vmatpush1.bf16.msra.mxu0 %v14154_v55  ;;  %v14228_v43 = vld [vmem:[%s16929_s29 + $0x504] ss:$16 sps:$4 sm:$0xff]   ;;  %v14226_v45 = vld [vmem:[%s16929_s29 + $0x500] ss:$16 sps:$4 sm:$0xff]  }
  0xa6   : > { %10150 = vmatpush1.bf16.msra.mxu1 %v14155_v56  ;;  %10110 = vmatprep.subr.bf16.mxu0 %v14156_v57  ;;  %v14231_v44 = vld [vmem:[%s16929_s29 + $0x704] ss:$16 sps:$4 sm:$0xff]   ;;  %v14229_v46 = vld [vmem:[%s16929_s29 + $0x700] ss:$16 sps:$4 sm:$0xff]  }
  0xa7   : > { %10151 = vmatprep.subr.bf16.mxu1 %v14158_v58  ;;  %v14234_v47 = vld [vmem:[%s16929_s29 + $0x524] ss:$16 sps:$4 sm:$0xff]   ;;  %v14232_v50 = vld [vmem:[%s16929_s29 + $0x520] ss:$16 sps:$4 sm:$0xff]  }
  0xa8   : > { %v14237_v49 = vld [vmem:[%s16929_s29 + $0x724] ss:$16 sps:$4 sm:$0xff]   ;;  %v14235_v51 = vld [vmem:[%s16929_s29 + $0x720] ss:$16 sps:$4 sm:$0xff]  }
  0xa9   : > { %10111 = vmatpush1.bf16.msra.mxu0 %v14160_v59  ;;  %v14240_v53 = vld [vmem:[%s16929_s29 + $0x544] ss:$16 sps:$4 sm:$0xff]   ;;  %v14238_v55 = vld [vmem:[%s16929_s29 + $0x540] ss:$16 sps:$4 sm:$0xff]  }
  0xaa   : > { %10152 = vmatpush1.bf16.msra.mxu1 %v14161_v60  ;;  %10112 = vmatprep.subr.bf16.mxu0 %v14162_v61  ;;  %v14243_v54 = vld [vmem:[%s16929_s29 + $0x744] ss:$16 sps:$4 sm:$0xff]   ;;  %v14241_v56 = vld [vmem:[%s16929_s29 + $0x740] ss:$16 sps:$4 sm:$0xff]  }
  0xab   : > { %10153 = vmatprep.subr.bf16.mxu1 %v14164_v62  ;;  %v14246_v57 = vld [vmem:[%s16929_s29 + $0x564] ss:$16 sps:$4 sm:$0xff]   ;;  %v14244_v59 = vld [vmem:[%s16929_s29 + $0x560] ss:$16 sps:$4 sm:$0xff]  }
  0xac   : > { %v14249_v58 = vld [vmem:[%s16929_s29 + $0x764] ss:$16 sps:$4 sm:$0xff]   ;;  %v14247_v60 = vld [vmem:[%s16929_s29 + $0x760] ss:$16 sps:$4 sm:$0xff]  }
  0xad   : > { %10113 = vmatpush1.bf16.msra.mxu0 %v14166_v63  ;;  %v14252_v61 = vld [vmem:[%s16929_s29 + $0x584] ss:$16 sps:$4 sm:$0xff]   ;;  %v14250_v63 = vld [vmem:[%s16929_s29 + $0x580] ss:$16 sps:$4 sm:$0xff]  }
  0xae   : > { %10154 = vmatpush1.bf16.msra.mxu1 %v14167_v0  ;;  %10114 = vmatprep.subr.bf16.mxu0 %v14168_v1  ;;  %v14255_v62 = vld [vmem:[%s16929_s29 + $0x784] ss:$16 sps:$4 sm:$0xff]   ;;  %v14253_v0 = vld [vmem:[%s16929_s29 + $0x780] ss:$16 sps:$4 sm:$0xff]  }
  0xaf   : > { %10155 = vmatprep.subr.bf16.mxu1 %v14170_v2  ;;  %v14258_v1 = vld [vmem:[%s16929_s29 + $0x5a4] ss:$16 sps:$4 sm:$0xff]  }
  0xb0   : > { %v14261_v2 = vld [vmem:[%s16929_s29 + $0x7a4] ss:$16 sps:$4 sm:$0xff]  }
  0xb1   : > { %10115 = vmatpush1.bf16.msra.mxu0 %v14172_v3  ;;  %v14256_v3 = vld [vmem:[%s16929_s29 + $0x5a0] ss:$16 sps:$4 sm:$0xff]  }
  0xb2   : > { %10156 = vmatpush1.bf16.msra.mxu1 %v14173_v4  ;;  %10166 = vmatprep.subr.bf16.mxu0 %v14180_v5  ;;  %v14259_v4 = vld [vmem:[%s16929_s29 + $0x7a0] ss:$16 sps:$4 sm:$0xff]   ;;  %v14264_v5 = vld [vmem:[%s16929_s29 + $0x5c4] ss:$16 sps:$4 sm:$0xff]  }
  0xb3   : > { %10207 = vmatprep.subr.bf16.mxu1 %v14183_v6  ;;  %v14267_v6 = vld [vmem:[%s16929_s29 + $0x7c4] ss:$16 sps:$4 sm:$0xff]  }
  0xb4   : > { %10117 = vmatmul.mubr.bf16.vlgmr.msra.gmra.mrb[0].mxu0 %v17030_v7 }
  0xb5   : > { %10158 = vmatmul.mubr.bf16.vlgmr.msra.gmra.mrb[0].mxu1 %v17032_v8  ;;  %10167 = vmatpush1.bf16.msra.mxu0 %v14178_v9  ;;  %v14262_v9 = vld [vmem:[%s16929_s29 + $0x5c0] ss:$16 sps:$4 sm:$0xff]  }
  0xb6   : > { %10208 = vmatpush1.bf16.msra.mxu1 %v14181_v10  ;;  %10168 = vmatprep.subr.bf16.mxu0 %v14186_v11  ;;  %v14265_v10 = vld [vmem:[%s16929_s29 + $0x7c0] ss:$16 sps:$4 sm:$0xff]   ;;  %v14270_v11 = vld [vmem:[%s16929_s29 + $0x5e4] ss:$16 sps:$4 sm:$0xff]  }
  0xb7   : > { %10209 = vmatprep.subr.bf16.mxu1 %v14189_v12  ;;  %10198 = vmatprep.mubr.bf16.mxu0 %v17070_v37  ;;  %v14273_v12 = vld [vmem:[%s16929_s29 + $0x7e4] ss:$16 sps:$4 sm:$0xff]  }
  0xb8   : > { %10239 = vmatprep.mubr.bf16.mxu1 %v17074_v38 }
  0xb9   : > { %10169 = vmatpush1.bf16.msra.mxu0 %v14184_v13  ;;  %v14268_v13 = vld [vmem:[%s16929_s29 + $0x5e0] ss:$16 sps:$4 sm:$0xff]  }
  0xba   : > { %10210 = vmatpush1.bf16.msra.mxu1 %v14187_v14  ;;  %10170 = vmatprep.subr.bf16.mxu0 %v14192_v15  ;;  %v14271_v14 = vld [vmem:[%s16929_s29 + $0x7e0] ss:$16 sps:$4 sm:$0xff]   ;;  %v14280_v15 = vld [vmem:[%s16929_s29 + $0x804] ss:$16 sps:$4 sm:$0xff]  }
  0xbb   : > { %10211 = vmatprep.subr.bf16.mxu1 %v14195_v16  ;;  %v14283_v16 = vld [vmem:[%s16929_s29 + $0xa04] ss:$16 sps:$4 sm:$0xff]  }
  0xbd   : > { %10171 = vmatpush1.bf16.msra.mxu0 %v14190_v17  ;;  %v17118_v17 = vcombine.low %v17061_v33, %v17061_v33  ;;  %v14298_v33 = vld [vmem:[%s16929_s29 + $0x864] ss:$16 sps:$4 sm:$0xff]  }
  0xbe   : > { %10212 = vmatpush1.bf16.msra.mxu1 %v14193_v18  ;;  %10172 = vmatprep.subr.bf16.mxu0 %v14198_v19  ;;  %v17122_v18 = vcombine.low %v17064_v34, %v17064_v34  ;;  %v14278_v19 = vld [vmem:[%s16929_s29 + $0x800] ss:$16 sps:$4 sm:$0xff]   ;;  %v14301_v34 = vld [vmem:[%s16929_s29 + $0xa64] ss:$16 sps:$4 sm:$0xff]  }
  0xbf   : > { %10213 = vmatprep.subr.bf16.mxu1 %v14201_v20  ;;  %v14281_v20 = vld [vmem:[%s16929_s29 + $0xa00] ss:$16 sps:$4 sm:$0xff]  }
  0xc1   : > { %10173 = vmatpush1.bf16.msra.mxu0 %v14196_v21  ;;  %v14286_v21 = vld [vmem:[%s16929_s29 + $0x824] ss:$16 sps:$4 sm:$0xff]  }
  0xc2   : > { %10214 = vmatpush1.bf16.msra.mxu1 %v14199_v22  ;;  %10174 = vmatprep.subr.bf16.mxu0 %v14204_v23  ;;  %v14289_v22 = vld [vmem:[%s16929_s29 + $0xa24] ss:$16 sps:$4 sm:$0xff]  }
  0xc3   : > { %10215 = vmatprep.subr.bf16.mxu1 %v14207_v24  ;;  %v17129_v23 = vld [vmem:[%s16953_s9 + $0x20] sm:$0xff]  ;;  %v17132_v24 = vld [vmem:[%s16953_s9 + $0x28] sm:$0xff] }
  0xc5   : > { %10175 = vmatpush1.bf16.msra.mxu0 %v14202_v25  ;;  %v17136_v25 = vcombine.high %v17129_v23, %v17129_v23 }
  0xc6   : > { %10216 = vmatpush1.bf16.msra.mxu1 %v14205_v26  ;;  %10176 = vmatprep.subr.bf16.mxu0 %v14210_v27  ;;  %v17140_v26 = vcombine.high %v17132_v24, %v17132_v24  ;;  %v14284_v27 = vld [vmem:[%s16929_s29 + $0x820] ss:$16 sps:$4 sm:$0xff]  }
  0xc7   : > { %10217 = vmatprep.subr.bf16.mxu1 %v14213_v28  ;;  %v14287_v28 = vld [vmem:[%s16929_s29 + $0xa20] ss:$16 sps:$4 sm:$0xff]  }
  0xc9   : > { %10177 = vmatpush1.bf16.msra.mxu0 %v14208_v29  ;;  %v14292_v29 = vld [vmem:[%s16929_s29 + $0x844] ss:$16 sps:$4 sm:$0xff]  }
  0xca   : > { %10218 = vmatpush1.bf16.msra.mxu1 %v14211_v30  ;;  %10178 = vmatprep.subr.bf16.mxu0 %v14216_v31  ;;  %v14295_v30 = vld [vmem:[%s16929_s29 + $0xa44] ss:$16 sps:$4 sm:$0xff]   ;;  %v14290_v31 = vld [vmem:[%s16929_s29 + $0x840] ss:$16 sps:$4 sm:$0xff]  }
  0xcb   : > { %10219 = vmatprep.subr.bf16.mxu1 %v14219_v32  ;;  %v14293_v32 = vld [vmem:[%s16929_s29 + $0xa40] ss:$16 sps:$4 sm:$0xff]  }
  0xcd   : > { %10179 = vmatpush1.bf16.msra.mxu0 %v14214_v35  ;;  %v14296_v35 = vld [vmem:[%s16929_s29 + $0x860] ss:$16 sps:$4 sm:$0xff]  }
  0xce   : > { %10220 = vmatpush1.bf16.msra.mxu1 %v14217_v36  ;;  %10180 = vmatprep.subr.bf16.mxu0 %v14222_v39  ;;  %v14299_v36 = vld [vmem:[%s16929_s29 + $0xa60] ss:$16 sps:$4 sm:$0xff]   ;;  %v14304_v39 = vld [vmem:[%s16929_s29 + $0x884] ss:$16 sps:$4 sm:$0xff]  }
  0xcf   : > { %10221 = vmatprep.subr.bf16.mxu1 %v14225_v40  ;;  %v14307_v40 = vld [vmem:[%s16929_s29 + $0xa84] ss:$16 sps:$4 sm:$0xff]  }
  0xd1   : > { %10181 = vmatpush1.bf16.msra.mxu0 %v14220_v41  ;;  %v14302_v41 = vld [vmem:[%s16929_s29 + $0x880] ss:$16 sps:$4 sm:$0xff]  }
  0xd2   : > { %10222 = vmatpush1.bf16.msra.mxu1 %v14223_v42  ;;  %10182 = vmatprep.subr.bf16.mxu0 %v14228_v43  ;;  %v14305_v42 = vld [vmem:[%s16929_s29 + $0xa80] ss:$16 sps:$4 sm:$0xff]   ;;  %v14310_v43 = vld [vmem:[%s16929_s29 + $0x8a4] ss:$16 sps:$4 sm:$0xff]  }
  0xd3   : > { %10223 = vmatprep.subr.bf16.mxu1 %v14231_v44  ;;  %v14313_v44 = vld [vmem:[%s16929_s29 + $0xaa4] ss:$16 sps:$4 sm:$0xff]  }
  0xd5   : > { %10183 = vmatpush1.bf16.msra.mxu0 %v14226_v45  ;;  %v14308_v45 = vld [vmem:[%s16929_s29 + $0x8a0] ss:$16 sps:$4 sm:$0xff]  }
  0xd6   : > { %10224 = vmatpush1.bf16.msra.mxu1 %v14229_v46  ;;  %10184 = vmatprep.subr.bf16.mxu0 %v14234_v47  ;;  %v14311_v46 = vld [vmem:[%s16929_s29 + $0xaa0] ss:$16 sps:$4 sm:$0xff]   ;;  %v14316_v47 = vld [vmem:[%s16929_s29 + $0x8c4] ss:$16 sps:$4 sm:$0xff]  }
  0xd7   : > { %10225 = vmatprep.subr.bf16.mxu1 %v14237_v49  ;;  %v14319_v49 = vld [vmem:[%s16929_s29 + $0xac4] ss:$16 sps:$4 sm:$0xff]  }
  0xd9   : > { %10185 = vmatpush1.bf16.msra.mxu0 %v14232_v50  ;;  %v14314_v50 = vld [vmem:[%s16929_s29 + $0x8c0] ss:$16 sps:$4 sm:$0xff]  }
  0xda   : > { %10226 = vmatpush1.bf16.msra.mxu1 %v14235_v51  ;;  %10186 = vmatprep.subr.bf16.mxu0 %v14240_v53  ;;  %v14317_v51 = vld [vmem:[%s16929_s29 + $0xac0] ss:$16 sps:$4 sm:$0xff]   ;;  %v14322_v53 = vld [vmem:[%s16929_s29 + $0x8e4] ss:$16 sps:$4 sm:$0xff]  }
  0xdb   : > { %10227 = vmatprep.subr.bf16.mxu1 %v14243_v54  ;;  %v14325_v54 = vld [vmem:[%s16929_s29 + $0xae4] ss:$16 sps:$4 sm:$0xff]  }
  0xdd   : > { %10187 = vmatpush1.bf16.msra.mxu0 %v14238_v55  ;;  %v14320_v55 = vld [vmem:[%s16929_s29 + $0x8e0] ss:$16 sps:$4 sm:$0xff]  }
  0xde   : > { %10228 = vmatpush1.bf16.msra.mxu1 %v14241_v56  ;;  %10188 = vmatprep.subr.bf16.mxu0 %v14246_v57  ;;  %v14323_v56 = vld [vmem:[%s16929_s29 + $0xae0] ss:$16 sps:$4 sm:$0xff]   ;;  %v14328_v57 = vld [vmem:[%s16929_s29 + $0x904] ss:$16 sps:$4 sm:$0xff]  }
  0xdf   : > { %10229 = vmatprep.subr.bf16.mxu1 %v14249_v58  ;;  %v14331_v58 = vld [vmem:[%s16929_s29 + $0xb04] ss:$16 sps:$4 sm:$0xff]  }
  0xe1   : > { %10189 = vmatpush1.bf16.msra.mxu0 %v14244_v59  ;;  %v14326_v59 = vld [vmem:[%s16929_s29 + $0x900] ss:$16 sps:$4 sm:$0xff]  }
  0xe2   : > { %10230 = vmatpush1.bf16.msra.mxu1 %v14247_v60  ;;  %10190 = vmatprep.subr.bf16.mxu0 %v14252_v61  ;;  %v14329_v60 = vld [vmem:[%s16929_s29 + $0xb00] ss:$16 sps:$4 sm:$0xff]   ;;  %v14334_v61 = vld [vmem:[%s16929_s29 + $0x924] ss:$16 sps:$4 sm:$0xff]  }
  0xe3   : > { %10231 = vmatprep.subr.bf16.mxu1 %v14255_v62  ;;  %v14337_v62 = vld [vmem:[%s16929_s29 + $0xb24] ss:$16 sps:$4 sm:$0xff]  }
  0xe5   : > { %10191 = vmatpush1.bf16.msra.mxu0 %v14250_v63  ;;  %v14332_v63 = vld [vmem:[%s16929_s29 + $0x920] ss:$16 sps:$4 sm:$0xff]  }
  0xe6   : > { %10232 = vmatpush1.bf16.msra.mxu1 %v14253_v0  ;;  %10192 = vmatprep.subr.bf16.mxu0 %v14258_v1  ;;  %v14335_v0 = vld [vmem:[%s16929_s29 + $0xb20] ss:$16 sps:$4 sm:$0xff]   ;;  %v14340_v1 = vld [vmem:[%s16929_s29 + $0x944] ss:$16 sps:$4 sm:$0xff]  }
  0xe7   : > { %10233 = vmatprep.subr.bf16.mxu1 %v14261_v2  ;;  %v14343_v2 = vld [vmem:[%s16929_s29 + $0xb44] ss:$16 sps:$4 sm:$0xff]  }
  0xe9   : > { %10193 = vmatpush1.bf16.msra.mxu0 %v14256_v3  ;;  %v14338_v3 = vld [vmem:[%s16929_s29 + $0x940] ss:$16 sps:$4 sm:$0xff]  }
  0xea   : > { %10234 = vmatpush1.bf16.msra.mxu1 %v14259_v4  ;;  %10194 = vmatprep.subr.bf16.mxu0 %v14264_v5  ;;  %v14341_v4 = vld [vmem:[%s16929_s29 + $0xb40] ss:$16 sps:$4 sm:$0xff]   ;;  %v14346_v5 = vld [vmem:[%s16929_s29 + $0x964] ss:$16 sps:$4 sm:$0xff]  }
  0xeb   : > { %10235 = vmatprep.subr.bf16.mxu1 %v14267_v6  ;;  %v14349_v6 = vld [vmem:[%s16929_s29 + $0xb64] ss:$16 sps:$4 sm:$0xff]  }
  0xed   : > { %10195 = vmatpush1.bf16.msra.mxu0 %v14262_v9  ;;  %v14344_v9 = vld [vmem:[%s16929_s29 + $0x960] ss:$16 sps:$4 sm:$0xff]  }
  0xee   : > { %10236 = vmatpush1.bf16.msra.mxu1 %v14265_v10  ;;  %10196 = vmatprep.subr.bf16.mxu0 %v14270_v11  ;;  %v14347_v10 = vld [vmem:[%s16929_s29 + $0xb60] ss:$16 sps:$4 sm:$0xff]   ;;  %v14352_v11 = vld [vmem:[%s16929_s29 + $0x984] ss:$16 sps:$4 sm:$0xff]  }
  0xef   : > { %10237 = vmatprep.subr.bf16.mxu1 %v14273_v12  ;;  %v14355_v12 = vld [vmem:[%s16929_s29 + $0xb84] ss:$16 sps:$4 sm:$0xff]  }
  0xf1   : > { %10197 = vmatpush1.bf16.msra.mxu0 %v14268_v13  ;;  %v14350_v13 = vld [vmem:[%s16929_s29 + $0x980] ss:$16 sps:$4 sm:$0xff]  }
  0xf2   : > { %10238 = vmatpush1.bf16.msra.mxu1 %v14271_v14  ;;  %10248 = vmatprep.subr.bf16.mxu0 %v14280_v15  ;;  %v14353_v14 = vld [vmem:[%s16929_s29 + $0xb80] ss:$16 sps:$4 sm:$0xff]   ;;  %v14358_v15 = vld [vmem:[%s16929_s29 + $0x9a4] ss:$16 sps:$4 sm:$0xff]  }
  0xf3   : > { %10289 = vmatprep.subr.bf16.mxu1 %v14283_v16  ;;  %v14361_v16 = vld [vmem:[%s16929_s29 + $0xba4] ss:$16 sps:$4 sm:$0xff]  }
  0xf4   : > { %10199 = vmatmul.mubr.bf16.vlgmr.msra.gmra.mrb[4].mxu0 %v17118_v17 }
  0xf5   : > { %10240 = vmatmul.mubr.bf16.vlgmr.msra.gmra.mrb[4].mxu1 %v17122_v18  ;;  %10249 = vmatpush1.bf16.msra.mxu0 %v14278_v19  ;;  %v14356_v19 = vld [vmem:[%s16929_s29 + $0x9a0] ss:$16 sps:$4 sm:$0xff]  }
  0xf6   : > { %10290 = vmatpush1.bf16.msra.mxu1 %v14281_v20  ;;  %10250 = vmatprep.subr.bf16.mxu0 %v14286_v21  ;;  %v14359_v20 = vld [vmem:[%s16929_s29 + $0xba0] ss:$16 sps:$4 sm:$0xff]   ;;  %v14364_v21 = vld [vmem:[%s16929_s29 + $0x9c4] ss:$16 sps:$4 sm:$0xff]  }
  0xf7   : > { %10291 = vmatprep.subr.bf16.mxu1 %v14289_v22  ;;  %10280 = vmatprep.mubr.bf16.mxu0 %v17136_v25  ;;  %v14367_v22 = vld [vmem:[%s16929_s29 + $0xbc4] ss:$16 sps:$4 sm:$0xff]  }
  0xf8   : > { %10321 = vmatprep.mubr.bf16.mxu1 %v17140_v26 }
  0xf9   : > { %10251 = vmatpush1.bf16.msra.mxu0 %v14284_v27  ;;  %v14362_v27 = vld [vmem:[%s16929_s29 + $0x9c0] ss:$16 sps:$4 sm:$0xff]  }
  0xfa   : > { %10292 = vmatpush1.bf16.msra.mxu1 %v14287_v28  ;;  %10252 = vmatprep.subr.bf16.mxu0 %v14292_v29  ;;  %v14365_v28 = vld [vmem:[%s16929_s29 + $0xbc0] ss:$16 sps:$4 sm:$0xff]   ;;  %v14370_v29 = vld [vmem:[%s16929_s29 + $0x9e4] ss:$16 sps:$4 sm:$0xff]  }
  0xfb   : > { %10293 = vmatprep.subr.bf16.mxu1 %v14295_v30  ;;  %v14373_v30 = vld [vmem:[%s16929_s29 + $0xbe4] ss:$16 sps:$4 sm:$0xff]  }
  0xfd   : > { %10253 = vmatpush1.bf16.msra.mxu0 %v14290_v31  ;;  %v14368_v31 = vld [vmem:[%s16929_s29 + $0x9e0] ss:$16 sps:$4 sm:$0xff]  }
  0xfe   : > { %10294 = vmatpush1.bf16.msra.mxu1 %v14293_v32  ;;  %10254 = vmatprep.subr.bf16.mxu0 %v14298_v33  ;;  %v14371_v32 = vld [vmem:[%s16929_s29 + $0xbe0] ss:$16 sps:$4 sm:$0xff]   ;;  %v14380_v33 = vld [vmem:[%s16929_s29 + $0xc04] ss:$16 sps:$4 sm:$0xff]  }
  0xff   : > { %10295 = vmatprep.subr.bf16.mxu1 %v14301_v34  ;;  %v14383_v34 = vld [vmem:[%s16929_s29 + $0xe04] ss:$16 sps:$4 sm:$0xff]  }
 0x101   : > { %10255 = vmatpush1.bf16.msra.mxu0 %v14296_v35  ;;  %v14378_v35 = vld [vmem:[%s16929_s29 + $0xc00] ss:$16 sps:$4 sm:$0xff]  }
 0x102   : > { %10296 = vmatpush1.bf16.msra.mxu1 %v14299_v36  ;;  %10256 = vmatprep.subr.bf16.mxu0 %v14304_v39  ;;  %v14381_v36 = vld [vmem:[%s16929_s29 + $0xe00] ss:$16 sps:$4 sm:$0xff]   ;;  %v17210_v39 = vcombine.low %v17129_v23, %v17129_v23 }
 0x103   : > { %10297 = vmatprep.subr.bf16.mxu1 %v14307_v40  ;;  %v17214_v40 = vcombine.low %v17132_v24, %v17132_v24 }
 0x105   : > { %10257 = vmatpush1.bf16.msra.mxu0 %v14302_v41  ;;  %v17217_v41 = vld [vmem:[%s16953_s9 + $0x30] sm:$0xff] }
 0x106   : > { %10298 = vmatpush1.bf16.msra.mxu1 %v14305_v42  ;;  %10258 = vmatprep.subr.bf16.mxu0 %v14310_v43  ;;  %v17220_v42 = vld [vmem:[%s16953_s9 + $0x38] sm:$0xff]  ;;  %v14386_v43 = vld [vmem:[%s16929_s29 + $0xc24] ss:$16 sps:$4 sm:$0xff]   ;;  %v17226_v23 = vcombine.high %v17217_v41, %v17217_v41 }
 0x107   : > { %10299 = vmatprep.subr.bf16.mxu1 %v14313_v44  ;;  %v14389_v44 = vld [vmem:[%s16929_s29 + $0xe24] ss:$16 sps:$4 sm:$0xff]   ;;  %v17230_v24 = vcombine.high %v17220_v42, %v17220_v42 }
 0x109   : > { %10259 = vmatpush1.bf16.msra.mxu0 %v14308_v45  ;;  %v14384_v45 = vld [vmem:[%s16929_s29 + $0xc20] ss:$16 sps:$4 sm:$0xff]  }
 0x10a   : > { %10300 = vmatpush1.bf16.msra.mxu1 %v14311_v46  ;;  %10260 = vmatprep.subr.bf16.mxu0 %v14316_v47  ;;  %v14387_v46 = vld [vmem:[%s16929_s29 + $0xe20] ss:$16 sps:$4 sm:$0xff]   ;;  %v14392_v47 = vld [vmem:[%s16929_s29 + $0xc44] ss:$16 sps:$4 sm:$0xff]  }
 0x10b   : > { %10301 = vmatprep.subr.bf16.mxu1 %v14319_v49  ;;  %v14395_v49 = vld [vmem:[%s16929_s29 + $0xe44] ss:$16 sps:$4 sm:$0xff]  }
 0x10d   : > { %10261 = vmatpush1.bf16.msra.mxu0 %v14314_v50  ;;  %v14390_v50 = vld [vmem:[%s16929_s29 + $0xc40] ss:$16 sps:$4 sm:$0xff]  }
 0x10e   : > { %10302 = vmatpush1.bf16.msra.mxu1 %v14317_v51  ;;  %10262 = vmatprep.subr.bf16.mxu0 %v14322_v53  ;;  %v14393_v51 = vld [vmem:[%s16929_s29 + $0xe40] ss:$16 sps:$4 sm:$0xff]   ;;  %v14398_v53 = vld [vmem:[%s16929_s29 + $0xc64] ss:$16 sps:$4 sm:$0xff]  }
 0x10f   : > { %10303 = vmatprep.subr.bf16.mxu1 %v14325_v54  ;;  %v14401_v54 = vld [vmem:[%s16929_s29 + $0xe64] ss:$16 sps:$4 sm:$0xff]  }
 0x111   : > { %10263 = vmatpush1.bf16.msra.mxu0 %v14320_v55  ;;  %v14396_v55 = vld [vmem:[%s16929_s29 + $0xc60] ss:$16 sps:$4 sm:$0xff]  }
 0x112   : > { %10304 = vmatpush1.bf16.msra.mxu1 %v14323_v56  ;;  %10264 = vmatprep.subr.bf16.mxu0 %v14328_v57  ;;  %v14399_v56 = vld [vmem:[%s16929_s29 + $0xe60] ss:$16 sps:$4 sm:$0xff]   ;;  %v14404_v57 = vld [vmem:[%s16929_s29 + $0xc84] ss:$16 sps:$4 sm:$0xff]  }
 0x113   : > { %10305 = vmatprep.subr.bf16.mxu1 %v14331_v58  ;;  %v14407_v58 = vld [vmem:[%s16929_s29 + $0xe84] ss:$16 sps:$4 sm:$0xff]  }
 0x115   : > { %10265 = vmatpush1.bf16.msra.mxu0 %v14326_v59  ;;  %v14402_v59 = vld [vmem:[%s16929_s29 + $0xc80] ss:$16 sps:$4 sm:$0xff]  }
 0x116   : > { %10306 = vmatpush1.bf16.msra.mxu1 %v14329_v60  ;;  %10266 = vmatprep.subr.bf16.mxu0 %v14334_v61  ;;  %v14405_v60 = vld [vmem:[%s16929_s29 + $0xe80] ss:$16 sps:$4 sm:$0xff]   ;;  %v14410_v61 = vld [vmem:[%s16929_s29 + $0xca4] ss:$16 sps:$4 sm:$0xff]  }
 0x117   : > { %10307 = vmatprep.subr.bf16.mxu1 %v14337_v62  ;;  %v14413_v62 = vld [vmem:[%s16929_s29 + $0xea4] ss:$16 sps:$4 sm:$0xff]  }
 0x119   : > { %10267 = vmatpush1.bf16.msra.mxu0 %v14332_v63  ;;  %v14408_v63 = vld [vmem:[%s16929_s29 + $0xca0] ss:$16 sps:$4 sm:$0xff]  }
 0x11a   : > { %10308 = vmatpush1.bf16.msra.mxu1 %v14335_v0  ;;  %10268 = vmatprep.subr.bf16.mxu0 %v14340_v1  ;;  %v14411_v0 = vld [vmem:[%s16929_s29 + $0xea0] ss:$16 sps:$4 sm:$0xff]   ;;  %v14416_v1 = vld [vmem:[%s16929_s29 + $0xcc4] ss:$16 sps:$4 sm:$0xff]  }
 0x11b   : > { %10309 = vmatprep.subr.bf16.mxu1 %v14343_v2  ;;  %v14419_v2 = vld [vmem:[%s16929_s29 + $0xec4] ss:$16 sps:$4 sm:$0xff]  }
 0x11d   : > { %10269 = vmatpush1.bf16.msra.mxu0 %v14338_v3  ;;  %v14414_v3 = vld [vmem:[%s16929_s29 + $0xcc0] ss:$16 sps:$4 sm:$0xff]  }
 0x11e   : > { %10310 = vmatpush1.bf16.msra.mxu1 %v14341_v4  ;;  %10270 = vmatprep.subr.bf16.mxu0 %v14346_v5  ;;  %v14417_v4 = vld [vmem:[%s16929_s29 + $0xec0] ss:$16 sps:$4 sm:$0xff]   ;;  %v14422_v5 = vld [vmem:[%s16929_s29 + $0xce4] ss:$16 sps:$4 sm:$0xff]  }
 0x11f   : > { %10311 = vmatprep.subr.bf16.mxu1 %v14349_v6  ;;  %v14425_v6 = vld [vmem:[%s16929_s29 + $0xee4] ss:$16 sps:$4 sm:$0xff]  }
 0x121   : > { %10271 = vmatpush1.bf16.msra.mxu0 %v14344_v9  ;;  %v14420_v9 = vld [vmem:[%s16929_s29 + $0xce0] ss:$16 sps:$4 sm:$0xff]  }
 0x122   : > { %10312 = vmatpush1.bf16.msra.mxu1 %v14347_v10  ;;  %10272 = vmatprep.subr.bf16.mxu0 %v14352_v11  ;;  %v14423_v10 = vld [vmem:[%s16929_s29 + $0xee0] ss:$16 sps:$4 sm:$0xff]   ;;  %v14428_v11 = vld [vmem:[%s16929_s29 + $0xd04] ss:$16 sps:$4 sm:$0xff]  }
 0x123   : > { %10313 = vmatprep.subr.bf16.mxu1 %v14355_v12  ;;  %v14431_v12 = vld [vmem:[%s16929_s29 + $0xf04] ss:$16 sps:$4 sm:$0xff]  }
 0x125   : > { %10273 = vmatpush1.bf16.msra.mxu0 %v14350_v13  ;;  %v14426_v13 = vld [vmem:[%s16929_s29 + $0xd00] ss:$16 sps:$4 sm:$0xff]  }
 0x126   : > { %10314 = vmatpush1.bf16.msra.mxu1 %v14353_v14  ;;  %10274 = vmatprep.subr.bf16.mxu0 %v14358_v15  ;;  %v14429_v14 = vld [vmem:[%s16929_s29 + $0xf00] ss:$16 sps:$4 sm:$0xff]   ;;  %v14434_v15 = vld [vmem:[%s16929_s29 + $0xd24] ss:$16 sps:$4 sm:$0xff]  }
 0x127   : > { %10315 = vmatprep.subr.bf16.mxu1 %v14361_v16  ;;  %v14437_v16 = vld [vmem:[%s16929_s29 + $0xf24] ss:$16 sps:$4 sm:$0xff]  }
 0x129   : > { %10275 = vmatpush1.bf16.msra.mxu0 %v14356_v19  ;;  %v14432_v19 = vld [vmem:[%s16929_s29 + $0xd20] ss:$16 sps:$4 sm:$0xff]  }
 0x12a   : > { %10316 = vmatpush1.bf16.msra.mxu1 %v14359_v20  ;;  %10276 = vmatprep.subr.bf16.mxu0 %v14364_v21  ;;  %v14435_v20 = vld [vmem:[%s16929_s29 + $0xf20] ss:$16 sps:$4 sm:$0xff]   ;;  %v14440_v21 = vld [vmem:[%s16929_s29 + $0xd44] ss:$16 sps:$4 sm:$0xff]  }
 0x12b   : > { %10317 = vmatprep.subr.bf16.mxu1 %v14367_v22  ;;  %v14443_v22 = vld [vmem:[%s16929_s29 + $0xf44] ss:$16 sps:$4 sm:$0xff]  }
 0x12d   : > { %10277 = vmatpush1.bf16.msra.mxu0 %v14362_v27  ;;  %v14438_v27 = vld [vmem:[%s16929_s29 + $0xd40] ss:$16 sps:$4 sm:$0xff]  }
 0x12e   : > { %10318 = vmatpush1.bf16.msra.mxu1 %v14365_v28  ;;  %10278 = vmatprep.subr.bf16.mxu0 %v14370_v29  ;;  %v14441_v28 = vld [vmem:[%s16929_s29 + $0xf40] ss:$16 sps:$4 sm:$0xff]   ;;  %v14446_v29 = vld [vmem:[%s16929_s29 + $0xd64] ss:$16 sps:$4 sm:$0xff]  }
 0x12f   : > { %10319 = vmatprep.subr.bf16.mxu1 %v14373_v30  ;;  %v14449_v30 = vld [vmem:[%s16929_s29 + $0xf64] ss:$16 sps:$4 sm:$0xff]  }
 0x131   : > { %10279 = vmatpush1.bf16.msra.mxu0 %v14368_v31  ;;  %v14444_v31 = vld [vmem:[%s16929_s29 + $0xd60] ss:$16 sps:$4 sm:$0xff]  }
 0x132   : > { %10320 = vmatpush1.bf16.msra.mxu1 %v14371_v32  ;;  %10330 = vmatprep.subr.bf16.mxu0 %v14380_v33  ;;  %v14447_v32 = vld [vmem:[%s16929_s29 + $0xf60] ss:$16 sps:$4 sm:$0xff]   ;;  %v14452_v33 = vld [vmem:[%s16929_s29 + $0xd84] ss:$16 sps:$4 sm:$0xff]  }
 0x133   : > { %10371 = vmatprep.subr.bf16.mxu1 %v14383_v34  ;;  %v14455_v34 = vld [vmem:[%s16929_s29 + $0xf84] ss:$16 sps:$4 sm:$0xff]  }
 0x134   : > { %10281 = vmatmul.mubr.bf16.vlgmr.msra.gmra.mrb[8].mxu0 %v17210_v39 }
 0x135   : > { %10322 = vmatmul.mubr.bf16.vlgmr.msra.gmra.mrb[8].mxu1 %v17214_v40  ;;  %10331 = vmatpush1.bf16.msra.mxu0 %v14378_v35  ;;  %v14450_v35 = vld [vmem:[%s16929_s29 + $0xd80] ss:$16 sps:$4 sm:$0xff]  }
 0x136   : > { %10372 = vmatpush1.bf16.msra.mxu1 %v14381_v36  ;;  %10332 = vmatprep.subr.bf16.mxu0 %v14386_v43  ;;  %v14453_v36 = vld [vmem:[%s16929_s29 + $0xf80] ss:$16 sps:$4 sm:$0xff]   ;;  %v14458_v43 = vld [vmem:[%s16929_s29 + $0xda4] ss:$16 sps:$4 sm:$0xff]  }
 0x137   : > { %10373 = vmatprep.subr.bf16.mxu1 %v14389_v44  ;;  %10362 = vmatprep.mubr.bf16.mxu0 %v17226_v23  ;;  %v14461_v44 = vld [vmem:[%s16929_s29 + $0xfa4] ss:$16 sps:$4 sm:$0xff]  }
 0x138   : > { %10403 = vmatprep.mubr.bf16.mxu1 %v17230_v24 }
 0x139   : > { %10333 = vmatpush1.bf16.msra.mxu0 %v14384_v45  ;;  %v14456_v45 = vld [vmem:[%s16929_s29 + $0xda0] ss:$16 sps:$4 sm:$0xff]  }
 0x13a   : > { %10374 = vmatpush1.bf16.msra.mxu1 %v14387_v46  ;;  %10334 = vmatprep.subr.bf16.mxu0 %v14392_v47  ;;  %v14459_v46 = vld [vmem:[%s16929_s29 + $0xfa0] ss:$16 sps:$4 sm:$0xff]   ;;  %v14464_v47 = vld [vmem:[%s16929_s29 + $0xdc4] ss:$16 sps:$4 sm:$0xff]  }
 0x13b   : > { %10375 = vmatprep.subr.bf16.mxu1 %v14395_v49  ;;  %v14467_v49 = vld [vmem:[%s16929_s29 + $0xfc4] ss:$16 sps:$4 sm:$0xff]  }
 0x13d   : > { %10335 = vmatpush1.bf16.msra.mxu0 %v14390_v50  ;;  %v14462_v50 = vld [vmem:[%s16929_s29 + $0xdc0] ss:$16 sps:$4 sm:$0xff]  }
 0x13e   : > { %10376 = vmatpush1.bf16.msra.mxu1 %v14393_v51  ;;  %10336 = vmatprep.subr.bf16.mxu0 %v14398_v53  ;;  %v14465_v51 = vld [vmem:[%s16929_s29 + $0xfc0] ss:$16 sps:$4 sm:$0xff]   ;;  %v14470_v53 = vld [vmem:[%s16929_s29 + $0xde4] ss:$16 sps:$4 sm:$0xff]  }
 0x13f   : > { %10377 = vmatprep.subr.bf16.mxu1 %v14401_v54  ;;  %v14473_v54 = vld [vmem:[%s16929_s29 + $0xfe4] ss:$16 sps:$4 sm:$0xff]  }
 0x141   : > { %10337 = vmatpush1.bf16.msra.mxu0 %v14396_v55  ;;  %v14468_v55 = vld [vmem:[%s16929_s29 + $0xde0] ss:$16 sps:$4 sm:$0xff]  }
 0x142   : > { %10378 = vmatpush1.bf16.msra.mxu1 %v14399_v56  ;;  %10338 = vmatprep.subr.bf16.mxu0 %v14404_v57  ;;  %v14471_v56 = vld [vmem:[%s16929_s29 + $0xfe0] ss:$16 sps:$4 sm:$0xff]   ;;  %v14480_v57 = vld [vmem:[%s16929_s29 + $0x1004] ss:$16 sps:$4 sm:$0xff]  }
 0x143   : > { %10379 = vmatprep.subr.bf16.mxu1 %v14407_v58  ;;  %v14483_v58 = vld [vmem:[%s16929_s29 + $0x1204] ss:$16 sps:$4 sm:$0xff]  }
 0x145   : > { %10339 = vmatpush1.bf16.msra.mxu0 %v14402_v59  ;;  %v17297_v59 = vld [vmem:[%s16953_s9 + $0x40] sm:$0xff] }
 0x146   : > { %10380 = vmatpush1.bf16.msra.mxu1 %v14405_v60  ;;  %10340 = vmatprep.subr.bf16.mxu0 %v14410_v61  ;;  %v17301_v60 = vcombine.low %v17217_v41, %v17217_v41  ;;  %v17305_v61 = vcombine.low %v17220_v42, %v17220_v42  ;;  %v17316_v41 = vcombine.high %v17297_v59, %v17297_v59 }
 0x147   : > { %10381 = vmatprep.subr.bf16.mxu1 %v14413_v62  ;;  %v17308_v62 = vld [vmem:[%s16953_s9 + $0x48] sm:$0xff] }
 0x148   : > { %v17320_v42 = vcombine.high %v17308_v62, %v17308_v62 }
 0x149   : > { %10341 = vmatpush1.bf16.msra.mxu0 %v14408_v63  ;;  %v14478_v63 = vld [vmem:[%s16929_s29 + $0x1000] ss:$16 sps:$4 sm:$0xff]  }
 0x14a   : > { %10382 = vmatpush1.bf16.msra.mxu1 %v14411_v0  ;;  %10342 = vmatprep.subr.bf16.mxu0 %v14416_v1  ;;  %v14481_v0 = vld [vmem:[%s16929_s29 + $0x1200] ss:$16 sps:$4 sm:$0xff]   ;;  %v14486_v1 = vld [vmem:[%s16929_s29 + $0x1024] ss:$16 sps:$4 sm:$0xff]  }
 0x14b   : > { %10383 = vmatprep.subr.bf16.mxu1 %v14419_v2  ;;  %v14489_v2 = vld [vmem:[%s16929_s29 + $0x1224] ss:$16 sps:$4 sm:$0xff]  }
 0x14d   : > { %10343 = vmatpush1.bf16.msra.mxu0 %v14414_v3  ;;  %v14484_v3 = vld [vmem:[%s16929_s29 + $0x1020] ss:$16 sps:$4 sm:$0xff]  }
 0x14e   : > { %10384 = vmatpush1.bf16.msra.mxu1 %v14417_v4  ;;  %10344 = vmatprep.subr.bf16.mxu0 %v14422_v5  ;;  %v14487_v4 = vld [vmem:[%s16929_s29 + $0x1220] ss:$16 sps:$4 sm:$0xff]   ;;  %v14492_v5 = vld [vmem:[%s16929_s29 + $0x1044] ss:$16 sps:$4 sm:$0xff]  }
 0x14f   : > { %10385 = vmatprep.subr.bf16.mxu1 %v14425_v6  ;;  %v14495_v6 = vld [vmem:[%s16929_s29 + $0x1244] ss:$16 sps:$4 sm:$0xff]  }
 0x151   : > { %10345 = vmatpush1.bf16.msra.mxu0 %v14420_v9  ;;  %v14490_v9 = vld [vmem:[%s16929_s29 + $0x1040] ss:$16 sps:$4 sm:$0xff]  }
 0x152   : > { %10386 = vmatpush1.bf16.msra.mxu1 %v14423_v10  ;;  %10346 = vmatprep.subr.bf16.mxu0 %v14428_v11  ;;  %v14493_v10 = vld [vmem:[%s16929_s29 + $0x1240] ss:$16 sps:$4 sm:$0xff]   ;;  %v14498_v11 = vld [vmem:[%s16929_s29 + $0x1064] ss:$16 sps:$4 sm:$0xff]  }
 0x153   : > { %10387 = vmatprep.subr.bf16.mxu1 %v14431_v12  ;;  %v14501_v12 = vld [vmem:[%s16929_s29 + $0x1264] ss:$16 sps:$4 sm:$0xff]  }
 0x155   : > { %10347 = vmatpush1.bf16.msra.mxu0 %v14426_v13  ;;  %v14496_v13 = vld [vmem:[%s16929_s29 + $0x1060] ss:$16 sps:$4 sm:$0xff]  }
 0x156   : > { %10388 = vmatpush1.bf16.msra.mxu1 %v14429_v14  ;;  %10348 = vmatprep.subr.bf16.mxu0 %v14434_v15  ;;  %v14499_v14 = vld [vmem:[%s16929_s29 + $0x1260] ss:$16 sps:$4 sm:$0xff]   ;;  %v14504_v15 = vld [vmem:[%s16929_s29 + $0x1084] ss:$16 sps:$4 sm:$0xff]  }
 0x157   : > { %10389 = vmatprep.subr.bf16.mxu1 %v14437_v16  ;;  %v14507_v16 = vld [vmem:[%s16929_s29 + $0x1284] ss:$16 sps:$4 sm:$0xff]  }
 0x159   : > { %10349 = vmatpush1.bf16.msra.mxu0 %v14432_v19  ;;  %v14502_v19 = vld [vmem:[%s16929_s29 + $0x1080] ss:$16 sps:$4 sm:$0xff]  }
 0x15a   : > { %10390 = vmatpush1.bf16.msra.mxu1 %v14435_v20  ;;  %10350 = vmatprep.subr.bf16.mxu0 %v14440_v21  ;;  %v14505_v20 = vld [vmem:[%s16929_s29 + $0x1280] ss:$16 sps:$4 sm:$0xff]   ;;  %v14510_v21 = vld [vmem:[%s16929_s29 + $0x10a4] ss:$16 sps:$4 sm:$0xff]  }
 0x15b   : > { %10391 = vmatprep.subr.bf16.mxu1 %v14443_v22  ;;  %v14513_v22 = vld [vmem:[%s16929_s29 + $0x12a4] ss:$16 sps:$4 sm:$0xff]  }
 0x15d   : > { %10351 = vmatpush1.bf16.msra.mxu0 %v14438_v27  ;;  %v14508_v27 = vld [vmem:[%s16929_s29 + $0x10a0] ss:$16 sps:$4 sm:$0xff]  }
 0x15e   : > { %10392 = vmatpush1.bf16.msra.mxu1 %v14441_v28  ;;  %10352 = vmatprep.subr.bf16.mxu0 %v14446_v29  ;;  %v14511_v28 = vld [vmem:[%s16929_s29 + $0x12a0] ss:$16 sps:$4 sm:$0xff]   ;;  %v14516_v29 = vld [vmem:[%s16929_s29 + $0x10c4] ss:$16 sps:$4 sm:$0xff]  }
 0x15f   : > { %10393 = vmatprep.subr.bf16.mxu1 %v14449_v30  ;;  %v14519_v30 = vld [vmem:[%s16929_s29 + $0x12c4] ss:$16 sps:$4 sm:$0xff]  }
 0x161   : > { %10353 = vmatpush1.bf16.msra.mxu0 %v14444_v31 }
 0x162   : > { %10394 = vmatpush1.bf16.msra.mxu1 %v14447_v32  ;;  %10354 = vmatprep.subr.bf16.mxu0 %v14452_v33  ;;  %v14514_v33 = vld [vmem:[%s16929_s29 + $0x10c0] ss:$16 sps:$4 sm:$0xff]  }
 0x163   : > { %10395 = vmatprep.subr.bf16.mxu1 %v14455_v34  ;;  %v14517_v34 = vld [vmem:[%s16929_s29 + $0x12c0] ss:$16 sps:$4 sm:$0xff]  }
 0x165   : > { %10355 = vmatpush1.bf16.msra.mxu0 %v14450_v35 }
 0x166   : > { %10396 = vmatpush1.bf16.msra.mxu1 %v14453_v36  ;;  %10356 = vmatprep.subr.bf16.mxu0 %v14458_v43 }
 0x167   : > { %10397 = vmatprep.subr.bf16.mxu1 %v14461_v44 }
 0x169   : > { %10357 = vmatpush1.bf16.msra.mxu0 %v14456_v45 }
 0x16a   : > { %10398 = vmatpush1.bf16.msra.mxu1 %v14459_v46  ;;  %10358 = vmatprep.subr.bf16.mxu0 %v14464_v47 }
 0x16b   : > { %10399 = vmatprep.subr.bf16.mxu1 %v14467_v49 }
 0x16d   : > { %10359 = vmatpush1.bf16.msra.mxu0 %v14462_v50  ;;  %v14522_v50 = vld [vmem:[%s16929_s29 + $0x10e4] ss:$16 sps:$4 sm:$0xff]  }
 0x16e   : > { %10400 = vmatpush1.bf16.msra.mxu1 %v14465_v51  ;;  %10360 = vmatprep.subr.bf16.mxu0 %v14470_v53  ;;  %v14525_v51 = vld [vmem:[%s16929_s29 + $0x12e4] ss:$16 sps:$4 sm:$0xff]   ;;  %v14520_v53 = vld [vmem:[%s16929_s29 + $0x10e0] ss:$16 sps:$4 sm:$0xff]  }
 0x16f   : > { %10401 = vmatprep.subr.bf16.mxu1 %v14473_v54  ;;  %v14523_v54 = vld [vmem:[%s16929_s29 + $0x12e0] ss:$16 sps:$4 sm:$0xff]  }
 0x171   : > { %10361 = vmatpush1.bf16.msra.mxu0 %v14468_v55  ;;  %v14528_v55 = vld [vmem:[%s16929_s29 + $0x1104] ss:$16 sps:$4 sm:$0xff]  }
 0x172   : > { %10402 = vmatpush1.bf16.msra.mxu1 %v14471_v56  ;;  %10412 = vmatprep.subr.bf16.mxu0 %v14480_v57  ;;  %v14531_v56 = vld [vmem:[%s16929_s29 + $0x1304] ss:$16 sps:$4 sm:$0xff]   ;;  %v14526_v57 = vld [vmem:[%s16929_s29 + $0x1100] ss:$16 sps:$4 sm:$0xff]  }
 0x173   : > { %10453 = vmatprep.subr.bf16.mxu1 %v14483_v58  ;;  %v14529_v58 = vld [vmem:[%s16929_s29 + $0x1300] ss:$16 sps:$4 sm:$0xff]  }
 0x174   : > { %10363 = vmatmul.mubr.bf16.vlgmr.msra.gmra.mrb[12].mxu0 %v17301_v60 }
 0x175   : > { %10404 = vmatmul.mubr.bf16.vlgmr.msra.gmra.mrb[12].mxu1 %v17305_v61  ;;  %10413 = vmatpush1.bf16.msra.mxu0 %v14478_v63  ;;  %v14534_v63 = vld [vmem:[%s16929_s29 + $0x1124] ss:$16 sps:$4 sm:$0xff]  }
 0x176   : > { %10454 = vmatpush1.bf16.msra.mxu1 %v14481_v0  ;;  %10414 = vmatprep.subr.bf16.mxu0 %v14486_v1  ;;  %v14537_v0 = vld [vmem:[%s16929_s29 + $0x1324] ss:$16 sps:$4 sm:$0xff]   ;;  %v14532_v1 = vld [vmem:[%s16929_s29 + $0x1120] ss:$16 sps:$4 sm:$0xff]  }
 0x177   : > { %10455 = vmatprep.subr.bf16.mxu1 %v14489_v2  ;;  %10444 = vmatprep.mubr.bf16.mxu0 %v17316_v41  ;;  %v14535_v2 = vld [vmem:[%s16929_s29 + $0x1320] ss:$16 sps:$4 sm:$0xff]  }
 0x178   : > { %10485 = vmatprep.mubr.bf16.mxu1 %v17320_v42 }
 0x179   : > { %10415 = vmatpush1.bf16.msra.mxu0 %v14484_v3  ;;  %v14540_v3 = vld [vmem:[%s16929_s29 + $0x1144] ss:$16 sps:$4 sm:$0xff]  }
 0x17a   : > { %10456 = vmatpush1.bf16.msra.mxu1 %v14487_v4  ;;  %10416 = vmatprep.subr.bf16.mxu0 %v14492_v5  ;;  %v14543_v4 = vld [vmem:[%s16929_s29 + $0x1344] ss:$16 sps:$4 sm:$0xff]   ;;  %v14538_v5 = vld [vmem:[%s16929_s29 + $0x1140] ss:$16 sps:$4 sm:$0xff]  }
 0x17b   : > { %10457 = vmatprep.subr.bf16.mxu1 %v14495_v6  ;;  %v14541_v6 = vld [vmem:[%s16929_s29 + $0x1340] ss:$16 sps:$4 sm:$0xff]  }
 0x17d   : > { %10417 = vmatpush1.bf16.msra.mxu0 %v14490_v9  ;;  %v14546_v9 = vld [vmem:[%s16929_s29 + $0x1164] ss:$16 sps:$4 sm:$0xff]  }
 0x17e   : > { %10458 = vmatpush1.bf16.msra.mxu1 %v14493_v10  ;;  %10418 = vmatprep.subr.bf16.mxu0 %v14498_v11  ;;  %v14549_v10 = vld [vmem:[%s16929_s29 + $0x1364] ss:$16 sps:$4 sm:$0xff]   ;;  %v14544_v11 = vld [vmem:[%s16929_s29 + $0x1160] ss:$16 sps:$4 sm:$0xff]  }
 0x17f   : > { %10459 = vmatprep.subr.bf16.mxu1 %v14501_v12  ;;  %v14547_v12 = vld [vmem:[%s16929_s29 + $0x1360] ss:$16 sps:$4 sm:$0xff]  }
 0x181   : > { %10419 = vmatpush1.bf16.msra.mxu0 %v14496_v13  ;;  %v14552_v13 = vld [vmem:[%s16929_s29 + $0x1184] ss:$16 sps:$4 sm:$0xff]  }
 0x182   : > { %10460 = vmatpush1.bf16.msra.mxu1 %v14499_v14  ;;  %10420 = vmatprep.subr.bf16.mxu0 %v14504_v15  ;;  %v14555_v14 = vld [vmem:[%s16929_s29 + $0x1384] ss:$16 sps:$4 sm:$0xff]   ;;  %v14550_v15 = vld [vmem:[%s16929_s29 + $0x1180] ss:$16 sps:$4 sm:$0xff]  }
 0x183   : > { %10461 = vmatprep.subr.bf16.mxu1 %v14507_v16  ;;  %v14553_v16 = vld [vmem:[%s16929_s29 + $0x1380] ss:$16 sps:$4 sm:$0xff]  }
 0x185   : > { %10421 = vmatpush1.bf16.msra.mxu0 %v14502_v19  ;;  %v14558_v19 = vld [vmem:[%s16929_s29 + $0x11a4] ss:$16 sps:$4 sm:$0xff]  }
 0x186   : > { %10462 = vmatpush1.bf16.msra.mxu1 %v14505_v20  ;;  %10422 = vmatprep.subr.bf16.mxu0 %v14510_v21  ;;  %v14561_v20 = vld [vmem:[%s16929_s29 + $0x13a4] ss:$16 sps:$4 sm:$0xff]   ;;  %v14556_v21 = vld [vmem:[%s16929_s29 + $0x11a0] ss:$16 sps:$4 sm:$0xff]  }
 0x187   : > { %10463 = vmatprep.subr.bf16.mxu1 %v14513_v22  ;;  %v10118_v31 = vpop.f32.mrb[0].mxu0  ;;  %v14559_v22 = vld [vmem:[%s16929_s29 + $0x13a0] ss:$16 sps:$4 sm:$0xff]  }
 0x188   : > { %v10159_v32 = vpop.f32.mrb[0].mxu1  ;;  %v10120_v36 = vpop.f32.mrb[1].mxu0 }
 0x189   : > { %v17348_v35 = vadd.f32 %v10159_v32, %v10118_v31  ;;  %v10161_v43 = vpop.f32.mrb[1].mxu1  ;;  %v10122_v45 = vpop.f32.mrb[2].mxu0  ;;  %10423 = vmatpush1.bf16.msra.mxu0 %v14508_v27  ;;  %v14564_v27 = vld [vmem:[%s16929_s29 + $0x11c4] ss:$16 sps:$4 sm:$0xff]  }
 0x18a   : > { %v17350_v44 = vadd.f32 %v10161_v43, %v10120_v36  ;;  %v10163_v46 = vpop.f32.mrb[2].mxu1  ;;  %10464 = vmatpush1.bf16.msra.mxu1 %v14511_v28  ;;  %v10123_v47 = vpop.f32.mrb[3].mxu0  ;;  %10424 = vmatprep.subr.bf16.mxu0 %v14516_v29  ;;  %v14567_v28 = vld [vmem:[%s16929_s29 + $0x13c4] ss:$16 sps:$4 sm:$0xff]   ;;  %v14562_v29 = vld [vmem:[%s16929_s29 + $0x11c0] ss:$16 sps:$4 sm:$0xff]  }
 0x18b   : > { %v10164_v49 = vpop.f32.mrb[3].mxu1  ;;  %10465 = vmatprep.subr.bf16.mxu1 %v14519_v30  ;;  %v14565_v30 = vld [vmem:[%s16929_s29 + $0x13c0] ss:$16 sps:$4 sm:$0xff]   ;;  %v14570_v31 = vld [vmem:[%s16929_s29 + $0x11e4] ss:$16 sps:$4 sm:$0xff]   ;;  %v17394_v47 = vcombine.low %v17297_v59, %v17297_v59 }
 0x18c   : > { %v14573_v32 = vld [vmem:[%s16929_s29 + $0x13e4] ss:$16 sps:$4 sm:$0xff]   ;;  %v14578_v45 = vld [vmem:[%s16929_s29 + $0x1400] ss:$16 sps:$4 sm:$0xff]   ;;  %v17398_v49 = vcombine.low %v17308_v62, %v17308_v62 }
 0x18d   : > { %10425 = vmatpush1.bf16.msra.mxu0 %v14514_v33  ;;  %v14568_v33 = vld [vmem:[%s16929_s29 + $0x11e0] ss:$16 sps:$4 sm:$0xff]   ;;  %v14580_v36 = vld [vmem:[%s16929_s29 + $0x1404] ss:$16 sps:$4 sm:$0xff]  }
 0x18e   : > { %10466 = vmatpush1.bf16.msra.mxu1 %v14517_v34  ;;  %10426 = vmatprep.subr.bf16.mxu0 %v14522_v50  ;;  %v14571_v34 = vld [vmem:[%s16929_s29 + $0x13e0] ss:$16 sps:$4 sm:$0xff]   ;;  %v14583_v43 = vld [vmem:[%s16929_s29 + $0x1604] ss:$16 sps:$4 sm:$0xff]  }
 0x18f   : > { %10467 = vmatprep.subr.bf16.mxu1 %v14525_v51  ;;  %v14581_v46 = vld [vmem:[%s16929_s29 + $0x1600] ss:$16 sps:$4 sm:$0xff]   ;;  %v17404_v51 = vld [vmem:[%s16953_s9 + $0x58] sm:$0xff] }
 0x190   : > { %v17401_v50 = vld [vmem:[%s16953_s9 + $0x50] sm:$0xff]  ;;  %v17414_v62 = vcombine.high %v17404_v51, %v17404_v51 }
 0x191   : > { %10427 = vmatpush1.bf16.msra.mxu0 %v14520_v53  ;;  %v14586_v53 = vld [vmem:[%s16929_s29 + $0x1424] ss:$16 sps:$4 sm:$0xff]   ;;  %v17410_v59 = vcombine.high %v17401_v50, %v17401_v50 }
 0x192   : > { %10468 = vmatpush1.bf16.msra.mxu1 %v14523_v54  ;;  %10428 = vmatprep.subr.bf16.mxu0 %v14528_v55  ;;  %v14589_v54 = vld [vmem:[%s16929_s29 + $0x1624] ss:$16 sps:$4 sm:$0xff]   ;;  %v14584_v55 = vld [vmem:[%s16929_s29 + $0x1420] ss:$16 sps:$4 sm:$0xff]  }
 0x193   : > { %10469 = vmatprep.subr.bf16.mxu1 %v14531_v56  ;;  %v14587_v56 = vld [vmem:[%s16929_s29 + $0x1620] ss:$16 sps:$4 sm:$0xff]  }
 0x195   : > { %10429 = vmatpush1.bf16.msra.mxu0 %v14526_v57  ;;  %v14592_v57 = vld [vmem:[%s16929_s29 + $0x1444] ss:$16 sps:$4 sm:$0xff]  }
 0x196   : > { %10470 = vmatpush1.bf16.msra.mxu1 %v14529_v58  ;;  %10430 = vmatprep.subr.bf16.mxu0 %v14534_v63  ;;  %v14595_v58 = vld [vmem:[%s16929_s29 + $0x1644] ss:$16 sps:$4 sm:$0xff]   ;;  %v14590_v63 = vld [vmem:[%s16929_s29 + $0x1440] ss:$16 sps:$4 sm:$0xff]  }
 0x197   : > { %10471 = vmatprep.subr.bf16.mxu1 %v14537_v0  ;;  %v14593_v0 = vld [vmem:[%s16929_s29 + $0x1640] ss:$16 sps:$4 sm:$0xff]  }
 0x199   : > { %10431 = vmatpush1.bf16.msra.mxu0 %v14532_v1  ;;  %v14598_v1 = vld [vmem:[%s16929_s29 + $0x1464] ss:$16 sps:$4 sm:$0xff]  }
 0x19a   : > { %10472 = vmatpush1.bf16.msra.mxu1 %v14535_v2  ;;  %10432 = vmatprep.subr.bf16.mxu0 %v14540_v3  ;;  %v14601_v2 = vld [vmem:[%s16929_s29 + $0x1664] ss:$16 sps:$4 sm:$0xff]   ;;  %v14596_v3 = vld [vmem:[%s16929_s29 + $0x1460] ss:$16 sps:$4 sm:$0xff]  }
 0x19b   : > { %10473 = vmatprep.subr.bf16.mxu1 %v14543_v4  ;;  %v14599_v4 = vld [vmem:[%s16929_s29 + $0x1660] ss:$16 sps:$4 sm:$0xff]  }
 0x19d   : > { %10433 = vmatpush1.bf16.msra.mxu0 %v14538_v5  ;;  %v14604_v5 = vld [vmem:[%s16929_s29 + $0x1484] ss:$16 sps:$4 sm:$0xff]  }
 0x19e   : > { %10474 = vmatpush1.bf16.msra.mxu1 %v14541_v6  ;;  %10434 = vmatprep.subr.bf16.mxu0 %v14546_v9  ;;  %v14607_v6 = vld [vmem:[%s16929_s29 + $0x1684] ss:$16 sps:$4 sm:$0xff]   ;;  %v14602_v9 = vld [vmem:[%s16929_s29 + $0x1480] ss:$16 sps:$4 sm:$0xff]  }
 0x19f   : > { %10475 = vmatprep.subr.bf16.mxu1 %v14549_v10  ;;  %v14605_v10 = vld [vmem:[%s16929_s29 + $0x1680] ss:$16 sps:$4 sm:$0xff]  }
 0x1a1   : > { %10435 = vmatpush1.bf16.msra.mxu0 %v14544_v11  ;;  %v14610_v11 = vld [vmem:[%s16929_s29 + $0x14a4] ss:$16 sps:$4 sm:$0xff]  }
 0x1a2   : > { %10476 = vmatpush1.bf16.msra.mxu1 %v14547_v12  ;;  %10436 = vmatprep.subr.bf16.mxu0 %v14552_v13  ;;  %v14613_v12 = vld [vmem:[%s16929_s29 + $0x16a4] ss:$16 sps:$4 sm:$0xff]   ;;  %v14608_v13 = vld [vmem:[%s16929_s29 + $0x14a0] ss:$16 sps:$4 sm:$0xff]  }
 0x1a3   : > { %10477 = vmatprep.subr.bf16.mxu1 %v14555_v14  ;;  %v14611_v14 = vld [vmem:[%s16929_s29 + $0x16a0] ss:$16 sps:$4 sm:$0xff]  }
 0x1a5   : > { %10437 = vmatpush1.bf16.msra.mxu0 %v14550_v15  ;;  %v14616_v15 = vld [vmem:[%s16929_s29 + $0x14c4] ss:$16 sps:$4 sm:$0xff]  }
 0x1a6   : > { %10478 = vmatpush1.bf16.msra.mxu1 %v14553_v16  ;;  %10438 = vmatprep.subr.bf16.mxu0 %v14558_v19  ;;  %v14619_v16 = vld [vmem:[%s16929_s29 + $0x16c4] ss:$16 sps:$4 sm:$0xff]  }
 0x1a7   : > { %10479 = vmatprep.subr.bf16.mxu1 %v14561_v20 }
 0x1a9   : > { %10439 = vmatpush1.bf16.msra.mxu0 %v14556_v21  ;;  %v14614_v21 = vld [vmem:[%s16929_s29 + $0x14c0] ss:$16 sps:$4 sm:$0xff]  }
 0x1aa   : > { %10480 = vmatpush1.bf16.msra.mxu1 %v14559_v22  ;;  %10440 = vmatprep.subr.bf16.mxu0 %v14564_v27  ;;  %v14617_v22 = vld [vmem:[%s16929_s29 + $0x16c0] ss:$16 sps:$4 sm:$0xff]  }
 0x1ab   : > { %10481 = vmatprep.subr.bf16.mxu1 %v14567_v28 }
 0x1ad   : > { %10441 = vmatpush1.bf16.msra.mxu0 %v14562_v29 }
 0x1ae   : > { %10482 = vmatpush1.bf16.msra.mxu1 %v14565_v30  ;;  %10442 = vmatprep.subr.bf16.mxu0 %v14570_v31 }
 0x1af   : > { %10483 = vmatprep.subr.bf16.mxu1 %v14573_v32 }
 0x1b1   : > { %10443 = vmatpush1.bf16.msra.mxu0 %v14568_v33 }
 0x1b2   : > { %10484 = vmatpush1.bf16.msra.mxu1 %v14571_v34  ;;  %10494 = vmatprep.subr.bf16.mxu0 %v14580_v36 }
 0x1b3   : > { %10535 = vmatprep.subr.bf16.mxu1 %v14583_v43  ;;  %v14625_v43 = vld [vmem:[%s16929_s29 + $0x16e4] ss:$16 sps:$4 sm:$0xff]  }
 0x1b4   : > { %10445 = vmatmul.mubr.bf16.vlgmr.msra.gmra.mrb[16].mxu0 %v17394_v47 }
 0x1b5   : > { %10486 = vmatmul.mubr.bf16.vlgmr.msra.gmra.mrb[16].mxu1 %v17398_v49  ;;  %10495 = vmatpush1.bf16.msra.mxu0 %v14578_v45 }
 0x1b6   : > { %10536 = vmatpush1.bf16.msra.mxu1 %v14581_v46  ;;  %10496 = vmatprep.subr.bf16.mxu0 %v14586_v53  ;;  %v14623_v46 = vld [vmem:[%s16929_s29 + $0x16e0] ss:$16 sps:$4 sm:$0xff]   ;;  %v14628_v53 = vld [vmem:[%s16929_s29 + $0x1504] ss:$16 sps:$4 sm:$0xff]  }
 0x1b7   : > { %10537 = vmatprep.subr.bf16.mxu1 %v14589_v54  ;;  %10526 = vmatprep.mubr.bf16.mxu0 %v17410_v59  ;;  %v14631_v54 = vld [vmem:[%s16929_s29 + $0x1704] ss:$16 sps:$4 sm:$0xff]  }
 0x1b8   : > { %10567 = vmatprep.mubr.bf16.mxu1 %v17414_v62 }
 0x1b9   : > { %10497 = vmatpush1.bf16.msra.mxu0 %v14584_v55  ;;  %v14626_v55 = vld [vmem:[%s16929_s29 + $0x1500] ss:$16 sps:$4 sm:$0xff]  }
 0x1ba   : > { %10538 = vmatpush1.bf16.msra.mxu1 %v14587_v56  ;;  %10498 = vmatprep.subr.bf16.mxu0 %v14592_v57  ;;  %v14629_v56 = vld [vmem:[%s16929_s29 + $0x1700] ss:$16 sps:$4 sm:$0xff]   ;;  %v14634_v57 = vld [vmem:[%s16929_s29 + $0x1524] ss:$16 sps:$4 sm:$0xff]  }
 0x1bb   : > { %10539 = vmatprep.subr.bf16.mxu1 %v14595_v58  ;;  %v14637_v58 = vld [vmem:[%s16929_s29 + $0x1724] ss:$16 sps:$4 sm:$0xff]  }
 0x1bd   : > { %10499 = vmatpush1.bf16.msra.mxu0 %v14590_v63  ;;  %v14632_v63 = vld [vmem:[%s16929_s29 + $0x1520] ss:$16 sps:$4 sm:$0xff]  }
 0x1be   : > { %10540 = vmatpush1.bf16.msra.mxu1 %v14593_v0  ;;  %10500 = vmatprep.subr.bf16.mxu0 %v14598_v1  ;;  %v14635_v0 = vld [vmem:[%s16929_s29 + $0x1720] ss:$16 sps:$4 sm:$0xff]   ;;  %v14640_v1 = vld [vmem:[%s16929_s29 + $0x1544] ss:$16 sps:$4 sm:$0xff]  }
 0x1bf   : > { %10541 = vmatprep.subr.bf16.mxu1 %v14601_v2  ;;  %v14643_v2 = vld [vmem:[%s16929_s29 + $0x1744] ss:$16 sps:$4 sm:$0xff]  }
 0x1c1   : > { %10501 = vmatpush1.bf16.msra.mxu0 %v14596_v3  ;;  %v14638_v3 = vld [vmem:[%s16929_s29 + $0x1540] ss:$16 sps:$4 sm:$0xff]  }
 0x1c2   : > { %10542 = vmatpush1.bf16.msra.mxu1 %v14599_v4  ;;  %10502 = vmatprep.subr.bf16.mxu0 %v14604_v5  ;;  %v14641_v4 = vld [vmem:[%s16929_s29 + $0x1740] ss:$16 sps:$4 sm:$0xff]   ;;  %v14646_v5 = vld [vmem:[%s16929_s29 + $0x1564] ss:$16 sps:$4 sm:$0xff]  }
 0x1c3   : > { %10543 = vmatprep.subr.bf16.mxu1 %v14607_v6  ;;  %v14649_v6 = vld [vmem:[%s16929_s29 + $0x1764] ss:$16 sps:$4 sm:$0xff]  }
 0x1c5   : > { %10503 = vmatpush1.bf16.msra.mxu0 %v14602_v9  ;;  %v14644_v9 = vld [vmem:[%s16929_s29 + $0x1560] ss:$16 sps:$4 sm:$0xff]  }
 0x1c6   : > { %10544 = vmatpush1.bf16.msra.mxu1 %v14605_v10  ;;  %10504 = vmatprep.subr.bf16.mxu0 %v14610_v11  ;;  %v14647_v10 = vld [vmem:[%s16929_s29 + $0x1760] ss:$16 sps:$4 sm:$0xff]   ;;  %v14652_v11 = vld [vmem:[%s16929_s29 + $0x1584] ss:$16 sps:$4 sm:$0xff]  }
 0x1c7   : > { %10545 = vmatprep.subr.bf16.mxu1 %v14613_v12  ;;  %v10200_v19 = vpop.f32.mrb[4].mxu0  ;;  %v14655_v12 = vld [vmem:[%s16929_s29 + $0x1784] ss:$16 sps:$4 sm:$0xff]  }
 0x1c8   : > { %v10241_v20 = vpop.f32.mrb[4].mxu1  ;;  %v10201_v27 = vadd.f32 %v10200_v19, %v17348_v35  ;;  %v10202_v28 = vpop.f32.mrb[5].mxu0  ;;  %v14622_v35 = vld [vmem:[%s16929_s29 + $0x14e4] ss:$16 sps:$4 sm:$0xff]   ;;  %v14656_v19 = vld [vmem:[%s16929_s29 + $0x15a0] ss:$16 sps:$4 sm:$0xff]  }
 0x1c9   : > { %v10243_v29 = vpop.f32.mrb[5].mxu1  ;;  %v10203_v30 = vadd.f32 %v10202_v28, %v17350_v44  ;;  %v10204_v31 = vpop.f32.mrb[6].mxu0  ;;  %10505 = vmatpush1.bf16.msra.mxu0 %v14608_v13  ;;  %v14620_v44 = vld [vmem:[%s16929_s29 + $0x14e0] ss:$16 sps:$4 sm:$0xff]  }
 0x1ca   : > { %v10245_v32 = vpop.f32.mrb[6].mxu1  ;;  %10546 = vmatpush1.bf16.msra.mxu1 %v14611_v14  ;;  %v17444_v33 = vadd.f32 %v10241_v20, %v10201_v27  ;;  %v10205_v34 = vpop.f32.mrb[7].mxu0  ;;  %10506 = vmatprep.subr.bf16.mxu0 %v14616_v15  ;;  %v14650_v13 = vld [vmem:[%s16929_s29 + $0x1580] ss:$16 sps:$4 sm:$0xff]   ;;  %v14658_v15 = vld [vmem:[%s16929_s29 + $0x15a4] ss:$16 sps:$4 sm:$0xff]  }
 0x1cb   : > { %v10246_v36 = vpop.f32.mrb[7].mxu1  ;;  %10547 = vmatprep.subr.bf16.mxu1 %v14619_v16  ;;  %v17448_v45 = vadd.f32 %v10243_v29, %v10203_v30  ;;  %v14653_v14 = vld [vmem:[%s16929_s29 + $0x1780] ss:$16 sps:$4 sm:$0xff]   ;;  %v14661_v16 = vld [vmem:[%s16929_s29 + $0x17a4] ss:$16 sps:$4 sm:$0xff]  }
 0x1cc   : > { %v14659_v20 = vld [vmem:[%s16929_s29 + $0x17a0] ss:$16 sps:$4 sm:$0xff]   ;;  %v14670_v29 = vld [vmem:[%s16929_s29 + $0x15e4] ss:$16 sps:$4 sm:$0xff]  }
 0x1cd   : > { %10507 = vmatpush1.bf16.msra.mxu0 %v14614_v21  ;;  %v14664_v21 = vld [vmem:[%s16929_s29 + $0x15c4] ss:$16 sps:$4 sm:$0xff]   ;;  %v14662_v27 = vld [vmem:[%s16929_s29 + $0x15c0] ss:$16 sps:$4 sm:$0xff]  }
 0x1ce   : > { %10548 = vmatpush1.bf16.msra.mxu1 %v14617_v22  ;;  %10508 = vmatprep.subr.bf16.mxu0 %v14622_v35  ;;  %v14667_v22 = vld [vmem:[%s16929_s29 + $0x17c4] ss:$16 sps:$4 sm:$0xff]   ;;  %v14665_v28 = vld [vmem:[%s16929_s29 + $0x17c0] ss:$16 sps:$4 sm:$0xff]  }
 0x1cf   : > { %10549 = vmatprep.subr.bf16.mxu1 %v14625_v43  ;;  %v14673_v30 = vld [vmem:[%s16929_s29 + $0x17e4] ss:$16 sps:$4 sm:$0xff]   ;;  %v14668_v31 = vld [vmem:[%s16929_s29 + $0x15e0] ss:$16 sps:$4 sm:$0xff]  }
 0x1d0   : > { %v14671_v32 = vld [vmem:[%s16929_s29 + $0x17e0] ss:$16 sps:$4 sm:$0xff]   ;;  %v14680_v34 = vld [vmem:[%s16929_s29 + $0x1804] ss:$16 sps:$4 sm:$0xff]  }
 0x1d1   : > { %10509 = vmatpush1.bf16.msra.mxu0 %v14620_v44  ;;  %v14683_v36 = vld [vmem:[%s16929_s29 + $0x1a04] ss:$16 sps:$4 sm:$0xff]   ;;  %v14678_v35 = vld [vmem:[%s16929_s29 + $0x1800] ss:$16 sps:$4 sm:$0xff]   ;;  %v17490_v44 = vcombine.low %v17401_v50, %v17401_v50 }
 0x1d2   : > { %10550 = vmatpush1.bf16.msra.mxu1 %v14623_v46  ;;  %10510 = vmatprep.subr.bf16.mxu0 %v14628_v53  ;;  %v14681_v43 = vld [vmem:[%s16929_s29 + $0x1a00] ss:$16 sps:$4 sm:$0xff]   ;;  %v17494_v46 = vcombine.low %v17404_v51, %v17404_v51 }
 0x1d3   : > { %10551 = vmatprep.subr.bf16.mxu1 %v14631_v54  ;;  %v17497_v53 = vld [vmem:[%s16953_s9 + $0x60] sm:$0xff]  ;;  %v17500_v54 = vld [vmem:[%s16953_s9 + $0x68] sm:$0xff] }
 0x1d4   : > { %v17506_v50 = vcombine.high %v17497_v53, %v17497_v53  ;;  %v17510_v51 = vcombine.high %v17500_v54, %v17500_v54 }
 0x1d5   : > { %10511 = vmatpush1.bf16.msra.mxu0 %v14626_v55  ;;  %v14686_v55 = vld [vmem:[%s16929_s29 + $0x1824] ss:$16 sps:$4 sm:$0xff]  }
 0x1d6   : > { %10552 = vmatpush1.bf16.msra.mxu1 %v14629_v56  ;;  %10512 = vmatprep.subr.bf16.mxu0 %v14634_v57  ;;  %v14689_v56 = vld [vmem:[%s16929_s29 + $0x1a24] ss:$16 sps:$4 sm:$0xff]   ;;  %v14684_v57 = vld [vmem:[%s16929_s29 + $0x1820] ss:$16 sps:$4 sm:$0xff]  }
 0x1d7   : > { %10553 = vmatprep.subr.bf16.mxu1 %v14637_v58  ;;  %v14687_v58 = vld [vmem:[%s16929_s29 + $0x1a20] ss:$16 sps:$4 sm:$0xff]  }
 0x1d9   : > { %10513 = vmatpush1.bf16.msra.mxu0 %v14632_v63  ;;  %v14692_v63 = vld [vmem:[%s16929_s29 + $0x1844] ss:$16 sps:$4 sm:$0xff]  }
 0x1da   : > { %10554 = vmatpush1.bf16.msra.mxu1 %v14635_v0  ;;  %10514 = vmatprep.subr.bf16.mxu0 %v14640_v1  ;;  %v14695_v0 = vld [vmem:[%s16929_s29 + $0x1a44] ss:$16 sps:$4 sm:$0xff]   ;;  %v14690_v1 = vld [vmem:[%s16929_s29 + $0x1840] ss:$16 sps:$4 sm:$0xff]  }
 0x1db   : > { %10555 = vmatprep.subr.bf16.mxu1 %v14643_v2  ;;  %v14693_v2 = vld [vmem:[%s16929_s29 + $0x1a40] ss:$16 sps:$4 sm:$0xff]  }
 0x1dd   : > { %10515 = vmatpush1.bf16.msra.mxu0 %v14638_v3  ;;  %v14698_v3 = vld [vmem:[%s16929_s29 + $0x1864] ss:$16 sps:$4 sm:$0xff]  }
 0x1de   : > { %10556 = vmatpush1.bf16.msra.mxu1 %v14641_v4  ;;  %10516 = vmatprep.subr.bf16.mxu0 %v14646_v5  ;;  %v14701_v4 = vld [vmem:[%s16929_s29 + $0x1a64] ss:$16 sps:$4 sm:$0xff]   ;;  %v14696_v5 = vld [vmem:[%s16929_s29 + $0x1860] ss:$16 sps:$4 sm:$0xff]  }
 0x1df   : > { %10557 = vmatprep.subr.bf16.mxu1 %v14649_v6  ;;  %v14699_v6 = vld [vmem:[%s16929_s29 + $0x1a60] ss:$16 sps:$4 sm:$0xff]  }
 0x1e1   : > { %10517 = vmatpush1.bf16.msra.mxu0 %v14644_v9  ;;  %v14704_v9 = vld [vmem:[%s16929_s29 + $0x1884] ss:$16 sps:$4 sm:$0xff]  }
 0x1e2   : > { %10558 = vmatpush1.bf16.msra.mxu1 %v14647_v10  ;;  %10518 = vmatprep.subr.bf16.mxu0 %v14652_v11  ;;  %v14707_v10 = vld [vmem:[%s16929_s29 + $0x1a84] ss:$16 sps:$4 sm:$0xff]   ;;  %v14702_v11 = vld [vmem:[%s16929_s29 + $0x1880] ss:$16 sps:$4 sm:$0xff]  }
 0x1e3   : > { %10559 = vmatprep.subr.bf16.mxu1 %v14655_v12  ;;  %v14705_v12 = vld [vmem:[%s16929_s29 + $0x1a80] ss:$16 sps:$4 sm:$0xff]  }
 0x1e5   : > { %10519 = vmatpush1.bf16.msra.mxu0 %v14650_v13  ;;  %v14710_v13 = vld [vmem:[%s16929_s29 + $0x18a4] ss:$16 sps:$4 sm:$0xff]  }
 0x1e6   : > { %10560 = vmatpush1.bf16.msra.mxu1 %v14653_v14  ;;  %10520 = vmatprep.subr.bf16.mxu0 %v14658_v15  ;;  %v14713_v14 = vld [vmem:[%s16929_s29 + $0x1aa4] ss:$16 sps:$4 sm:$0xff]   ;;  %v14708_v15 = vld [vmem:[%s16929_s29 + $0x18a0] ss:$16 sps:$4 sm:$0xff]  }
 0x1e7   : > { %10561 = vmatprep.subr.bf16.mxu1 %v14661_v16  ;;  %v14711_v16 = vld [vmem:[%s16929_s29 + $0x1aa0] ss:$16 sps:$4 sm:$0xff]  }
 0x1e9   : > { %10521 = vmatpush1.bf16.msra.mxu0 %v14656_v19  ;;  %v14716_v19 = vld [vmem:[%s16929_s29 + $0x18c4] ss:$16 sps:$4 sm:$0xff]  }
 0x1ea   : > { %10562 = vmatpush1.bf16.msra.mxu1 %v14659_v20  ;;  %10522 = vmatprep.subr.bf16.mxu0 %v14664_v21  ;;  %v14719_v20 = vld [vmem:[%s16929_s29 + $0x1ac4] ss:$16 sps:$4 sm:$0xff]  }
 0x1eb   : > { %10563 = vmatprep.subr.bf16.mxu1 %v14667_v22 }
 0x1ed   : > { %10523 = vmatpush1.bf16.msra.mxu0 %v14662_v27  ;;  %v14714_v27 = vld [vmem:[%s16929_s29 + $0x18c0] ss:$16 sps:$4 sm:$0xff]  }
 0x1ee   : > { %10564 = vmatpush1.bf16.msra.mxu1 %v14665_v28  ;;  %10524 = vmatprep.subr.bf16.mxu0 %v14670_v29  ;;  %v14717_v28 = vld [vmem:[%s16929_s29 + $0x1ac0] ss:$16 sps:$4 sm:$0xff]  }
 0x1ef   : > { %10565 = vmatprep.subr.bf16.mxu1 %v14673_v30 }
 0x1f1   : > { %10525 = vmatpush1.bf16.msra.mxu0 %v14668_v31 }
 0x1f2   : > { %10566 = vmatpush1.bf16.msra.mxu1 %v14671_v32  ;;  %10576 = vmatprep.subr.bf16.mxu0 %v14680_v34 }
 0x1f3   : > { %10617 = vmatprep.subr.bf16.mxu1 %v14683_v36 }
 0x1f4   : > { %10527 = vmatmul.mubr.bf16.vlgmr.msra.gmra.mrb[20].mxu0 %v17490_v44 }
 0x1f5   : > { %10568 = vmatmul.mubr.bf16.vlgmr.msra.gmra.mrb[20].mxu1 %v17494_v46  ;;  %10577 = vmatpush1.bf16.msra.mxu0 %v14678_v35 }
 0x1f6   : > { %10618 = vmatpush1.bf16.msra.mxu1 %v14681_v43  ;;  %10578 = vmatprep.subr.bf16.mxu0 %v14686_v55 }
 0x1f7   : > { %10619 = vmatprep.subr.bf16.mxu1 %v14689_v56  ;;  %10608 = vmatprep.mubr.bf16.mxu0 %v17506_v50  ;;  %v14725_v56 = vld [vmem:[%s16929_s29 + $0x1ae4] ss:$16 sps:$4 sm:$0xff]  }
 0x1f8   : > { %10649 = vmatprep.mubr.bf16.mxu1 %v17510_v51 }
 0x1f9   : > { %10579 = vmatpush1.bf16.msra.mxu0 %v14684_v57 }
 0x1fa   : > { %10620 = vmatpush1.bf16.msra.mxu1 %v14687_v58  ;;  %10580 = vmatprep.subr.bf16.mxu0 %v14692_v63  ;;  %v14723_v58 = vld [vmem:[%s16929_s29 + $0x1ae0] ss:$16 sps:$4 sm:$0xff]   ;;  %v14728_v63 = vld [vmem:[%s16929_s29 + $0x1904] ss:$16 sps:$4 sm:$0xff]  }
 0x1fb   : > { %10621 = vmatprep.subr.bf16.mxu1 %v14695_v0  ;;  %v14731_v0 = vld [vmem:[%s16929_s29 + $0x1b04] ss:$16 sps:$4 sm:$0xff]  }
 0x1fd   : > { %10581 = vmatpush1.bf16.msra.mxu0 %v14690_v1  ;;  %v14726_v1 = vld [vmem:[%s16929_s29 + $0x1900] ss:$16 sps:$4 sm:$0xff]  }
 0x1fe   : > { %10622 = vmatpush1.bf16.msra.mxu1 %v14693_v2  ;;  %10582 = vmatprep.subr.bf16.mxu0 %v14698_v3  ;;  %v14729_v2 = vld [vmem:[%s16929_s29 + $0x1b00] ss:$16 sps:$4 sm:$0xff]   ;;  %v14734_v3 = vld [vmem:[%s16929_s29 + $0x1924] ss:$16 sps:$4 sm:$0xff]  }
 0x1ff   : > { %10623 = vmatprep.subr.bf16.mxu1 %v14701_v4  ;;  %v14737_v4 = vld [vmem:[%s16929_s29 + $0x1b24] ss:$16 sps:$4 sm:$0xff]  }
 0x201   : > { %10583 = vmatpush1.bf16.msra.mxu0 %v14696_v5  ;;  %v14732_v5 = vld [vmem:[%s16929_s29 + $0x1920] ss:$16 sps:$4 sm:$0xff]  }
 0x202   : > { %10624 = vmatpush1.bf16.msra.mxu1 %v14699_v6  ;;  %10584 = vmatprep.subr.bf16.mxu0 %v14704_v9  ;;  %v14735_v6 = vld [vmem:[%s16929_s29 + $0x1b20] ss:$16 sps:$4 sm:$0xff]   ;;  %v14740_v9 = vld [vmem:[%s16929_s29 + $0x1944] ss:$16 sps:$4 sm:$0xff]  }
 0x203   : > { %10625 = vmatprep.subr.bf16.mxu1 %v14707_v10  ;;  %v14743_v10 = vld [vmem:[%s16929_s29 + $0x1b44] ss:$16 sps:$4 sm:$0xff]  }
 0x205   : > { %10585 = vmatpush1.bf16.msra.mxu0 %v14702_v11  ;;  %v14738_v11 = vld [vmem:[%s16929_s29 + $0x1940] ss:$16 sps:$4 sm:$0xff]  }
 0x206   : > { %10626 = vmatpush1.bf16.msra.mxu1 %v14705_v12  ;;  %10586 = vmatprep.subr.bf16.mxu0 %v14710_v13  ;;  %v14741_v12 = vld [vmem:[%s16929_s29 + $0x1b40] ss:$16 sps:$4 sm:$0xff]   ;;  %v14746_v13 = vld [vmem:[%s16929_s29 + $0x1964] ss:$16 sps:$4 sm:$0xff]  }
 0x207   : > { %10627 = vmatprep.subr.bf16.mxu1 %v14713_v14  ;;  %v10282_v21 = vpop.f32.mrb[8].mxu0  ;;  %v14749_v14 = vld [vmem:[%s16929_s29 + $0x1b64] ss:$16 sps:$4 sm:$0xff]  }
 0x208   : > { %v10323_v22 = vpop.f32.mrb[8].mxu1  ;;  %v10283_v29 = vadd.f32 %v10282_v21, %v17444_v33  ;;  %v10284_v30 = vpop.f32.mrb[9].mxu0  ;;  %v14722_v33 = vld [vmem:[%s16929_s29 + $0x18e4] ss:$16 sps:$4 sm:$0xff]   ;;  %v14750_v21 = vld [vmem:[%s16929_s29 + $0x1980] ss:$16 sps:$4 sm:$0xff]  }
 0x209   : > { %v10325_v31 = vpop.f32.mrb[9].mxu1  ;;  %v10285_v32 = vadd.f32 %v10284_v30, %v17448_v45  ;;  %v10286_v34 = vpop.f32.mrb[10].mxu0  ;;  %10587 = vmatpush1.bf16.msra.mxu0 %v14708_v15  ;;  %v14720_v45 = vld [vmem:[%s16929_s29 + $0x18e0] ss:$16 sps:$4 sm:$0xff]  }
 0x20a   : > { %v10327_v36 = vpop.f32.mrb[10].mxu1  ;;  %10628 = vmatpush1.bf16.msra.mxu1 %v14711_v16  ;;  %v17540_v35 = vadd.f32 %v10323_v22, %v10283_v29  ;;  %v10287_v43 = vpop.f32.mrb[11].mxu0  ;;  %10588 = vmatprep.subr.bf16.mxu0 %v14716_v19  ;;  %v14744_v15 = vld [vmem:[%s16929_s29 + $0x1960] ss:$16 sps:$4 sm:$0xff]   ;;  %v14752_v19 = vld [vmem:[%s16929_s29 + $0x1984] ss:$16 sps:$4 sm:$0xff]  }
 0x20b   : > { %v10328_v55 = vpop.f32.mrb[11].mxu1  ;;  %10629 = vmatprep.subr.bf16.mxu1 %v14719_v20  ;;  %v17544_v57 = vadd.f32 %v10325_v31, %v10285_v32  ;;  %v14747_v16 = vld [vmem:[%s16929_s29 + $0x1b60] ss:$16 sps:$4 sm:$0xff]   ;;  %v14755_v20 = vld [vmem:[%s16929_s29 + $0x1b84] ss:$16 sps:$4 sm:$0xff]  }
 0x20c   : > { %v14753_v22 = vld [vmem:[%s16929_s29 + $0x1b80] ss:$16 sps:$4 sm:$0xff]   ;;  %v14764_v31 = vld [vmem:[%s16929_s29 + $0x19c4] ss:$16 sps:$4 sm:$0xff]  }
 0x20d   : > { %10589 = vmatpush1.bf16.msra.mxu0 %v14714_v27  ;;  %v14758_v27 = vld [vmem:[%s16929_s29 + $0x19a4] ss:$16 sps:$4 sm:$0xff]   ;;  %v14756_v29 = vld [vmem:[%s16929_s29 + $0x19a0] ss:$16 sps:$4 sm:$0xff]  }
 0x20e   : > { %10630 = vmatpush1.bf16.msra.mxu1 %v14717_v28  ;;  %10590 = vmatprep.subr.bf16.mxu0 %v14722_v33  ;;  %v14761_v28 = vld [vmem:[%s16929_s29 + $0x1ba4] ss:$16 sps:$4 sm:$0xff]   ;;  %v14759_v30 = vld [vmem:[%s16929_s29 + $0x1ba0] ss:$16 sps:$4 sm:$0xff]  }
 0x20f   : > { %10631 = vmatprep.subr.bf16.mxu1 %v14725_v56  ;;  %v14767_v32 = vld [vmem:[%s16929_s29 + $0x1bc4] ss:$16 sps:$4 sm:$0xff]   ;;  %v14762_v34 = vld [vmem:[%s16929_s29 + $0x19c0] ss:$16 sps:$4 sm:$0xff]  }
 0x210   : > { %v14765_v36 = vld [vmem:[%s16929_s29 + $0x1bc0] ss:$16 sps:$4 sm:$0xff]   ;;  %v14770_v43 = vld [vmem:[%s16929_s29 + $0x19e4] ss:$16 sps:$4 sm:$0xff]  }
 0x211   : > { %10591 = vmatpush1.bf16.msra.mxu0 %v14720_v45  ;;  %v14773_v55 = vld [vmem:[%s16929_s29 + $0x1be4] ss:$16 sps:$4 sm:$0xff]   ;;  %v14768_v33 = vld [vmem:[%s16929_s29 + $0x19e0] ss:$16 sps:$4 sm:$0xff]  }
 0x212   : > { %10632 = vmatpush1.bf16.msra.mxu1 %v14723_v58  ;;  %10592 = vmatprep.subr.bf16.mxu0 %v14728_v63  ;;  %v14771_v56 = vld [vmem:[%s16929_s29 + $0x1be0] ss:$16 sps:$4 sm:$0xff]   ;;  %v14780_v45 = vld [vmem:[%s16929_s29 + $0x1c04] ss:$16 sps:$4 sm:$0xff]  }
 0x213   : > { %10633 = vmatprep.subr.bf16.mxu1 %v14731_v0  ;;  %v14783_v58 = vld [vmem:[%s16929_s29 + $0x1e04] ss:$16 sps:$4 sm:$0xff]   ;;  %v14778_v63 = vld [vmem:[%s16929_s29 + $0x1c00] ss:$16 sps:$4 sm:$0xff]  }
 0x214   : > { %v14781_v0 = vld [vmem:[%s16929_s29 + $0x1e00] ss:$16 sps:$4 sm:$0xff]  }
 0x215   : > { %10593 = vmatpush1.bf16.msra.mxu0 %v14726_v1  ;;  %v17586_v1 = vcombine.low %v17497_v53, %v17497_v53 }
 0x216   : > { %10634 = vmatpush1.bf16.msra.mxu1 %v14729_v2  ;;  %10594 = vmatprep.subr.bf16.mxu0 %v14734_v3  ;;  %v17590_v2 = vcombine.low %v17500_v54, %v17500_v54  ;;  %v17593_v3 = vld [vmem:[%s16953_s9 + $0x70] sm:$0xff] }
 0x217   : > { %10635 = vmatprep.subr.bf16.mxu1 %v14737_v4  ;;  %v17596_v4 = vld [vmem:[%s16953_s9 + $0x78] sm:$0xff]  ;;  %v17602_v53 = vcombine.high %v17593_v3, %v17593_v3 }
 0x218   : > { %v17606_v54 = vcombine.high %v17596_v4, %v17596_v4 }
 0x219   : > { %10595 = vmatpush1.bf16.msra.mxu0 %v14732_v5  ;;  %v14786_v5 = vld [vmem:[%s16929_s29 + $0x1c24] ss:$16 sps:$4 sm:$0xff]  }
 0x21a   : > { %10636 = vmatpush1.bf16.msra.mxu1 %v14735_v6  ;;  %10596 = vmatprep.subr.bf16.mxu0 %v14740_v9  ;;  %v14789_v6 = vld [vmem:[%s16929_s29 + $0x1e24] ss:$16 sps:$4 sm:$0xff]   ;;  %v14784_v9 = vld [vmem:[%s16929_s29 + $0x1c20] ss:$16 sps:$4 sm:$0xff]  }
 0x21b   : > { %10637 = vmatprep.subr.bf16.mxu1 %v14743_v10  ;;  %v14787_v10 = vld [vmem:[%s16929_s29 + $0x1e20] ss:$16 sps:$4 sm:$0xff]  }
 0x21d   : > { %10597 = vmatpush1.bf16.msra.mxu0 %v14738_v11  ;;  %v14792_v11 = vld [vmem:[%s16929_s29 + $0x1c44] ss:$16 sps:$4 sm:$0xff]  }
 0x21e   : > { %10638 = vmatpush1.bf16.msra.mxu1 %v14741_v12  ;;  %10598 = vmatprep.subr.bf16.mxu0 %v14746_v13  ;;  %v14795_v12 = vld [vmem:[%s16929_s29 + $0x1e44] ss:$16 sps:$4 sm:$0xff]   ;;  %v14790_v13 = vld [vmem:[%s16929_s29 + $0x1c40] ss:$16 sps:$4 sm:$0xff]  }
 0x21f   : > { %10639 = vmatprep.subr.bf16.mxu1 %v14749_v14  ;;  %v14793_v14 = vld [vmem:[%s16929_s29 + $0x1e40] ss:$16 sps:$4 sm:$0xff]  }
 0x221   : > { %10599 = vmatpush1.bf16.msra.mxu0 %v14744_v15  ;;  %v14798_v15 = vld [vmem:[%s16929_s29 + $0x1c64] ss:$16 sps:$4 sm:$0xff]  }
 0x222   : > { %10640 = vmatpush1.bf16.msra.mxu1 %v14747_v16  ;;  %10600 = vmatprep.subr.bf16.mxu0 %v14752_v19  ;;  %v14801_v16 = vld [vmem:[%s16929_s29 + $0x1e64] ss:$16 sps:$4 sm:$0xff]   ;;  %v14796_v19 = vld [vmem:[%s16929_s29 + $0x1c60] ss:$16 sps:$4 sm:$0xff]  }
 0x223   : > { %10641 = vmatprep.subr.bf16.mxu1 %v14755_v20  ;;  %v14799_v20 = vld [vmem:[%s16929_s29 + $0x1e60] ss:$16 sps:$4 sm:$0xff]  }
 0x225   : > { %10601 = vmatpush1.bf16.msra.mxu0 %v14750_v21  ;;  %v14804_v21 = vld [vmem:[%s16929_s29 + $0x1c84] ss:$16 sps:$4 sm:$0xff]  }
 0x226   : > { %10642 = vmatpush1.bf16.msra.mxu1 %v14753_v22  ;;  %10602 = vmatprep.subr.bf16.mxu0 %v14758_v27  ;;  %v14807_v22 = vld [vmem:[%s16929_s29 + $0x1e84] ss:$16 sps:$4 sm:$0xff]   ;;  %v14802_v27 = vld [vmem:[%s16929_s29 + $0x1c80] ss:$16 sps:$4 sm:$0xff]  }
 0x227   : > { %10643 = vmatprep.subr.bf16.mxu1 %v14761_v28  ;;  %v14805_v28 = vld [vmem:[%s16929_s29 + $0x1e80] ss:$16 sps:$4 sm:$0xff]  }
 0x229   : > { %10603 = vmatpush1.bf16.msra.mxu0 %v14756_v29  ;;  %v14810_v29 = vld [vmem:[%s16929_s29 + $0x1ca4] ss:$16 sps:$4 sm:$0xff]  }
 0x22a   : > { %10644 = vmatpush1.bf16.msra.mxu1 %v14759_v30  ;;  %10604 = vmatprep.subr.bf16.mxu0 %v14764_v31  ;;  %v14813_v30 = vld [vmem:[%s16929_s29 + $0x1ea4] ss:$16 sps:$4 sm:$0xff]   ;;  %v14808_v31 = vld [vmem:[%s16929_s29 + $0x1ca0] ss:$16 sps:$4 sm:$0xff]  }
 0x22b   : > { %10645 = vmatprep.subr.bf16.mxu1 %v14767_v32  ;;  %v14811_v32 = vld [vmem:[%s16929_s29 + $0x1ea0] ss:$16 sps:$4 sm:$0xff]  }
 0x22d   : > { %10605 = vmatpush1.bf16.msra.mxu0 %v14762_v34  ;;  %v14816_v34 = vld [vmem:[%s16929_s29 + $0x1cc4] ss:$16 sps:$4 sm:$0xff]  }
 0x22e   : > { %10646 = vmatpush1.bf16.msra.mxu1 %v14765_v36  ;;  %10606 = vmatprep.subr.bf16.mxu0 %v14770_v43  ;;  %v14819_v36 = vld [vmem:[%s16929_s29 + $0x1ec4] ss:$16 sps:$4 sm:$0xff]  }
 0x22f   : > { %10647 = vmatprep.subr.bf16.mxu1 %v14773_v55 }
 0x231   : > { %10607 = vmatpush1.bf16.msra.mxu0 %v14768_v33  ;;  %v14814_v33 = vld [vmem:[%s16929_s29 + $0x1cc0] ss:$16 sps:$4 sm:$0xff]  }
 0x232   : > { %10648 = vmatpush1.bf16.msra.mxu1 %v14771_v56  ;;  %10658 = vmatprep.subr.bf16.mxu0 %v14780_v45  ;;  %v14817_v56 = vld [vmem:[%s16929_s29 + $0x1ec0] ss:$16 sps:$4 sm:$0xff]  }
 0x233   : > { %10699 = vmatprep.subr.bf16.mxu1 %v14783_v58 }
 0x234   : > { %10609 = vmatmul.mubr.bf16.vlgmr.msra.gmra.mrb[24].mxu0 %v17586_v1 }
 0x235   : > { %10650 = vmatmul.mubr.bf16.vlgmr.msra.gmra.mrb[24].mxu1 %v17590_v2  ;;  %10659 = vmatpush1.bf16.msra.mxu0 %v14778_v63 }
 0x236   : > { %10700 = vmatpush1.bf16.msra.mxu1 %v14781_v0  ;;  %10660 = vmatprep.subr.bf16.mxu0 %v14786_v5 }
 0x237   : > { %10701 = vmatprep.subr.bf16.mxu1 %v14789_v6  ;;  %10690 = vmatprep.mubr.bf16.mxu0 %v17602_v53 }
 0x238   : > { %10731 = vmatprep.mubr.bf16.mxu1 %v17606_v54 }
 0x239   : > { %10661 = vmatpush1.bf16.msra.mxu0 %v14784_v9 }
 0x23a   : > { %10702 = vmatpush1.bf16.msra.mxu1 %v14787_v10  ;;  %10662 = vmatprep.subr.bf16.mxu0 %v14792_v11 }
 0x23b   : > { %10703 = vmatprep.subr.bf16.mxu1 %v14795_v12  ;;  %v14825_v12 = vld [vmem:[%s16929_s29 + $0x1ee4] ss:$16 sps:$4 sm:$0xff]  }
 0x23d   : > { %10663 = vmatpush1.bf16.msra.mxu0 %v14790_v13 }
 0x23e   : > { %10704 = vmatpush1.bf16.msra.mxu1 %v14793_v14  ;;  %10664 = vmatprep.subr.bf16.mxu0 %v14798_v15  ;;  %v14823_v14 = vld [vmem:[%s16929_s29 + $0x1ee0] ss:$16 sps:$4 sm:$0xff]   ;;  %v14828_v15 = vld [vmem:[%s16929_s29 + $0x1d04] ss:$16 sps:$4 sm:$0xff]  }
 0x23f   : > { %10705 = vmatprep.subr.bf16.mxu1 %v14801_v16  ;;  %v14831_v16 = vld [vmem:[%s16929_s29 + $0x1f04] ss:$16 sps:$4 sm:$0xff]  }
 0x241   : > { %10665 = vmatpush1.bf16.msra.mxu0 %v14796_v19  ;;  %v14826_v19 = vld [vmem:[%s16929_s29 + $0x1d00] ss:$16 sps:$4 sm:$0xff]  }
 0x242   : > { %10706 = vmatpush1.bf16.msra.mxu1 %v14799_v20  ;;  %10666 = vmatprep.subr.bf16.mxu0 %v14804_v21  ;;  %v14829_v20 = vld [vmem:[%s16929_s29 + $0x1f00] ss:$16 sps:$4 sm:$0xff]   ;;  %v14834_v21 = vld [vmem:[%s16929_s29 + $0x1d24] ss:$16 sps:$4 sm:$0xff]  }
 0x243   : > { %10707 = vmatprep.subr.bf16.mxu1 %v14807_v22  ;;  %v14837_v22 = vld [vmem:[%s16929_s29 + $0x1f24] ss:$16 sps:$4 sm:$0xff]  }
 0x245   : > { %10667 = vmatpush1.bf16.msra.mxu0 %v14802_v27  ;;  %v14832_v27 = vld [vmem:[%s16929_s29 + $0x1d20] ss:$16 sps:$4 sm:$0xff]  }
 0x246   : > { %10708 = vmatpush1.bf16.msra.mxu1 %v14805_v28  ;;  %10668 = vmatprep.subr.bf16.mxu0 %v14810_v29  ;;  %v14835_v28 = vld [vmem:[%s16929_s29 + $0x1f20] ss:$16 sps:$4 sm:$0xff]   ;;  %v14840_v29 = vld [vmem:[%s16929_s29 + $0x1d44] ss:$16 sps:$4 sm:$0xff]  }
 0x247   : > { %10709 = vmatprep.subr.bf16.mxu1 %v14813_v30  ;;  %v10364_v43 = vpop.f32.mrb[12].mxu0  ;;  %v14843_v30 = vld [vmem:[%s16929_s29 + $0x1f44] ss:$16 sps:$4 sm:$0xff]  }
 0x248   : > { %v10405_v55 = vpop.f32.mrb[12].mxu1  ;;  %v10365_v45 = vadd.f32 %v10364_v43, %v17540_v35  ;;  %v10366_v58 = vpop.f32.mrb[13].mxu0  ;;  %v14822_v35 = vld [vmem:[%s16929_s29 + $0x1ce4] ss:$16 sps:$4 sm:$0xff]   ;;  %v14844_v43 = vld [vmem:[%s16929_s29 + $0x1d60] ss:$16 sps:$4 sm:$0xff]  }
 0x249   : > { %v10407_v63 = vpop.f32.mrb[13].mxu1  ;;  %v10367_v0 = vadd.f32 %v10366_v58, %v17544_v57  ;;  %v10368_v5 = vpop.f32.mrb[14].mxu0  ;;  %10669 = vmatpush1.bf16.msra.mxu0 %v14808_v31  ;;  %v14820_v57 = vld [vmem:[%s16929_s29 + $0x1ce0] ss:$16 sps:$4 sm:$0xff]  }
 0x24a   : > { %v10409_v6 = vpop.f32.mrb[14].mxu1  ;;  %10710 = vmatpush1.bf16.msra.mxu1 %v14811_v32  ;;  %v17636_v9 = vadd.f32 %v10405_v55, %v10365_v45  ;;  %v10369_v10 = vpop.f32.mrb[15].mxu0  ;;  %10670 = vmatprep.subr.bf16.mxu0 %v14816_v34  ;;  %v14838_v31 = vld [vmem:[%s16929_s29 + $0x1d40] ss:$16 sps:$4 sm:$0xff]   ;;  %v14846_v34 = vld [vmem:[%s16929_s29 + $0x1d64] ss:$16 sps:$4 sm:$0xff]  }
 0x24b   : > { %v10410_v11 = vpop.f32.mrb[15].mxu1  ;;  %10711 = vmatprep.subr.bf16.mxu1 %v14819_v36  ;;  %v17640_v13 = vadd.f32 %v10407_v63, %v10367_v0  ;;  %v14841_v32 = vld [vmem:[%s16929_s29 + $0x1f40] ss:$16 sps:$4 sm:$0xff]   ;;  %v14849_v36 = vld [vmem:[%s16929_s29 + $0x1f64] ss:$16 sps:$4 sm:$0xff]  }
 0x24c   : > { %v14847_v55 = vld [vmem:[%s16929_s29 + $0x1f60] ss:$16 sps:$4 sm:$0xff]   ;;  %v14858_v63 = vld [vmem:[%s16929_s29 + $0x1da4] ss:$16 sps:$4 sm:$0xff]  }
 0x24d   : > { %10671 = vmatpush1.bf16.msra.mxu0 %v14814_v33  ;;  %v14852_v33 = vld [vmem:[%s16929_s29 + $0x1d84] ss:$16 sps:$4 sm:$0xff]   ;;  %v14850_v45 = vld [vmem:[%s16929_s29 + $0x1d80] ss:$16 sps:$4 sm:$0xff]  }
 0x24e   : > { %10712 = vmatpush1.bf16.msra.mxu1 %v14817_v56  ;;  %10672 = vmatprep.subr.bf16.mxu0 %v14822_v35  ;;  %v14855_v56 = vld [vmem:[%s16929_s29 + $0x1f84] ss:$16 sps:$4 sm:$0xff]   ;;  %v14853_v58 = vld [vmem:[%s16929_s29 + $0x1f80] ss:$16 sps:$4 sm:$0xff]  }
 0x24f   : > { %10713 = vmatprep.subr.bf16.mxu1 %v14825_v12  ;;  %v14861_v0 = vld [vmem:[%s16929_s29 + $0x1fa4] ss:$16 sps:$4 sm:$0xff]   ;;  %v14856_v5 = vld [vmem:[%s16929_s29 + $0x1da0] ss:$16 sps:$4 sm:$0xff]  }
 0x250   : > { %v14859_v6 = vld [vmem:[%s16929_s29 + $0x1fa0] ss:$16 sps:$4 sm:$0xff]   ;;  %v14864_v10 = vld [vmem:[%s16929_s29 + $0x1dc4] ss:$16 sps:$4 sm:$0xff]  }
 0x251   : > { %10673 = vmatpush1.bf16.msra.mxu0 %v14820_v57  ;;  %v14867_v11 = vld [vmem:[%s16929_s29 + $0x1fc4] ss:$16 sps:$4 sm:$0xff]   ;;  %v14862_v35 = vld [vmem:[%s16929_s29 + $0x1dc0] ss:$16 sps:$4 sm:$0xff]  }
 0x252   : > { %10714 = vmatpush1.bf16.msra.mxu1 %v14823_v14  ;;  %10674 = vmatprep.subr.bf16.mxu0 %v14828_v15  ;;  %v14865_v12 = vld [vmem:[%s16929_s29 + $0x1fc0] ss:$16 sps:$4 sm:$0xff]   ;;  %v14870_v57 = vld [vmem:[%s16929_s29 + $0x1de4] ss:$16 sps:$4 sm:$0xff]  }
 0x253   : > { %10715 = vmatprep.subr.bf16.mxu1 %v14831_v16  ;;  %v14873_v14 = vld [vmem:[%s16929_s29 + $0x1fe4] ss:$16 sps:$4 sm:$0xff]   ;;  %v14868_v15 = vld [vmem:[%s16929_s29 + $0x1de0] ss:$16 sps:$4 sm:$0xff]  }
 0x254   : > { %v14871_v16 = vld [vmem:[%s16929_s29 + $0x1fe0] ss:$16 sps:$4 sm:$0xff]  }
 0x255   : > { %10675 = vmatpush1.bf16.msra.mxu0 %v14826_v19  ;;  %v14880_v19 = vld [vmem:[%s16929_s29 + $0x2004] ss:$16 sps:$4 sm:$0xff]  }
 0x256   : > { %10716 = vmatpush1.bf16.msra.mxu1 %v14829_v20  ;;  %10676 = vmatprep.subr.bf16.mxu0 %v14834_v21  ;;  %v14883_v20 = vld [vmem:[%s16929_s29 + $0x2204] ss:$16 sps:$4 sm:$0xff]   ;;  %v14878_v21 = vld [vmem:[%s16929_s29 + $0x2000] ss:$16 sps:$4 sm:$0xff]  }
 0x257   : > { %10717 = vmatprep.subr.bf16.mxu1 %v14837_v22  ;;  %v14881_v22 = vld [vmem:[%s16929_s29 + $0x2200] ss:$16 sps:$4 sm:$0xff]  }
 0x259   : > { %10677 = vmatpush1.bf16.msra.mxu0 %v14832_v27  ;;  %v17682_v27 = vcombine.low %v17593_v3, %v17593_v3 }
 0x25a   : > { %10718 = vmatpush1.bf16.msra.mxu1 %v14835_v28  ;;  %10678 = vmatprep.subr.bf16.mxu0 %v14840_v29  ;;  %v17686_v28 = vcombine.low %v17596_v4, %v17596_v4  ;;  %v17689_v29 = vld [vmem:[%s16953_s9 + $0x80] sm:$0xff] }
 0x25b   : > { %10719 = vmatprep.subr.bf16.mxu1 %v14843_v30  ;;  %v17692_v30 = vld [vmem:[%s16953_s9 + $0x88] sm:$0xff]  ;;  %v17698_v3 = vcombine.high %v17689_v29, %v17689_v29 }
 0x25c   : > { %v17702_v4 = vcombine.high %v17692_v30, %v17692_v30 }
 0x25d   : > { %10679 = vmatpush1.bf16.msra.mxu0 %v14838_v31  ;;  %v14886_v31 = vld [vmem:[%s16929_s29 + $0x2024] ss:$16 sps:$4 sm:$0xff]  }
 0x25e   : > { %10720 = vmatpush1.bf16.msra.mxu1 %v14841_v32  ;;  %10680 = vmatprep.subr.bf16.mxu0 %v14846_v34  ;;  %v14889_v32 = vld [vmem:[%s16929_s29 + $0x2224] ss:$16 sps:$4 sm:$0xff]   ;;  %v14884_v34 = vld [vmem:[%s16929_s29 + $0x2020] ss:$16 sps:$4 sm:$0xff]  }
 0x25f   : > { %10721 = vmatprep.subr.bf16.mxu1 %v14849_v36  ;;  %v14887_v36 = vld [vmem:[%s16929_s29 + $0x2220] ss:$16 sps:$4 sm:$0xff]  }
 0x261   : > { %10681 = vmatpush1.bf16.msra.mxu0 %v14844_v43  ;;  %v14892_v43 = vld [vmem:[%s16929_s29 + $0x2044] ss:$16 sps:$4 sm:$0xff]  }
 0x262   : > { %10722 = vmatpush1.bf16.msra.mxu1 %v14847_v55  ;;  %10682 = vmatprep.subr.bf16.mxu0 %v14852_v33  ;;  %v14895_v55 = vld [vmem:[%s16929_s29 + $0x2244] ss:$16 sps:$4 sm:$0xff]   ;;  %v14890_v33 = vld [vmem:[%s16929_s29 + $0x2040] ss:$16 sps:$4 sm:$0xff]  }
 0x263   : > { %10723 = vmatprep.subr.bf16.mxu1 %v14855_v56  ;;  %v14893_v56 = vld [vmem:[%s16929_s29 + $0x2240] ss:$16 sps:$4 sm:$0xff]  }
 0x265   : > { %10683 = vmatpush1.bf16.msra.mxu0 %v14850_v45  ;;  %v14898_v45 = vld [vmem:[%s16929_s29 + $0x2064] ss:$16 sps:$4 sm:$0xff]  }
 0x266   : > { %10724 = vmatpush1.bf16.msra.mxu1 %v14853_v58  ;;  %10684 = vmatprep.subr.bf16.mxu0 %v14858_v63  ;;  %v14901_v58 = vld [vmem:[%s16929_s29 + $0x2264] ss:$16 sps:$4 sm:$0xff]   ;;  %v14896_v63 = vld [vmem:[%s16929_s29 + $0x2060] ss:$16 sps:$4 sm:$0xff]  }
 0x267   : > { %10725 = vmatprep.subr.bf16.mxu1 %v14861_v0  ;;  %v14899_v0 = vld [vmem:[%s16929_s29 + $0x2260] ss:$16 sps:$4 sm:$0xff]  }
 0x269   : > { %10685 = vmatpush1.bf16.msra.mxu0 %v14856_v5  ;;  %v14904_v5 = vld [vmem:[%s16929_s29 + $0x2084] ss:$16 sps:$4 sm:$0xff]  }
 0x26a   : > { %10726 = vmatpush1.bf16.msra.mxu1 %v14859_v6  ;;  %10686 = vmatprep.subr.bf16.mxu0 %v14864_v10  ;;  %v14907_v6 = vld [vmem:[%s16929_s29 + $0x2284] ss:$16 sps:$4 sm:$0xff]   ;;  %v14902_v10 = vld [vmem:[%s16929_s29 + $0x2080] ss:$16 sps:$4 sm:$0xff]  }
 0x26b   : > { %10727 = vmatprep.subr.bf16.mxu1 %v14867_v11  ;;  %v14905_v11 = vld [vmem:[%s16929_s29 + $0x2280] ss:$16 sps:$4 sm:$0xff]  }
 0x26d   : > { %10687 = vmatpush1.bf16.msra.mxu0 %v14862_v35  ;;  %v14910_v35 = vld [vmem:[%s16929_s29 + $0x20a4] ss:$16 sps:$4 sm:$0xff]  }
 0x26e   : > { %10728 = vmatpush1.bf16.msra.mxu1 %v14865_v12  ;;  %10688 = vmatprep.subr.bf16.mxu0 %v14870_v57  ;;  %v14913_v12 = vld [vmem:[%s16929_s29 + $0x22a4] ss:$16 sps:$4 sm:$0xff]   ;;  %v14908_v57 = vld [vmem:[%s16929_s29 + $0x20a0] ss:$16 sps:$4 sm:$0xff]  }
 0x26f   : > { %10729 = vmatprep.subr.bf16.mxu1 %v14873_v14  ;;  %v14911_v14 = vld [vmem:[%s16929_s29 + $0x22a0] ss:$16 sps:$4 sm:$0xff]  }
 0x271   : > { %10689 = vmatpush1.bf16.msra.mxu0 %v14868_v15  ;;  %v14916_v15 = vld [vmem:[%s16929_s29 + $0x20c4] ss:$16 sps:$4 sm:$0xff]  }
 0x272   : > { %10730 = vmatpush1.bf16.msra.mxu1 %v14871_v16  ;;  %10740 = vmatprep.subr.bf16.mxu0 %v14880_v19  ;;  %v14919_v16 = vld [vmem:[%s16929_s29 + $0x22c4] ss:$16 sps:$4 sm:$0xff]  }
 0x273   : > { %10781 = vmatprep.subr.bf16.mxu1 %v14883_v20 }
 0x274   : > { %10691 = vmatmul.mubr.bf16.vlgmr.msra.gmra.mrb[28].mxu0 %v17682_v27 }
 0x275   : > { %10732 = vmatmul.mubr.bf16.vlgmr.msra.gmra.mrb[28].mxu1 %v17686_v28  ;;  %10741 = vmatpush1.bf16.msra.mxu0 %v14878_v21  ;;  %v14914_v21 = vld [vmem:[%s16929_s29 + $0x20c0] ss:$16 sps:$4 sm:$0xff]  }
 0x276   : > { %10782 = vmatpush1.bf16.msra.mxu1 %v14881_v22  ;;  %10742 = vmatprep.subr.bf16.mxu0 %v14886_v31  ;;  %v14917_v22 = vld [vmem:[%s16929_s29 + $0x22c0] ss:$16 sps:$4 sm:$0xff]  }
 0x277   : > { %10783 = vmatprep.subr.bf16.mxu1 %v14889_v32  ;;  %10772 = vmatprep.mubr.bf16.mxu0 %v17698_v3 }
 0x278   : > { %10813 = vmatprep.mubr.bf16.mxu1 %v17702_v4 }
 0x279   : > { %10743 = vmatpush1.bf16.msra.mxu0 %v14884_v34 }
 0x27a   : > { %10784 = vmatpush1.bf16.msra.mxu1 %v14887_v36  ;;  %10744 = vmatprep.subr.bf16.mxu0 %v14892_v43 }
 0x27b   : > { %10785 = vmatprep.subr.bf16.mxu1 %v14895_v55 }
 0x27d   : > { %10745 = vmatpush1.bf16.msra.mxu0 %v14890_v33 }
 0x27e   : > { %10786 = vmatpush1.bf16.msra.mxu1 %v14893_v56  ;;  %10746 = vmatprep.subr.bf16.mxu0 %v14898_v45 }
 0x27f   : > { %10787 = vmatprep.subr.bf16.mxu1 %v14901_v58  ;;  %v14925_v58 = vld [vmem:[%s16929_s29 + $0x22e4] ss:$16 sps:$4 sm:$0xff]  }
 0x281   : > { %10747 = vmatpush1.bf16.msra.mxu0 %v14896_v63 }
 0x282   : > { %10788 = vmatpush1.bf16.msra.mxu1 %v14899_v0  ;;  %10748 = vmatprep.subr.bf16.mxu0 %v14904_v5  ;;  %v14923_v0 = vld [vmem:[%s16929_s29 + $0x22e0] ss:$16 sps:$4 sm:$0xff]   ;;  %v14928_v5 = vld [vmem:[%s16929_s29 + $0x2104] ss:$16 sps:$4 sm:$0xff]  }
 0x283   : > { %10789 = vmatprep.subr.bf16.mxu1 %v14907_v6  ;;  %v14931_v6 = vld [vmem:[%s16929_s29 + $0x2304] ss:$16 sps:$4 sm:$0xff]  }
 0x285   : > { %10749 = vmatpush1.bf16.msra.mxu0 %v14902_v10  ;;  %v14926_v10 = vld [vmem:[%s16929_s29 + $0x2100] ss:$16 sps:$4 sm:$0xff]  }
 0x286   : > { %10790 = vmatpush1.bf16.msra.mxu1 %v14905_v11  ;;  %10750 = vmatprep.subr.bf16.mxu0 %v14910_v35  ;;  %v14929_v11 = vld [vmem:[%s16929_s29 + $0x2300] ss:$16 sps:$4 sm:$0xff]   ;;  %v14934_v35 = vld [vmem:[%s16929_s29 + $0x2124] ss:$16 sps:$4 sm:$0xff]  }
 0x287   : > { %10791 = vmatprep.subr.bf16.mxu1 %v14913_v12  ;;  %v10446_v19 = vpop.f32.mrb[16].mxu0  ;;  %v14937_v12 = vld [vmem:[%s16929_s29 + $0x2324] ss:$16 sps:$4 sm:$0xff]  }
 0x288   : > { %v10487_v20 = vpop.f32.mrb[16].mxu1  ;;  %v10447_v31 = vadd.f32 %v10446_v19, %v17636_v9  ;;  %v10448_v32 = vpop.f32.mrb[17].mxu0  ;;  %v14922_v9 = vld [vmem:[%s16929_s29 + $0x20e4] ss:$16 sps:$4 sm:$0xff]   ;;  %v14938_v19 = vld [vmem:[%s16929_s29 + $0x2140] ss:$16 sps:$4 sm:$0xff]  }
 0x289   : > { %v10489_v34 = vpop.f32.mrb[17].mxu1  ;;  %v10449_v36 = vadd.f32 %v10448_v32, %v17640_v13  ;;  %v10450_v43 = vpop.f32.mrb[18].mxu0  ;;  %10751 = vmatpush1.bf16.msra.mxu0 %v14908_v57  ;;  %v14920_v13 = vld [vmem:[%s16929_s29 + $0x20e0] ss:$16 sps:$4 sm:$0xff]  }
 0x28a   : > { %v10491_v55 = vpop.f32.mrb[18].mxu1  ;;  %10792 = vmatpush1.bf16.msra.mxu1 %v14911_v14  ;;  %v17732_v33 = vadd.f32 %v10487_v20, %v10447_v31  ;;  %v10451_v56 = vpop.f32.mrb[19].mxu0  ;;  %10752 = vmatprep.subr.bf16.mxu0 %v14916_v15  ;;  %v14932_v57 = vld [vmem:[%s16929_s29 + $0x2120] ss:$16 sps:$4 sm:$0xff]   ;;  %v14940_v15 = vld [vmem:[%s16929_s29 + $0x2144] ss:$16 sps:$4 sm:$0xff]  }
 0x28b   : > { %v10492_v45 = vpop.f32.mrb[19].mxu1  ;;  %10793 = vmatprep.subr.bf16.mxu1 %v14919_v16  ;;  %v17736_v63 = vadd.f32 %v10489_v34, %v10449_v36  ;;  %v14935_v14 = vld [vmem:[%s16929_s29 + $0x2320] ss:$16 sps:$4 sm:$0xff]   ;;  %v14943_v16 = vld [vmem:[%s16929_s29 + $0x2344] ss:$16 sps:$4 sm:$0xff]  }
 0x28c   : > { %v14941_v20 = vld [vmem:[%s16929_s29 + $0x2340] ss:$16 sps:$4 sm:$0xff]   ;;  %v14952_v34 = vld [vmem:[%s16929_s29 + $0x2184] ss:$16 sps:$4 sm:$0xff]  }
 0x28d   : > { %10753 = vmatpush1.bf16.msra.mxu0 %v14914_v21  ;;  %v14946_v21 = vld [vmem:[%s16929_s29 + $0x2164] ss:$16 sps:$4 sm:$0xff]   ;;  %v14944_v31 = vld [vmem:[%s16929_s29 + $0x2160] ss:$16 sps:$4 sm:$0xff]  }
 0x28e   : > { %10794 = vmatpush1.bf16.msra.mxu1 %v14917_v22  ;;  %10754 = vmatprep.subr.bf16.mxu0 %v14922_v9  ;;  %v14949_v22 = vld [vmem:[%s16929_s29 + $0x2364] ss:$16 sps:$4 sm:$0xff]   ;;  %v14947_v32 = vld [vmem:[%s16929_s29 + $0x2360] ss:$16 sps:$4 sm:$0xff]  }
 0x28f   : > { %10795 = vmatprep.subr.bf16.mxu1 %v14925_v58  ;;  %v14955_v36 = vld [vmem:[%s16929_s29 + $0x2384] ss:$16 sps:$4 sm:$0xff]   ;;  %v14950_v43 = vld [vmem:[%s16929_s29 + $0x2180] ss:$16 sps:$4 sm:$0xff]  }
 0x290   : > { %v14953_v55 = vld [vmem:[%s16929_s29 + $0x2380] ss:$16 sps:$4 sm:$0xff]   ;;  %v14958_v56 = vld [vmem:[%s16929_s29 + $0x21a4] ss:$16 sps:$4 sm:$0xff]  }
 0x291   : > { %10755 = vmatpush1.bf16.msra.mxu0 %v14920_v13  ;;  %v14961_v45 = vld [vmem:[%s16929_s29 + $0x23a4] ss:$16 sps:$4 sm:$0xff]   ;;  %v14956_v9 = vld [vmem:[%s16929_s29 + $0x21a0] ss:$16 sps:$4 sm:$0xff]  }
 0x292   : > { %10796 = vmatpush1.bf16.msra.mxu1 %v14923_v0  ;;  %10756 = vmatprep.subr.bf16.mxu0 %v14928_v5  ;;  %v14959_v58 = vld [vmem:[%s16929_s29 + $0x23a0] ss:$16 sps:$4 sm:$0xff]   ;;  %v14964_v13 = vld [vmem:[%s16929_s29 + $0x21c4] ss:$16 sps:$4 sm:$0xff]  }
 0x293   : > { %10797 = vmatprep.subr.bf16.mxu1 %v14931_v6  ;;  %v14967_v0 = vld [vmem:[%s16929_s29 + $0x23c4] ss:$16 sps:$4 sm:$0xff]   ;;  %v14962_v5 = vld [vmem:[%s16929_s29 + $0x21c0] ss:$16 sps:$4 sm:$0xff]  }
 0x294   : > { %v14965_v6 = vld [vmem:[%s16929_s29 + $0x23c0] ss:$16 sps:$4 sm:$0xff]  }
 0x295   : > { %10757 = vmatpush1.bf16.msra.mxu0 %v14926_v10  ;;  %v14970_v10 = vld [vmem:[%s16929_s29 + $0x21e4] ss:$16 sps:$4 sm:$0xff]  }
 0x296   : > { %10798 = vmatpush1.bf16.msra.mxu1 %v14929_v11  ;;  %10758 = vmatprep.subr.bf16.mxu0 %v14934_v35  ;;  %v14973_v11 = vld [vmem:[%s16929_s29 + $0x23e4] ss:$16 sps:$4 sm:$0xff]   ;;  %v14968_v35 = vld [vmem:[%s16929_s29 + $0x21e0] ss:$16 sps:$4 sm:$0xff]  }
 0x297   : > { %10799 = vmatprep.subr.bf16.mxu1 %v14937_v12  ;;  %v14971_v12 = vld [vmem:[%s16929_s29 + $0x23e0] ss:$16 sps:$4 sm:$0xff]  }
 0x299   : > { %10759 = vmatpush1.bf16.msra.mxu0 %v14932_v57  ;;  %v14980_v57 = vld [vmem:[%s16929_s29 + $0x2404] ss:$16 sps:$4 sm:$0xff]  }
 0x29a   : > { %10800 = vmatpush1.bf16.msra.mxu1 %v14935_v14  ;;  %10760 = vmatprep.subr.bf16.mxu0 %v14940_v15  ;;  %v14983_v14 = vld [vmem:[%s16929_s29 + $0x2604] ss:$16 sps:$4 sm:$0xff]   ;;  %v14978_v15 = vld [vmem:[%s16929_s29 + $0x2400] ss:$16 sps:$4 sm:$0xff]  }
 0x29b   : > { %10801 = vmatprep.subr.bf16.mxu1 %v14943_v16  ;;  %v14981_v16 = vld [vmem:[%s16929_s29 + $0x2600] ss:$16 sps:$4 sm:$0xff]  }
 0x29d   : > { %10761 = vmatpush1.bf16.msra.mxu0 %v14938_v19  ;;  %v17778_v19 = vcombine.low %v17689_v29, %v17689_v29 }
 0x29e   : > { %10802 = vmatpush1.bf16.msra.mxu1 %v14941_v20  ;;  %10762 = vmatprep.subr.bf16.mxu0 %v14946_v21  ;;  %v17782_v20 = vcombine.low %v17692_v30, %v17692_v30  ;;  %v17785_v21 = vld [vmem:[%s16953_s9 + $0x90] sm:$0xff] }
 0x29f   : > { %10803 = vmatprep.subr.bf16.mxu1 %v14949_v22  ;;  %v17788_v22 = vld [vmem:[%s16953_s9 + $0x98] sm:$0xff]  ;;  %v17794_v29 = vcombine.high %v17785_v21, %v17785_v21 }
 0x2a0   : > { %v17798_v30 = vcombine.high %v17788_v22, %v17788_v22 }
 0x2a1   : > { %10763 = vmatpush1.bf16.msra.mxu0 %v14944_v31  ;;  %v14986_v31 = vld [vmem:[%s16929_s29 + $0x2424] ss:$16 sps:$4 sm:$0xff]  }
 0x2a2   : > { %10804 = vmatpush1.bf16.msra.mxu1 %v14947_v32  ;;  %10764 = vmatprep.subr.bf16.mxu0 %v14952_v34  ;;  %v14989_v32 = vld [vmem:[%s16929_s29 + $0x2624] ss:$16 sps:$4 sm:$0xff]   ;;  %v14984_v34 = vld [vmem:[%s16929_s29 + $0x2420] ss:$16 sps:$4 sm:$0xff]  }
 0x2a3   : > { %10805 = vmatprep.subr.bf16.mxu1 %v14955_v36  ;;  %v14987_v36 = vld [vmem:[%s16929_s29 + $0x2620] ss:$16 sps:$4 sm:$0xff]  }
 0x2a5   : > { %10765 = vmatpush1.bf16.msra.mxu0 %v14950_v43  ;;  %v14992_v43 = vld [vmem:[%s16929_s29 + $0x2444] ss:$16 sps:$4 sm:$0xff]  }
 0x2a6   : > { %10806 = vmatpush1.bf16.msra.mxu1 %v14953_v55  ;;  %10766 = vmatprep.subr.bf16.mxu0 %v14958_v56  ;;  %v14995_v55 = vld [vmem:[%s16929_s29 + $0x2644] ss:$16 sps:$4 sm:$0xff]   ;;  %v14990_v56 = vld [vmem:[%s16929_s29 + $0x2440] ss:$16 sps:$4 sm:$0xff]  }
 0x2a7   : > { %10807 = vmatprep.subr.bf16.mxu1 %v14961_v45  ;;  %v14993_v45 = vld [vmem:[%s16929_s29 + $0x2640] ss:$16 sps:$4 sm:$0xff]  }
 0x2a9   : > { %10767 = vmatpush1.bf16.msra.mxu0 %v14956_v9  ;;  %v14998_v9 = vld [vmem:[%s16929_s29 + $0x2464] ss:$16 sps:$4 sm:$0xff]  }
 0x2aa   : > { %10808 = vmatpush1.bf16.msra.mxu1 %v14959_v58  ;;  %10768 = vmatprep.subr.bf16.mxu0 %v14964_v13  ;;  %v15001_v58 = vld [vmem:[%s16929_s29 + $0x2664] ss:$16 sps:$4 sm:$0xff]   ;;  %v14996_v13 = vld [vmem:[%s16929_s29 + $0x2460] ss:$16 sps:$4 sm:$0xff]  }
 0x2ab   : > { %10809 = vmatprep.subr.bf16.mxu1 %v14967_v0  ;;  %v14999_v0 = vld [vmem:[%s16929_s29 + $0x2660] ss:$16 sps:$4 sm:$0xff]  }
 0x2ad   : > { %10769 = vmatpush1.bf16.msra.mxu0 %v14962_v5  ;;  %v15004_v5 = vld [vmem:[%s16929_s29 + $0x2484] ss:$16 sps:$4 sm:$0xff]  }
 0x2ae   : > { %10810 = vmatpush1.bf16.msra.mxu1 %v14965_v6  ;;  %10770 = vmatprep.subr.bf16.mxu0 %v14970_v10  ;;  %v15007_v6 = vld [vmem:[%s16929_s29 + $0x2684] ss:$16 sps:$4 sm:$0xff]   ;;  %v15002_v10 = vld [vmem:[%s16929_s29 + $0x2480] ss:$16 sps:$4 sm:$0xff]  }
 0x2af   : > { %10811 = vmatprep.subr.bf16.mxu1 %v14973_v11  ;;  %v15005_v11 = vld [vmem:[%s16929_s29 + $0x2680] ss:$16 sps:$4 sm:$0xff]  }
 0x2b1   : > { %10771 = vmatpush1.bf16.msra.mxu0 %v14968_v35  ;;  %v15010_v35 = vld [vmem:[%s16929_s29 + $0x24a4] ss:$16 sps:$4 sm:$0xff]  }
 0x2b2   : > { %10812 = vmatpush1.bf16.msra.mxu1 %v14971_v12  ;;  %10822 = vmatprep.subr.bf16.mxu0 %v14980_v57  ;;  %v15013_v12 = vld [vmem:[%s16929_s29 + $0x26a4] ss:$16 sps:$4 sm:$0xff]   ;;  %v15008_v57 = vld [vmem:[%s16929_s29 + $0x24a0] ss:$16 sps:$4 sm:$0xff]  }
 0x2b3   : > { %10863 = vmatprep.subr.bf16.mxu1 %v14983_v14  ;;  %v15011_v14 = vld [vmem:[%s16929_s29 + $0x26a0] ss:$16 sps:$4 sm:$0xff]  }
 0x2b4   : > { %10773 = vmatmul.mubr.bf16.vlgmr.msra.gmra.mrb[32].mxu0 %v17778_v19 }
 0x2b5   : > { %10814 = vmatmul.mubr.bf16.vlgmr.msra.gmra.mrb[32].mxu1 %v17782_v20  ;;  %10823 = vmatpush1.bf16.msra.mxu0 %v14978_v15  ;;  %v15016_v15 = vld [vmem:[%s16929_s29 + $0x24c4] ss:$16 sps:$4 sm:$0xff]  }
 0x2b6   : > { %10864 = vmatpush1.bf16.msra.mxu1 %v14981_v16  ;;  %10824 = vmatprep.subr.bf16.mxu0 %v14986_v31  ;;  %v15019_v16 = vld [vmem:[%s16929_s29 + $0x26c4] ss:$16 sps:$4 sm:$0xff]  }
 0x2b7   : > { %10865 = vmatprep.subr.bf16.mxu1 %v14989_v32  ;;  %10854 = vmatprep.mubr.bf16.mxu0 %v17794_v29 }
 0x2b8   : > { %10895 = vmatprep.mubr.bf16.mxu1 %v17798_v30 }
 0x2b9   : > { %10825 = vmatpush1.bf16.msra.mxu0 %v14984_v34  ;;  %v15014_v34 = vld [vmem:[%s16929_s29 + $0x24c0] ss:$16 sps:$4 sm:$0xff]  }
 0x2ba   : > { %10866 = vmatpush1.bf16.msra.mxu1 %v14987_v36  ;;  %10826 = vmatprep.subr.bf16.mxu0 %v14992_v43  ;;  %v15017_v36 = vld [vmem:[%s16929_s29 + $0x26c0] ss:$16 sps:$4 sm:$0xff]  }
 0x2bb   : > { %10867 = vmatprep.subr.bf16.mxu1 %v14995_v55 }
 0x2bd   : > { %10827 = vmatpush1.bf16.msra.mxu0 %v14990_v56 }
 0x2be   : > { %10868 = vmatpush1.bf16.msra.mxu1 %v14993_v45  ;;  %10828 = vmatprep.subr.bf16.mxu0 %v14998_v9 }
 0x2bf   : > { %10869 = vmatprep.subr.bf16.mxu1 %v15001_v58 }
 0x2c1   : > { %10829 = vmatpush1.bf16.msra.mxu0 %v14996_v13 }
 0x2c2   : > { %10870 = vmatpush1.bf16.msra.mxu1 %v14999_v0  ;;  %10830 = vmatprep.subr.bf16.mxu0 %v15004_v5 }
 0x2c3   : > { %10871 = vmatprep.subr.bf16.mxu1 %v15007_v6  ;;  %v15025_v6 = vld [vmem:[%s16929_s29 + $0x26e4] ss:$16 sps:$4 sm:$0xff]  }
 0x2c5   : > { %10831 = vmatpush1.bf16.msra.mxu0 %v15002_v10 }
 0x2c6   : > { %10872 = vmatpush1.bf16.msra.mxu1 %v15005_v11  ;;  %10832 = vmatprep.subr.bf16.mxu0 %v15010_v35  ;;  %v15023_v11 = vld [vmem:[%s16929_s29 + $0x26e0] ss:$16 sps:$4 sm:$0xff]   ;;  %v15028_v35 = vld [vmem:[%s16929_s29 + $0x2504] ss:$16 sps:$4 sm:$0xff]  }
 0x2c7   : > { %10873 = vmatprep.subr.bf16.mxu1 %v15013_v12  ;;  %v10528_v31 = vpop.f32.mrb[20].mxu0  ;;  %v15031_v12 = vld [vmem:[%s16929_s29 + $0x2704] ss:$16 sps:$4 sm:$0xff]  }
 0x2c8   : > { %v10569_v32 = vpop.f32.mrb[20].mxu1  ;;  %v10529_v43 = vadd.f32 %v10528_v31, %v17732_v33  ;;  %v10530_v55 = vpop.f32.mrb[21].mxu0  ;;  %v15022_v33 = vld [vmem:[%s16929_s29 + $0x24e4] ss:$16 sps:$4 sm:$0xff]   ;;  %v15032_v31 = vld [vmem:[%s16929_s29 + $0x2520] ss:$16 sps:$4 sm:$0xff]  }
 0x2c9   : > { %v10571_v56 = vpop.f32.mrb[21].mxu1  ;;  %v10531_v45 = vadd.f32 %v10530_v55, %v17736_v63  ;;  %v10532_v9 = vpop.f32.mrb[22].mxu0  ;;  %10833 = vmatpush1.bf16.msra.mxu0 %v15008_v57  ;;  %v15020_v63 = vld [vmem:[%s16929_s29 + $0x24e0] ss:$16 sps:$4 sm:$0xff]  }
 0x2ca   : > { %v10573_v58 = vpop.f32.mrb[22].mxu1  ;;  %10874 = vmatpush1.bf16.msra.mxu1 %v15011_v14  ;;  %v17828_v13 = vadd.f32 %v10569_v32, %v10529_v43  ;;  %v10533_v0 = vpop.f32.mrb[23].mxu0  ;;  %10834 = vmatprep.subr.bf16.mxu0 %v15016_v15  ;;  %v15026_v57 = vld [vmem:[%s16929_s29 + $0x2500] ss:$16 sps:$4 sm:$0xff]   ;;  %v15034_v15 = vld [vmem:[%s16929_s29 + $0x2524] ss:$16 sps:$4 sm:$0xff]  }
 0x2cb   : > { %v10574_v5 = vpop.f32.mrb[23].mxu1  ;;  %10875 = vmatprep.subr.bf16.mxu1 %v15019_v16  ;;  %v17832_v10 = vadd.f32 %v10571_v56, %v10531_v45  ;;  %v15029_v14 = vld [vmem:[%s16929_s29 + $0x2700] ss:$16 sps:$4 sm:$0xff]   ;;  %v15037_v16 = vld [vmem:[%s16929_s29 + $0x2724] ss:$16 sps:$4 sm:$0xff]  }
 0x2cc   : > { %v15035_v32 = vld [vmem:[%s16929_s29 + $0x2720] ss:$16 sps:$4 sm:$0xff]   ;;  %v15046_v56 = vld [vmem:[%s16929_s29 + $0x2564] ss:$16 sps:$4 sm:$0xff]  }
 0x2cd   : > { %10835 = vmatpush1.bf16.msra.mxu0 %v15014_v34  ;;  %v15040_v34 = vld [vmem:[%s16929_s29 + $0x2544] ss:$16 sps:$4 sm:$0xff]   ;;  %v15038_v43 = vld [vmem:[%s16929_s29 + $0x2540] ss:$16 sps:$4 sm:$0xff]  }
 0x2ce   : > { %10876 = vmatpush1.bf16.msra.mxu1 %v15017_v36  ;;  %10836 = vmatprep.subr.bf16.mxu0 %v15022_v33  ;;  %v15043_v36 = vld [vmem:[%s16929_s29 + $0x2744] ss:$16 sps:$4 sm:$0xff]   ;;  %v15041_v55 = vld [vmem:[%s16929_s29 + $0x2740] ss:$16 sps:$4 sm:$0xff]  }
 0x2cf   : > { %10877 = vmatprep.subr.bf16.mxu1 %v15025_v6  ;;  %v15049_v45 = vld [vmem:[%s16929_s29 + $0x2764] ss:$16 sps:$4 sm:$0xff]   ;;  %v15044_v9 = vld [vmem:[%s16929_s29 + $0x2560] ss:$16 sps:$4 sm:$0xff]  }
 0x2d0   : > { %v15047_v58 = vld [vmem:[%s16929_s29 + $0x2760] ss:$16 sps:$4 sm:$0xff]   ;;  %v15052_v0 = vld [vmem:[%s16929_s29 + $0x2584] ss:$16 sps:$4 sm:$0xff]  }
 0x2d1   : > { %10837 = vmatpush1.bf16.msra.mxu0 %v15020_v63  ;;  %v15055_v5 = vld [vmem:[%s16929_s29 + $0x2784] ss:$16 sps:$4 sm:$0xff]   ;;  %v15050_v33 = vld [vmem:[%s16929_s29 + $0x2580] ss:$16 sps:$4 sm:$0xff]  }
 0x2d2   : > { %10878 = vmatpush1.bf16.msra.mxu1 %v15023_v11  ;;  %10838 = vmatprep.subr.bf16.mxu0 %v15028_v35  ;;  %v15053_v6 = vld [vmem:[%s16929_s29 + $0x2780] ss:$16 sps:$4 sm:$0xff]   ;;  %v15058_v63 = vld [vmem:[%s16929_s29 + $0x25a4] ss:$16 sps:$4 sm:$0xff]  }
 0x2d3   : > { %10879 = vmatprep.subr.bf16.mxu1 %v15031_v12  ;;  %v15061_v11 = vld [vmem:[%s16929_s29 + $0x27a4] ss:$16 sps:$4 sm:$0xff]   ;;  %v15056_v35 = vld [vmem:[%s16929_s29 + $0x25a0] ss:$16 sps:$4 sm:$0xff]  }
 0x2d4   : > { %v15059_v12 = vld [vmem:[%s16929_s29 + $0x27a0] ss:$16 sps:$4 sm:$0xff]  }
 0x2d5   : > { %10839 = vmatpush1.bf16.msra.mxu0 %v15026_v57  ;;  %v15064_v57 = vld [vmem:[%s16929_s29 + $0x25c4] ss:$16 sps:$4 sm:$0xff]  }
 0x2d6   : > { %10880 = vmatpush1.bf16.msra.mxu1 %v15029_v14  ;;  %10840 = vmatprep.subr.bf16.mxu0 %v15034_v15  ;;  %v15067_v14 = vld [vmem:[%s16929_s29 + $0x27c4] ss:$16 sps:$4 sm:$0xff]   ;;  %v15062_v15 = vld [vmem:[%s16929_s29 + $0x25c0] ss:$16 sps:$4 sm:$0xff]  }
 0x2d7   : > { %10881 = vmatprep.subr.bf16.mxu1 %v15037_v16  ;;  %v15065_v16 = vld [vmem:[%s16929_s29 + $0x27c0] ss:$16 sps:$4 sm:$0xff]  }
 0x2d9   : > { %10841 = vmatpush1.bf16.msra.mxu0 %v15032_v31  ;;  %v15070_v31 = vld [vmem:[%s16929_s29 + $0x25e4] ss:$16 sps:$4 sm:$0xff]  }
 0x2da   : > { %10882 = vmatpush1.bf16.msra.mxu1 %v15035_v32  ;;  %10842 = vmatprep.subr.bf16.mxu0 %v15040_v34  ;;  %v15073_v32 = vld [vmem:[%s16929_s29 + $0x27e4] ss:$16 sps:$4 sm:$0xff]   ;;  %v15068_v34 = vld [vmem:[%s16929_s29 + $0x25e0] ss:$16 sps:$4 sm:$0xff]  }
 0x2db   : > { %10883 = vmatprep.subr.bf16.mxu1 %v15043_v36  ;;  %v15071_v36 = vld [vmem:[%s16929_s29 + $0x27e0] ss:$16 sps:$4 sm:$0xff]  }
 0x2dd   : > { %10843 = vmatpush1.bf16.msra.mxu0 %v15038_v43  ;;  %v15080_v43 = vld [vmem:[%s16929_s29 + $0x2804] ss:$16 sps:$4 sm:$0xff]  }
 0x2de   : > { %10884 = vmatpush1.bf16.msra.mxu1 %v15041_v55  ;;  %10844 = vmatprep.subr.bf16.mxu0 %v15046_v56  ;;  %v15083_v55 = vld [vmem:[%s16929_s29 + $0x2a04] ss:$16 sps:$4 sm:$0xff]   ;;  %v15078_v56 = vld [vmem:[%s16929_s29 + $0x2800] ss:$16 sps:$4 sm:$0xff]  }
 0x2df   : > { %10885 = vmatprep.subr.bf16.mxu1 %v15049_v45  ;;  %v15081_v45 = vld [vmem:[%s16929_s29 + $0x2a00] ss:$16 sps:$4 sm:$0xff]  }
 0x2e1   : > { %10845 = vmatpush1.bf16.msra.mxu0 %v15044_v9  ;;  %v17874_v9 = vcombine.low %v17785_v21, %v17785_v21 }
 0x2e2   : > { %10886 = vmatpush1.bf16.msra.mxu1 %v15047_v58  ;;  %10846 = vmatprep.subr.bf16.mxu0 %v15052_v0  ;;  %v17878_v58 = vcombine.low %v17788_v22, %v17788_v22  ;;  %v17881_v0 = vld [vmem:[%s16953_s9 + $0xa0] sm:$0xff] }
 0x2e3   : > { %10887 = vmatprep.subr.bf16.mxu1 %v15055_v5  ;;  %v17884_v5 = vld [vmem:[%s16953_s9 + $0xa8] sm:$0xff]  ;;  %v17890_v21 = vcombine.high %v17881_v0, %v17881_v0 }
 0x2e4   : > { %v17894_v22 = vcombine.high %v17884_v5, %v17884_v5 }
 0x2e5   : > { %10847 = vmatpush1.bf16.msra.mxu0 %v15050_v33  ;;  %v15086_v33 = vld [vmem:[%s16929_s29 + $0x2824] ss:$16 sps:$4 sm:$0xff]  }
 0x2e6   : > { %10888 = vmatpush1.bf16.msra.mxu1 %v15053_v6  ;;  %10848 = vmatprep.subr.bf16.mxu0 %v15058_v63  ;;  %v15089_v6 = vld [vmem:[%s16929_s29 + $0x2a24] ss:$16 sps:$4 sm:$0xff]   ;;  %19117 = vst [vmem:[#allocation10_spill] sm:$0xff] %v17894_v22  ;;  %v15084_v63 = vld [vmem:[%s16929_s29 + $0x2820] ss:$16 sps:$4 sm:$0xff]  }
 0x2e7   : > { %10889 = vmatprep.subr.bf16.mxu1 %v15061_v11  ;;  %v15087_v11 = vld [vmem:[%s16929_s29 + $0x2a20] ss:$16 sps:$4 sm:$0xff]  }
 0x2e9   : > { %10849 = vmatpush1.bf16.msra.mxu0 %v15056_v35  ;;  %v15092_v35 = vld [vmem:[%s16929_s29 + $0x2844] ss:$16 sps:$4 sm:$0xff]  }
 0x2ea   : > { %10890 = vmatpush1.bf16.msra.mxu1 %v15059_v12  ;;  %10850 = vmatprep.subr.bf16.mxu0 %v15064_v57  ;;  %v15095_v12 = vld [vmem:[%s16929_s29 + $0x2a44] ss:$16 sps:$4 sm:$0xff]   ;;  %v15090_v57 = vld [vmem:[%s16929_s29 + $0x2840] ss:$16 sps:$4 sm:$0xff]  }
 0x2eb   : > { %10891 = vmatprep.subr.bf16.mxu1 %v15067_v14  ;;  %v15093_v14 = vld [vmem:[%s16929_s29 + $0x2a40] ss:$16 sps:$4 sm:$0xff]  }
 0x2ed   : > { %10851 = vmatpush1.bf16.msra.mxu0 %v15062_v15  ;;  %v15098_v15 = vld [vmem:[%s16929_s29 + $0x2864] ss:$16 sps:$4 sm:$0xff]  }
 0x2ee   : > { %10892 = vmatpush1.bf16.msra.mxu1 %v15065_v16  ;;  %10852 = vmatprep.subr.bf16.mxu0 %v15070_v31  ;;  %v15101_v16 = vld [vmem:[%s16929_s29 + $0x2a64] ss:$16 sps:$4 sm:$0xff]   ;;  %v15096_v31 = vld [vmem:[%s16929_s29 + $0x2860] ss:$16 sps:$4 sm:$0xff]  }
 0x2ef   : > { %10893 = vmatprep.subr.bf16.mxu1 %v15073_v32  ;;  %v15099_v32 = vld [vmem:[%s16929_s29 + $0x2a60] ss:$16 sps:$4 sm:$0xff]  }
 0x2f1   : > { %10853 = vmatpush1.bf16.msra.mxu0 %v15068_v34  ;;  %v15104_v34 = vld [vmem:[%s16929_s29 + $0x2884] ss:$16 sps:$4 sm:$0xff]  }
 0x2f2   : > { %10894 = vmatpush1.bf16.msra.mxu1 %v15071_v36  ;;  %10904 = vmatprep.subr.bf16.mxu0 %v15080_v43  ;;  %v15107_v36 = vld [vmem:[%s16929_s29 + $0x2a84] ss:$16 sps:$4 sm:$0xff]   ;;  %v15102_v43 = vld [vmem:[%s16929_s29 + $0x2880] ss:$16 sps:$4 sm:$0xff]  }
 0x2f3   : > { %10945 = vmatprep.subr.bf16.mxu1 %v15083_v55  ;;  %v15105_v55 = vld [vmem:[%s16929_s29 + $0x2a80] ss:$16 sps:$4 sm:$0xff]  }
 0x2f4   : > { %10855 = vmatmul.mubr.bf16.vlgmr.msra.gmra.mrb[36].mxu0 %v17874_v9 }
 0x2f5   : > { %10896 = vmatmul.mubr.bf16.vlgmr.msra.gmra.mrb[36].mxu1 %v17878_v58  ;;  %10905 = vmatpush1.bf16.msra.mxu0 %v15078_v56  ;;  %v15110_v56 = vld [vmem:[%s16929_s29 + $0x28a4] ss:$16 sps:$4 sm:$0xff]  }
 0x2f6   : > { %10946 = vmatpush1.bf16.msra.mxu1 %v15081_v45  ;;  %10906 = vmatprep.subr.bf16.mxu0 %v15086_v33  ;;  %v15113_v45 = vld [vmem:[%s16929_s29 + $0x2aa4] ss:$16 sps:$4 sm:$0xff]   ;;  %v15108_v33 = vld [vmem:[%s16929_s29 + $0x28a0] ss:$16 sps:$4 sm:$0xff]  }
 0x2f7   : > { %10947 = vmatprep.subr.bf16.mxu1 %v15089_v6  ;;  %10936 = vmatprep.mubr.bf16.mxu0 %v17890_v21  ;;  %v15111_v6 = vld [vmem:[%s16929_s29 + $0x2aa0] ss:$16 sps:$4 sm:$0xff]  }
 0x2f8   : > { %10977 = vmatprep.mubr.bf16.mxu1 %v17894_v22 }
 0x2f9   : > { %10907 = vmatpush1.bf16.msra.mxu0 %v15084_v63  ;;  %v15116_v63 = vld [vmem:[%s16929_s29 + $0x28c4] ss:$16 sps:$4 sm:$0xff]  }
 0x2fa   : > { %10948 = vmatpush1.bf16.msra.mxu1 %v15087_v11  ;;  %10908 = vmatprep.subr.bf16.mxu0 %v15092_v35  ;;  %v15119_v11 = vld [vmem:[%s16929_s29 + $0x2ac4] ss:$16 sps:$4 sm:$0xff]  }
 0x2fb   : > { %10949 = vmatprep.subr.bf16.mxu1 %v15095_v12 }
 0x2fd   : > { %10909 = vmatpush1.bf16.msra.mxu0 %v15090_v57  ;;  %v15114_v57 = vld [vmem:[%s16929_s29 + $0x28c0] ss:$16 sps:$4 sm:$0xff]  }
 0x2fe   : > { %10950 = vmatpush1.bf16.msra.mxu1 %v15093_v14  ;;  %10910 = vmatprep.subr.bf16.mxu0 %v15098_v15  ;;  %v15117_v14 = vld [vmem:[%s16929_s29 + $0x2ac0] ss:$16 sps:$4 sm:$0xff]  }
 0x2ff   : > { %10951 = vmatprep.subr.bf16.mxu1 %v15101_v16 }
 0x301   : > { %10911 = vmatpush1.bf16.msra.mxu0 %v15096_v31 }
 0x302   : > { %10952 = vmatpush1.bf16.msra.mxu1 %v15099_v32  ;;  %10912 = vmatprep.subr.bf16.mxu0 %v15104_v34 }
 0x303   : > { %10953 = vmatprep.subr.bf16.mxu1 %v15107_v36 }
 0x305   : > { %10913 = vmatpush1.bf16.msra.mxu0 %v15102_v43 }
 0x306   : > { %10954 = vmatpush1.bf16.msra.mxu1 %v15105_v55  ;;  %10914 = vmatprep.subr.bf16.mxu0 %v15110_v56 }
 0x307   : > { %10955 = vmatprep.subr.bf16.mxu1 %v15113_v45  ;;  %v10610_v35 = vpop.f32.mrb[24].mxu0  ;;  %v15125_v45 = vld [vmem:[%s16929_s29 + $0x2ae4] ss:$16 sps:$4 sm:$0xff]  }
 0x308   : > { %v10651_v12 = vpop.f32.mrb[24].mxu1  ;;  %v10611_v15 = vadd.f32 %v10610_v35, %v17828_v13  ;;  %v10612_v16 = vpop.f32.mrb[25].mxu0  ;;  %v15122_v13 = vld [vmem:[%s16929_s29 + $0x28e4] ss:$16 sps:$4 sm:$0xff]  }
 0x309   : > { %v10653_v31 = vpop.f32.mrb[25].mxu1  ;;  %v10613_v32 = vadd.f32 %v10612_v16, %v17832_v10  ;;  %v10614_v34 = vpop.f32.mrb[26].mxu0  ;;  %10915 = vmatpush1.bf16.msra.mxu0 %v15108_v33  ;;  %v15120_v10 = vld [vmem:[%s16929_s29 + $0x28e0] ss:$16 sps:$4 sm:$0xff]  }
 0x30a   : > { %v10655_v36 = vpop.f32.mrb[26].mxu1  ;;  %10956 = vmatpush1.bf16.msra.mxu1 %v15111_v6  ;;  %v17924_v43 = vadd.f32 %v10651_v12, %v10611_v15  ;;  %v10615_v55 = vpop.f32.mrb[27].mxu0  ;;  %10916 = vmatprep.subr.bf16.mxu0 %v15116_v63  ;;  %v15123_v33 = vld [vmem:[%s16929_s29 + $0x2ae0] ss:$16 sps:$4 sm:$0xff]   ;;  %v15128_v6 = vld [vmem:[%s16929_s29 + $0x2904] ss:$16 sps:$4 sm:$0xff]  }
 0x30b   : > { %v10656_v56 = vpop.f32.mrb[27].mxu1  ;;  %10957 = vmatprep.subr.bf16.mxu1 %v15119_v11  ;;  %v17928_v35 = vadd.f32 %v10653_v31, %v10613_v32  ;;  %v15131_v12 = vld [vmem:[%s16929_s29 + $0x2b04] ss:$16 sps:$4 sm:$0xff]   ;;  %v15126_v63 = vld [vmem:[%s16929_s29 + $0x2900] ss:$16 sps:$4 sm:$0xff]  }
 0x30c   : > { %v15129_v11 = vld [vmem:[%s16929_s29 + $0x2b00] ss:$16 sps:$4 sm:$0xff]   ;;  %v15140_v31 = vld [vmem:[%s16929_s29 + $0x2944] ss:$16 sps:$4 sm:$0xff]  }
 0x30d   : > { %10917 = vmatpush1.bf16.msra.mxu0 %v15114_v57  ;;  %v15134_v57 = vld [vmem:[%s16929_s29 + $0x2924] ss:$16 sps:$4 sm:$0xff]   ;;  %v15132_v15 = vld [vmem:[%s16929_s29 + $0x2920] ss:$16 sps:$4 sm:$0xff]  }
 0x30e   : > { %10958 = vmatpush1.bf16.msra.mxu1 %v15117_v14  ;;  %10918 = vmatprep.subr.bf16.mxu0 %v15122_v13  ;;  %v15137_v14 = vld [vmem:[%s16929_s29 + $0x2b24] ss:$16 sps:$4 sm:$0xff]   ;;  %v15135_v16 = vld [vmem:[%s16929_s29 + $0x2b20] ss:$16 sps:$4 sm:$0xff]  }
 0x30f   : > { %10959 = vmatprep.subr.bf16.mxu1 %v15125_v45  ;;  %v15143_v32 = vld [vmem:[%s16929_s29 + $0x2b44] ss:$16 sps:$4 sm:$0xff]   ;;  %v15138_v34 = vld [vmem:[%s16929_s29 + $0x2940] ss:$16 sps:$4 sm:$0xff]  }
 0x310   : > { %v15141_v36 = vld [vmem:[%s16929_s29 + $0x2b40] ss:$16 sps:$4 sm:$0xff]   ;;  %v15146_v55 = vld [vmem:[%s16929_s29 + $0x2964] ss:$16 sps:$4 sm:$0xff]  }
 0x311   : > { %10919 = vmatpush1.bf16.msra.mxu0 %v15120_v10  ;;  %v15149_v56 = vld [vmem:[%s16929_s29 + $0x2b64] ss:$16 sps:$4 sm:$0xff]   ;;  %v15144_v13 = vld [vmem:[%s16929_s29 + $0x2960] ss:$16 sps:$4 sm:$0xff]  }
 0x312   : > { %10960 = vmatpush1.bf16.msra.mxu1 %v15123_v33  ;;  %10920 = vmatprep.subr.bf16.mxu0 %v15128_v6  ;;  %v15147_v45 = vld [vmem:[%s16929_s29 + $0x2b60] ss:$16 sps:$4 sm:$0xff]   ;;  %v15152_v10 = vld [vmem:[%s16929_s29 + $0x2984] ss:$16 sps:$4 sm:$0xff]  }
 0x313   : > { %10961 = vmatprep.subr.bf16.mxu1 %v15131_v12  ;;  %v15155_v33 = vld [vmem:[%s16929_s29 + $0x2b84] ss:$16 sps:$4 sm:$0xff]   ;;  %v15150_v6 = vld [vmem:[%s16929_s29 + $0x2980] ss:$16 sps:$4 sm:$0xff]  }
 0x314   : > { %v15153_v12 = vld [vmem:[%s16929_s29 + $0x2b80] ss:$16 sps:$4 sm:$0xff]  }
 0x315   : > { %10921 = vmatpush1.bf16.msra.mxu0 %v15126_v63  ;;  %v15158_v63 = vld [vmem:[%s16929_s29 + $0x29a4] ss:$16 sps:$4 sm:$0xff]  }
 0x316   : > { %10962 = vmatpush1.bf16.msra.mxu1 %v15129_v11  ;;  %10922 = vmatprep.subr.bf16.mxu0 %v15134_v57  ;;  %v15161_v11 = vld [vmem:[%s16929_s29 + $0x2ba4] ss:$16 sps:$4 sm:$0xff]   ;;  %v15156_v57 = vld [vmem:[%s16929_s29 + $0x29a0] ss:$16 sps:$4 sm:$0xff]  }
 0x317   : > { %10963 = vmatprep.subr.bf16.mxu1 %v15137_v14  ;;  %v15159_v14 = vld [vmem:[%s16929_s29 + $0x2ba0] ss:$16 sps:$4 sm:$0xff]  }
 0x319   : > { %10923 = vmatpush1.bf16.msra.mxu0 %v15132_v15  ;;  %v15164_v15 = vld [vmem:[%s16929_s29 + $0x29c4] ss:$16 sps:$4 sm:$0xff]  }
 0x31a   : > { %10964 = vmatpush1.bf16.msra.mxu1 %v15135_v16  ;;  %10924 = vmatprep.subr.bf16.mxu0 %v15140_v31  ;;  %v15167_v16 = vld [vmem:[%s16929_s29 + $0x2bc4] ss:$16 sps:$4 sm:$0xff]   ;;  %v15162_v31 = vld [vmem:[%s16929_s29 + $0x29c0] ss:$16 sps:$4 sm:$0xff]  }
 0x31b   : > { %10965 = vmatprep.subr.bf16.mxu1 %v15143_v32  ;;  %v15165_v32 = vld [vmem:[%s16929_s29 + $0x2bc0] ss:$16 sps:$4 sm:$0xff]  }
 0x31d   : > { %10925 = vmatpush1.bf16.msra.mxu0 %v15138_v34  ;;  %v15170_v34 = vld [vmem:[%s16929_s29 + $0x29e4] ss:$16 sps:$4 sm:$0xff]  }
 0x31e   : > { %10966 = vmatpush1.bf16.msra.mxu1 %v15141_v36  ;;  %10926 = vmatprep.subr.bf16.mxu0 %v15146_v55  ;;  %v15173_v36 = vld [vmem:[%s16929_s29 + $0x2be4] ss:$16 sps:$4 sm:$0xff]   ;;  %v15168_v55 = vld [vmem:[%s16929_s29 + $0x29e0] ss:$16 sps:$4 sm:$0xff]  }
 0x31f   : > { %10967 = vmatprep.subr.bf16.mxu1 %v15149_v56  ;;  %v15171_v56 = vld [vmem:[%s16929_s29 + $0x2be0] ss:$16 sps:$4 sm:$0xff]  }
 0x321   : > { %10927 = vmatpush1.bf16.msra.mxu0 %v15144_v13  ;;  %v15180_v13 = vld [vmem:[%s16929_s29 + $0x2c04] ss:$16 sps:$4 sm:$0xff]  }
 0x322   : > { %10968 = vmatpush1.bf16.msra.mxu1 %v15147_v45  ;;  %10928 = vmatprep.subr.bf16.mxu0 %v15152_v10  ;;  %v15183_v45 = vld [vmem:[%s16929_s29 + $0x2e04] ss:$16 sps:$4 sm:$0xff]  }
 0x323   : > { %10969 = vmatprep.subr.bf16.mxu1 %v15155_v33  ;;  %v17967_v10 = vld [vmem:[%s16953_s9 + $0xb0] sm:$0xff] }
 0x324   : > { %v15178_v33 = vld [vmem:[%s16929_s29 + $0x2c00] ss:$16 sps:$4 sm:$0xff]  }
 0x325   : > { %10929 = vmatpush1.bf16.msra.mxu0 %v15150_v6  ;;  %v15181_v6 = vld [vmem:[%s16929_s29 + $0x2e00] ss:$16 sps:$4 sm:$0xff]  }
 0x326   : > { %10970 = vmatpush1.bf16.msra.mxu1 %v15153_v12  ;;  %10930 = vmatprep.subr.bf16.mxu0 %v15158_v63  ;;  %v17973_v12 = vcombine.low %v17881_v0, %v17881_v0  ;;  %v17977_v63 = vcombine.low %v17884_v5, %v17884_v5  ;;  %v15184_v5 = vld [vmem:[%s16929_s29 + $0x2c20] ss:$16 sps:$4 sm:$0xff]  }
 0x327   : > { %10971 = vmatprep.subr.bf16.mxu1 %v15161_v11  ;;  %v17980_v11 = vld [vmem:[%s16953_s9 + $0xb8] sm:$0xff] }
 0x328   : > { %19118 = vst [vmem:[#allocation11_spill] sm:$0xff] %v17977_v63  ;;  %v17990_v0 = vcombine.high %v17980_v11, %v17980_v11 }
 0x329   : > { %10931 = vmatpush1.bf16.msra.mxu0 %v15156_v57  ;;  %v15186_v57 = vld [vmem:[%s16929_s29 + $0x2c24] ss:$16 sps:$4 sm:$0xff]  }
 0x32a   : > { %10972 = vmatpush1.bf16.msra.mxu1 %v15159_v14  ;;  %10932 = vmatprep.subr.bf16.mxu0 %v15164_v15  ;;  %v15189_v14 = vld [vmem:[%s16929_s29 + $0x2e24] ss:$16 sps:$4 sm:$0xff]   ;;  %v17986_v15 = vcombine.high %v17967_v10, %v17967_v10  ;;  %19120 = vst [vmem:[#allocation13_spill] sm:$0xff] %v17990_v0 }
 0x32b   : > { %10973 = vmatprep.subr.bf16.mxu1 %v15167_v16  ;;  %v15187_v16 = vld [vmem:[%s16929_s29 + $0x2e20] ss:$16 sps:$4 sm:$0xff]  }
 0x32c   : > { %19119 = vst [vmem:[#allocation12_spill] sm:$0xff] %v17986_v15 }
 0x32d   : > { %10933 = vmatpush1.bf16.msra.mxu0 %v15162_v31  ;;  %v15192_v31 = vld [vmem:[%s16929_s29 + $0x2c44] ss:$16 sps:$4 sm:$0xff]  }
 0x32e   : > { %10974 = vmatpush1.bf16.msra.mxu1 %v15165_v32  ;;  %10934 = vmatprep.subr.bf16.mxu0 %v15170_v34  ;;  %v15195_v32 = vld [vmem:[%s16929_s29 + $0x2e44] ss:$16 sps:$4 sm:$0xff]   ;;  %v15190_v34 = vld [vmem:[%s16929_s29 + $0x2c40] ss:$16 sps:$4 sm:$0xff]  }
 0x32f   : > { %10975 = vmatprep.subr.bf16.mxu1 %v15173_v36  ;;  %v15193_v36 = vld [vmem:[%s16929_s29 + $0x2e40] ss:$16 sps:$4 sm:$0xff]  }
 0x331   : > { %10935 = vmatpush1.bf16.msra.mxu0 %v15168_v55  ;;  %v15198_v55 = vld [vmem:[%s16929_s29 + $0x2c64] ss:$16 sps:$4 sm:$0xff]  }
 0x332   : > { %10976 = vmatpush1.bf16.msra.mxu1 %v15171_v56  ;;  %10986 = vmatprep.subr.bf16.mxu0 %v15180_v13  ;;  %v15201_v56 = vld [vmem:[%s16929_s29 + $0x2e64] ss:$16 sps:$4 sm:$0xff]   ;;  %v15196_v13 = vld [vmem:[%s16929_s29 + $0x2c60] ss:$16 sps:$4 sm:$0xff]  }
 0x333   : > { %11027 = vmatprep.subr.bf16.mxu1 %v15183_v45  ;;  %v15199_v45 = vld [vmem:[%s16929_s29 + $0x2e60] ss:$16 sps:$4 sm:$0xff]  }
 0x334   : > { %10937 = vmatmul.mubr.bf16.vlgmr.msra.gmra.mrb[40].mxu0 %v17973_v12 }
 0x335   : > { %10978 = vmatmul.mubr.bf16.vlgmr.msra.gmra.mrb[40].mxu1 %v17977_v63  ;;  %10987 = vmatpush1.bf16.msra.mxu0 %v15178_v33  ;;  %v15204_v33 = vld [vmem:[%s16929_s29 + $0x2c84] ss:$16 sps:$4 sm:$0xff]  }
 0x336   : > { %11028 = vmatpush1.bf16.msra.mxu1 %v15181_v6  ;;  %10988 = vmatprep.subr.bf16.mxu0 %v15186_v57  ;;  %v15207_v6 = vld [vmem:[%s16929_s29 + $0x2e84] ss:$16 sps:$4 sm:$0xff]   ;;  %v15202_v57 = vld [vmem:[%s16929_s29 + $0x2c80] ss:$16 sps:$4 sm:$0xff]  }
 0x337   : > { %11029 = vmatprep.subr.bf16.mxu1 %v15189_v14  ;;  %11018 = vmatprep.mubr.bf16.mxu0 %v17986_v15  ;;  %v15205_v14 = vld [vmem:[%s16929_s29 + $0x2e80] ss:$16 sps:$4 sm:$0xff]  }
 0x338   : > { %11059 = vmatprep.mubr.bf16.mxu1 %v17990_v0 }
 0x339   : > { %10989 = vmatpush1.bf16.msra.mxu0 %v15184_v5  ;;  %v15210_v5 = vld [vmem:[%s16929_s29 + $0x2ca4] ss:$16 sps:$4 sm:$0xff]  }
 0x33a   : > { %11030 = vmatpush1.bf16.msra.mxu1 %v15187_v16  ;;  %10990 = vmatprep.subr.bf16.mxu0 %v15192_v31  ;;  %v15213_v16 = vld [vmem:[%s16929_s29 + $0x2ea4] ss:$16 sps:$4 sm:$0xff]   ;;  %v15208_v31 = vld [vmem:[%s16929_s29 + $0x2ca0] ss:$16 sps:$4 sm:$0xff]  }
 0x33b   : > { %11031 = vmatprep.subr.bf16.mxu1 %v15195_v32  ;;  %v15211_v32 = vld [vmem:[%s16929_s29 + $0x2ea0] ss:$16 sps:$4 sm:$0xff]  }
 0x33d   : > { %10991 = vmatpush1.bf16.msra.mxu0 %v15190_v34  ;;  %v15216_v34 = vld [vmem:[%s16929_s29 + $0x2cc4] ss:$16 sps:$4 sm:$0xff]  }
 0x33e   : > { %11032 = vmatpush1.bf16.msra.mxu1 %v15193_v36  ;;  %10992 = vmatprep.subr.bf16.mxu0 %v15198_v55  ;;  %v15219_v36 = vld [vmem:[%s16929_s29 + $0x2ec4] ss:$16 sps:$4 sm:$0xff]  }
 0x33f   : > { %11033 = vmatprep.subr.bf16.mxu1 %v15201_v56 }
 0x341   : > { %10993 = vmatpush1.bf16.msra.mxu0 %v15196_v13  ;;  %v15214_v13 = vld [vmem:[%s16929_s29 + $0x2cc0] ss:$16 sps:$4 sm:$0xff]  }
 0x342   : > { %11034 = vmatpush1.bf16.msra.mxu1 %v15199_v45  ;;  %10994 = vmatprep.subr.bf16.mxu0 %v15204_v33  ;;  %v15217_v45 = vld [vmem:[%s16929_s29 + $0x2ec0] ss:$16 sps:$4 sm:$0xff]  }
 0x343   : > { %11035 = vmatprep.subr.bf16.mxu1 %v15207_v6 }
 0x345   : > { %10995 = vmatpush1.bf16.msra.mxu0 %v15202_v57 }
 0x346   : > { %11036 = vmatpush1.bf16.msra.mxu1 %v15205_v14  ;;  %10996 = vmatprep.subr.bf16.mxu0 %v15210_v5 }
 0x347   : > { %11037 = vmatprep.subr.bf16.mxu1 %v15213_v16  ;;  %v10692_v55 = vpop.f32.mrb[28].mxu0 }
 0x348   : > { %v10733_v56 = vpop.f32.mrb[28].mxu1  ;;  %v10693_v0 = vadd.f32 %v10692_v55, %v17924_v43  ;;  %v10694_v33 = vpop.f32.mrb[29].mxu0  ;;  %v15222_v43 = vld [vmem:[%s16929_s29 + $0x2ce4] ss:$16 sps:$4 sm:$0xff]  }
 0x349   : > { %v10735_v6 = vpop.f32.mrb[29].mxu1  ;;  %v10695_v63 = vadd.f32 %v10694_v33, %v17928_v35  ;;  %v10696_v57 = vpop.f32.mrb[30].mxu0  ;;  %10997 = vmatpush1.bf16.msra.mxu0 %v15208_v31  ;;  %v15225_v55 = vld [vmem:[%s16929_s29 + $0x2ee4] ss:$16 sps:$4 sm:$0xff]   ;;  %v15220_v35 = vld [vmem:[%s16929_s29 + $0x2ce0] ss:$16 sps:$4 sm:$0xff]  }
 0x34a   : > { %v10737_v14 = vpop.f32.mrb[30].mxu1  ;;  %11038 = vmatpush1.bf16.msra.mxu1 %v15211_v32  ;;  %v18020_v5 = vadd.f32 %v10733_v56, %v10693_v0  ;;  %v10697_v16 = vpop.f32.mrb[31].mxu0  ;;  %10998 = vmatprep.subr.bf16.mxu0 %v15216_v34  ;;  %v15223_v31 = vld [vmem:[%s16929_s29 + $0x2ee0] ss:$16 sps:$4 sm:$0xff]   ;;  %v15228_v0 = vld [vmem:[%s16929_s29 + $0x2d04] ss:$16 sps:$4 sm:$0xff]  }
 0x34b   : > { %v10738_v15 = vpop.f32.mrb[31].mxu1  ;;  %11039 = vmatprep.subr.bf16.mxu1 %v15219_v36  ;;  %v18024_v22 = vadd.f32 %v10735_v6, %v10695_v63  ;;  %v15226_v32 = vld [vmem:[%s16929_s29 + $0x2d00] ss:$16 sps:$4 sm:$0xff]   ;;  %v15234_v63 = vld [vmem:[%s16929_s29 + $0x2d24] ss:$16 sps:$4 sm:$0xff]  }
 0x34c   : > { %v15231_v15 = vld [vmem:[%s16929_s29 + $0x2f04] ss:$16 sps:$4 sm:$0xff]   ;;  %v15229_v34 = vld [vmem:[%s16929_s29 + $0x2f00] ss:$16 sps:$4 sm:$0xff]  }
 0x34d   : > { %10999 = vmatpush1.bf16.msra.mxu0 %v15214_v13  ;;  %v15237_v36 = vld [vmem:[%s16929_s29 + $0x2f24] ss:$16 sps:$4 sm:$0xff]   ;;  %v15232_v56 = vld [vmem:[%s16929_s29 + $0x2d20] ss:$16 sps:$4 sm:$0xff]  }
 0x34e   : > { %11040 = vmatpush1.bf16.msra.mxu1 %v15217_v45  ;;  %11000 = vmatprep.subr.bf16.mxu0 %v15222_v43  ;;  %v15235_v13 = vld [vmem:[%s16929_s29 + $0x2f20] ss:$16 sps:$4 sm:$0xff]   ;;  %v15240_v45 = vld [vmem:[%s16929_s29 + $0x2d44] ss:$16 sps:$4 sm:$0xff]  }
 0x34f   : > { %11041 = vmatprep.subr.bf16.mxu1 %v15225_v55  ;;  %v15243_v33 = vld [vmem:[%s16929_s29 + $0x2f44] ss:$16 sps:$4 sm:$0xff]   ;;  %v15238_v6 = vld [vmem:[%s16929_s29 + $0x2d40] ss:$16 sps:$4 sm:$0xff]  }
 0x350   : > { %v15241_v57 = vld [vmem:[%s16929_s29 + $0x2f40] ss:$16 sps:$4 sm:$0xff]   ;;  %v15246_v14 = vld [vmem:[%s16929_s29 + $0x2d64] ss:$16 sps:$4 sm:$0xff]  }
 0x351   : > { %11001 = vmatpush1.bf16.msra.mxu0 %v15220_v35  ;;  %v15249_v16 = vld [vmem:[%s16929_s29 + $0x2f64] ss:$16 sps:$4 sm:$0xff]   ;;  %v15244_v43 = vld [vmem:[%s16929_s29 + $0x2d60] ss:$16 sps:$4 sm:$0xff]  }
 0x352   : > { %11042 = vmatpush1.bf16.msra.mxu1 %v15223_v31  ;;  %11002 = vmatprep.subr.bf16.mxu0 %v15228_v0  ;;  %v15247_v55 = vld [vmem:[%s16929_s29 + $0x2f60] ss:$16 sps:$4 sm:$0xff]   ;;  %v15252_v35 = vld [vmem:[%s16929_s29 + $0x2d84] ss:$16 sps:$4 sm:$0xff]  }
 0x353   : > { %11043 = vmatprep.subr.bf16.mxu1 %v15231_v15  ;;  %v15255_v31 = vld [vmem:[%s16929_s29 + $0x2f84] ss:$16 sps:$4 sm:$0xff]   ;;  %v15250_v0 = vld [vmem:[%s16929_s29 + $0x2d80] ss:$16 sps:$4 sm:$0xff]  }
 0x354   : > { %v15253_v15 = vld [vmem:[%s16929_s29 + $0x2f80] ss:$16 sps:$4 sm:$0xff]  }
 0x355   : > { %11003 = vmatpush1.bf16.msra.mxu0 %v15226_v32  ;;  %v15258_v32 = vld [vmem:[%s16929_s29 + $0x2da4] ss:$16 sps:$4 sm:$0xff]  }
 0x356   : > { %11044 = vmatpush1.bf16.msra.mxu1 %v15229_v34  ;;  %11004 = vmatprep.subr.bf16.mxu0 %v15234_v63  ;;  %v15261_v34 = vld [vmem:[%s16929_s29 + $0x2fa4] ss:$16 sps:$4 sm:$0xff]   ;;  %v15256_v63 = vld [vmem:[%s16929_s29 + $0x2da0] ss:$16 sps:$4 sm:$0xff]  }
 0x357   : > { %11045 = vmatprep.subr.bf16.mxu1 %v15237_v36  ;;  %v15259_v36 = vld [vmem:[%s16929_s29 + $0x2fa0] ss:$16 sps:$4 sm:$0xff]  }
 0x359   : > { %11005 = vmatpush1.bf16.msra.mxu0 %v15232_v56  ;;  %v15264_v56 = vld [vmem:[%s16929_s29 + $0x2dc4] ss:$16 sps:$4 sm:$0xff]  }
 0x35a   : > { %11046 = vmatpush1.bf16.msra.mxu1 %v15235_v13  ;;  %11006 = vmatprep.subr.bf16.mxu0 %v15240_v45  ;;  %v15267_v13 = vld [vmem:[%s16929_s29 + $0x2fc4] ss:$16 sps:$4 sm:$0xff]   ;;  %v15262_v45 = vld [vmem:[%s16929_s29 + $0x2dc0] ss:$16 sps:$4 sm:$0xff]  }
 0x35b   : > { %11047 = vmatprep.subr.bf16.mxu1 %v15243_v33  ;;  %v15265_v33 = vld [vmem:[%s16929_s29 + $0x2fc0] ss:$16 sps:$4 sm:$0xff]  }
 0x35d   : > { %11007 = vmatpush1.bf16.msra.mxu0 %v15238_v6  ;;  %v15270_v6 = vld [vmem:[%s16929_s29 + $0x2de4] ss:$16 sps:$4 sm:$0xff]  }
 0x35e   : > { %11048 = vmatpush1.bf16.msra.mxu1 %v15241_v57  ;;  %11008 = vmatprep.subr.bf16.mxu0 %v15246_v14  ;;  %v15273_v57 = vld [vmem:[%s16929_s29 + $0x2fe4] ss:$16 sps:$4 sm:$0xff]   ;;  %v15268_v14 = vld [vmem:[%s16929_s29 + $0x2de0] ss:$16 sps:$4 sm:$0xff]  }
 0x35f   : > { %11049 = vmatprep.subr.bf16.mxu1 %v15249_v16  ;;  %v15271_v16 = vld [vmem:[%s16929_s29 + $0x2fe0] ss:$16 sps:$4 sm:$0xff]  }
 0x361   : > { %11009 = vmatpush1.bf16.msra.mxu0 %v15244_v43  ;;  %v15280_v43 = vld [vmem:[%s16929_s29 + $0x3004] ss:$16 sps:$4 sm:$0xff]  }
 0x362   : > { %11050 = vmatpush1.bf16.msra.mxu1 %v15247_v55  ;;  %11010 = vmatprep.subr.bf16.mxu0 %v15252_v35  ;;  %v15283_v55 = vld [vmem:[%s16929_s29 + $0xc] ss:$16 sps:$4 sm:$0xff]   ;;  %v18063_v35 = vld [vmem:[%s16953_s9 + $0xc0] sm:$0xff] }
 0x363   : > { %11051 = vmatprep.subr.bf16.mxu1 %v15255_v31  ;;  %v15278_v31 = vld [vmem:[%s16929_s29 + $0x3000] ss:$16 sps:$4 sm:$0xff]  }
 0x365   : > { %11011 = vmatpush1.bf16.msra.mxu0 %v15250_v0  ;;  %v15281_v0 = vld [vmem:[%s16929_s29 + $0x8] ss:$16 sps:$4 sm:$0xff]  }
 0x366   : > { %11052 = vmatpush1.bf16.msra.mxu1 %v15253_v15  ;;  %11012 = vmatprep.subr.bf16.mxu0 %v15258_v32  ;;  %v18069_v15 = vcombine.low %v17967_v10, %v17967_v10  ;;  %v18073_v32 = vcombine.low %v17980_v11, %v17980_v11  ;;  %v15284_v10 = vld [vmem:[%s16929_s29 + $0x3020] ss:$16 sps:$4 sm:$0xff]   ;;  %v15287_v11 = vld [vmem:[%s16929_s29 + $0x28] ss:$16 sps:$4 sm:$0xff]  }
 0x367   : > { %11053 = vmatprep.subr.bf16.mxu1 %v15261_v34  ;;  %v15286_v34 = vld [vmem:[%s16929_s29 + $0x3024] ss:$16 sps:$4 sm:$0xff]  }
 0x368   : > { %19121 = vst [vmem:[#allocation14_spill] sm:$0xff] %v18073_v32 }
 0x369   : > { %11013 = vmatpush1.bf16.msra.mxu0 %v15256_v63  ;;  %v15289_v63 = vld [vmem:[%s16929_s29 + $0x2c] ss:$16 sps:$4 sm:$0xff]  }
 0x36a   : > { %11054 = vmatpush1.bf16.msra.mxu1 %v15259_v36  ;;  %11014 = vmatprep.subr.bf16.mxu0 %v15264_v56  ;;  %v18079_v36 = vcombine.high %v18063_v35, %v18063_v35  ;;  %v15292_v56 = vld [vmem:[%s16929_s29 + $0x3044] ss:$16 sps:$4 sm:$0xff]  }
 0x36b   : > { %11055 = vmatprep.subr.bf16.mxu1 %v15267_v13  ;;  %v15295_v13 = vld [vmem:[%s16929_s29 + $0x4c] ss:$16 sps:$4 sm:$0xff]  }
 0x36d   : > { %11015 = vmatpush1.bf16.msra.mxu0 %v15262_v45  ;;  %v15290_v45 = vld [vmem:[%s16929_s29 + $0x3040] ss:$16 sps:$4 sm:$0xff]  }
 0x36e   : > { %11056 = vmatpush1.bf16.msra.mxu1 %v15265_v33  ;;  %11016 = vmatprep.subr.bf16.mxu0 %v15270_v6  ;;  %v15293_v33 = vld [vmem:[%s16929_s29 + $0x48] ss:$16 sps:$4 sm:$0xff]   ;;  %v15298_v6 = vld [vmem:[%s16929_s29 + $0x3064] ss:$16 sps:$4 sm:$0xff]  }
 0x36f   : > { %11057 = vmatprep.subr.bf16.mxu1 %v15273_v57  ;;  %v15301_v57 = vld [vmem:[%s16929_s29 + $0x6c] ss:$16 sps:$4 sm:$0xff]  }
 0x371   : > { %11017 = vmatpush1.bf16.msra.mxu0 %v15268_v14  ;;  %v15296_v14 = vld [vmem:[%s16929_s29 + $0x3060] ss:$16 sps:$4 sm:$0xff]  }
 0x372   : > { %11058 = vmatpush1.bf16.msra.mxu1 %v15271_v16  ;;  %11068 = vmatprep.subr.bf16.mxu0 %v15280_v43  ;;  %v15299_v16 = vld [vmem:[%s16929_s29 + $0x68] ss:$16 sps:$4 sm:$0xff]   ;;  %v15307_v43 = vld [vmem:[%s16929_s29 + $0x8c] ss:$16 sps:$4 sm:$0xff]  }
 0x373   : > { %11109 = vmatprep.subr.bf16.mxu1 %v15283_v55  ;;  %v15302_v55 = vld [vmem:[%s16929_s29 + $0x3080] ss:$16 sps:$4 sm:$0xff]  }
 0x374   : > { %11019 = vmatmul.mubr.bf16.vlgmr.msra.gmra.mrb[44].mxu0 %v18069_v15 }
 0x375   : > { %11060 = vmatmul.mubr.bf16.vlgmr.msra.gmra.mrb[44].mxu1 %v18073_v32  ;;  %11069 = vmatpush1.bf16.msra.mxu0 %v15278_v31  ;;  %v15305_v31 = vld [vmem:[%s16929_s29 + $0x88] ss:$16 sps:$4 sm:$0xff]  }
 0x376   : > { %11110 = vmatpush1.bf16.msra.mxu1 %v15281_v0  ;;  %11070 = vmatprep.subr.bf16.mxu0 %v15286_v34  ;;  %v15310_v0 = vld [vmem:[%s16929_s29 + $0x30a4] ss:$16 sps:$4 sm:$0xff]   ;;  %v15313_v34 = vld [vmem:[%s16929_s29 + $0xac] ss:$16 sps:$4 sm:$0xff]  }
 0x377   : > { %11111 = vmatprep.subr.bf16.mxu1 %v15289_v63  ;;  %11100 = vmatprep.mubr.bf16.mxu0 %v18079_v36  ;;  %v15308_v63 = vld [vmem:[%s16929_s29 + $0x30a0] ss:$16 sps:$4 sm:$0xff]  }
 0x378   : > { %11141 = vmatprep.mubr.bf16.mxu1 %v17003_v48  ;;  %v15304_v48 = vld [vmem:[%s16929_s29 + $0x3084] ss:$16 sps:$4 sm:$0xff]  }
 0x379   : > { %11071 = vmatpush1.bf16.msra.mxu0 %v15284_v10  ;;  %v15311_v10 = vld [vmem:[%s16929_s29 + $0xa8] ss:$16 sps:$4 sm:$0xff]  }
 0x37a   : > { %11112 = vmatpush1.bf16.msra.mxu1 %v15287_v11  ;;  %11072 = vmatprep.subr.bf16.mxu0 %v15292_v56  ;;  %v15316_v11 = vld [vmem:[%s16929_s29 + $0x30c4] ss:$16 sps:$4 sm:$0xff]   ;;  %v15319_v56 = vld [vmem:[%s16929_s29 + $0xcc] ss:$16 sps:$4 sm:$0xff]  }
 0x37b   : > { %11113 = vmatprep.subr.bf16.mxu1 %v15295_v13 }
 0x37d   : > { %11073 = vmatpush1.bf16.msra.mxu0 %v15290_v45 }
 0x37e   : > { %11114 = vmatpush1.bf16.msra.mxu1 %v15293_v33  ;;  %11074 = vmatprep.subr.bf16.mxu0 %v15298_v6  ;;  %v15314_v33 = vld [vmem:[%s16929_s29 + $0x30c0] ss:$16 sps:$4 sm:$0xff]   ;;  %v15317_v6 = vld [vmem:[%s16929_s29 + $0xc8] ss:$16 sps:$4 sm:$0xff]  }
 0x37f   : > { %11115 = vmatprep.subr.bf16.mxu1 %v15301_v57 }
 0x381   : > { %11075 = vmatpush1.bf16.msra.mxu0 %v15296_v14 }
 0x382   : > { %11116 = vmatpush1.bf16.msra.mxu1 %v15299_v16  ;;  %11076 = vmatprep.subr.bf16.mxu0 %v15304_v48 }
 0x383   : > { %11117 = vmatprep.subr.bf16.mxu1 %v15307_v43 }
 0x385   : > { %11077 = vmatpush1.bf16.msra.mxu0 %v15302_v55 }
 0x386   : > { %11118 = vmatpush1.bf16.msra.mxu1 %v15305_v31  ;;  %11078 = vmatprep.subr.bf16.mxu0 %v15310_v0 }
 0x387   : > { %11119 = vmatprep.subr.bf16.mxu1 %v15313_v34  ;;  %v10774_v13 = vpop.f32.mrb[32].mxu0 }
 0x388   : > { %v10815_v45 = vpop.f32.mrb[32].mxu1  ;;  %v10775_v57 = vadd.f32 %v10774_v13, %v18020_v5  ;;  %v10776_v14 = vpop.f32.mrb[33].mxu0  ;;  %v15322_v5 = vld [vmem:[%s16929_s29 + $0x30e4] ss:$16 sps:$4 sm:$0xff]   ;;  %v15325_v13 = vld [vmem:[%s16929_s29 + $0xec] ss:$16 sps:$4 sm:$0xff]  }
 0x389   : > { %v10817_v16 = vpop.f32.mrb[33].mxu1  ;;  %v10777_v48 = vadd.f32 %v10776_v14, %v18024_v22  ;;  %v10778_v43 = vpop.f32.mrb[34].mxu0  ;;  %11079 = vmatpush1.bf16.msra.mxu0 %v15308_v63  ;;  %v15320_v22 = vld [vmem:[%s16929_s29 + $0x30e0] ss:$16 sps:$4 sm:$0xff]   ;;  %v15323_v63 = vld [vmem:[%s16929_s29 + $0xe8] ss:$16 sps:$4 sm:$0xff]  }
 0x38a   : > { %v10819_v55 = vpop.f32.mrb[34].mxu1  ;;  %11120 = vmatpush1.bf16.msra.mxu1 %v15311_v10  ;;  %v18109_v31 = vadd.f32 %v10815_v45, %v10775_v57  ;;  %v10779_v0 = vpop.f32.mrb[35].mxu0  ;;  %11080 = vmatprep.subr.bf16.mxu0 %v15316_v11  ;;  %v15328_v10 = vld [vmem:[%s16929_s29 + $0x3104] ss:$16 sps:$4 sm:$0xff]   ;;  %v15331_v45 = vld [vmem:[%s16929_s29 + $0x10c] ss:$16 sps:$4 sm:$0xff]  }
 0x38b   : > { %v10820_v34 = vpop.f32.mrb[35].mxu1  ;;  %11121 = vmatprep.subr.bf16.mxu1 %v15319_v56  ;;  %v18113_v32 = vadd.f32 %v10817_v16, %v10777_v48  ;;  %v15326_v11 = vld [vmem:[%s16929_s29 + $0x3100] ss:$16 sps:$4 sm:$0xff]   ;;  %v15329_v56 = vld [vmem:[%s16929_s29 + $0x108] ss:$16 sps:$4 sm:$0xff]  }
 0x38c   : > { %v15332_v57 = vld [vmem:[%s16929_s29 + $0x3120] ss:$16 sps:$4 sm:$0xff]   ;;  %v15335_v14 = vld [vmem:[%s16929_s29 + $0x128] ss:$16 sps:$4 sm:$0xff]   ;;  %v15340_v16 = vld [vmem:[%s16929_s29 + $0x3144] ss:$16 sps:$4 sm:$0xff]  }
 0x38d   : > { %11081 = vmatpush1.bf16.msra.mxu0 %v15314_v33  ;;  %v15334_v33 = vld [vmem:[%s16929_s29 + $0x3124] ss:$16 sps:$4 sm:$0xff]   ;;  %v15343_v48 = vld [vmem:[%s16929_s29 + $0x14c] ss:$16 sps:$4 sm:$0xff]   ;;  %v15338_v43 = vld [vmem:[%s16929_s29 + $0x3140] ss:$16 sps:$4 sm:$0xff]  }
 0x38e   : > { %11122 = vmatpush1.bf16.msra.mxu1 %v15317_v6  ;;  %11082 = vmatprep.subr.bf16.mxu0 %v15322_v5  ;;  %v15337_v6 = vld [vmem:[%s16929_s29 + $0x12c] ss:$16 sps:$4 sm:$0xff]   ;;  %v15341_v55 = vld [vmem:[%s16929_s29 + $0x148] ss:$16 sps:$4 sm:$0xff]   ;;  %v15346_v0 = vld [vmem:[%s16929_s29 + $0x3164] ss:$16 sps:$4 sm:$0xff]  }
 0x38f   : > { %11123 = vmatprep.subr.bf16.mxu1 %v15325_v13  ;;  %v15349_v34 = vld [vmem:[%s16929_s29 + $0x16c] ss:$16 sps:$4 sm:$0xff]   ;;  %v15344_v5 = vld [vmem:[%s16929_s29 + $0x3160] ss:$16 sps:$4 sm:$0xff]   ;;  %v15347_v13 = vld [vmem:[%s16929_s29 + $0x168] ss:$16 sps:$4 sm:$0xff]  }
 0x391   : > { %11083 = vmatpush1.bf16.msra.mxu0 %v15320_v22  ;;  %v15352_v22 = vld [vmem:[%s16929_s29 + $0x3184] ss:$16 sps:$4 sm:$0xff]  }
 0x392   : > { %11124 = vmatpush1.bf16.msra.mxu1 %v15323_v63  ;;  %11084 = vmatprep.subr.bf16.mxu0 %v15328_v10  ;;  %v15355_v63 = vld [vmem:[%s16929_s29 + $0x18c] ss:$16 sps:$4 sm:$0xff]   ;;  %v15350_v10 = vld [vmem:[%s16929_s29 + $0x3180] ss:$16 sps:$4 sm:$0xff]  }
 0x393   : > { %11125 = vmatprep.subr.bf16.mxu1 %v15331_v45  ;;  %v15353_v45 = vld [vmem:[%s16929_s29 + $0x188] ss:$16 sps:$4 sm:$0xff]  }
 0x395   : > { %11085 = vmatpush1.bf16.msra.mxu0 %v15326_v11  ;;  %v15358_v11 = vld [vmem:[%s16929_s29 + $0x31a4] ss:$16 sps:$4 sm:$0xff]  }
 0x396   : > { %11126 = vmatpush1.bf16.msra.mxu1 %v15329_v56  ;;  %11086 = vmatprep.subr.bf16.mxu0 %v15334_v33  ;;  %v15361_v56 = vld [vmem:[%s16929_s29 + $0x1ac] ss:$16 sps:$4 sm:$0xff]   ;;  %v15356_v33 = vld [vmem:[%s16929_s29 + $0x31a0] ss:$16 sps:$4 sm:$0xff]  }
 0x397   : > { %11127 = vmatprep.subr.bf16.mxu1 %v15337_v6  ;;  %v15359_v6 = vld [vmem:[%s16929_s29 + $0x1a8] ss:$16 sps:$4 sm:$0xff]  }
 0x399   : > { %11087 = vmatpush1.bf16.msra.mxu0 %v15332_v57  ;;  %v15364_v57 = vld [vmem:[%s16929_s29 + $0x31c4] ss:$16 sps:$4 sm:$0xff]  }
 0x39a   : > { %11128 = vmatpush1.bf16.msra.mxu1 %v15335_v14  ;;  %11088 = vmatprep.subr.bf16.mxu0 %v15340_v16  ;;  %v15367_v14 = vld [vmem:[%s16929_s29 + $0x1cc] ss:$16 sps:$4 sm:$0xff]   ;;  %v15362_v16 = vld [vmem:[%s16929_s29 + $0x31c0] ss:$16 sps:$4 sm:$0xff]  }
 0x39b   : > { %11129 = vmatprep.subr.bf16.mxu1 %v15343_v48  ;;  %v15365_v48 = vld [vmem:[%s16929_s29 + $0x1c8] ss:$16 sps:$4 sm:$0xff]  }
 0x39d   : > { %11089 = vmatpush1.bf16.msra.mxu0 %v15338_v43  ;;  %v15370_v43 = vld [vmem:[%s16929_s29 + $0x31e4] ss:$16 sps:$4 sm:$0xff]  }
 0x39e   : > { %11130 = vmatpush1.bf16.msra.mxu1 %v15341_v55  ;;  %11090 = vmatprep.subr.bf16.mxu0 %v15346_v0  ;;  %v15373_v55 = vld [vmem:[%s16929_s29 + $0x1ec] ss:$16 sps:$4 sm:$0xff]   ;;  %v15368_v0 = vld [vmem:[%s16929_s29 + $0x31e0] ss:$16 sps:$4 sm:$0xff]  }
 0x39f   : > { %11131 = vmatprep.subr.bf16.mxu1 %v15349_v34  ;;  %v15371_v34 = vld [vmem:[%s16929_s29 + $0x1e8] ss:$16 sps:$4 sm:$0xff]  }
 0x3a1   : > { %11091 = vmatpush1.bf16.msra.mxu0 %v15344_v5  ;;  %v15378_v5 = vld [vmem:[%s16929_s29 + $0x20c] ss:$16 sps:$4 sm:$0xff]  }
 0x3a2   : > { %11132 = vmatpush1.bf16.msra.mxu1 %v15347_v13  ;;  %11092 = vmatprep.subr.bf16.mxu0 %v15352_v22  ;;  %v15381_v13 = vld [vmem:[%s16929_s29 + $0x40c] ss:$16 sps:$4 sm:$0xff]   ;;  %v15376_v22 = vld [vmem:[%s16929_s29 + $0x208] ss:$16 sps:$4 sm:$0xff]  }
 0x3a3   : > { %11133 = vmatprep.subr.bf16.mxu1 %v15355_v63  ;;  %v15379_v63 = vld [vmem:[%s16929_s29 + $0x408] ss:$16 sps:$4 sm:$0xff]  }
 0x3a5   : > { %11093 = vmatpush1.bf16.msra.mxu0 %v15350_v10  ;;  %v18155_v10 = vcombine.low %v18063_v35, %v18063_v35  ;;  %v15385_v35 = vld [vmem:[%s16929_s29 + $0x428] ss:$16 sps:$4 sm:$0xff]  }
 0x3a6   : > { %11134 = vmatpush1.bf16.msra.mxu1 %v15353_v45  ;;  %11094 = vmatprep.subr.bf16.mxu0 %v15358_v11  ;;  %v15384_v45 = vld [vmem:[%s16929_s29 + $0x22c] ss:$16 sps:$4 sm:$0xff]  }
 0x3a7   : > { %11135 = vmatprep.subr.bf16.mxu1 %v15361_v56  ;;  %v15387_v11 = vld [vmem:[%s16929_s29 + $0x42c] ss:$16 sps:$4 sm:$0xff]   ;;  %v15382_v56 = vld [vmem:[%s16929_s29 + $0x228] ss:$16 sps:$4 sm:$0xff]  }
 0x3a9   : > { %11095 = vmatpush1.bf16.msra.mxu0 %v15356_v33  ;;  %v15390_v33 = vld [vmem:[%s16929_s29 + $0x24c] ss:$16 sps:$4 sm:$0xff]  }
 0x3aa   : > { %11136 = vmatpush1.bf16.msra.mxu1 %v15359_v6  ;;  %11096 = vmatprep.subr.bf16.mxu0 %v15364_v57  ;;  %v15393_v6 = vld [vmem:[%s16929_s29 + $0x44c] ss:$16 sps:$4 sm:$0xff]   ;;  %v15391_v57 = vld [vmem:[%s16929_s29 + $0x448] ss:$16 sps:$4 sm:$0xff]  }
 0x3ab   : > { %11137 = vmatprep.subr.bf16.mxu1 %v15367_v14  ;;  %v15396_v14 = vld [vmem:[%s16929_s29 + $0x26c] ss:$16 sps:$4 sm:$0xff]  }
 0x3ad   : > { %11097 = vmatpush1.bf16.msra.mxu0 %v15362_v16  ;;  %v15399_v16 = vld [vmem:[%s16929_s29 + $0x46c] ss:$16 sps:$4 sm:$0xff]  }
 0x3ae   : > { %11138 = vmatpush1.bf16.msra.mxu1 %v15365_v48  ;;  %11098 = vmatprep.subr.bf16.mxu0 %v15370_v43  ;;  %v15397_v48 = vld [vmem:[%s16929_s29 + $0x468] ss:$16 sps:$4 sm:$0xff]   ;;  %v15405_v43 = vld [vmem:[%s16929_s29 + $0x48c] ss:$16 sps:$4 sm:$0xff]  }
 0x3af   : > { %11139 = vmatprep.subr.bf16.mxu1 %v15373_v55  ;;  %v15400_v55 = vld [vmem:[%s16929_s29 + $0x288] ss:$16 sps:$4 sm:$0xff]  }
 0x3b1   : > { %11099 = vmatpush1.bf16.msra.mxu0 %v15368_v0  ;;  %v15403_v0 = vld [vmem:[%s16929_s29 + $0x488] ss:$16 sps:$4 sm:$0xff]  }
 0x3b2   : > { %11140 = vmatpush1.bf16.msra.mxu1 %v15371_v34  ;;  %11150 = vmatprep.subr.bf16.mxu0 %v15378_v5  ;;  %v15408_v34 = vld [vmem:[%s16929_s29 + $0x2ac] ss:$16 sps:$4 sm:$0xff]  }
 0x3b3   : > { %11191 = vmatprep.subr.bf16.mxu1 %v15381_v13  ;;  %v15411_v5 = vld [vmem:[%s16929_s29 + $0x4ac] ss:$16 sps:$4 sm:$0xff]   ;;  %v15406_v13 = vld [vmem:[%s16929_s29 + $0x2a8] ss:$16 sps:$4 sm:$0xff]  }
 0x3b4   : > { %11101 = vmatmul.mubr.bf16.vlgmr.msra.gmra.mrb[48].mxu0 %v18155_v10 }
 0x3b5   : > { %11142 = vmatmul.mubr.bf16.vlgmr.msra.gmra.mrb[48].mxu1 %v17030_v7  ;;  %11151 = vmatpush1.bf16.msra.mxu0 %v15376_v22  ;;  %v15388_v7 = vld [vmem:[%s16929_s29 + $0x248] ss:$16 sps:$4 sm:$0xff]  }
 0x3b6   : > { %11192 = vmatpush1.bf16.msra.mxu1 %v15379_v63  ;;  %11152 = vmatprep.subr.bf16.mxu0 %v15384_v45  ;;  %v15409_v22 = vld [vmem:[%s16929_s29 + $0x4a8] ss:$16 sps:$4 sm:$0xff]   ;;  %v15414_v63 = vld [vmem:[%s16929_s29 + $0x2cc] ss:$16 sps:$4 sm:$0xff]  }
 0x3b7   : > { %11193 = vmatprep.subr.bf16.mxu1 %v15387_v11  ;;  %11182 = vmatprep.mubr.bf16.mxu0 %v17008_v52  ;;  %v15394_v52 = vld [vmem:[%s16929_s29 + $0x268] ss:$16 sps:$4 sm:$0xff]   ;;  %v15417_v45 = vld [vmem:[%s16929_s29 + $0x4cc] ss:$16 sps:$4 sm:$0xff]  }
 0x3b8   : > { %11223 = vmatprep.mubr.bf16.mxu1 %v17070_v37  ;;  %v15402_v37 = vld [vmem:[%s16929_s29 + $0x28c] ss:$16 sps:$4 sm:$0xff]  }
 0x3b9   : > { %11153 = vmatpush1.bf16.msra.mxu0 %v15382_v56 }
 0x3ba   : > { %11194 = vmatpush1.bf16.msra.mxu1 %v15385_v35  ;;  %11154 = vmatprep.subr.bf16.mxu0 %v15390_v33  ;;  %v15412_v35 = vld [vmem:[%s16929_s29 + $0x2c8] ss:$16 sps:$4 sm:$0xff]  }
 0x3bb   : > { %11195 = vmatprep.subr.bf16.mxu1 %v15393_v6  ;;  %v15415_v33 = vld [vmem:[%s16929_s29 + $0x4c8] ss:$16 sps:$4 sm:$0xff]  }
 0x3bd   : > { %11155 = vmatpush1.bf16.msra.mxu0 %v15388_v7 }
 0x3be   : > { %11196 = vmatpush1.bf16.msra.mxu1 %v15391_v57  ;;  %11156 = vmatprep.subr.bf16.mxu0 %v15396_v14 }
 0x3bf   : > { %11197 = vmatprep.subr.bf16.mxu1 %v15399_v16 }
 0x3c1   : > { %11157 = vmatpush1.bf16.msra.mxu0 %v15394_v52 }
 0x3c2   : > { %11198 = vmatpush1.bf16.msra.mxu1 %v15397_v48  ;;  %11158 = vmatprep.subr.bf16.mxu0 %v15402_v37 }
 0x3c3   : > { %11199 = vmatprep.subr.bf16.mxu1 %v15405_v43 }
 0x3c5   : > { %11159 = vmatpush1.bf16.msra.mxu0 %v15400_v55  ;;  %v15423_v55 = vld [vmem:[%s16929_s29 + $0x4ec] ss:$16 sps:$4 sm:$0xff]  }
 0x3c6   : > { %11200 = vmatpush1.bf16.msra.mxu1 %v15403_v0  ;;  %11160 = vmatprep.subr.bf16.mxu0 %v15408_v34  ;;  %v15421_v34 = vld [vmem:[%s16929_s29 + $0x4e8] ss:$16 sps:$4 sm:$0xff]  }
 0x3c7   : > { %11201 = vmatprep.subr.bf16.mxu1 %v15411_v5  ;;  %v10856_v11 = vpop.f32.mrb[36].mxu0  ;;  %v15426_v5 = vld [vmem:[%s16929_s29 + $0x30c] ss:$16 sps:$4 sm:$0xff]  }
 0x3c8   : > { %v10897_v56 = vpop.f32.mrb[36].mxu1  ;;  %v10857_v6 = vadd.f32 %v10856_v11, %v18109_v31  ;;  %v10858_v7 = vpop.f32.mrb[37].mxu0  ;;  %v15420_v31 = vld [vmem:[%s16929_s29 + $0x2ec] ss:$16 sps:$4 sm:$0xff]  }
 0x3c9   : > { %v10899_v57 = vpop.f32.mrb[37].mxu1  ;;  %v10859_v14 = vadd.f32 %v10858_v7, %v18113_v32  ;;  %v10860_v16 = vpop.f32.mrb[38].mxu0  ;;  %11161 = vmatpush1.bf16.msra.mxu0 %v15406_v13  ;;  %v15418_v32 = vld [vmem:[%s16929_s29 + $0x2e8] ss:$16 sps:$4 sm:$0xff]   ;;  %v15429_v13 = vld [vmem:[%s16929_s29 + $0x50c] ss:$16 sps:$4 sm:$0xff]  }
 0x3ca   : > { %v10901_v52 = vpop.f32.mrb[38].mxu1  ;;  %11202 = vmatpush1.bf16.msra.mxu1 %v15409_v22  ;;  %v18187_v48 = vadd.f32 %v10897_v56, %v10857_v6  ;;  %v10861_v37 = vpop.f32.mrb[39].mxu0  ;;  %11162 = vmatprep.subr.bf16.mxu0 %v15414_v63  ;;  %v15424_v22 = vld [vmem:[%s16929_s29 + $0x308] ss:$16 sps:$4 sm:$0xff]   ;;  %v15435_v11 = vld [vmem:[%s16929_s29 + $0x52c] ss:$16 sps:$4 sm:$0xff]  }
 0x3cb   : > { %v10902_v43 = vpop.f32.mrb[39].mxu1  ;;  %11203 = vmatprep.subr.bf16.mxu1 %v15417_v45  ;;  %v18191_v0 = vadd.f32 %v10899_v57, %v10859_v14  ;;  %v15427_v63 = vld [vmem:[%s16929_s29 + $0x508] ss:$16 sps:$4 sm:$0xff]   ;;  %v15432_v45 = vld [vmem:[%s16929_s29 + $0x32c] ss:$16 sps:$4 sm:$0xff]  }
 0x3cc   : > { %v15430_v56 = vld [vmem:[%s16929_s29 + $0x328] ss:$16 sps:$4 sm:$0xff]   ;;  %v15441_v6 = vld [vmem:[%s16929_s29 + $0x54c] ss:$16 sps:$4 sm:$0xff]  }
 0x3cd   : > { %11163 = vmatpush1.bf16.msra.mxu0 %v15412_v35  ;;  %v15433_v35 = vld [vmem:[%s16929_s29 + $0x528] ss:$16 sps:$4 sm:$0xff]   ;;  %v15444_v14 = vld [vmem:[%s16929_s29 + $0x36c] ss:$16 sps:$4 sm:$0xff]  }
 0x3ce   : > { %11204 = vmatpush1.bf16.msra.mxu1 %v15415_v33  ;;  %11164 = vmatprep.subr.bf16.mxu0 %v15420_v31  ;;  %v15438_v33 = vld [vmem:[%s16929_s29 + $0x34c] ss:$16 sps:$4 sm:$0xff]   ;;  %v15436_v7 = vld [vmem:[%s16929_s29 + $0x348] ss:$16 sps:$4 sm:$0xff]  }
 0x3cf   : > { %11205 = vmatprep.subr.bf16.mxu1 %v15423_v55  ;;  %v15439_v57 = vld [vmem:[%s16929_s29 + $0x548] ss:$16 sps:$4 sm:$0xff]   ;;  %v15447_v16 = vld [vmem:[%s16929_s29 + $0x56c] ss:$16 sps:$4 sm:$0xff]  }
 0x3d0   : > { %v15442_v52 = vld [vmem:[%s16929_s29 + $0x368] ss:$16 sps:$4 sm:$0xff]   ;;  %v15450_v43 = vld [vmem:[%s16929_s29 + $0x38c] ss:$16 sps:$4 sm:$0xff]  }
 0x3d1   : > { %11165 = vmatpush1.bf16.msra.mxu0 %v15418_v32  ;;  %v15445_v37 = vld [vmem:[%s16929_s29 + $0x568] ss:$16 sps:$4 sm:$0xff]   ;;  %v15453_v31 = vld [vmem:[%s16929_s29 + $0x58c] ss:$16 sps:$4 sm:$0xff]  }
 0x3d2   : > { %11206 = vmatpush1.bf16.msra.mxu1 %v15421_v34  ;;  %11166 = vmatprep.subr.bf16.mxu0 %v15426_v5  ;;  %v15448_v55 = vld [vmem:[%s16929_s29 + $0x388] ss:$16 sps:$4 sm:$0xff]   ;;  %v15456_v34 = vld [vmem:[%s16929_s29 + $0x3ac] ss:$16 sps:$4 sm:$0xff]  }
 0x3d3   : > { %11207 = vmatprep.subr.bf16.mxu1 %v15429_v13  ;;  %v15451_v32 = vld [vmem:[%s16929_s29 + $0x588] ss:$16 sps:$4 sm:$0xff]   ;;  %v15459_v5 = vld [vmem:[%s16929_s29 + $0x5ac] ss:$16 sps:$4 sm:$0xff]  }
 0x3d4   : > { %v15454_v13 = vld [vmem:[%s16929_s29 + $0x3a8] ss:$16 sps:$4 sm:$0xff]  }
 0x3d5   : > { %11167 = vmatpush1.bf16.msra.mxu0 %v15424_v22  ;;  %v15457_v22 = vld [vmem:[%s16929_s29 + $0x5a8] ss:$16 sps:$4 sm:$0xff]  }
 0x3d6   : > { %11208 = vmatpush1.bf16.msra.mxu1 %v15427_v63  ;;  %11168 = vmatprep.subr.bf16.mxu0 %v15432_v45  ;;  %v15462_v63 = vld [vmem:[%s16929_s29 + $0x3cc] ss:$16 sps:$4 sm:$0xff]  }
 0x3d7   : > { %11209 = vmatprep.subr.bf16.mxu1 %v15435_v11  ;;  %v15465_v45 = vld [vmem:[%s16929_s29 + $0x5cc] ss:$16 sps:$4 sm:$0xff]   ;;  %v15460_v11 = vld [vmem:[%s16929_s29 + $0x3c8] ss:$16 sps:$4 sm:$0xff]  }
 0x3d9   : > { %11169 = vmatpush1.bf16.msra.mxu0 %v15430_v56  ;;  %v15463_v56 = vld [vmem:[%s16929_s29 + $0x5c8] ss:$16 sps:$4 sm:$0xff]  }
 0x3da   : > { %11210 = vmatpush1.bf16.msra.mxu1 %v15433_v35  ;;  %11170 = vmatprep.subr.bf16.mxu0 %v15438_v33  ;;  %v15468_v35 = vld [vmem:[%s16929_s29 + $0x3ec] ss:$16 sps:$4 sm:$0xff]  }
 0x3db   : > { %11211 = vmatprep.subr.bf16.mxu1 %v15441_v6  ;;  %v15471_v33 = vld [vmem:[%s16929_s29 + $0x5ec] ss:$16 sps:$4 sm:$0xff]   ;;  %v15466_v6 = vld [vmem:[%s16929_s29 + $0x3e8] ss:$16 sps:$4 sm:$0xff]  }
 0x3dd   : > { %11171 = vmatpush1.bf16.msra.mxu0 %v15436_v7  ;;  %v15469_v7 = vld [vmem:[%s16929_s29 + $0x5e8] ss:$16 sps:$4 sm:$0xff]  }
 0x3de   : > { %11212 = vmatpush1.bf16.msra.mxu1 %v15439_v57  ;;  %11172 = vmatprep.subr.bf16.mxu0 %v15444_v14  ;;  %v15474_v57 = vld [vmem:[%s16929_s29 + $0x60c] ss:$16 sps:$4 sm:$0xff]  }
 0x3df   : > { %11213 = vmatprep.subr.bf16.mxu1 %v15447_v16  ;;  %v15477_v14 = vld [vmem:[%s16929_s29 + $0x80c] ss:$16 sps:$4 sm:$0xff]   ;;  %v15472_v16 = vld [vmem:[%s16929_s29 + $0x608] ss:$16 sps:$4 sm:$0xff]  }
 0x3e1   : > { %11173 = vmatpush1.bf16.msra.mxu0 %v15442_v52  ;;  %v15475_v52 = vld [vmem:[%s16929_s29 + $0x808] ss:$16 sps:$4 sm:$0xff]  }
 0x3e2   : > { %11214 = vmatpush1.bf16.msra.mxu1 %v15445_v37  ;;  %11174 = vmatprep.subr.bf16.mxu0 %v15450_v43  ;;  %v15480_v37 = vld [vmem:[%s16929_s29 + $0x62c] ss:$16 sps:$4 sm:$0xff]  }
 0x3e3   : > { %11215 = vmatprep.subr.bf16.mxu1 %v15453_v31  ;;  %v15483_v43 = vld [vmem:[%s16929_s29 + $0x82c] ss:$16 sps:$4 sm:$0xff]   ;;  %v15478_v31 = vld [vmem:[%s16929_s29 + $0x628] ss:$16 sps:$4 sm:$0xff]  }
 0x3e5   : > { %11175 = vmatpush1.bf16.msra.mxu0 %v15448_v55  ;;  %v15481_v55 = vld [vmem:[%s16929_s29 + $0x828] ss:$16 sps:$4 sm:$0xff]  }
 0x3e6   : > { %11216 = vmatpush1.bf16.msra.mxu1 %v15451_v32  ;;  %11176 = vmatprep.subr.bf16.mxu0 %v15456_v34  ;;  %v15486_v32 = vld [vmem:[%s16929_s29 + $0x64c] ss:$16 sps:$4 sm:$0xff]  }
 0x3e7   : > { %11217 = vmatprep.subr.bf16.mxu1 %v15459_v5  ;;  %v15489_v34 = vld [vmem:[%s16929_s29 + $0x84c] ss:$16 sps:$4 sm:$0xff]  }
 0x3e8   : > { %v15492_v5 = vld [vmem:[%s16929_s29 + $0x66c] ss:$16 sps:$4 sm:$0xff]  }
 0x3e9   : > { %11177 = vmatpush1.bf16.msra.mxu0 %v15454_v13  ;;  %v15495_v13 = vld [vmem:[%s16929_s29 + $0x86c] ss:$16 sps:$4 sm:$0xff]  }
 0x3ea   : > { %11218 = vmatpush1.bf16.msra.mxu1 %v15457_v22  ;;  %11178 = vmatprep.subr.bf16.mxu0 %v15462_v63  ;;  %v15490_v22 = vld [vmem:[%s16929_s29 + $0x668] ss:$16 sps:$4 sm:$0xff]   ;;  %v15501_v63 = vld [vmem:[%s16929_s29 + $0x88c] ss:$16 sps:$4 sm:$0xff]  }
 0x3eb   : > { %11219 = vmatprep.subr.bf16.mxu1 %v15465_v45  ;;  %v15496_v45 = vld [vmem:[%s16929_s29 + $0x688] ss:$16 sps:$4 sm:$0xff]  }
 0x3ed   : > { %11179 = vmatpush1.bf16.msra.mxu0 %v15460_v11  ;;  %v15499_v11 = vld [vmem:[%s16929_s29 + $0x888] ss:$16 sps:$4 sm:$0xff]  }
 0x3ee   : > { %11220 = vmatpush1.bf16.msra.mxu1 %v15463_v56  ;;  %11180 = vmatprep.subr.bf16.mxu0 %v15468_v35  ;;  %v15504_v56 = vld [vmem:[%s16929_s29 + $0x6ac] ss:$16 sps:$4 sm:$0xff]  }
 0x3ef   : > { %11221 = vmatprep.subr.bf16.mxu1 %v15471_v33  ;;  %v15507_v35 = vld [vmem:[%s16929_s29 + $0x8ac] ss:$16 sps:$4 sm:$0xff]   ;;  %v15502_v33 = vld [vmem:[%s16929_s29 + $0x6a8] ss:$16 sps:$4 sm:$0xff]  }
 0x3f1   : > { %11181 = vmatpush1.bf16.msra.mxu0 %v15466_v6  ;;  %v15505_v6 = vld [vmem:[%s16929_s29 + $0x8a8] ss:$16 sps:$4 sm:$0xff]  }
 0x3f2   : > { %11222 = vmatpush1.bf16.msra.mxu1 %v15469_v7  ;;  %11232 = vmatprep.subr.bf16.mxu0 %v15474_v57  ;;  %v15510_v7 = vld [vmem:[%s16929_s29 + $0x6cc] ss:$16 sps:$4 sm:$0xff]  }
 0x3f3   : > { %11273 = vmatprep.subr.bf16.mxu1 %v15477_v14  ;;  %v15513_v57 = vld [vmem:[%s16929_s29 + $0x8cc] ss:$16 sps:$4 sm:$0xff]  }
 0x3f4   : > { %11183 = vmatmul.mubr.bf16.vlgmr.msra.gmra.mrb[52].mxu0 %v17032_v8  ;;  %v15484_v8 = vld [vmem:[%s16929_s29 + $0x648] ss:$16 sps:$4 sm:$0xff]  }
 0x3f5   : > { %11224 = vmatmul.mubr.bf16.vlgmr.msra.gmra.mrb[52].mxu1 %v17118_v17  ;;  %11233 = vmatpush1.bf16.msra.mxu0 %v15472_v16  ;;  %v15487_v17 = vld [vmem:[%s16929_s29 + $0x848] ss:$16 sps:$4 sm:$0xff]  }
 0x3f6   : > { %11274 = vmatpush1.bf16.msra.mxu1 %v15475_v52  ;;  %11234 = vmatprep.subr.bf16.mxu0 %v15480_v37 }
 0x3f7   : > { %11275 = vmatprep.subr.bf16.mxu1 %v15483_v43  ;;  %11264 = vmatprep.mubr.bf16.mxu0 %v17074_v38  ;;  %v15493_v38 = vld [vmem:[%s16929_s29 + $0x868] ss:$16 sps:$4 sm:$0xff]  }
 0x3f8   : > { %11305 = vmatprep.mubr.bf16.mxu1 %v17136_v25  ;;  %v15498_v25 = vld [vmem:[%s16929_s29 + $0x68c] ss:$16 sps:$4 sm:$0xff]  }
 0x3f9   : > { %11235 = vmatpush1.bf16.msra.mxu0 %v15478_v31 }
 0x3fa   : > { %11276 = vmatpush1.bf16.msra.mxu1 %v15481_v55  ;;  %11236 = vmatprep.subr.bf16.mxu0 %v15486_v32 }
 0x3fb   : > { %11277 = vmatprep.subr.bf16.mxu1 %v15489_v34  ;;  %v15508_v34 = vld [vmem:[%s16929_s29 + $0x6c8] ss:$16 sps:$4 sm:$0xff]  }
 0x3fd   : > { %11237 = vmatpush1.bf16.msra.mxu0 %v15484_v8  ;;  %v15511_v8 = vld [vmem:[%s16929_s29 + $0x8c8] ss:$16 sps:$4 sm:$0xff]  }
 0x3fe   : > { %11278 = vmatpush1.bf16.msra.mxu1 %v15487_v17  ;;  %11238 = vmatprep.subr.bf16.mxu0 %v15492_v5 }
 0x3ff   : > { %11279 = vmatprep.subr.bf16.mxu1 %v15495_v13 }
 0x401   : > { %11239 = vmatpush1.bf16.msra.mxu0 %v15490_v22 }
 0x402   : > { %11280 = vmatpush1.bf16.msra.mxu1 %v15493_v38  ;;  %11240 = vmatprep.subr.bf16.mxu0 %v15498_v25  ;;  %v15514_v38 = vld [vmem:[%s16929_s29 + $0x6e8] ss:$16 sps:$4 sm:$0xff]  }
 0x403   : > { %11281 = vmatprep.subr.bf16.mxu1 %v15501_v63  ;;  %v15517_v25 = vld [vmem:[%s16929_s29 + $0x8e8] ss:$16 sps:$4 sm:$0xff]   ;;  %v15522_v63 = vld [vmem:[%s16929_s29 + $0x70c] ss:$16 sps:$4 sm:$0xff]  }
 0x405   : > { %11241 = vmatpush1.bf16.msra.mxu0 %v15496_v45  ;;  %v15525_v45 = vld [vmem:[%s16929_s29 + $0x90c] ss:$16 sps:$4 sm:$0xff]  }
 0x406   : > { %11282 = vmatpush1.bf16.msra.mxu1 %v15499_v11  ;;  %11242 = vmatprep.subr.bf16.mxu0 %v15504_v56  ;;  %v15520_v11 = vld [vmem:[%s16929_s29 + $0x708] ss:$16 sps:$4 sm:$0xff]  }
 0x407   : > { %11283 = vmatprep.subr.bf16.mxu1 %v15507_v35  ;;  %v10938_v14 = vpop.f32.mrb[40].mxu0  ;;  %v15523_v56 = vld [vmem:[%s16929_s29 + $0x908] ss:$16 sps:$4 sm:$0xff]   ;;  %v15528_v35 = vld [vmem:[%s16929_s29 + $0x72c] ss:$16 sps:$4 sm:$0xff]  }
 0x408   : > { %v10979_v16 = vpop.f32.mrb[40].mxu1  ;;  %v10939_v52 = vadd.f32 %v10938_v14, %v18187_v48  ;;  %v10940_v37 = vpop.f32.mrb[41].mxu0  ;;  %v15516_v48 = vld [vmem:[%s16929_s29 + $0x6ec] ss:$16 sps:$4 sm:$0xff]  }
 0x409   : > { %v10981_v43 = vpop.f32.mrb[41].mxu1  ;;  %v10941_v31 = vadd.f32 %v10940_v37, %v18191_v0  ;;  %v10942_v55 = vpop.f32.mrb[42].mxu0  ;;  %11243 = vmatpush1.bf16.msra.mxu0 %v15502_v33  ;;  %v15519_v0 = vld [vmem:[%s16929_s29 + $0x8ec] ss:$16 sps:$4 sm:$0xff]  }
 0x40a   : > { %v10983_v32 = vpop.f32.mrb[42].mxu1  ;;  %11284 = vmatpush1.bf16.msra.mxu1 %v15505_v6  ;;  %v18261_v17 = vadd.f32 %v10979_v16, %v10939_v52  ;;  %v10943_v5 = vpop.f32.mrb[43].mxu0  ;;  %11244 = vmatprep.subr.bf16.mxu0 %v15510_v7  ;;  %v15531_v33 = vld [vmem:[%s16929_s29 + $0x92c] ss:$16 sps:$4 sm:$0xff]   ;;  %v15526_v6 = vld [vmem:[%s16929_s29 + $0x728] ss:$16 sps:$4 sm:$0xff]  }
 0x40b   : > { %v10984_v13 = vpop.f32.mrb[43].mxu1  ;;  %11285 = vmatprep.subr.bf16.mxu1 %v15513_v57  ;;  %v18265_v22 = vadd.f32 %v10981_v43, %v10941_v31  ;;  %v15529_v7 = vld [vmem:[%s16929_s29 + $0x928] ss:$16 sps:$4 sm:$0xff]   ;;  %v15534_v57 = vld [vmem:[%s16929_s29 + $0x74c] ss:$16 sps:$4 sm:$0xff]  }
 0x40c   : > { %v15537_v14 = vld [vmem:[%s16929_s29 + $0x94c] ss:$16 sps:$4 sm:$0xff]   ;;  %v15532_v16 = vld [vmem:[%s16929_s29 + $0x748] ss:$16 sps:$4 sm:$0xff]  }
 0x40d   : > { %11245 = vmatpush1.bf16.msra.mxu0 %v15508_v34  ;;  %v15535_v52 = vld [vmem:[%s16929_s29 + $0x948] ss:$16 sps:$4 sm:$0xff]   ;;  %v15540_v37 = vld [vmem:[%s16929_s29 + $0x76c] ss:$16 sps:$4 sm:$0xff]  }
 0x40e   : > { %11286 = vmatpush1.bf16.msra.mxu1 %v15511_v8  ;;  %11246 = vmatprep.subr.bf16.mxu0 %v15516_v48  ;;  %v15543_v43 = vld [vmem:[%s16929_s29 + $0x96c] ss:$16 sps:$4 sm:$0xff]   ;;  %v15538_v31 = vld [vmem:[%s16929_s29 + $0x768] ss:$16 sps:$4 sm:$0xff]  }
 0x40f   : > { %11287 = vmatprep.subr.bf16.mxu1 %v15519_v0  ;;  %v15541_v55 = vld [vmem:[%s16929_s29 + $0x968] ss:$16 sps:$4 sm:$0xff]   ;;  %v15546_v32 = vld [vmem:[%s16929_s29 + $0x78c] ss:$16 sps:$4 sm:$0xff]  }
 0x410   : > { %v15549_v34 = vld [vmem:[%s16929_s29 + $0x98c] ss:$16 sps:$4 sm:$0xff]   ;;  %v15544_v8 = vld [vmem:[%s16929_s29 + $0x788] ss:$16 sps:$4 sm:$0xff]  }
 0x411   : > { %11247 = vmatpush1.bf16.msra.mxu0 %v15514_v38  ;;  %v15547_v5 = vld [vmem:[%s16929_s29 + $0x988] ss:$16 sps:$4 sm:$0xff]   ;;  %v15552_v13 = vld [vmem:[%s16929_s29 + $0x7ac] ss:$16 sps:$4 sm:$0xff]  }
 0x412   : > { %11288 = vmatpush1.bf16.msra.mxu1 %v15517_v25  ;;  %11248 = vmatprep.subr.bf16.mxu0 %v15522_v63  ;;  %v15555_v48 = vld [vmem:[%s16929_s29 + $0x9ac] ss:$16 sps:$4 sm:$0xff]   ;;  %v15550_v0 = vld [vmem:[%s16929_s29 + $0x7a8] ss:$16 sps:$4 sm:$0xff]  }
 0x413   : > { %11289 = vmatprep.subr.bf16.mxu1 %v15525_v45  ;;  %v15553_v38 = vld [vmem:[%s16929_s29 + $0x9a8] ss:$16 sps:$4 sm:$0xff]   ;;  %v15558_v25 = vld [vmem:[%s16929_s29 + $0x7cc] ss:$16 sps:$4 sm:$0xff]  }
 0x414   : > { %v15561_v63 = vld [vmem:[%s16929_s29 + $0x9cc] ss:$16 sps:$4 sm:$0xff]   ;;  %v15556_v45 = vld [vmem:[%s16929_s29 + $0x7c8] ss:$16 sps:$4 sm:$0xff]  }
 0x415   : > { %11249 = vmatpush1.bf16.msra.mxu0 %v15520_v11  ;;  %v15559_v11 = vld [vmem:[%s16929_s29 + $0x9c8] ss:$16 sps:$4 sm:$0xff]  }
 0x416   : > { %11290 = vmatpush1.bf16.msra.mxu1 %v15523_v56  ;;  %11250 = vmatprep.subr.bf16.mxu0 %v15528_v35  ;;  %v15564_v56 = vld [vmem:[%s16929_s29 + $0x7ec] ss:$16 sps:$4 sm:$0xff]  }
 0x417   : > { %11291 = vmatprep.subr.bf16.mxu1 %v15531_v33  ;;  %v15567_v35 = vld [vmem:[%s16929_s29 + $0x9ec] ss:$16 sps:$4 sm:$0xff]   ;;  %v15562_v33 = vld [vmem:[%s16929_s29 + $0x7e8] ss:$16 sps:$4 sm:$0xff]  }
 0x419   : > { %11251 = vmatpush1.bf16.msra.mxu0 %v15526_v6  ;;  %v15565_v6 = vld [vmem:[%s16929_s29 + $0x9e8] ss:$16 sps:$4 sm:$0xff]  }
 0x41a   : > { %11292 = vmatpush1.bf16.msra.mxu1 %v15529_v7  ;;  %11252 = vmatprep.subr.bf16.mxu0 %v15534_v57  ;;  %v15570_v7 = vld [vmem:[%s16929_s29 + $0xa0c] ss:$16 sps:$4 sm:$0xff]  }
 0x41b   : > { %11293 = vmatprep.subr.bf16.mxu1 %v15537_v14  ;;  %v15573_v57 = vld [vmem:[%s16929_s29 + $0xc0c] ss:$16 sps:$4 sm:$0xff]   ;;  %v15568_v14 = vld [vmem:[%s16929_s29 + $0xa08] ss:$16 sps:$4 sm:$0xff]  }
 0x41d   : > { %11253 = vmatpush1.bf16.msra.mxu0 %v15532_v16  ;;  %v15571_v16 = vld [vmem:[%s16929_s29 + $0xc08] ss:$16 sps:$4 sm:$0xff]  }
 0x41e   : > { %11294 = vmatpush1.bf16.msra.mxu1 %v15535_v52  ;;  %11254 = vmatprep.subr.bf16.mxu0 %v15540_v37  ;;  %v15576_v52 = vld [vmem:[%s16929_s29 + $0xa2c] ss:$16 sps:$4 sm:$0xff]  }
 0x41f   : > { %11295 = vmatprep.subr.bf16.mxu1 %v15543_v43  ;;  %v15579_v37 = vld [vmem:[%s16929_s29 + $0xc2c] ss:$16 sps:$4 sm:$0xff]   ;;  %v15574_v43 = vld [vmem:[%s16929_s29 + $0xa28] ss:$16 sps:$4 sm:$0xff]  }
 0x421   : > { %11255 = vmatpush1.bf16.msra.mxu0 %v15538_v31  ;;  %v15577_v31 = vld [vmem:[%s16929_s29 + $0xc28] ss:$16 sps:$4 sm:$0xff]  }
 0x422   : > { %11296 = vmatpush1.bf16.msra.mxu1 %v15541_v55  ;;  %11256 = vmatprep.subr.bf16.mxu0 %v15546_v32  ;;  %v15582_v55 = vld [vmem:[%s16929_s29 + $0xa4c] ss:$16 sps:$4 sm:$0xff]  }
 0x423   : > { %11297 = vmatprep.subr.bf16.mxu1 %v15549_v34  ;;  %v15585_v32 = vld [vmem:[%s16929_s29 + $0xc4c] ss:$16 sps:$4 sm:$0xff]  }
 0x424   : > { %v15588_v34 = vld [vmem:[%s16929_s29 + $0xa6c] ss:$16 sps:$4 sm:$0xff]  }
 0x425   : > { %11257 = vmatpush1.bf16.msra.mxu0 %v15544_v8  ;;  %v15591_v8 = vld [vmem:[%s16929_s29 + $0xc6c] ss:$16 sps:$4 sm:$0xff]  }
 0x426   : > { %11298 = vmatpush1.bf16.msra.mxu1 %v15547_v5  ;;  %11258 = vmatprep.subr.bf16.mxu0 %v15552_v13  ;;  %v15586_v5 = vld [vmem:[%s16929_s29 + $0xa68] ss:$16 sps:$4 sm:$0xff]   ;;  %v15597_v13 = vld [vmem:[%s16929_s29 + $0xc8c] ss:$16 sps:$4 sm:$0xff]  }
 0x427   : > { %11299 = vmatprep.subr.bf16.mxu1 %v15555_v48  ;;  %v15592_v48 = vld [vmem:[%s16929_s29 + $0xa88] ss:$16 sps:$4 sm:$0xff]  }
 0x429   : > { %11259 = vmatpush1.bf16.msra.mxu0 %v15550_v0  ;;  %v15595_v0 = vld [vmem:[%s16929_s29 + $0xc88] ss:$16 sps:$4 sm:$0xff]  }
 0x42a   : > { %11300 = vmatpush1.bf16.msra.mxu1 %v15553_v38  ;;  %11260 = vmatprep.subr.bf16.mxu0 %v15558_v25  ;;  %v15600_v38 = vld [vmem:[%s16929_s29 + $0xaac] ss:$16 sps:$4 sm:$0xff]  }
 0x42b   : > { %11301 = vmatprep.subr.bf16.mxu1 %v15561_v63  ;;  %v15603_v25 = vld [vmem:[%s16929_s29 + $0xcac] ss:$16 sps:$4 sm:$0xff]   ;;  %v15598_v63 = vld [vmem:[%s16929_s29 + $0xaa8] ss:$16 sps:$4 sm:$0xff]  }
 0x42d   : > { %11261 = vmatpush1.bf16.msra.mxu0 %v15556_v45  ;;  %v15601_v45 = vld [vmem:[%s16929_s29 + $0xca8] ss:$16 sps:$4 sm:$0xff]  }
 0x42e   : > { %11302 = vmatpush1.bf16.msra.mxu1 %v15559_v11  ;;  %11262 = vmatprep.subr.bf16.mxu0 %v15564_v56  ;;  %v15606_v11 = vld [vmem:[%s16929_s29 + $0xacc] ss:$16 sps:$4 sm:$0xff]  }
 0x42f   : > { %11303 = vmatprep.subr.bf16.mxu1 %v15567_v35  ;;  %v15609_v56 = vld [vmem:[%s16929_s29 + $0xccc] ss:$16 sps:$4 sm:$0xff]  }
 0x431   : > { %11263 = vmatpush1.bf16.msra.mxu0 %v15562_v33 }
 0x432   : > { %11304 = vmatpush1.bf16.msra.mxu1 %v15565_v6  ;;  %11314 = vmatprep.subr.bf16.mxu0 %v15570_v7 }
 0x433   : > { %11355 = vmatprep.subr.bf16.mxu1 %v15573_v57 }
 0x434   : > { %11265 = vmatmul.mubr.bf16.vlgmr.msra.gmra.mrb[56].mxu0 %v17122_v18  ;;  %v15580_v18 = vld [vmem:[%s16929_s29 + $0xa48] ss:$16 sps:$4 sm:$0xff]  }
 0x435   : > { %11306 = vmatmul.mubr.bf16.vlgmr.msra.gmra.mrb[56].mxu1 %v17210_v39  ;;  %11315 = vmatpush1.bf16.msra.mxu0 %v15568_v14  ;;  %v15583_v39 = vld [vmem:[%s16929_s29 + $0xc48] ss:$16 sps:$4 sm:$0xff]  }
 0x436   : > { %11356 = vmatpush1.bf16.msra.mxu1 %v15571_v16  ;;  %11316 = vmatprep.subr.bf16.mxu0 %v15576_v52 }
 0x437   : > { %11357 = vmatprep.subr.bf16.mxu1 %v15579_v37  ;;  %11346 = vmatprep.mubr.bf16.mxu0 %v17140_v26  ;;  %v15589_v26 = vld [vmem:[%s16929_s29 + $0xc68] ss:$16 sps:$4 sm:$0xff]  }
 0x438   : > { %11387 = vmatprep.mubr.bf16.mxu1 %v17226_v23  ;;  %v15594_v23 = vld [vmem:[%s16929_s29 + $0xa8c] ss:$16 sps:$4 sm:$0xff]   ;;  %v15604_v37 = vld [vmem:[%s16929_s29 + $0xac8] ss:$16 sps:$4 sm:$0xff]  }
 0x439   : > { %11317 = vmatpush1.bf16.msra.mxu0 %v15574_v43  ;;  %v15607_v43 = vld [vmem:[%s16929_s29 + $0xcc8] ss:$16 sps:$4 sm:$0xff]  }
 0x43a   : > { %11358 = vmatpush1.bf16.msra.mxu1 %v15577_v31  ;;  %11318 = vmatprep.subr.bf16.mxu0 %v15582_v55 }
 0x43b   : > { %11359 = vmatprep.subr.bf16.mxu1 %v15585_v32 }
 0x43d   : > { %11319 = vmatpush1.bf16.msra.mxu0 %v15580_v18 }
 0x43e   : > { %11360 = vmatpush1.bf16.msra.mxu1 %v15583_v39  ;;  %11320 = vmatprep.subr.bf16.mxu0 %v15588_v34  ;;  %v15610_v39 = vld [vmem:[%s16929_s29 + $0xae8] ss:$16 sps:$4 sm:$0xff]  }
 0x43f   : > { %11361 = vmatprep.subr.bf16.mxu1 %v15591_v8  ;;  %v15613_v34 = vld [vmem:[%s16929_s29 + $0xce8] ss:$16 sps:$4 sm:$0xff]   ;;  %v15618_v8 = vld [vmem:[%s16929_s29 + $0xb0c] ss:$16 sps:$4 sm:$0xff]  }
 0x441   : > { %11321 = vmatpush1.bf16.msra.mxu0 %v15586_v5  ;;  %v15621_v5 = vld [vmem:[%s16929_s29 + $0xd0c] ss:$16 sps:$4 sm:$0xff]  }
 0x442   : > { %11362 = vmatpush1.bf16.msra.mxu1 %v15589_v26  ;;  %11322 = vmatprep.subr.bf16.mxu0 %v15594_v23  ;;  %v15616_v26 = vld [vmem:[%s16929_s29 + $0xb08] ss:$16 sps:$4 sm:$0xff]  }
 0x443   : > { %11363 = vmatprep.subr.bf16.mxu1 %v15597_v13  ;;  %v15619_v23 = vld [vmem:[%s16929_s29 + $0xd08] ss:$16 sps:$4 sm:$0xff]   ;;  %v15624_v13 = vld [vmem:[%s16929_s29 + $0xb2c] ss:$16 sps:$4 sm:$0xff]  }
 0x445   : > { %11323 = vmatpush1.bf16.msra.mxu0 %v15592_v48  ;;  %v15627_v48 = vld [vmem:[%s16929_s29 + $0xd2c] ss:$16 sps:$4 sm:$0xff]  }
 0x446   : > { %11364 = vmatpush1.bf16.msra.mxu1 %v15595_v0  ;;  %11324 = vmatprep.subr.bf16.mxu0 %v15600_v38  ;;  %v15622_v0 = vld [vmem:[%s16929_s29 + $0xb28] ss:$16 sps:$4 sm:$0xff]  }
 0x447   : > { %11365 = vmatprep.subr.bf16.mxu1 %v15603_v25  ;;  %v11020_v35 = vpop.f32.mrb[44].mxu0  ;;  %v15625_v38 = vld [vmem:[%s16929_s29 + $0xd28] ss:$16 sps:$4 sm:$0xff]   ;;  %v15630_v25 = vld [vmem:[%s16929_s29 + $0xb4c] ss:$16 sps:$4 sm:$0xff]  }
 0x448   : > { %v11061_v33 = vpop.f32.mrb[44].mxu1  ;;  %v11021_v6 = vadd.f32 %v11020_v35, %v18261_v17  ;;  %v11022_v7 = vpop.f32.mrb[45].mxu0  ;;  %v15612_v17 = vld [vmem:[%s16929_s29 + $0xaec] ss:$16 sps:$4 sm:$0xff]  }
 0x449   : > { %v11063_v57 = vpop.f32.mrb[45].mxu1  ;;  %v11023_v14 = vadd.f32 %v11022_v7, %v18265_v22  ;;  %v11024_v16 = vpop.f32.mrb[46].mxu0  ;;  %11325 = vmatpush1.bf16.msra.mxu0 %v15598_v63  ;;  %v15615_v22 = vld [vmem:[%s16929_s29 + $0xcec] ss:$16 sps:$4 sm:$0xff]  }
 0x44a   : > { %v11065_v52 = vpop.f32.mrb[46].mxu1  ;;  %11366 = vmatpush1.bf16.msra.mxu1 %v15601_v45  ;;  %v18335_v31 = vadd.f32 %v11061_v33, %v11021_v6  ;;  %v11025_v55 = vpop.f32.mrb[47].mxu0  ;;  %11326 = vmatprep.subr.bf16.mxu0 %v15606_v11  ;;  %v15633_v63 = vld [vmem:[%s16929_s29 + $0xd4c] ss:$16 sps:$4 sm:$0xff]   ;;  %v15628_v45 = vld [vmem:[%s16929_s29 + $0xb48] ss:$16 sps:$4 sm:$0xff]  }
 0x44b   : > { %v11066_v32 = vpop.f32.mrb[47].mxu1  ;;  %11367 = vmatprep.subr.bf16.mxu1 %v15609_v56  ;;  %v18339_v18 = vadd.f32 %v11063_v57, %v11023_v14  ;;  %v15631_v11 = vld [vmem:[%s16929_s29 + $0xd48] ss:$16 sps:$4 sm:$0xff]   ;;  %v15636_v56 = vld [vmem:[%s16929_s29 + $0xb6c] ss:$16 sps:$4 sm:$0xff]  }
 0x44c   : > { %v15639_v35 = vld [vmem:[%s16929_s29 + $0xd6c] ss:$16 sps:$4 sm:$0xff]   ;;  %v15634_v33 = vld [vmem:[%s16929_s29 + $0xb68] ss:$16 sps:$4 sm:$0xff]  }
 0x44d   : > { %11327 = vmatpush1.bf16.msra.mxu0 %v15604_v37  ;;  %v15637_v6 = vld [vmem:[%s16929_s29 + $0xd68] ss:$16 sps:$4 sm:$0xff]   ;;  %v15642_v7 = vld [vmem:[%s16929_s29 + $0xb8c] ss:$16 sps:$4 sm:$0xff]  }
 0x44e   : > { %11368 = vmatpush1.bf16.msra.mxu1 %v15607_v43  ;;  %11328 = vmatprep.subr.bf16.mxu0 %v15612_v17  ;;  %v15645_v57 = vld [vmem:[%s16929_s29 + $0xd8c] ss:$16 sps:$4 sm:$0xff]   ;;  %v15640_v14 = vld [vmem:[%s16929_s29 + $0xb88] ss:$16 sps:$4 sm:$0xff]  }
 0x44f   : > { %11369 = vmatprep.subr.bf16.mxu1 %v15615_v22  ;;  %v15643_v16 = vld [vmem:[%s16929_s29 + $0xd88] ss:$16 sps:$4 sm:$0xff]   ;;  %v15648_v52 = vld [vmem:[%s16929_s29 + $0xbac] ss:$16 sps:$4 sm:$0xff]  }
 0x450   : > { %v15651_v37 = vld [vmem:[%s16929_s29 + $0xdac] ss:$16 sps:$4 sm:$0xff]   ;;  %v15646_v43 = vld [vmem:[%s16929_s29 + $0xba8] ss:$16 sps:$4 sm:$0xff]  }
 0x451   : > { %11329 = vmatpush1.bf16.msra.mxu0 %v15610_v39  ;;  %v15649_v55 = vld [vmem:[%s16929_s29 + $0xda8] ss:$16 sps:$4 sm:$0xff]   ;;  %v15654_v32 = vld [vmem:[%s16929_s29 + $0xbcc] ss:$16 sps:$4 sm:$0xff]  }
 0x452   : > { %11370 = vmatpush1.bf16.msra.mxu1 %v15613_v34  ;;  %11330 = vmatprep.subr.bf16.mxu0 %v15618_v8  ;;  %v15657_v17 = vld [vmem:[%s16929_s29 + $0xdcc] ss:$16 sps:$4 sm:$0xff]   ;;  %v15652_v22 = vld [vmem:[%s16929_s29 + $0xbc8] ss:$16 sps:$4 sm:$0xff]  }
 0x453   : > { %11371 = vmatprep.subr.bf16.mxu1 %v15621_v5  ;;  %v15655_v39 = vld [vmem:[%s16929_s29 + $0xdc8] ss:$16 sps:$4 sm:$0xff]   ;;  %v15660_v34 = vld [vmem:[%s16929_s29 + $0xbec] ss:$16 sps:$4 sm:$0xff]  }
 0x454   : > { %v15663_v8 = vld [vmem:[%s16929_s29 + $0xdec] ss:$16 sps:$4 sm:$0xff]   ;;  %v15658_v5 = vld [vmem:[%s16929_s29 + $0xbe8] ss:$16 sps:$4 sm:$0xff]  }
 0x455   : > { %11331 = vmatpush1.bf16.msra.mxu0 %v15616_v26  ;;  %v15661_v26 = vld [vmem:[%s16929_s29 + $0xde8] ss:$16 sps:$4 sm:$0xff]  }
 0x456   : > { %11372 = vmatpush1.bf16.msra.mxu1 %v15619_v23  ;;  %11332 = vmatprep.subr.bf16.mxu0 %v15624_v13  ;;  %v15666_v23 = vld [vmem:[%s16929_s29 + $0xe0c] ss:$16 sps:$4 sm:$0xff]  }
 0x457   : > { %11373 = vmatprep.subr.bf16.mxu1 %v15627_v48  ;;  %v15669_v13 = vld [vmem:[%s16929_s29 + $0x100c] ss:$16 sps:$4 sm:$0xff]   ;;  %v15664_v48 = vld [vmem:[%s16929_s29 + $0xe08] ss:$16 sps:$4 sm:$0xff]  }
 0x459   : > { %11333 = vmatpush1.bf16.msra.mxu0 %v15622_v0  ;;  %v15667_v0 = vld [vmem:[%s16929_s29 + $0x1008] ss:$16 sps:$4 sm:$0xff]  }
 0x45a   : > { %11374 = vmatpush1.bf16.msra.mxu1 %v15625_v38  ;;  %11334 = vmatprep.subr.bf16.mxu0 %v15630_v25  ;;  %v15672_v38 = vld [vmem:[%s16929_s29 + $0xe2c] ss:$16 sps:$4 sm:$0xff]  }
 0x45b   : > { %11375 = vmatprep.subr.bf16.mxu1 %v15633_v63  ;;  %v15675_v25 = vld [vmem:[%s16929_s29 + $0x102c] ss:$16 sps:$4 sm:$0xff]   ;;  %v15670_v63 = vld [vmem:[%s16929_s29 + $0xe28] ss:$16 sps:$4 sm:$0xff]  }
 0x45d   : > { %11335 = vmatpush1.bf16.msra.mxu0 %v15628_v45  ;;  %v15673_v45 = vld [vmem:[%s16929_s29 + $0x1028] ss:$16 sps:$4 sm:$0xff]  }
 0x45e   : > { %11376 = vmatpush1.bf16.msra.mxu1 %v15631_v11  ;;  %11336 = vmatprep.subr.bf16.mxu0 %v15636_v56  ;;  %v15678_v11 = vld [vmem:[%s16929_s29 + $0xe4c] ss:$16 sps:$4 sm:$0xff]  }
 0x45f   : > { %11377 = vmatprep.subr.bf16.mxu1 %v15639_v35  ;;  %v15681_v56 = vld [vmem:[%s16929_s29 + $0x104c] ss:$16 sps:$4 sm:$0xff]  }
 0x460   : > { %v15684_v35 = vld [vmem:[%s16929_s29 + $0xe6c] ss:$16 sps:$4 sm:$0xff]  }
 0x461   : > { %11337 = vmatpush1.bf16.msra.mxu0 %v15634_v33  ;;  %v15687_v33 = vld [vmem:[%s16929_s29 + $0x106c] ss:$16 sps:$4 sm:$0xff]  }
 0x462   : > { %11378 = vmatpush1.bf16.msra.mxu1 %v15637_v6  ;;  %11338 = vmatprep.subr.bf16.mxu0 %v15642_v7  ;;  %v15682_v6 = vld [vmem:[%s16929_s29 + $0xe68] ss:$16 sps:$4 sm:$0xff]   ;;  %v15693_v7 = vld [vmem:[%s16929_s29 + $0x108c] ss:$16 sps:$4 sm:$0xff]  }
 0x463   : > { %11379 = vmatprep.subr.bf16.mxu1 %v15645_v57  ;;  %v15688_v57 = vld [vmem:[%s16929_s29 + $0xe88] ss:$16 sps:$4 sm:$0xff]  }
 0x465   : > { %11339 = vmatpush1.bf16.msra.mxu0 %v15640_v14  ;;  %v15691_v14 = vld [vmem:[%s16929_s29 + $0x1088] ss:$16 sps:$4 sm:$0xff]  }
 0x466   : > { %11380 = vmatpush1.bf16.msra.mxu1 %v15643_v16  ;;  %11340 = vmatprep.subr.bf16.mxu0 %v15648_v52  ;;  %v15696_v16 = vld [vmem:[%s16929_s29 + $0xeac] ss:$16 sps:$4 sm:$0xff]  }
 0x467   : > { %11381 = vmatprep.subr.bf16.mxu1 %v15651_v37  ;;  %v15699_v52 = vld [vmem:[%s16929_s29 + $0x10ac] ss:$16 sps:$4 sm:$0xff]   ;;  %v15694_v37 = vld [vmem:[%s16929_s29 + $0xea8] ss:$16 sps:$4 sm:$0xff]  }
 0x469   : > { %11341 = vmatpush1.bf16.msra.mxu0 %v15646_v43  ;;  %v15697_v43 = vld [vmem:[%s16929_s29 + $0x10a8] ss:$16 sps:$4 sm:$0xff]  }
 0x46a   : > { %11382 = vmatpush1.bf16.msra.mxu1 %v15649_v55  ;;  %11342 = vmatprep.subr.bf16.mxu0 %v15654_v32  ;;  %v15702_v55 = vld [vmem:[%s16929_s29 + $0xecc] ss:$16 sps:$4 sm:$0xff]  }
 0x46b   : > { %11383 = vmatprep.subr.bf16.mxu1 %v15657_v17  ;;  %v15705_v32 = vld [vmem:[%s16929_s29 + $0x10cc] ss:$16 sps:$4 sm:$0xff]   ;;  %v280_v17 = vld [vmem:[#allocation2] sm:$0xff] }
 0x46d   : > { %11343 = vmatpush1.bf16.msra.mxu0 %v15652_v22 }
 0x46e   : > { %11384 = vmatpush1.bf16.msra.mxu1 %v15655_v39  ;;  %11344 = vmatprep.subr.bf16.mxu0 %v15660_v34 }
 0x46f   : > { %11385 = vmatprep.subr.bf16.mxu1 %v15663_v8  ;;  %v281_v8 = vld [vmem:[#allocation2 + $0x8] sm:$0xff] }
 0x471   : > { %11345 = vmatpush1.bf16.msra.mxu0 %v15658_v5 }
 0x472   : > { %11386 = vmatpush1.bf16.msra.mxu1 %v15661_v26  ;;  %11396 = vmatprep.subr.bf16.mxu0 %v15666_v23 }
 0x473   : > { %11437 = vmatprep.subr.bf16.mxu1 %v15669_v13 }
 0x474   : > { %11347 = vmatmul.mubr.bf16.vlgmr.msra.gmra.mrb[60].mxu0 %v17214_v40  ;;  %v15676_v40 = vld [vmem:[%s16929_s29 + $0xe48] ss:$16 sps:$4 sm:$0xff]  }
 0x475   : > { %11388 = vmatmul.mubr.bf16.vlgmr.msra.gmra.mrb[60].mxu1 %v17301_v60  ;;  %11397 = vmatpush1.bf16.msra.mxu0 %v15664_v48  ;;  %v15679_v60 = vld [vmem:[%s16929_s29 + $0x1048] ss:$16 sps:$4 sm:$0xff]  }
 0x476   : > { %11438 = vmatpush1.bf16.msra.mxu1 %v15667_v0  ;;  %11398 = vmatprep.subr.bf16.mxu0 %v15672_v38  ;;  %v15700_v0 = vld [vmem:[%s16929_s29 + $0xec8] ss:$16 sps:$4 sm:$0xff]  }
 0x477   : > { %11439 = vmatprep.subr.bf16.mxu1 %v15675_v25  ;;  %11428 = vmatprep.mubr.bf16.mxu0 %v17230_v24  ;;  %v15685_v24 = vld [vmem:[%s16929_s29 + $0x1068] ss:$16 sps:$4 sm:$0xff]  }
 0x478   : > { %11469 = vmatprep.mubr.bf16.mxu1 %v17316_v41  ;;  %v15690_v41 = vld [vmem:[%s16929_s29 + $0xe8c] ss:$16 sps:$4 sm:$0xff]   ;;  %v15703_v38 = vld [vmem:[%s16929_s29 + $0x10c8] ss:$16 sps:$4 sm:$0xff]  }
 0x479   : > { %11399 = vmatpush1.bf16.msra.mxu0 %v15670_v63 }
 0x47a   : > { %11440 = vmatpush1.bf16.msra.mxu1 %v15673_v45  ;;  %11400 = vmatprep.subr.bf16.mxu0 %v15678_v11  ;;  %v15708_v45 = vld [vmem:[%s16929_s29 + $0xeec] ss:$16 sps:$4 sm:$0xff]  }
 0x47b   : > { %11441 = vmatprep.subr.bf16.mxu1 %v15681_v56  ;;  %v15711_v11 = vld [vmem:[%s16929_s29 + $0x10ec] ss:$16 sps:$4 sm:$0xff]   ;;  %v15706_v56 = vld [vmem:[%s16929_s29 + $0xee8] ss:$16 sps:$4 sm:$0xff]  }
 0x47d   : > { %11401 = vmatpush1.bf16.msra.mxu0 %v15676_v40  ;;  %v15709_v40 = vld [vmem:[%s16929_s29 + $0x10e8] ss:$16 sps:$4 sm:$0xff]  }
 0x47e   : > { %11442 = vmatpush1.bf16.msra.mxu1 %v15679_v60  ;;  %11402 = vmatprep.subr.bf16.mxu0 %v15684_v35  ;;  %v15714_v60 = vld [vmem:[%s16929_s29 + $0xf0c] ss:$16 sps:$4 sm:$0xff]  }
 0x47f   : > { %11443 = vmatprep.subr.bf16.mxu1 %v15687_v33  ;;  %v15717_v35 = vld [vmem:[%s16929_s29 + $0x110c] ss:$16 sps:$4 sm:$0xff]   ;;  %v15712_v33 = vld [vmem:[%s16929_s29 + $0xf08] ss:$16 sps:$4 sm:$0xff]  }
 0x481   : > { %11403 = vmatpush1.bf16.msra.mxu0 %v15682_v6  ;;  %v15715_v6 = vld [vmem:[%s16929_s29 + $0x1108] ss:$16 sps:$4 sm:$0xff]  }
 0x482   : > { %11444 = vmatpush1.bf16.msra.mxu1 %v15685_v24  ;;  %11404 = vmatprep.subr.bf16.mxu0 %v15690_v41  ;;  %v15720_v24 = vld [vmem:[%s16929_s29 + $0xf2c] ss:$16 sps:$4 sm:$0xff]  }
 0x483   : > { %11445 = vmatprep.subr.bf16.mxu1 %v15693_v7  ;;  %v15723_v41 = vld [vmem:[%s16929_s29 + $0x112c] ss:$16 sps:$4 sm:$0xff]   ;;  %v15718_v7 = vld [vmem:[%s16929_s29 + $0xf28] ss:$16 sps:$4 sm:$0xff]  }
 0x485   : > { %11405 = vmatpush1.bf16.msra.mxu0 %v15688_v57  ;;  %v15721_v57 = vld [vmem:[%s16929_s29 + $0x1128] ss:$16 sps:$4 sm:$0xff]  }
 0x486   : > { %11446 = vmatpush1.bf16.msra.mxu1 %v15691_v14  ;;  %11406 = vmatprep.subr.bf16.mxu0 %v15696_v16  ;;  %v15726_v14 = vld [vmem:[%s16929_s29 + $0xf4c] ss:$16 sps:$4 sm:$0xff]  }
 0x487   : > { %11447 = vmatprep.subr.bf16.mxu1 %v15699_v52  ;;  %v11102_v22 = vpop.f32.mrb[48].mxu0  ;;  %v15729_v16 = vld [vmem:[%s16929_s29 + $0x114c] ss:$16 sps:$4 sm:$0xff]   ;;  %v15724_v52 = vld [vmem:[%s16929_s29 + $0xf48] ss:$16 sps:$4 sm:$0xff]  }
 0x488   : > { %v18405_v39 = vpop.f32.mrb[48].mxu1  ;;  %v11103_v34 = vadd.f32 %v11102_v22, %v18335_v31  ;;  %v11104_v5 = vpop.f32.mrb[49].mxu0  ;;  %v15738_v22 = vld [vmem:[%s16929_s29 + $0xf8c] ss:$16 sps:$4 sm:$0xff]  }
 0x489   : > { %v18408_v26 = vpop.f32.mrb[49].mxu1  ;;  %v11105_v23 = vadd.f32 %v11104_v5, %v18339_v18  ;;  %v11106_v13 = vpop.f32.mrb[50].mxu0  ;;  %11407 = vmatpush1.bf16.msra.mxu0 %v15694_v37  ;;  %v15727_v37 = vld [vmem:[%s16929_s29 + $0x1148] ss:$16 sps:$4 sm:$0xff]  }
 0x48a   : > { %v11147_v48 = vpop.f32.mrb[50].mxu1  ;;  %11448 = vmatpush1.bf16.msra.mxu1 %v15697_v43  ;;  %v12134_v25 = vadd.f32 %v11103_v34, %v280_v17  ;;  %v11107_v63 = vpop.f32.mrb[51].mxu0  ;;  %11408 = vmatprep.subr.bf16.mxu0 %v15702_v55  ;;  %v15732_v43 = vld [vmem:[%s16929_s29 + $0xf6c] ss:$16 sps:$4 sm:$0xff]   ;;  %v15733_v17 = vld [vmem:[%s16929_s29 + $0x1168] ss:$16 sps:$4 sm:$0xff]  }
 0x48b   : > { %v11148_v31 = vpop.f32.mrb[51].mxu1  ;;  %11449 = vmatprep.subr.bf16.mxu1 %v15705_v32  ;;  %v12135_v18 = vadd.f32 %v11105_v23, %v281_v8  ;;  %v15735_v55 = vld [vmem:[%s16929_s29 + $0x116c] ss:$16 sps:$4 sm:$0xff]   ;;  %v15730_v32 = vld [vmem:[%s16929_s29 + $0xf68] ss:$16 sps:$4 sm:$0xff]  }
 0x48c   : > { %12138 = vst [vmem:[#allocation2] sm:$0xff] %v12134_v25  ;;  %v15741_v34 = vld [vmem:[%s16929_s29 + $0x118c] ss:$16 sps:$4 sm:$0xff]   ;;  %v15736_v8 = vld [vmem:[%s16929_s29 + $0xf88] ss:$16 sps:$4 sm:$0xff]  }
 0x48d   : > { %12139 = vst [vmem:[#allocation2 + $0x8] sm:$0xff] %v12135_v18  ;;  %11409 = vmatpush1.bf16.msra.mxu0 %v15700_v0  ;;  %v15739_v5 = vld [vmem:[%s16929_s29 + $0x1188] ss:$16 sps:$4 sm:$0xff]   ;;  %v15744_v23 = vld [vmem:[%s16929_s29 + $0xfac] ss:$16 sps:$4 sm:$0xff]  }
 0x48e   : > { %11450 = vmatpush1.bf16.msra.mxu1 %v15703_v38  ;;  %11410 = vmatprep.subr.bf16.mxu0 %v15708_v45  ;;  %v15747_v13 = vld [vmem:[%s16929_s29 + $0x11ac] ss:$16 sps:$4 sm:$0xff]   ;;  %v15742_v48 = vld [vmem:[%s16929_s29 + $0xfa8] ss:$16 sps:$4 sm:$0xff]  }
 0x48f   : > { %11451 = vmatprep.subr.bf16.mxu1 %v15711_v11  ;;  %v15745_v0 = vld [vmem:[%s16929_s29 + $0x11a8] ss:$16 sps:$4 sm:$0xff]   ;;  %v15750_v38 = vld [vmem:[%s16929_s29 + $0xfcc] ss:$16 sps:$4 sm:$0xff]  }
 0x490   : > { %v15753_v25 = vld [vmem:[%s16929_s29 + $0x11cc] ss:$16 sps:$4 sm:$0xff]   ;;  %v15748_v63 = vld [vmem:[%s16929_s29 + $0xfc8] ss:$16 sps:$4 sm:$0xff]  }
 0x491   : > { %11411 = vmatpush1.bf16.msra.mxu0 %v15706_v56  ;;  %v15751_v31 = vld [vmem:[%s16929_s29 + $0x11c8] ss:$16 sps:$4 sm:$0xff]   ;;  %v15756_v45 = vld [vmem:[%s16929_s29 + $0xfec] ss:$16 sps:$4 sm:$0xff]  }
 0x492   : > { %11452 = vmatpush1.bf16.msra.mxu1 %v15709_v40  ;;  %11412 = vmatprep.subr.bf16.mxu0 %v15714_v60  ;;  %v15759_v11 = vld [vmem:[%s16929_s29 + $0x11ec] ss:$16 sps:$4 sm:$0xff]   ;;  %v15754_v18 = vld [vmem:[%s16929_s29 + $0xfe8] ss:$16 sps:$4 sm:$0xff]  }
 0x493   : > { %11453 = vmatprep.subr.bf16.mxu1 %v15717_v35  ;;  %v15757_v56 = vld [vmem:[%s16929_s29 + $0x11e8] ss:$16 sps:$4 sm:$0xff]   ;;  %v15762_v40 = vld [vmem:[%s16929_s29 + $0x120c] ss:$16 sps:$4 sm:$0xff]  }
 0x494   : > { %v15765_v60 = vld [vmem:[%s16929_s29 + $0x140c] ss:$16 sps:$4 sm:$0xff]   ;;  %v15760_v35 = vld [vmem:[%s16929_s29 + $0x1208] ss:$16 sps:$4 sm:$0xff]  }
 0x495   : > { %11413 = vmatpush1.bf16.msra.mxu0 %v15712_v33  ;;  %v15763_v33 = vld [vmem:[%s16929_s29 + $0x1408] ss:$16 sps:$4 sm:$0xff]  }
 0x496   : > { %11454 = vmatpush1.bf16.msra.mxu1 %v15715_v6  ;;  %11414 = vmatprep.subr.bf16.mxu0 %v15720_v24  ;;  %v15768_v6 = vld [vmem:[%s16929_s29 + $0x122c] ss:$16 sps:$4 sm:$0xff]  }
 0x497   : > { %11455 = vmatprep.subr.bf16.mxu1 %v15723_v41  ;;  %v15771_v24 = vld [vmem:[%s16929_s29 + $0x142c] ss:$16 sps:$4 sm:$0xff]   ;;  %v15766_v41 = vld [vmem:[%s16929_s29 + $0x1228] ss:$16 sps:$4 sm:$0xff]  }
 0x499   : > { %11415 = vmatpush1.bf16.msra.mxu0 %v15718_v7  ;;  %v15769_v7 = vld [vmem:[%s16929_s29 + $0x1428] ss:$16 sps:$4 sm:$0xff]  }
 0x49a   : > { %11456 = vmatpush1.bf16.msra.mxu1 %v15721_v57  ;;  %11416 = vmatprep.subr.bf16.mxu0 %v15726_v14  ;;  %v15774_v57 = vld [vmem:[%s16929_s29 + $0x124c] ss:$16 sps:$4 sm:$0xff]  }
 0x49b   : > { %11457 = vmatprep.subr.bf16.mxu1 %v15729_v16  ;;  %v15777_v14 = vld [vmem:[%s16929_s29 + $0x144c] ss:$16 sps:$4 sm:$0xff]  }
 0x49c   : > { %v15780_v16 = vld [vmem:[%s16929_s29 + $0x126c] ss:$16 sps:$4 sm:$0xff]  }
 0x49d   : > { %11417 = vmatpush1.bf16.msra.mxu0 %v15724_v52  ;;  %v15783_v52 = vld [vmem:[%s16929_s29 + $0x146c] ss:$16 sps:$4 sm:$0xff]  }
 0x49e   : > { %11458 = vmatpush1.bf16.msra.mxu1 %v15727_v37  ;;  %11418 = vmatprep.subr.bf16.mxu0 %v15732_v43  ;;  %v15778_v37 = vld [vmem:[%s16929_s29 + $0x1268] ss:$16 sps:$4 sm:$0xff]   ;;  %v15789_v43 = vld [vmem:[%s16929_s29 + $0x148c] ss:$16 sps:$4 sm:$0xff]  }
 0x49f   : > { %11459 = vmatprep.subr.bf16.mxu1 %v15735_v55  ;;  %v15784_v55 = vld [vmem:[%s16929_s29 + $0x1288] ss:$16 sps:$4 sm:$0xff]  }
 0x4a1   : > { %11419 = vmatpush1.bf16.msra.mxu0 %v15730_v32  ;;  %v15787_v32 = vld [vmem:[%s16929_s29 + $0x1488] ss:$16 sps:$4 sm:$0xff]  }
 0x4a2   : > { %11460 = vmatpush1.bf16.msra.mxu1 %v15733_v17  ;;  %11420 = vmatprep.subr.bf16.mxu0 %v15738_v22  ;;  %v15792_v17 = vld [vmem:[%s16929_s29 + $0x12ac] ss:$16 sps:$4 sm:$0xff]  }
 0x4a3   : > { %11461 = vmatprep.subr.bf16.mxu1 %v15741_v34  ;;  %v15795_v22 = vld [vmem:[%s16929_s29 + $0x14ac] ss:$16 sps:$4 sm:$0xff]   ;;  %v15790_v34 = vld [vmem:[%s16929_s29 + $0x12a8] ss:$16 sps:$4 sm:$0xff]  }
 0x4a5   : > { %11421 = vmatpush1.bf16.msra.mxu0 %v15736_v8  ;;  %v15793_v8 = vld [vmem:[%s16929_s29 + $0x14a8] ss:$16 sps:$4 sm:$0xff]  }
 0x4a6   : > { %11462 = vmatpush1.bf16.msra.mxu1 %v15739_v5  ;;  %11422 = vmatprep.subr.bf16.mxu0 %v15744_v23  ;;  %v15798_v5 = vld [vmem:[%s16929_s29 + $0x12cc] ss:$16 sps:$4 sm:$0xff]  }
 0x4a7   : > { %11463 = vmatprep.subr.bf16.mxu1 %v15747_v13  ;;  %v15801_v23 = vld [vmem:[%s16929_s29 + $0x14cc] ss:$16 sps:$4 sm:$0xff]  }
 0x4a9   : > { %11423 = vmatpush1.bf16.msra.mxu0 %v15742_v48 }
 0x4aa   : > { %11464 = vmatpush1.bf16.msra.mxu1 %v15745_v0  ;;  %11424 = vmatprep.subr.bf16.mxu0 %v15750_v38 }
 0x4ab   : > { %11465 = vmatprep.subr.bf16.mxu1 %v15753_v25 }
 0x4ad   : > { %11425 = vmatpush1.bf16.msra.mxu0 %v15748_v63 }
 0x4ae   : > { %11466 = vmatpush1.bf16.msra.mxu1 %v15751_v31  ;;  %11426 = vmatprep.subr.bf16.mxu0 %v15756_v45 }
 0x4af   : > { %11467 = vmatprep.subr.bf16.mxu1 %v15759_v11  ;;  %v15796_v11 = vld [vmem:[%s16929_s29 + $0x12c8] ss:$16 sps:$4 sm:$0xff]  }
 0x4b1   : > { %11427 = vmatpush1.bf16.msra.mxu0 %v15754_v18  ;;  %v15799_v18 = vld [vmem:[%s16929_s29 + $0x14c8] ss:$16 sps:$4 sm:$0xff]  }
 0x4b2   : > { %11468 = vmatpush1.bf16.msra.mxu1 %v15757_v56  ;;  %11478 = vmatprep.subr.bf16.mxu0 %v15762_v40 }
 0x4b3   : > { %11519 = vmatprep.subr.bf16.mxu1 %v15765_v60 }
 0x4b4   : > { %11429 = vmatmul.mubr.bf16.vlgmr.msra.gmra.mrb[64].mxu0 %v17305_v61  ;;  %v15772_v61 = vld [vmem:[%s16929_s29 + $0x1248] ss:$16 sps:$4 sm:$0xff]  }
 0x4b5   : > { %11470 = vmatmul.mubr.bf16.vlgmr.msra.gmra.mrb[64].mxu1 %v17394_v47  ;;  %11479 = vmatpush1.bf16.msra.mxu0 %v15760_v35  ;;  %v15775_v47 = vld [vmem:[%s16929_s29 + $0x1448] ss:$16 sps:$4 sm:$0xff]  }
 0x4b6   : > { %11520 = vmatpush1.bf16.msra.mxu1 %v15763_v33  ;;  %11480 = vmatprep.subr.bf16.mxu0 %v15768_v6  ;;  %v15802_v33 = vld [vmem:[%s16929_s29 + $0x12e8] ss:$16 sps:$4 sm:$0xff]  }
 0x4b7   : > { %11521 = vmatprep.subr.bf16.mxu1 %v15771_v24  ;;  %11510 = vmatprep.mubr.bf16.mxu0 %v17320_v42  ;;  %v15781_v42 = vld [vmem:[%s16929_s29 + $0x1468] ss:$16 sps:$4 sm:$0xff]   ;;  %v15810_v24 = vld [vmem:[%s16929_s29 + $0x130c] ss:$16 sps:$4 sm:$0xff]  }
 0x4b8   : > { %11551 = vmatprep.mubr.bf16.mxu1 %v17410_v59  ;;  %v15786_v59 = vld [vmem:[%s16929_s29 + $0x128c] ss:$16 sps:$4 sm:$0xff]   ;;  %v15805_v6 = vld [vmem:[%s16929_s29 + $0x14e8] ss:$16 sps:$4 sm:$0xff]  }
 0x4b9   : > { %11481 = vmatpush1.bf16.msra.mxu0 %v15766_v41  ;;  %v15813_v41 = vld [vmem:[%s16929_s29 + $0x150c] ss:$16 sps:$4 sm:$0xff]  }
 0x4ba   : > { %11522 = vmatpush1.bf16.msra.mxu1 %v15769_v7  ;;  %11482 = vmatprep.subr.bf16.mxu0 %v15774_v57  ;;  %v15808_v7 = vld [vmem:[%s16929_s29 + $0x1308] ss:$16 sps:$4 sm:$0xff]  }
 0x4bb   : > { %11523 = vmatprep.subr.bf16.mxu1 %v15777_v14  ;;  %v15811_v57 = vld [vmem:[%s16929_s29 + $0x1508] ss:$16 sps:$4 sm:$0xff]   ;;  %v15816_v14 = vld [vmem:[%s16929_s29 + $0x132c] ss:$16 sps:$4 sm:$0xff]  }
 0x4bd   : > { %11483 = vmatpush1.bf16.msra.mxu0 %v15772_v61  ;;  %v15819_v61 = vld [vmem:[%s16929_s29 + $0x152c] ss:$16 sps:$4 sm:$0xff]  }
 0x4be   : > { %11524 = vmatpush1.bf16.msra.mxu1 %v15775_v47  ;;  %11484 = vmatprep.subr.bf16.mxu0 %v15780_v16  ;;  %v15814_v47 = vld [vmem:[%s16929_s29 + $0x1328] ss:$16 sps:$4 sm:$0xff]  }
 0x4bf   : > { %11525 = vmatprep.subr.bf16.mxu1 %v15783_v52  ;;  %v15817_v16 = vld [vmem:[%s16929_s29 + $0x1528] ss:$16 sps:$4 sm:$0xff]   ;;  %v15822_v52 = vld [vmem:[%s16929_s29 + $0x134c] ss:$16 sps:$4 sm:$0xff]  }
 0x4c1   : > { %11485 = vmatpush1.bf16.msra.mxu0 %v15778_v37  ;;  %v15825_v37 = vld [vmem:[%s16929_s29 + $0x154c] ss:$16 sps:$4 sm:$0xff]  }
 0x4c2   : > { %11526 = vmatpush1.bf16.msra.mxu1 %v15781_v42  ;;  %11486 = vmatprep.subr.bf16.mxu0 %v15786_v59  ;;  %v15820_v42 = vld [vmem:[%s16929_s29 + $0x1348] ss:$16 sps:$4 sm:$0xff]  }
 0x4c3   : > { %11527 = vmatprep.subr.bf16.mxu1 %v15789_v43  ;;  %v15823_v59 = vld [vmem:[%s16929_s29 + $0x1548] ss:$16 sps:$4 sm:$0xff]   ;;  %v15828_v43 = vld [vmem:[%s16929_s29 + $0x136c] ss:$16 sps:$4 sm:$0xff]  }
 0x4c5   : > { %11487 = vmatpush1.bf16.msra.mxu0 %v15784_v55  ;;  %v15831_v55 = vld [vmem:[%s16929_s29 + $0x156c] ss:$16 sps:$4 sm:$0xff]  }
 0x4c6   : > { %11528 = vmatpush1.bf16.msra.mxu1 %v15787_v32  ;;  %11488 = vmatprep.subr.bf16.mxu0 %v15792_v17  ;;  %v15826_v32 = vld [vmem:[%s16929_s29 + $0x1368] ss:$16 sps:$4 sm:$0xff]  }
 0x4c7   : > { %11529 = vmatprep.subr.bf16.mxu1 %v15795_v22  ;;  %v11184_v13 = vpop.f32.mrb[52].mxu0  ;;  %v15829_v17 = vld [vmem:[%s16929_s29 + $0x1568] ss:$16 sps:$4 sm:$0xff]   ;;  %v15834_v22 = vld [vmem:[%s16929_s29 + $0x138c] ss:$16 sps:$4 sm:$0xff]  }
 0x4c8   : > { %v11225_v48 = vpop.f32.mrb[52].mxu1  ;;  %v11185_v0 = vadd.f32 %v11184_v13, %v18405_v39  ;;  %v11186_v38 = vpop.f32.mrb[53].mxu0  ;;  %v15804_v39 = vld [vmem:[%s16929_s29 + $0x12ec] ss:$16 sps:$4 sm:$0xff]  }
 0x4c9   : > { %v11227_v25 = vpop.f32.mrb[53].mxu1  ;;  %v11187_v63 = vadd.f32 %v11186_v38, %v18408_v26  ;;  %v11188_v31 = vpop.f32.mrb[54].mxu0  ;;  %11489 = vmatpush1.bf16.msra.mxu0 %v15790_v34  ;;  %v15807_v26 = vld [vmem:[%s16929_s29 + $0x14ec] ss:$16 sps:$4 sm:$0xff]  }
 0x4ca   : > { %v11229_v45 = vpop.f32.mrb[54].mxu1  ;;  %11530 = vmatpush1.bf16.msra.mxu1 %v15793_v8  ;;  %v18483_v56 = vadd.f32 %v11225_v48, %v11185_v0  ;;  %v11189_v40 = vpop.f32.mrb[55].mxu0  ;;  %11490 = vmatprep.subr.bf16.mxu0 %v15798_v5  ;;  %v15837_v34 = vld [vmem:[%s16929_s29 + $0x158c] ss:$16 sps:$4 sm:$0xff]   ;;  %v15832_v8 = vld [vmem:[%s16929_s29 + $0x1388] ss:$16 sps:$4 sm:$0xff]  }
 0x4cb   : > { %v11230_v60 = vpop.f32.mrb[55].mxu1  ;;  %11531 = vmatprep.subr.bf16.mxu1 %v15801_v23  ;;  %v18487_v35 = vadd.f32 %v11227_v25, %v11187_v63  ;;  %v15835_v5 = vld [vmem:[%s16929_s29 + $0x1588] ss:$16 sps:$4 sm:$0xff]   ;;  %v15840_v23 = vld [vmem:[%s16929_s29 + $0x13ac] ss:$16 sps:$4 sm:$0xff]  }
 0x4cc   : > { %v15843_v13 = vld [vmem:[%s16929_s29 + $0x15ac] ss:$16 sps:$4 sm:$0xff]   ;;  %v15838_v48 = vld [vmem:[%s16929_s29 + $0x13a8] ss:$16 sps:$4 sm:$0xff]  }
 0x4cd   : > { %11491 = vmatpush1.bf16.msra.mxu0 %v15796_v11  ;;  %v15841_v0 = vld [vmem:[%s16929_s29 + $0x15a8] ss:$16 sps:$4 sm:$0xff]   ;;  %v15846_v38 = vld [vmem:[%s16929_s29 + $0x13cc] ss:$16 sps:$4 sm:$0xff]  }
 0x4ce   : > { %11532 = vmatpush1.bf16.msra.mxu1 %v15799_v18  ;;  %11492 = vmatprep.subr.bf16.mxu0 %v15804_v39  ;;  %v15849_v25 = vld [vmem:[%s16929_s29 + $0x15cc] ss:$16 sps:$4 sm:$0xff]   ;;  %v15844_v63 = vld [vmem:[%s16929_s29 + $0x13c8] ss:$16 sps:$4 sm:$0xff]  }
 0x4cf   : > { %11533 = vmatprep.subr.bf16.mxu1 %v15807_v26  ;;  %v15847_v31 = vld [vmem:[%s16929_s29 + $0x15c8] ss:$16 sps:$4 sm:$0xff]   ;;  %v15852_v45 = vld [vmem:[%s16929_s29 + $0x13ec] ss:$16 sps:$4 sm:$0xff]  }
 0x4d0   : > { %v15855_v11 = vld [vmem:[%s16929_s29 + $0x15ec] ss:$16 sps:$4 sm:$0xff]   ;;  %v15850_v18 = vld [vmem:[%s16929_s29 + $0x13e8] ss:$16 sps:$4 sm:$0xff]  }
 0x4d1   : > { %11493 = vmatpush1.bf16.msra.mxu0 %v15802_v33  ;;  %v15853_v40 = vld [vmem:[%s16929_s29 + $0x15e8] ss:$16 sps:$4 sm:$0xff]   ;;  %v15858_v60 = vld [vmem:[%s16929_s29 + $0x160c] ss:$16 sps:$4 sm:$0xff]  }
 0x4d2   : > { %11534 = vmatpush1.bf16.msra.mxu1 %v15805_v6  ;;  %11494 = vmatprep.subr.bf16.mxu0 %v15810_v24  ;;  %v15861_v39 = vld [vmem:[%s16929_s29 + $0x180c] ss:$16 sps:$4 sm:$0xff]   ;;  %v15856_v26 = vld [vmem:[%s16929_s29 + $0x1608] ss:$16 sps:$4 sm:$0xff]  }
 0x4d3   : > { %11535 = vmatprep.subr.bf16.mxu1 %v15813_v41  ;;  %v15859_v33 = vld [vmem:[%s16929_s29 + $0x1808] ss:$16 sps:$4 sm:$0xff]   ;;  %v15864_v6 = vld [vmem:[%s16929_s29 + $0x162c] ss:$16 sps:$4 sm:$0xff]  }
 0x4d4   : > { %v15867_v24 = vld [vmem:[%s16929_s29 + $0x182c] ss:$16 sps:$4 sm:$0xff]   ;;  %v15862_v41 = vld [vmem:[%s16929_s29 + $0x1628] ss:$16 sps:$4 sm:$0xff]  }
 0x4d5   : > { %11495 = vmatpush1.bf16.msra.mxu0 %v15808_v7  ;;  %v15865_v7 = vld [vmem:[%s16929_s29 + $0x1828] ss:$16 sps:$4 sm:$0xff]  }
 0x4d6   : > { %11536 = vmatpush1.bf16.msra.mxu1 %v15811_v57  ;;  %11496 = vmatprep.subr.bf16.mxu0 %v15816_v14  ;;  %v15870_v57 = vld [vmem:[%s16929_s29 + $0x164c] ss:$16 sps:$4 sm:$0xff]  }
 0x4d7   : > { %11537 = vmatprep.subr.bf16.mxu1 %v15819_v61  ;;  %v15873_v14 = vld [vmem:[%s16929_s29 + $0x184c] ss:$16 sps:$4 sm:$0xff]  }
 0x4d8   : > { %v15876_v61 = vld [vmem:[%s16929_s29 + $0x166c] ss:$16 sps:$4 sm:$0xff]  }
 0x4d9   : > { %11497 = vmatpush1.bf16.msra.mxu0 %v15814_v47  ;;  %v15879_v47 = vld [vmem:[%s16929_s29 + $0x186c] ss:$16 sps:$4 sm:$0xff]  }
 0x4da   : > { %11538 = vmatpush1.bf16.msra.mxu1 %v15817_v16  ;;  %11498 = vmatprep.subr.bf16.mxu0 %v15822_v52  ;;  %v15874_v16 = vld [vmem:[%s16929_s29 + $0x1668] ss:$16 sps:$4 sm:$0xff]   ;;  %v15885_v52 = vld [vmem:[%s16929_s29 + $0x188c] ss:$16 sps:$4 sm:$0xff]  }
 0x4db   : > { %11539 = vmatprep.subr.bf16.mxu1 %v15825_v37  ;;  %v15880_v37 = vld [vmem:[%s16929_s29 + $0x1688] ss:$16 sps:$4 sm:$0xff]  }
 0x4dd   : > { %11499 = vmatpush1.bf16.msra.mxu0 %v15820_v42  ;;  %v15883_v42 = vld [vmem:[%s16929_s29 + $0x1888] ss:$16 sps:$4 sm:$0xff]  }
 0x4de   : > { %11540 = vmatpush1.bf16.msra.mxu1 %v15823_v59  ;;  %11500 = vmatprep.subr.bf16.mxu0 %v15828_v43  ;;  %v15888_v59 = vld [vmem:[%s16929_s29 + $0x16ac] ss:$16 sps:$4 sm:$0xff]  }
 0x4df   : > { %11541 = vmatprep.subr.bf16.mxu1 %v15831_v55  ;;  %v15891_v43 = vld [vmem:[%s16929_s29 + $0x18ac] ss:$16 sps:$4 sm:$0xff]   ;;  %v15886_v55 = vld [vmem:[%s16929_s29 + $0x16a8] ss:$16 sps:$4 sm:$0xff]  }
 0x4e1   : > { %11501 = vmatpush1.bf16.msra.mxu0 %v15826_v32  ;;  %v15889_v32 = vld [vmem:[%s16929_s29 + $0x18a8] ss:$16 sps:$4 sm:$0xff]  }
 0x4e2   : > { %11542 = vmatpush1.bf16.msra.mxu1 %v15829_v17  ;;  %11502 = vmatprep.subr.bf16.mxu0 %v15834_v22  ;;  %v15894_v17 = vld [vmem:[%s16929_s29 + $0x16cc] ss:$16 sps:$4 sm:$0xff]  }
 0x4e3   : > { %11543 = vmatprep.subr.bf16.mxu1 %v15837_v34  ;;  %v15897_v22 = vld [vmem:[%s16929_s29 + $0x18cc] ss:$16 sps:$4 sm:$0xff]  }
 0x4e5   : > { %11503 = vmatpush1.bf16.msra.mxu0 %v15832_v8 }
 0x4e6   : > { %11544 = vmatpush1.bf16.msra.mxu1 %v15835_v5  ;;  %11504 = vmatprep.subr.bf16.mxu0 %v15840_v23 }
 0x4e7   : > { %11545 = vmatprep.subr.bf16.mxu1 %v15843_v13 }
 0x4e9   : > { %11505 = vmatpush1.bf16.msra.mxu0 %v15838_v48 }
 0x4ea   : > { %11546 = vmatpush1.bf16.msra.mxu1 %v15841_v0  ;;  %11506 = vmatprep.subr.bf16.mxu0 %v15846_v38 }
 0x4eb   : > { %11547 = vmatprep.subr.bf16.mxu1 %v15849_v25  ;;  %v15892_v25 = vld [vmem:[%s16929_s29 + $0x16c8] ss:$16 sps:$4 sm:$0xff]  }
 0x4ed   : > { %11507 = vmatpush1.bf16.msra.mxu0 %v15844_v63  ;;  %v15895_v63 = vld [vmem:[%s16929_s29 + $0x18c8] ss:$16 sps:$4 sm:$0xff]  }
 0x4ee   : > { %11548 = vmatpush1.bf16.msra.mxu1 %v15847_v31  ;;  %11508 = vmatprep.subr.bf16.mxu0 %v15852_v45 }
 0x4ef   : > { %11549 = vmatprep.subr.bf16.mxu1 %v15855_v11 }
 0x4f1   : > { %11509 = vmatpush1.bf16.msra.mxu0 %v15850_v18 }
 0x4f2   : > { %11550 = vmatpush1.bf16.msra.mxu1 %v15853_v40  ;;  %11560 = vmatprep.subr.bf16.mxu0 %v15858_v60  ;;  %v15898_v40 = vld [vmem:[%s16929_s29 + $0x16e8] ss:$16 sps:$4 sm:$0xff]  }
 0x4f3   : > { %11601 = vmatprep.subr.bf16.mxu1 %v15861_v39  ;;  %v15901_v60 = vld [vmem:[%s16929_s29 + $0x18e8] ss:$16 sps:$4 sm:$0xff]   ;;  %v15906_v39 = vld [vmem:[%s16929_s29 + $0x170c] ss:$16 sps:$4 sm:$0xff]  }
 0x4f4   : > { %11511 = vmatmul.mubr.bf16.vlgmr.msra.gmra.mrb[68].mxu0 %v17398_v49  ;;  %v15868_v49 = vld [vmem:[%s16929_s29 + $0x1648] ss:$16 sps:$4 sm:$0xff]  }
 0x4f5   : > { %11552 = vmatmul.mubr.bf16.vlgmr.msra.gmra.mrb[68].mxu1 %v17490_v44  ;;  %11561 = vmatpush1.bf16.msra.mxu0 %v15856_v26  ;;  %v15871_v44 = vld [vmem:[%s16929_s29 + $0x1848] ss:$16 sps:$4 sm:$0xff]   ;;  %v15909_v26 = vld [vmem:[%s16929_s29 + $0x190c] ss:$16 sps:$4 sm:$0xff]  }
 0x4f6   : > { %11602 = vmatpush1.bf16.msra.mxu1 %v15859_v33  ;;  %11562 = vmatprep.subr.bf16.mxu0 %v15864_v6  ;;  %v15904_v33 = vld [vmem:[%s16929_s29 + $0x1708] ss:$16 sps:$4 sm:$0xff]  }
 0x4f7   : > { %11603 = vmatprep.subr.bf16.mxu1 %v15867_v24  ;;  %11592 = vmatprep.mubr.bf16.mxu0 %v17414_v62  ;;  %v15877_v62 = vld [vmem:[%s16929_s29 + $0x1868] ss:$16 sps:$4 sm:$0xff]   ;;  %v15912_v24 = vld [vmem:[%s16929_s29 + $0x172c] ss:$16 sps:$4 sm:$0xff]  }
 0x4f8   : > { %11633 = vmatprep.mubr.bf16.mxu1 %v17506_v50  ;;  %v15882_v50 = vld [vmem:[%s16929_s29 + $0x168c] ss:$16 sps:$4 sm:$0xff]   ;;  %v15907_v6 = vld [vmem:[%s16929_s29 + $0x1908] ss:$16 sps:$4 sm:$0xff]  }
 0x4f9   : > { %11563 = vmatpush1.bf16.msra.mxu0 %v15862_v41  ;;  %v15915_v41 = vld [vmem:[%s16929_s29 + $0x192c] ss:$16 sps:$4 sm:$0xff]  }
 0x4fa   : > { %11604 = vmatpush1.bf16.msra.mxu1 %v15865_v7  ;;  %11564 = vmatprep.subr.bf16.mxu0 %v15870_v57  ;;  %v15910_v7 = vld [vmem:[%s16929_s29 + $0x1728] ss:$16 sps:$4 sm:$0xff]  }
 0x4fb   : > { %11605 = vmatprep.subr.bf16.mxu1 %v15873_v14  ;;  %v15913_v57 = vld [vmem:[%s16929_s29 + $0x1928] ss:$16 sps:$4 sm:$0xff]   ;;  %v15918_v14 = vld [vmem:[%s16929_s29 + $0x174c] ss:$16 sps:$4 sm:$0xff]  }
 0x4fd   : > { %11565 = vmatpush1.bf16.msra.mxu0 %v15868_v49  ;;  %v15921_v49 = vld [vmem:[%s16929_s29 + $0x194c] ss:$16 sps:$4 sm:$0xff]  }
 0x4fe   : > { %11606 = vmatpush1.bf16.msra.mxu1 %v15871_v44  ;;  %11566 = vmatprep.subr.bf16.mxu0 %v15876_v61  ;;  %v15916_v44 = vld [vmem:[%s16929_s29 + $0x1748] ss:$16 sps:$4 sm:$0xff]  }
 0x4ff   : > { %11607 = vmatprep.subr.bf16.mxu1 %v15879_v47  ;;  %v15919_v61 = vld [vmem:[%s16929_s29 + $0x1948] ss:$16 sps:$4 sm:$0xff]   ;;  %v15924_v47 = vld [vmem:[%s16929_s29 + $0x176c] ss:$16 sps:$4 sm:$0xff]  }
 0x501   : > { %11567 = vmatpush1.bf16.msra.mxu0 %v15874_v16  ;;  %v15927_v16 = vld [vmem:[%s16929_s29 + $0x196c] ss:$16 sps:$4 sm:$0xff]  }
 0x502   : > { %11608 = vmatpush1.bf16.msra.mxu1 %v15877_v62  ;;  %11568 = vmatprep.subr.bf16.mxu0 %v15882_v50  ;;  %v15922_v62 = vld [vmem:[%s16929_s29 + $0x1768] ss:$16 sps:$4 sm:$0xff]  }
 0x503   : > { %11609 = vmatprep.subr.bf16.mxu1 %v15885_v52  ;;  %v15925_v50 = vld [vmem:[%s16929_s29 + $0x1968] ss:$16 sps:$4 sm:$0xff]   ;;  %v15930_v52 = vld [vmem:[%s16929_s29 + $0x178c] ss:$16 sps:$4 sm:$0xff]  }
 0x505   : > { %11569 = vmatpush1.bf16.msra.mxu0 %v15880_v37  ;;  %v15933_v37 = vld [vmem:[%s16929_s29 + $0x198c] ss:$16 sps:$4 sm:$0xff]  }
 0x506   : > { %11610 = vmatpush1.bf16.msra.mxu1 %v15883_v42  ;;  %11570 = vmatprep.subr.bf16.mxu0 %v15888_v59  ;;  %v15928_v42 = vld [vmem:[%s16929_s29 + $0x1788] ss:$16 sps:$4 sm:$0xff]  }
 0x507   : > { %11611 = vmatprep.subr.bf16.mxu1 %v15891_v43  ;;  %v11266_v34 = vpop.f32.mrb[56].mxu0  ;;  %v15931_v59 = vld [vmem:[%s16929_s29 + $0x1988] ss:$16 sps:$4 sm:$0xff]   ;;  %v15936_v43 = vld [vmem:[%s16929_s29 + $0x17ac] ss:$16 sps:$4 sm:$0xff]  }
 0x508   : > { %v11307_v8 = vpop.f32.mrb[56].mxu1  ;;  %v11267_v5 = vadd.f32 %v11266_v34, %v18483_v56  ;;  %v11268_v23 = vpop.f32.mrb[57].mxu0  ;;  %v15900_v56 = vld [vmem:[%s16929_s29 + $0x16ec] ss:$16 sps:$4 sm:$0xff]  }
 0x509   : > { %v11309_v13 = vpop.f32.mrb[57].mxu1  ;;  %v11269_v48 = vadd.f32 %v11268_v23, %v18487_v35  ;;  %v11270_v0 = vpop.f32.mrb[58].mxu0  ;;  %11571 = vmatpush1.bf16.msra.mxu0 %v15886_v55  ;;  %v15903_v35 = vld [vmem:[%s16929_s29 + $0x18ec] ss:$16 sps:$4 sm:$0xff]  }
 0x50a   : > { %v11311_v38 = vpop.f32.mrb[58].mxu1  ;;  %11612 = vmatpush1.bf16.msra.mxu1 %v15889_v32  ;;  %v18557_v31 = vadd.f32 %v11307_v8, %v11267_v5  ;;  %v11271_v45 = vpop.f32.mrb[59].mxu0  ;;  %11572 = vmatprep.subr.bf16.mxu0 %v15894_v17  ;;  %v15939_v55 = vld [vmem:[%s16929_s29 + $0x19ac] ss:$16 sps:$4 sm:$0xff]   ;;  %v15934_v32 = vld [vmem:[%s16929_s29 + $0x17a8] ss:$16 sps:$4 sm:$0xff]  }
 0x50b   : > { %v11312_v11 = vpop.f32.mrb[59].mxu1  ;;  %11613 = vmatprep.subr.bf16.mxu1 %v15897_v22  ;;  %v18561_v18 = vadd.f32 %v11309_v13, %v11269_v48  ;;  %v15937_v17 = vld [vmem:[%s16929_s29 + $0x19a8] ss:$16 sps:$4 sm:$0xff]   ;;  %v15942_v22 = vld [vmem:[%s16929_s29 + $0x17cc] ss:$16 sps:$4 sm:$0xff]  }
 0x50c   : > { %v15945_v34 = vld [vmem:[%s16929_s29 + $0x19cc] ss:$16 sps:$4 sm:$0xff]   ;;  %v15940_v8 = vld [vmem:[%s16929_s29 + $0x17c8] ss:$16 sps:$4 sm:$0xff]  }
 0x50d   : > { %11573 = vmatpush1.bf16.msra.mxu0 %v15892_v25  ;;  %v15943_v5 = vld [vmem:[%s16929_s29 + $0x19c8] ss:$16 sps:$4 sm:$0xff]   ;;  %v15948_v23 = vld [vmem:[%s16929_s29 + $0x17ec] ss:$16 sps:$4 sm:$0xff]  }
 0x50e   : > { %11614 = vmatpush1.bf16.msra.mxu1 %v15895_v63  ;;  %11574 = vmatprep.subr.bf16.mxu0 %v15900_v56  ;;  %v15951_v13 = vld [vmem:[%s16929_s29 + $0x19ec] ss:$16 sps:$4 sm:$0xff]   ;;  %v15946_v48 = vld [vmem:[%s16929_s29 + $0x17e8] ss:$16 sps:$4 sm:$0xff]  }
 0x50f   : > { %11615 = vmatprep.subr.bf16.mxu1 %v15903_v35  ;;  %v15949_v0 = vld [vmem:[%s16929_s29 + $0x19e8] ss:$16 sps:$4 sm:$0xff]   ;;  %v15954_v38 = vld [vmem:[%s16929_s29 + $0x1a0c] ss:$16 sps:$4 sm:$0xff]  }
 0x510   : > { %v15957_v25 = vld [vmem:[%s16929_s29 + $0x1c0c] ss:$16 sps:$4 sm:$0xff]   ;;  %v15952_v63 = vld [vmem:[%s16929_s29 + $0x1a08] ss:$16 sps:$4 sm:$0xff]  }
 0x511   : > { %11575 = vmatpush1.bf16.msra.mxu0 %v15898_v40  ;;  %v15955_v45 = vld [vmem:[%s16929_s29 + $0x1c08] ss:$16 sps:$4 sm:$0xff]   ;;  %v15960_v11 = vld [vmem:[%s16929_s29 + $0x1a2c] ss:$16 sps:$4 sm:$0xff]  }
 0x512   : > { %11616 = vmatpush1.bf16.msra.mxu1 %v15901_v60  ;;  %11576 = vmatprep.subr.bf16.mxu0 %v15906_v39  ;;  %v15963_v56 = vld [vmem:[%s16929_s29 + $0x1c2c] ss:$16 sps:$4 sm:$0xff]   ;;  %v15958_v35 = vld [vmem:[%s16929_s29 + $0x1a28] ss:$16 sps:$4 sm:$0xff]  }
 0x513   : > { %11617 = vmatprep.subr.bf16.mxu1 %v15909_v26  ;;  %v15961_v40 = vld [vmem:[%s16929_s29 + $0x1c28] ss:$16 sps:$4 sm:$0xff]   ;;  %v15966_v60 = vld [vmem:[%s16929_s29 + $0x1a4c] ss:$16 sps:$4 sm:$0xff]  }
 0x514   : > { %v15969_v39 = vld [vmem:[%s16929_s29 + $0x1c4c] ss:$16 sps:$4 sm:$0xff]  }
 0x515   : > { %11577 = vmatpush1.bf16.msra.mxu0 %v15904_v33  ;;  %v15972_v26 = vld [vmem:[%s16929_s29 + $0x1a6c] ss:$16 sps:$4 sm:$0xff]  }
 0x516   : > { %11618 = vmatpush1.bf16.msra.mxu1 %v15907_v6  ;;  %11578 = vmatprep.subr.bf16.mxu0 %v15912_v24  ;;  %v15975_v33 = vld [vmem:[%s16929_s29 + $0x1c6c] ss:$16 sps:$4 sm:$0xff]   ;;  %v15970_v6 = vld [vmem:[%s16929_s29 + $0x1a68] ss:$16 sps:$4 sm:$0xff]  }
 0x517   : > { %11619 = vmatprep.subr.bf16.mxu1 %v15915_v41  ;;  %v15981_v24 = vld [vmem:[%s16929_s29 + $0x1c8c] ss:$16 sps:$4 sm:$0xff]   ;;  %v15976_v41 = vld [vmem:[%s16929_s29 + $0x1a88] ss:$16 sps:$4 sm:$0xff]  }
 0x519   : > { %11579 = vmatpush1.bf16.msra.mxu0 %v15910_v7  ;;  %v15979_v7 = vld [vmem:[%s16929_s29 + $0x1c88] ss:$16 sps:$4 sm:$0xff]  }
 0x51a   : > { %11620 = vmatpush1.bf16.msra.mxu1 %v15913_v57  ;;  %11580 = vmatprep.subr.bf16.mxu0 %v15918_v14  ;;  %v15984_v57 = vld [vmem:[%s16929_s29 + $0x1aac] ss:$16 sps:$4 sm:$0xff]  }
 0x51b   : > { %11621 = vmatprep.subr.bf16.mxu1 %v15921_v49  ;;  %v15987_v14 = vld [vmem:[%s16929_s29 + $0x1cac] ss:$16 sps:$4 sm:$0xff]   ;;  %v15982_v49 = vld [vmem:[%s16929_s29 + $0x1aa8] ss:$16 sps:$4 sm:$0xff]  }
 0x51d   : > { %11581 = vmatpush1.bf16.msra.mxu0 %v15916_v44  ;;  %v15985_v44 = vld [vmem:[%s16929_s29 + $0x1ca8] ss:$16 sps:$4 sm:$0xff]  }
 0x51e   : > { %11622 = vmatpush1.bf16.msra.mxu1 %v15919_v61  ;;  %11582 = vmatprep.subr.bf16.mxu0 %v15924_v47  ;;  %v15990_v61 = vld [vmem:[%s16929_s29 + $0x1acc] ss:$16 sps:$4 sm:$0xff]  }
 0x51f   : > { %11623 = vmatprep.subr.bf16.mxu1 %v15927_v16  ;;  %v15993_v47 = vld [vmem:[%s16929_s29 + $0x1ccc] ss:$16 sps:$4 sm:$0xff]  }
 0x521   : > { %11583 = vmatpush1.bf16.msra.mxu0 %v15922_v62 }
 0x522   : > { %11624 = vmatpush1.bf16.msra.mxu1 %v15925_v50  ;;  %11584 = vmatprep.subr.bf16.mxu0 %v15930_v52 }
 0x523   : > { %11625 = vmatprep.subr.bf16.mxu1 %v15933_v37 }
 0x525   : > { %11585 = vmatpush1.bf16.msra.mxu0 %v15928_v42 }
 0x526   : > { %11626 = vmatpush1.bf16.msra.mxu1 %v15931_v59  ;;  %11586 = vmatprep.subr.bf16.mxu0 %v15936_v43 }
 0x527   : > { %11627 = vmatprep.subr.bf16.mxu1 %v15939_v55  ;;  %v15988_v55 = vld [vmem:[%s16929_s29 + $0x1ac8] ss:$16 sps:$4 sm:$0xff]  }
 0x529   : > { %11587 = vmatpush1.bf16.msra.mxu0 %v15934_v32  ;;  %v15991_v32 = vld [vmem:[%s16929_s29 + $0x1cc8] ss:$16 sps:$4 sm:$0xff]  }
 0x52a   : > { %11628 = vmatpush1.bf16.msra.mxu1 %v15937_v17  ;;  %11588 = vmatprep.subr.bf16.mxu0 %v15942_v22 }
 0x52b   : > { %11629 = vmatprep.subr.bf16.mxu1 %v15945_v34 }
 0x52d   : > { %11589 = vmatpush1.bf16.msra.mxu0 %v15940_v8 }
 0x52e   : > { %11630 = vmatpush1.bf16.msra.mxu1 %v15943_v5  ;;  %11590 = vmatprep.subr.bf16.mxu0 %v15948_v23  ;;  %v15994_v5 = vld [vmem:[%s16929_s29 + $0x1ae8] ss:$16 sps:$4 sm:$0xff]  }
 0x52f   : > { %11631 = vmatprep.subr.bf16.mxu1 %v15951_v13  ;;  %v15997_v23 = vld [vmem:[%s16929_s29 + $0x1ce8] ss:$16 sps:$4 sm:$0xff]   ;;  %v16002_v13 = vld [vmem:[%s16929_s29 + $0x1b0c] ss:$16 sps:$4 sm:$0xff]  }
 0x531   : > { %11591 = vmatpush1.bf16.msra.mxu0 %v15946_v48  ;;  %v16005_v48 = vld [vmem:[%s16929_s29 + $0x1d0c] ss:$16 sps:$4 sm:$0xff]  }
 0x532   : > { %11632 = vmatpush1.bf16.msra.mxu1 %v15949_v0  ;;  %11642 = vmatprep.subr.bf16.mxu0 %v15954_v38  ;;  %v16000_v0 = vld [vmem:[%s16929_s29 + $0x1b08] ss:$16 sps:$4 sm:$0xff]  }
 0x533   : > { %11683 = vmatprep.subr.bf16.mxu1 %v15957_v25  ;;  %v16003_v38 = vld [vmem:[%s16929_s29 + $0x1d08] ss:$16 sps:$4 sm:$0xff]   ;;  %v16008_v25 = vld [vmem:[%s16929_s29 + $0x1b2c] ss:$16 sps:$4 sm:$0xff]  }
 0x534   : > { %11593 = vmatmul.mubr.bf16.vlgmr.msra.gmra.mrb[72].mxu0 %v17494_v46  ;;  %v15964_v46 = vld [vmem:[%s16929_s29 + $0x1a48] ss:$16 sps:$4 sm:$0xff]  }
 0x535   : > { %11634 = vmatmul.mubr.bf16.vlgmr.msra.gmra.mrb[72].mxu1 %v17586_v1  ;;  %11643 = vmatpush1.bf16.msra.mxu0 %v15952_v63  ;;  %v15967_v1 = vld [vmem:[%s16929_s29 + $0x1c48] ss:$16 sps:$4 sm:$0xff]   ;;  %v16011_v63 = vld [vmem:[%s16929_s29 + $0x1d2c] ss:$16 sps:$4 sm:$0xff]  }
 0x536   : > { %11684 = vmatpush1.bf16.msra.mxu1 %v15955_v45  ;;  %11644 = vmatprep.subr.bf16.mxu0 %v15960_v11  ;;  %v16006_v45 = vld [vmem:[%s16929_s29 + $0x1b28] ss:$16 sps:$4 sm:$0xff]  }
 0x537   : > { %11685 = vmatprep.subr.bf16.mxu1 %v15963_v56  ;;  %11674 = vmatprep.mubr.bf16.mxu0 %v17510_v51  ;;  %v15973_v51 = vld [vmem:[%s16929_s29 + $0x1c68] ss:$16 sps:$4 sm:$0xff]   ;;  %v16014_v56 = vld [vmem:[%s16929_s29 + $0x1b4c] ss:$16 sps:$4 sm:$0xff]  }
 0x538   : > { %11715 = vmatprep.mubr.bf16.mxu1 %v17602_v53  ;;  %v15978_v53 = vld [vmem:[%s16929_s29 + $0x1a8c] ss:$16 sps:$4 sm:$0xff]   ;;  %v16009_v11 = vld [vmem:[%s16929_s29 + $0x1d28] ss:$16 sps:$4 sm:$0xff]  }
 0x539   : > { %11645 = vmatpush1.bf16.msra.mxu0 %v15958_v35  ;;  %v16017_v35 = vld [vmem:[%s16929_s29 + $0x1d4c] ss:$16 sps:$4 sm:$0xff]  }
 0x53a   : > { %11686 = vmatpush1.bf16.msra.mxu1 %v15961_v40  ;;  %11646 = vmatprep.subr.bf16.mxu0 %v15966_v60  ;;  %v16012_v40 = vld [vmem:[%s16929_s29 + $0x1b48] ss:$16 sps:$4 sm:$0xff]  }
 0x53b   : > { %11687 = vmatprep.subr.bf16.mxu1 %v15969_v39  ;;  %v16015_v60 = vld [vmem:[%s16929_s29 + $0x1d48] ss:$16 sps:$4 sm:$0xff]   ;;  %v16020_v39 = vld [vmem:[%s16929_s29 + $0x1b6c] ss:$16 sps:$4 sm:$0xff]  }
 0x53d   : > { %11647 = vmatpush1.bf16.msra.mxu0 %v15964_v46  ;;  %v16023_v46 = vld [vmem:[%s16929_s29 + $0x1d6c] ss:$16 sps:$4 sm:$0xff]  }
 0x53e   : > { %11688 = vmatpush1.bf16.msra.mxu1 %v15967_v1  ;;  %11648 = vmatprep.subr.bf16.mxu0 %v15972_v26  ;;  %v16018_v1 = vld [vmem:[%s16929_s29 + $0x1b68] ss:$16 sps:$4 sm:$0xff]  }
 0x53f   : > { %11689 = vmatprep.subr.bf16.mxu1 %v15975_v33  ;;  %v16021_v26 = vld [vmem:[%s16929_s29 + $0x1d68] ss:$16 sps:$4 sm:$0xff]   ;;  %v16026_v33 = vld [vmem:[%s16929_s29 + $0x1b8c] ss:$16 sps:$4 sm:$0xff]  }
 0x541   : > { %11649 = vmatpush1.bf16.msra.mxu0 %v15970_v6  ;;  %v16029_v6 = vld [vmem:[%s16929_s29 + $0x1d8c] ss:$16 sps:$4 sm:$0xff]  }
 0x542   : > { %11690 = vmatpush1.bf16.msra.mxu1 %v15973_v51  ;;  %11650 = vmatprep.subr.bf16.mxu0 %v15978_v53  ;;  %v16024_v51 = vld [vmem:[%s16929_s29 + $0x1b88] ss:$16 sps:$4 sm:$0xff]  }
 0x543   : > { %11691 = vmatprep.subr.bf16.mxu1 %v15981_v24  ;;  %v16027_v53 = vld [vmem:[%s16929_s29 + $0x1d88] ss:$16 sps:$4 sm:$0xff]   ;;  %v16032_v24 = vld [vmem:[%s16929_s29 + $0x1bac] ss:$16 sps:$4 sm:$0xff]  }
 0x545   : > { %11651 = vmatpush1.bf16.msra.mxu0 %v15976_v41  ;;  %v16035_v41 = vld [vmem:[%s16929_s29 + $0x1dac] ss:$16 sps:$4 sm:$0xff]  }
 0x546   : > { %11692 = vmatpush1.bf16.msra.mxu1 %v15979_v7  ;;  %11652 = vmatprep.subr.bf16.mxu0 %v15984_v57  ;;  %v16030_v7 = vld [vmem:[%s16929_s29 + $0x1ba8] ss:$16 sps:$4 sm:$0xff]  }
 0x547   : > { %11693 = vmatprep.subr.bf16.mxu1 %v15987_v14  ;;  %v11348_v16 = vpop.f32.mrb[60].mxu0  ;;  %v16033_v57 = vld [vmem:[%s16929_s29 + $0x1da8] ss:$16 sps:$4 sm:$0xff]   ;;  %v16038_v14 = vld [vmem:[%s16929_s29 + $0x1bcc] ss:$16 sps:$4 sm:$0xff]  }
 0x548   : > { %v11389_v62 = vpop.f32.mrb[60].mxu1  ;;  %v11349_v50 = vadd.f32 %v11348_v16, %v18557_v31  ;;  %v11350_v52 = vpop.f32.mrb[61].mxu0  ;;  %v15996_v31 = vld [vmem:[%s16929_s29 + $0x1aec] ss:$16 sps:$4 sm:$0xff]  }
 0x549   : > { %v11391_v37 = vpop.f32.mrb[61].mxu1  ;;  %v11351_v42 = vadd.f32 %v11350_v52, %v18561_v18  ;;  %v11352_v59 = vpop.f32.mrb[62].mxu0  ;;  %11653 = vmatpush1.bf16.msra.mxu0 %v15982_v49  ;;  %v15999_v18 = vld [vmem:[%s16929_s29 + $0x1cec] ss:$16 sps:$4 sm:$0xff]  }
 0x54a   : > { %v11393_v43 = vpop.f32.mrb[62].mxu1  ;;  %11694 = vmatpush1.bf16.msra.mxu1 %v15985_v44  ;;  %v18631_v17 = vadd.f32 %v11389_v62, %v11349_v50  ;;  %v11353_v22 = vpop.f32.mrb[63].mxu0  ;;  %11654 = vmatprep.subr.bf16.mxu0 %v15990_v61  ;;  %v16041_v49 = vld [vmem:[%s16929_s29 + $0x1dcc] ss:$16 sps:$4 sm:$0xff]   ;;  %v16036_v44 = vld [vmem:[%s16929_s29 + $0x1bc8] ss:$16 sps:$4 sm:$0xff]  }
 0x54b   : > { %v11394_v34 = vpop.f32.mrb[63].mxu1  ;;  %11695 = vmatprep.subr.bf16.mxu1 %v15993_v47  ;;  %v18635_v8 = vadd.f32 %v11391_v37, %v11351_v42  ;;  %v16039_v61 = vld [vmem:[%s16929_s29 + $0x1dc8] ss:$16 sps:$4 sm:$0xff]   ;;  %v16044_v47 = vld [vmem:[%s16929_s29 + $0x1bec] ss:$16 sps:$4 sm:$0xff]  }
 0x54c   : > { %v16047_v16 = vld [vmem:[%s16929_s29 + $0x1dec] ss:$16 sps:$4 sm:$0xff]   ;;  %v16042_v62 = vld [vmem:[%s16929_s29 + $0x1be8] ss:$16 sps:$4 sm:$0xff]  }
 0x54d   : > { %11655 = vmatpush1.bf16.msra.mxu0 %v15988_v55  ;;  %v16045_v50 = vld [vmem:[%s16929_s29 + $0x1de8] ss:$16 sps:$4 sm:$0xff]   ;;  %v16050_v52 = vld [vmem:[%s16929_s29 + $0x1e0c] ss:$16 sps:$4 sm:$0xff]  }
 0x54e   : > { %11696 = vmatpush1.bf16.msra.mxu1 %v15991_v32  ;;  %11656 = vmatprep.subr.bf16.mxu0 %v15996_v31  ;;  %v16053_v37 = vld [vmem:[%s16929_s29 + $0x200c] ss:$16 sps:$4 sm:$0xff]   ;;  %v16048_v42 = vld [vmem:[%s16929_s29 + $0x1e08] ss:$16 sps:$4 sm:$0xff]  }
 0x54f   : > { %11697 = vmatprep.subr.bf16.mxu1 %v15999_v18  ;;  %v16051_v59 = vld [vmem:[%s16929_s29 + $0x2008] ss:$16 sps:$4 sm:$0xff]   ;;  %v16056_v43 = vld [vmem:[%s16929_s29 + $0x1e2c] ss:$16 sps:$4 sm:$0xff]  }
 0x550   : > { %v16059_v55 = vld [vmem:[%s16929_s29 + $0x202c] ss:$16 sps:$4 sm:$0xff]   ;;  %v16054_v32 = vld [vmem:[%s16929_s29 + $0x1e28] ss:$16 sps:$4 sm:$0xff]  }
 0x551   : > { %11657 = vmatpush1.bf16.msra.mxu0 %v15994_v5  ;;  %v16057_v22 = vld [vmem:[%s16929_s29 + $0x2028] ss:$16 sps:$4 sm:$0xff]   ;;  %v16062_v34 = vld [vmem:[%s16929_s29 + $0x1e4c] ss:$16 sps:$4 sm:$0xff]  }
 0x552   : > { %11698 = vmatpush1.bf16.msra.mxu1 %v15997_v23  ;;  %11658 = vmatprep.subr.bf16.mxu0 %v16002_v13  ;;  %v16065_v31 = vld [vmem:[%s16929_s29 + $0x204c] ss:$16 sps:$4 sm:$0xff]   ;;  %v16066_v23 = vld [vmem:[%s16929_s29 + $0x1e68] ss:$16 sps:$4 sm:$0xff]  }
 0x553   : > { %11699 = vmatprep.subr.bf16.mxu1 %v16005_v48  ;;  %v16068_v18 = vld [vmem:[%s16929_s29 + $0x1e6c] ss:$16 sps:$4 sm:$0xff]   ;;  %v16072_v48 = vld [vmem:[%s16929_s29 + $0x1e88] ss:$16 sps:$4 sm:$0xff]  }
 0x554   : > { %v16071_v5 = vld [vmem:[%s16929_s29 + $0x206c] ss:$16 sps:$4 sm:$0xff]  }
 0x555   : > { %11659 = vmatpush1.bf16.msra.mxu0 %v16000_v0  ;;  %v16077_v13 = vld [vmem:[%s16929_s29 + $0x208c] ss:$16 sps:$4 sm:$0xff]   ;;  %v16075_v0 = vld [vmem:[%s16929_s29 + $0x2088] ss:$16 sps:$4 sm:$0xff]  }
 0x556   : > { %11700 = vmatpush1.bf16.msra.mxu1 %v16003_v38  ;;  %11660 = vmatprep.subr.bf16.mxu0 %v16008_v25  ;;  %v16080_v38 = vld [vmem:[%s16929_s29 + $0x1eac] ss:$16 sps:$4 sm:$0xff]  }
 0x557   : > { %11701 = vmatprep.subr.bf16.mxu1 %v16011_v63  ;;  %v16083_v25 = vld [vmem:[%s16929_s29 + $0x20ac] ss:$16 sps:$4 sm:$0xff]   ;;  %v16078_v63 = vld [vmem:[%s16929_s29 + $0x1ea8] ss:$16 sps:$4 sm:$0xff]  }
 0x559   : > { %11661 = vmatpush1.bf16.msra.mxu0 %v16006_v45  ;;  %v16081_v45 = vld [vmem:[%s16929_s29 + $0x20a8] ss:$16 sps:$4 sm:$0xff]  }
 0x55a   : > { %11702 = vmatpush1.bf16.msra.mxu1 %v16009_v11  ;;  %11662 = vmatprep.subr.bf16.mxu0 %v16014_v56  ;;  %v16086_v11 = vld [vmem:[%s16929_s29 + $0x1ecc] ss:$16 sps:$4 sm:$0xff]  }
 0x55b   : > { %11703 = vmatprep.subr.bf16.mxu1 %v16017_v35  ;;  %v16089_v56 = vld [vmem:[%s16929_s29 + $0x20cc] ss:$16 sps:$4 sm:$0xff]  }
 0x55d   : > { %11663 = vmatpush1.bf16.msra.mxu0 %v16012_v40 }
 0x55e   : > { %11704 = vmatpush1.bf16.msra.mxu1 %v16015_v60  ;;  %11664 = vmatprep.subr.bf16.mxu0 %v16020_v39 }
 0x55f   : > { %11705 = vmatprep.subr.bf16.mxu1 %v16023_v46 }
 0x561   : > { %11665 = vmatpush1.bf16.msra.mxu0 %v16018_v1 }
 0x562   : > { %11706 = vmatpush1.bf16.msra.mxu1 %v16021_v26  ;;  %11666 = vmatprep.subr.bf16.mxu0 %v16026_v33 }
 0x563   : > { %11707 = vmatprep.subr.bf16.mxu1 %v16029_v6  ;;  %v16084_v6 = vld [vmem:[%s16929_s29 + $0x1ec8] ss:$16 sps:$4 sm:$0xff]  }
 0x565   : > { %11667 = vmatpush1.bf16.msra.mxu0 %v16024_v51  ;;  %v16087_v51 = vld [vmem:[%s16929_s29 + $0x20c8] ss:$16 sps:$4 sm:$0xff]  }
 0x566   : > { %11708 = vmatpush1.bf16.msra.mxu1 %v16027_v53  ;;  %11668 = vmatprep.subr.bf16.mxu0 %v16032_v24 }
 0x567   : > { %11709 = vmatprep.subr.bf16.mxu1 %v16035_v41 }
 0x569   : > { %11669 = vmatpush1.bf16.msra.mxu0 %v16030_v7 }
 0x56a   : > { %11710 = vmatpush1.bf16.msra.mxu1 %v16033_v57  ;;  %11670 = vmatprep.subr.bf16.mxu0 %v16038_v14  ;;  %v16090_v57 = vld [vmem:[%s16929_s29 + $0x1ee8] ss:$16 sps:$4 sm:$0xff]  }
 0x56b   : > { %11711 = vmatprep.subr.bf16.mxu1 %v16041_v49  ;;  %v16093_v14 = vld [vmem:[%s16929_s29 + $0x20e8] ss:$16 sps:$4 sm:$0xff]   ;;  %v16098_v49 = vld [vmem:[%s16929_s29 + $0x1f0c] ss:$16 sps:$4 sm:$0xff]  }
 0x56d   : > { %11671 = vmatpush1.bf16.msra.mxu0 %v16036_v44  ;;  %v16101_v44 = vld [vmem:[%s16929_s29 + $0x210c] ss:$16 sps:$4 sm:$0xff]  }
 0x56e   : > { %11712 = vmatpush1.bf16.msra.mxu1 %v16039_v61  ;;  %11672 = vmatprep.subr.bf16.mxu0 %v16044_v47  ;;  %v16096_v61 = vld [vmem:[%s16929_s29 + $0x1f08] ss:$16 sps:$4 sm:$0xff]  }
 0x56f   : > { %11713 = vmatprep.subr.bf16.mxu1 %v16047_v16  ;;  %v16099_v47 = vld [vmem:[%s16929_s29 + $0x2108] ss:$16 sps:$4 sm:$0xff]   ;;  %v16104_v16 = vld [vmem:[%s16929_s29 + $0x1f2c] ss:$16 sps:$4 sm:$0xff]  }
 0x571   : > { %11673 = vmatpush1.bf16.msra.mxu0 %v16042_v62  ;;  %v16107_v62 = vld [vmem:[%s16929_s29 + $0x212c] ss:$16 sps:$4 sm:$0xff]  }
 0x572   : > { %11714 = vmatpush1.bf16.msra.mxu1 %v16045_v50  ;;  %11724 = vmatprep.subr.bf16.mxu0 %v16050_v52  ;;  %v16102_v50 = vld [vmem:[%s16929_s29 + $0x1f28] ss:$16 sps:$4 sm:$0xff]  }
 0x573   : > { %11765 = vmatprep.subr.bf16.mxu1 %v16053_v37  ;;  %v16105_v52 = vld [vmem:[%s16929_s29 + $0x2128] ss:$16 sps:$4 sm:$0xff]   ;;  %v16110_v37 = vld [vmem:[%s16929_s29 + $0x1f4c] ss:$16 sps:$4 sm:$0xff]  }
 0x574   : > { %11675 = vmatmul.mubr.bf16.vlgmr.msra.gmra.mrb[76].mxu0 %v17590_v2  ;;  %v16060_v2 = vld [vmem:[%s16929_s29 + $0x1e48] ss:$16 sps:$4 sm:$0xff]  }
 0x575   : > { %11716 = vmatmul.mubr.bf16.vlgmr.msra.gmra.mrb[76].mxu1 %v17682_v27  ;;  %11725 = vmatpush1.bf16.msra.mxu0 %v16048_v42  ;;  %v16063_v27 = vld [vmem:[%s16929_s29 + $0x2048] ss:$16 sps:$4 sm:$0xff]   ;;  %v16113_v42 = vld [vmem:[%s16929_s29 + $0x214c] ss:$16 sps:$4 sm:$0xff]  }
 0x576   : > { %11766 = vmatpush1.bf16.msra.mxu1 %v16051_v59  ;;  %11726 = vmatprep.subr.bf16.mxu0 %v16056_v43  ;;  %v16108_v59 = vld [vmem:[%s16929_s29 + $0x1f48] ss:$16 sps:$4 sm:$0xff]  }
 0x577   : > { %11767 = vmatprep.subr.bf16.mxu1 %v16059_v55  ;;  %11756 = vmatprep.mubr.bf16.mxu0 %v17606_v54  ;;  %v16069_v54 = vld [vmem:[%s16929_s29 + $0x2068] ss:$16 sps:$4 sm:$0xff]   ;;  %v16116_v55 = vld [vmem:[%s16929_s29 + $0x1f6c] ss:$16 sps:$4 sm:$0xff]  }
 0x578   : > { %11797 = vmatprep.mubr.bf16.mxu1 %v17698_v3  ;;  %v16074_v3 = vld [vmem:[%s16929_s29 + $0x1e8c] ss:$16 sps:$4 sm:$0xff]   ;;  %v16111_v43 = vld [vmem:[%s16929_s29 + $0x2148] ss:$16 sps:$4 sm:$0xff]  }
 0x579   : > { %11727 = vmatpush1.bf16.msra.mxu0 %v16054_v32  ;;  %v16119_v32 = vld [vmem:[%s16929_s29 + $0x216c] ss:$16 sps:$4 sm:$0xff]  }
 0x57a   : > { %11768 = vmatpush1.bf16.msra.mxu1 %v16057_v22  ;;  %11728 = vmatprep.subr.bf16.mxu0 %v16062_v34  ;;  %v16114_v22 = vld [vmem:[%s16929_s29 + $0x1f68] ss:$16 sps:$4 sm:$0xff]  }
 0x57b   : > { %11769 = vmatprep.subr.bf16.mxu1 %v16065_v31  ;;  %v16117_v34 = vld [vmem:[%s16929_s29 + $0x2168] ss:$16 sps:$4 sm:$0xff]   ;;  %v16122_v31 = vld [vmem:[%s16929_s29 + $0x1f8c] ss:$16 sps:$4 sm:$0xff]  }
 0x57d   : > { %11729 = vmatpush1.bf16.msra.mxu0 %v16060_v2  ;;  %v16125_v2 = vld [vmem:[%s16929_s29 + $0x218c] ss:$16 sps:$4 sm:$0xff]  }
 0x57e   : > { %11770 = vmatpush1.bf16.msra.mxu1 %v16063_v27  ;;  %11730 = vmatprep.subr.bf16.mxu0 %v16068_v18  ;;  %v16120_v27 = vld [vmem:[%s16929_s29 + $0x1f88] ss:$16 sps:$4 sm:$0xff]  }
 0x57f   : > { %11771 = vmatprep.subr.bf16.mxu1 %v16071_v5  ;;  %v16123_v18 = vld [vmem:[%s16929_s29 + $0x2188] ss:$16 sps:$4 sm:$0xff]   ;;  %v16128_v5 = vld [vmem:[%s16929_s29 + $0x1fac] ss:$16 sps:$4 sm:$0xff]  }
 0x581   : > { %11731 = vmatpush1.bf16.msra.mxu0 %v16066_v23  ;;  %v16131_v23 = vld [vmem:[%s16929_s29 + $0x21ac] ss:$16 sps:$4 sm:$0xff]  }
 0x582   : > { %11772 = vmatpush1.bf16.msra.mxu1 %v16069_v54  ;;  %11732 = vmatprep.subr.bf16.mxu0 %v16074_v3  ;;  %v16126_v54 = vld [vmem:[%s16929_s29 + $0x1fa8] ss:$16 sps:$4 sm:$0xff]  }
 0x583   : > { %11773 = vmatprep.subr.bf16.mxu1 %v16077_v13  ;;  %v16129_v3 = vld [vmem:[%s16929_s29 + $0x21a8] ss:$16 sps:$4 sm:$0xff]   ;;  %v16134_v13 = vld [vmem:[%s16929_s29 + $0x1fcc] ss:$16 sps:$4 sm:$0xff]  }
 0x585   : > { %11733 = vmatpush1.bf16.msra.mxu0 %v16072_v48  ;;  %v16137_v48 = vld [vmem:[%s16929_s29 + $0x21cc] ss:$16 sps:$4 sm:$0xff]  }
 0x586   : > { %11774 = vmatpush1.bf16.msra.mxu1 %v16075_v0  ;;  %11734 = vmatprep.subr.bf16.mxu0 %v16080_v38  ;;  %v16132_v0 = vld [vmem:[%s16929_s29 + $0x1fc8] ss:$16 sps:$4 sm:$0xff]  }
 0x587   : > { %11775 = vmatprep.subr.bf16.mxu1 %v16083_v25  ;;  %v11430_v35 = vpop.f32.mrb[64].mxu0  ;;  %v16135_v38 = vld [vmem:[%s16929_s29 + $0x21c8] ss:$16 sps:$4 sm:$0xff]   ;;  %v16140_v25 = vld [vmem:[%s16929_s29 + $0x1fec] ss:$16 sps:$4 sm:$0xff]  }
 0x588   : > { %v11471_v40 = vpop.f32.mrb[64].mxu1  ;;  %v11431_v60 = vadd.f32 %v11430_v35, %v18631_v17  ;;  %v11432_v39 = vpop.f32.mrb[65].mxu0  ;;  %v16092_v17 = vld [vmem:[%s16929_s29 + $0x1eec] ss:$16 sps:$4 sm:$0xff]  }
 0x589   : > { %v11473_v46 = vpop.f32.mrb[65].mxu1  ;;  %v11433_v1 = vadd.f32 %v11432_v39, %v18635_v8  ;;  %v11434_v26 = vpop.f32.mrb[66].mxu0  ;;  %11735 = vmatpush1.bf16.msra.mxu0 %v16078_v63  ;;  %v16095_v8 = vld [vmem:[%s16929_s29 + $0x20ec] ss:$16 sps:$4 sm:$0xff]  }
 0x58a   : > { %v11475_v33 = vpop.f32.mrb[66].mxu1  ;;  %11776 = vmatpush1.bf16.msra.mxu1 %v16081_v45  ;;  %v18705_v53 = vadd.f32 %v11471_v40, %v11431_v60  ;;  %v11435_v24 = vpop.f32.mrb[67].mxu0  ;;  %11736 = vmatprep.subr.bf16.mxu0 %v16086_v11  ;;  %v16143_v63 = vld [vmem:[%s16929_s29 + $0x21ec] ss:$16 sps:$4 sm:$0xff]   ;;  %v16138_v45 = vld [vmem:[%s16929_s29 + $0x1fe8] ss:$16 sps:$4 sm:$0xff]  }
 0x58b   : > { %v11476_v41 = vpop.f32.mrb[67].mxu1  ;;  %11777 = vmatprep.subr.bf16.mxu1 %v16089_v56  ;;  %v18709_v7 = vadd.f32 %v11473_v46, %v11433_v1  ;;  %v16141_v11 = vld [vmem:[%s16929_s29 + $0x21e8] ss:$16 sps:$4 sm:$0xff]   ;;  %v16146_v56 = vld [vmem:[%s16929_s29 + $0x220c] ss:$16 sps:$4 sm:$0xff]  }
 0x58c   : > { %v16149_v35 = vld [vmem:[%s16929_s29 + $0x240c] ss:$16 sps:$4 sm:$0xff]   ;;  %v16144_v40 = vld [vmem:[%s16929_s29 + $0x2208] ss:$16 sps:$4 sm:$0xff]  }
 0x58d   : > { %11737 = vmatpush1.bf16.msra.mxu0 %v16084_v6  ;;  %v16147_v60 = vld [vmem:[%s16929_s29 + $0x2408] ss:$16 sps:$4 sm:$0xff]   ;;  %v16152_v39 = vld [vmem:[%s16929_s29 + $0x222c] ss:$16 sps:$4 sm:$0xff]  }
 0x58e   : > { %11778 = vmatpush1.bf16.msra.mxu1 %v16087_v51  ;;  %11738 = vmatprep.subr.bf16.mxu0 %v16092_v17  ;;  %v16155_v46 = vld [vmem:[%s16929_s29 + $0x242c] ss:$16 sps:$4 sm:$0xff]   ;;  %v16150_v1 = vld [vmem:[%s16929_s29 + $0x2228] ss:$16 sps:$4 sm:$0xff]  }
 0x58f   : > { %11779 = vmatprep.subr.bf16.mxu1 %v16095_v8  ;;  %v16153_v26 = vld [vmem:[%s16929_s29 + $0x2428] ss:$16 sps:$4 sm:$0xff]   ;;  %v16158_v33 = vld [vmem:[%s16929_s29 + $0x224c] ss:$16 sps:$4 sm:$0xff]  }
 0x590   : > { %v16161_v6 = vld [vmem:[%s16929_s29 + $0x244c] ss:$16 sps:$4 sm:$0xff]   ;;  %v16162_v41 = vld [vmem:[%s16929_s29 + $0x2268] ss:$16 sps:$4 sm:$0xff]  }
 0x591   : > { %11739 = vmatpush1.bf16.msra.mxu0 %v16090_v57  ;;  %v16164_v51 = vld [vmem:[%s16929_s29 + $0x226c] ss:$16 sps:$4 sm:$0xff]   ;;  %v16168_v8 = vld [vmem:[%s16929_s29 + $0x2288] ss:$16 sps:$4 sm:$0xff]  }
 0x592   : > { %11780 = vmatpush1.bf16.msra.mxu1 %v16093_v14  ;;  %11740 = vmatprep.subr.bf16.mxu0 %v16098_v49  ;;  %v16167_v24 = vld [vmem:[%s16929_s29 + $0x246c] ss:$16 sps:$4 sm:$0xff]   ;;  %v16171_v57 = vld [vmem:[%s16929_s29 + $0x2488] ss:$16 sps:$4 sm:$0xff]  }
 0x593   : > { %11781 = vmatprep.subr.bf16.mxu1 %v16101_v44  ;;  %v16173_v17 = vld [vmem:[%s16929_s29 + $0x248c] ss:$16 sps:$4 sm:$0xff]   ;;  %v16174_v44 = vld [vmem:[%s16929_s29 + $0x22a8] ss:$16 sps:$4 sm:$0xff]  }
 0x594   : > { %v16176_v14 = vld [vmem:[%s16929_s29 + $0x22ac] ss:$16 sps:$4 sm:$0xff]  }
 0x595   : > { %11741 = vmatpush1.bf16.msra.mxu0 %v16096_v61  ;;  %v16179_v49 = vld [vmem:[%s16929_s29 + $0x24ac] ss:$16 sps:$4 sm:$0xff]   ;;  %v16177_v61 = vld [vmem:[%s16929_s29 + $0x24a8] ss:$16 sps:$4 sm:$0xff]  }
 0x596   : > { %11782 = vmatpush1.bf16.msra.mxu1 %v16099_v47  ;;  %11742 = vmatprep.subr.bf16.mxu0 %v16104_v16  ;;  %v16182_v47 = vld [vmem:[%s16929_s29 + $0x22cc] ss:$16 sps:$4 sm:$0xff]  }
 0x597   : > { %11783 = vmatprep.subr.bf16.mxu1 %v16107_v62  ;;  %v16185_v16 = vld [vmem:[%s16929_s29 + $0x24cc] ss:$16 sps:$4 sm:$0xff]  }
 0x599   : > { %11743 = vmatpush1.bf16.msra.mxu0 %v16102_v50 }
 0x59a   : > { %11784 = vmatpush1.bf16.msra.mxu1 %v16105_v52  ;;  %11744 = vmatprep.subr.bf16.mxu0 %v16110_v37 }
 0x59b   : > { %11785 = vmatprep.subr.bf16.mxu1 %v16113_v42 }
 0x59d   : > { %11745 = vmatpush1.bf16.msra.mxu0 %v16108_v59 }
 0x59e   : > { %11786 = vmatpush1.bf16.msra.mxu1 %v16111_v43  ;;  %11746 = vmatprep.subr.bf16.mxu0 %v16116_v55 }
 0x59f   : > { %11787 = vmatprep.subr.bf16.mxu1 %v16119_v32  ;;  %v16180_v32 = vld [vmem:[%s16929_s29 + $0x22c8] ss:$16 sps:$4 sm:$0xff]  }
 0x5a1   : > { %11747 = vmatpush1.bf16.msra.mxu0 %v16114_v22  ;;  %v16183_v22 = vld [vmem:[%s16929_s29 + $0x24c8] ss:$16 sps:$4 sm:$0xff]  }
 0x5a2   : > { %11788 = vmatpush1.bf16.msra.mxu1 %v16117_v34  ;;  %11748 = vmatprep.subr.bf16.mxu0 %v16122_v31 }
 0x5a3   : > { %11789 = vmatprep.subr.bf16.mxu1 %v16125_v2 }
 0x5a5   : > { %11749 = vmatpush1.bf16.msra.mxu0 %v16120_v27 }
 0x5a6   : > { %11790 = vmatpush1.bf16.msra.mxu1 %v16123_v18  ;;  %11750 = vmatprep.subr.bf16.mxu0 %v16128_v5  ;;  %v16186_v18 = vld [vmem:[%s16929_s29 + $0x22e8] ss:$16 sps:$4 sm:$0xff]  }
 0x5a7   : > { %11791 = vmatprep.subr.bf16.mxu1 %v16131_v23  ;;  %v16189_v5 = vld [vmem:[%s16929_s29 + $0x24e8] ss:$16 sps:$4 sm:$0xff]   ;;  %v16194_v23 = vld [vmem:[%s16929_s29 + $0x230c] ss:$16 sps:$4 sm:$0xff]  }
 0x5a9   : > { %11751 = vmatpush1.bf16.msra.mxu0 %v16126_v54  ;;  %v16197_v54 = vld [vmem:[%s16929_s29 + $0x250c] ss:$16 sps:$4 sm:$0xff]  }
 0x5aa   : > { %11792 = vmatpush1.bf16.msra.mxu1 %v16129_v3  ;;  %11752 = vmatprep.subr.bf16.mxu0 %v16134_v13  ;;  %v16192_v3 = vld [vmem:[%s16929_s29 + $0x2308] ss:$16 sps:$4 sm:$0xff]  }
 0x5ab   : > { %11793 = vmatprep.subr.bf16.mxu1 %v16137_v48  ;;  %v16195_v13 = vld [vmem:[%s16929_s29 + $0x2508] ss:$16 sps:$4 sm:$0xff]   ;;  %v16200_v48 = vld [vmem:[%s16929_s29 + $0x232c] ss:$16 sps:$4 sm:$0xff]  }
 0x5ad   : > { %11753 = vmatpush1.bf16.msra.mxu0 %v16132_v0  ;;  %v16203_v0 = vld [vmem:[%s16929_s29 + $0x252c] ss:$16 sps:$4 sm:$0xff]  }
 0x5ae   : > { %11794 = vmatpush1.bf16.msra.mxu1 %v16135_v38  ;;  %11754 = vmatprep.subr.bf16.mxu0 %v16140_v25  ;;  %v16198_v38 = vld [vmem:[%s16929_s29 + $0x2328] ss:$16 sps:$4 sm:$0xff]  }
 0x5af   : > { %11795 = vmatprep.subr.bf16.mxu1 %v16143_v63  ;;  %v16201_v25 = vld [vmem:[%s16929_s29 + $0x2528] ss:$16 sps:$4 sm:$0xff]   ;;  %v16206_v63 = vld [vmem:[%s16929_s29 + $0x234c] ss:$16 sps:$4 sm:$0xff]  }
 0x5b1   : > { %11755 = vmatpush1.bf16.msra.mxu0 %v16138_v45  ;;  %v16209_v45 = vld [vmem:[%s16929_s29 + $0x254c] ss:$16 sps:$4 sm:$0xff]  }
 0x5b2   : > { %11796 = vmatpush1.bf16.msra.mxu1 %v16141_v11  ;;  %11806 = vmatprep.subr.bf16.mxu0 %v16146_v56  ;;  %v16204_v11 = vld [vmem:[%s16929_s29 + $0x2348] ss:$16 sps:$4 sm:$0xff]  }
 0x5b3   : > { %11847 = vmatprep.subr.bf16.mxu1 %v16149_v35  ;;  %v16207_v56 = vld [vmem:[%s16929_s29 + $0x2548] ss:$16 sps:$4 sm:$0xff]   ;;  %v16212_v35 = vld [vmem:[%s16929_s29 + $0x236c] ss:$16 sps:$4 sm:$0xff]  }
 0x5b4   : > { %11757 = vmatmul.mubr.bf16.vlgmr.msra.gmra.mrb[80].mxu0 %v17686_v28  ;;  %v16156_v28 = vld [vmem:[%s16929_s29 + $0x2248] ss:$16 sps:$4 sm:$0xff]  }
 0x5b5   : > { %11798 = vmatmul.mubr.bf16.vlgmr.msra.gmra.mrb[80].mxu1 %v17778_v19  ;;  %11807 = vmatpush1.bf16.msra.mxu0 %v16144_v40  ;;  %v16159_v19 = vld [vmem:[%s16929_s29 + $0x2448] ss:$16 sps:$4 sm:$0xff]   ;;  %v16215_v40 = vld [vmem:[%s16929_s29 + $0x256c] ss:$16 sps:$4 sm:$0xff]  }
 0x5b6   : > { %11848 = vmatpush1.bf16.msra.mxu1 %v16147_v60  ;;  %11808 = vmatprep.subr.bf16.mxu0 %v16152_v39  ;;  %v16210_v60 = vld [vmem:[%s16929_s29 + $0x2368] ss:$16 sps:$4 sm:$0xff]  }
 0x5b7   : > { %11849 = vmatprep.subr.bf16.mxu1 %v16155_v46  ;;  %11838 = vmatprep.mubr.bf16.mxu0 %v17702_v4  ;;  %v16165_v4 = vld [vmem:[%s16929_s29 + $0x2468] ss:$16 sps:$4 sm:$0xff]   ;;  %v16218_v46 = vld [vmem:[%s16929_s29 + $0x238c] ss:$16 sps:$4 sm:$0xff]  }
 0x5b8   : > { %11879 = vmatprep.mubr.bf16.mxu1 %v17794_v29  ;;  %v16170_v29 = vld [vmem:[%s16929_s29 + $0x228c] ss:$16 sps:$4 sm:$0xff]   ;;  %v16213_v39 = vld [vmem:[%s16929_s29 + $0x2568] ss:$16 sps:$4 sm:$0xff]  }
 0x5b9   : > { %11809 = vmatpush1.bf16.msra.mxu0 %v16150_v1  ;;  %v16221_v1 = vld [vmem:[%s16929_s29 + $0x258c] ss:$16 sps:$4 sm:$0xff]  }
 0x5ba   : > { %11850 = vmatpush1.bf16.msra.mxu1 %v16153_v26  ;;  %11810 = vmatprep.subr.bf16.mxu0 %v16158_v33  ;;  %v16216_v26 = vld [vmem:[%s16929_s29 + $0x2388] ss:$16 sps:$4 sm:$0xff]  }
 0x5bb   : > { %11851 = vmatprep.subr.bf16.mxu1 %v16161_v6  ;;  %v16219_v33 = vld [vmem:[%s16929_s29 + $0x2588] ss:$16 sps:$4 sm:$0xff]   ;;  %v16224_v6 = vld [vmem:[%s16929_s29 + $0x23ac] ss:$16 sps:$4 sm:$0xff]  }
 0x5bd   : > { %11811 = vmatpush1.bf16.msra.mxu0 %v16156_v28  ;;  %v16227_v28 = vld [vmem:[%s16929_s29 + $0x25ac] ss:$16 sps:$4 sm:$0xff]  }
 0x5be   : > { %11852 = vmatpush1.bf16.msra.mxu1 %v16159_v19  ;;  %11812 = vmatprep.subr.bf16.mxu0 %v16164_v51  ;;  %v16222_v19 = vld [vmem:[%s16929_s29 + $0x23a8] ss:$16 sps:$4 sm:$0xff]  }
 0x5bf   : > { %11853 = vmatprep.subr.bf16.mxu1 %v16167_v24  ;;  %v16225_v51 = vld [vmem:[%s16929_s29 + $0x25a8] ss:$16 sps:$4 sm:$0xff]   ;;  %v16230_v24 = vld [vmem:[%s16929_s29 + $0x23cc] ss:$16 sps:$4 sm:$0xff]  }
 0x5c1   : > { %11813 = vmatpush1.bf16.msra.mxu0 %v16162_v41  ;;  %v16233_v41 = vld [vmem:[%s16929_s29 + $0x25cc] ss:$16 sps:$4 sm:$0xff]  }
 0x5c2   : > { %11854 = vmatpush1.bf16.msra.mxu1 %v16165_v4  ;;  %11814 = vmatprep.subr.bf16.mxu0 %v16170_v29  ;;  %v16228_v4 = vld [vmem:[%s16929_s29 + $0x23c8] ss:$16 sps:$4 sm:$0xff]  }
 0x5c3   : > { %11855 = vmatprep.subr.bf16.mxu1 %v16173_v17  ;;  %v16231_v29 = vld [vmem:[%s16929_s29 + $0x25c8] ss:$16 sps:$4 sm:$0xff]   ;;  %v16236_v17 = vld [vmem:[%s16929_s29 + $0x23ec] ss:$16 sps:$4 sm:$0xff]  }
 0x5c5   : > { %11815 = vmatpush1.bf16.msra.mxu0 %v16168_v8  ;;  %v16239_v8 = vld [vmem:[%s16929_s29 + $0x25ec] ss:$16 sps:$4 sm:$0xff]  }
 0x5c6   : > { %11856 = vmatpush1.bf16.msra.mxu1 %v16171_v57  ;;  %11816 = vmatprep.subr.bf16.mxu0 %v16176_v14  ;;  %v16234_v57 = vld [vmem:[%s16929_s29 + $0x23e8] ss:$16 sps:$4 sm:$0xff]  }
 0x5c7   : > { %11857 = vmatprep.subr.bf16.mxu1 %v16179_v49  ;;  %v11512_v62 = vpop.f32.mrb[68].mxu0  ;;  %v16237_v14 = vld [vmem:[%s16929_s29 + $0x25e8] ss:$16 sps:$4 sm:$0xff]   ;;  %v16242_v49 = vld [vmem:[%s16929_s29 + $0x260c] ss:$16 sps:$4 sm:$0xff]  }
 0x5c8   : > { %v11553_v50 = vpop.f32.mrb[68].mxu1  ;;  %v11513_v52 = vadd.f32 %v11512_v62, %v18705_v53  ;;  %v11514_v37 = vpop.f32.mrb[69].mxu0  ;;  %v16188_v53 = vld [vmem:[%s16929_s29 + $0x22ec] ss:$16 sps:$4 sm:$0xff]  }
 0x5c9   : > { %v11555_v42 = vpop.f32.mrb[69].mxu1  ;;  %v11515_v59 = vadd.f32 %v11514_v37, %v18709_v7  ;;  %v11516_v43 = vpop.f32.mrb[70].mxu0  ;;  %11817 = vmatpush1.bf16.msra.mxu0 %v16174_v44  ;;  %v16191_v7 = vld [vmem:[%s16929_s29 + $0x24ec] ss:$16 sps:$4 sm:$0xff]  }
 0x5ca   : > { %v11557_v55 = vpop.f32.mrb[70].mxu1  ;;  %11858 = vmatpush1.bf16.msra.mxu1 %v16177_v61  ;;  %v18779_v34 = vadd.f32 %v11553_v50, %v11513_v52  ;;  %v11517_v31 = vpop.f32.mrb[71].mxu0  ;;  %11818 = vmatprep.subr.bf16.mxu0 %v16182_v47  ;;  %v16245_v44 = vld [vmem:[%s16929_s29 + $0x280c] ss:$16 sps:$4 sm:$0xff]   ;;  %v16240_v61 = vld [vmem:[%s16929_s29 + $0x2608] ss:$16 sps:$4 sm:$0xff]  }
 0x5cb   : > { %v11558_v2 = vpop.f32.mrb[71].mxu1  ;;  %11859 = vmatprep.subr.bf16.mxu1 %v16185_v16  ;;  %v18783_v27 = vadd.f32 %v11555_v42, %v11515_v59  ;;  %v16243_v47 = vld [vmem:[%s16929_s29 + $0x2808] ss:$16 sps:$4 sm:$0xff]   ;;  %v16248_v16 = vld [vmem:[%s16929_s29 + $0x262c] ss:$16 sps:$4 sm:$0xff]  }
 0x5cc   : > { %v16251_v62 = vld [vmem:[%s16929_s29 + $0x282c] ss:$16 sps:$4 sm:$0xff]   ;;  %v16246_v50 = vld [vmem:[%s16929_s29 + $0x2628] ss:$16 sps:$4 sm:$0xff]  }
 0x5cd   : > { %11819 = vmatpush1.bf16.msra.mxu0 %v16180_v32  ;;  %v16249_v52 = vld [vmem:[%s16929_s29 + $0x2828] ss:$16 sps:$4 sm:$0xff]   ;;  %v16254_v37 = vld [vmem:[%s16929_s29 + $0x264c] ss:$16 sps:$4 sm:$0xff]  }
 0x5ce   : > { %11860 = vmatpush1.bf16.msra.mxu1 %v16183_v22  ;;  %11820 = vmatprep.subr.bf16.mxu0 %v16188_v53  ;;  %v16257_v42 = vld [vmem:[%s16929_s29 + $0x284c] ss:$16 sps:$4 sm:$0xff]   ;;  %v16258_v55 = vld [vmem:[%s16929_s29 + $0x2668] ss:$16 sps:$4 sm:$0xff]  }
 0x5cf   : > { %11861 = vmatprep.subr.bf16.mxu1 %v16191_v7  ;;  %v16260_v59 = vld [vmem:[%s16929_s29 + $0x266c] ss:$16 sps:$4 sm:$0xff]   ;;  %v16264_v22 = vld [vmem:[%s16929_s29 + $0x2688] ss:$16 sps:$4 sm:$0xff]  }
 0x5d0   : > { %v16263_v43 = vld [vmem:[%s16929_s29 + $0x286c] ss:$16 sps:$4 sm:$0xff]   ;;  %v16267_v31 = vld [vmem:[%s16929_s29 + $0x2888] ss:$16 sps:$4 sm:$0xff]  }
 0x5d1   : > { %11821 = vmatpush1.bf16.msra.mxu0 %v16186_v18  ;;  %v16269_v32 = vld [vmem:[%s16929_s29 + $0x288c] ss:$16 sps:$4 sm:$0xff]   ;;  %v16270_v7 = vld [vmem:[%s16929_s29 + $0x26a8] ss:$16 sps:$4 sm:$0xff]  }
 0x5d2   : > { %11862 = vmatpush1.bf16.msra.mxu1 %v16189_v5  ;;  %11822 = vmatprep.subr.bf16.mxu0 %v16194_v23  ;;  %v16272_v2 = vld [vmem:[%s16929_s29 + $0x26ac] ss:$16 sps:$4 sm:$0xff]   ;;  %v16273_v18 = vld [vmem:[%s16929_s29 + $0x28a8] ss:$16 sps:$4 sm:$0xff]  }
 0x5d3   : > { %11863 = vmatprep.subr.bf16.mxu1 %v16197_v54  ;;  %v16275_v53 = vld [vmem:[%s16929_s29 + $0x28ac] ss:$16 sps:$4 sm:$0xff]  }
 0x5d4   : > { %v16278_v5 = vld [vmem:[%s16929_s29 + $0x26cc] ss:$16 sps:$4 sm:$0xff]  }
 0x5d5   : > { %11823 = vmatpush1.bf16.msra.mxu0 %v16192_v3  ;;  %v16281_v23 = vld [vmem:[%s16929_s29 + $0x28cc] ss:$16 sps:$4 sm:$0xff]  }
 0x5d6   : > { %11864 = vmatpush1.bf16.msra.mxu1 %v16195_v13  ;;  %11824 = vmatprep.subr.bf16.mxu0 %v16200_v48 }
 0x5d7   : > { %11865 = vmatprep.subr.bf16.mxu1 %v16203_v0 }
 0x5d9   : > { %11825 = vmatpush1.bf16.msra.mxu0 %v16198_v38 }
 0x5da   : > { %11866 = vmatpush1.bf16.msra.mxu1 %v16201_v25  ;;  %11826 = vmatprep.subr.bf16.mxu0 %v16206_v63 }
 0x5db   : > { %11867 = vmatprep.subr.bf16.mxu1 %v16209_v45  ;;  %v16276_v45 = vld [vmem:[%s16929_s29 + $0x26c8] ss:$16 sps:$4 sm:$0xff]  }
 0x5dd   : > { %11827 = vmatpush1.bf16.msra.mxu0 %v16204_v11  ;;  %v16279_v11 = vld [vmem:[%s16929_s29 + $0x28c8] ss:$16 sps:$4 sm:$0xff]  }
 0x5de   : > { %11868 = vmatpush1.bf16.msra.mxu1 %v16207_v56  ;;  %11828 = vmatprep.subr.bf16.mxu0 %v16212_v35 }
 0x5df   : > { %11869 = vmatprep.subr.bf16.mxu1 %v16215_v40 }
 0x5e1   : > { %11829 = vmatpush1.bf16.msra.mxu0 %v16210_v60 }
 0x5e2   : > { %11870 = vmatpush1.bf16.msra.mxu1 %v16213_v39  ;;  %11830 = vmatprep.subr.bf16.mxu0 %v16218_v46  ;;  %v16282_v39 = vld [vmem:[%s16929_s29 + $0x26e8] ss:$16 sps:$4 sm:$0xff]  }
 0x5e3   : > { %11871 = vmatprep.subr.bf16.mxu1 %v16221_v1  ;;  %v16285_v46 = vld [vmem:[%s16929_s29 + $0x28e8] ss:$16 sps:$4 sm:$0xff]   ;;  %v16290_v1 = vld [vmem:[%s16929_s29 + $0x270c] ss:$16 sps:$4 sm:$0xff]  }
 0x5e5   : > { %11831 = vmatpush1.bf16.msra.mxu0 %v16216_v26  ;;  %v16293_v26 = vld [vmem:[%s16929_s29 + $0x290c] ss:$16 sps:$4 sm:$0xff]  }
 0x5e6   : > { %11872 = vmatpush1.bf16.msra.mxu1 %v16219_v33  ;;  %11832 = vmatprep.subr.bf16.mxu0 %v16224_v6  ;;  %v16288_v33 = vld [vmem:[%s16929_s29 + $0x2708] ss:$16 sps:$4 sm:$0xff]  }
 0x5e7   : > { %11873 = vmatprep.subr.bf16.mxu1 %v16227_v28  ;;  %v16291_v6 = vld [vmem:[%s16929_s29 + $0x2908] ss:$16 sps:$4 sm:$0xff]   ;;  %v16296_v28 = vld [vmem:[%s16929_s29 + $0x272c] ss:$16 sps:$4 sm:$0xff]  }
 0x5e9   : > { %11833 = vmatpush1.bf16.msra.mxu0 %v16222_v19  ;;  %v16299_v19 = vld [vmem:[%s16929_s29 + $0x292c] ss:$16 sps:$4 sm:$0xff]  }
 0x5ea   : > { %11874 = vmatpush1.bf16.msra.mxu1 %v16225_v51  ;;  %11834 = vmatprep.subr.bf16.mxu0 %v16230_v24  ;;  %v16294_v51 = vld [vmem:[%s16929_s29 + $0x2728] ss:$16 sps:$4 sm:$0xff]  }
 0x5eb   : > { %11875 = vmatprep.subr.bf16.mxu1 %v16233_v41  ;;  %v16297_v24 = vld [vmem:[%s16929_s29 + $0x2928] ss:$16 sps:$4 sm:$0xff]   ;;  %v16302_v41 = vld [vmem:[%s16929_s29 + $0x274c] ss:$16 sps:$4 sm:$0xff]  }
 0x5ed   : > { %11835 = vmatpush1.bf16.msra.mxu0 %v16228_v4  ;;  %v16305_v4 = vld [vmem:[%s16929_s29 + $0x294c] ss:$16 sps:$4 sm:$0xff]  }
 0x5ee   : > { %11876 = vmatpush1.bf16.msra.mxu1 %v16231_v29  ;;  %11836 = vmatprep.subr.bf16.mxu0 %v16236_v17  ;;  %v16300_v29 = vld [vmem:[%s16929_s29 + $0x2748] ss:$16 sps:$4 sm:$0xff]  }
 0x5ef   : > { %11877 = vmatprep.subr.bf16.mxu1 %v16239_v8  ;;  %v16303_v17 = vld [vmem:[%s16929_s29 + $0x2948] ss:$16 sps:$4 sm:$0xff]   ;;  %v16308_v8 = vld [vmem:[%s16929_s29 + $0x276c] ss:$16 sps:$4 sm:$0xff]  }
 0x5f1   : > { %11837 = vmatpush1.bf16.msra.mxu0 %v16234_v57  ;;  %v16311_v57 = vld [vmem:[%s16929_s29 + $0x296c] ss:$16 sps:$4 sm:$0xff]  }
 0x5f2   : > { %11878 = vmatpush1.bf16.msra.mxu1 %v16237_v14  ;;  %11888 = vmatprep.subr.bf16.mxu0 %v16242_v49  ;;  %v16306_v14 = vld [vmem:[%s16929_s29 + $0x2768] ss:$16 sps:$4 sm:$0xff]  }
 0x5f3   : > { %11929 = vmatprep.subr.bf16.mxu1 %v16245_v44  ;;  %v16309_v49 = vld [vmem:[%s16929_s29 + $0x2968] ss:$16 sps:$4 sm:$0xff]   ;;  %v16314_v44 = vld [vmem:[%s16929_s29 + $0x278c] ss:$16 sps:$4 sm:$0xff]  }
 0x5f4   : > { %11839 = vmatmul.mubr.bf16.vlgmr.msra.gmra.mrb[84].mxu0 %v17782_v20  ;;  %v16252_v20 = vld [vmem:[%s16929_s29 + $0x2648] ss:$16 sps:$4 sm:$0xff]  }
 0x5f5   : > { %11880 = vmatmul.mubr.bf16.vlgmr.msra.gmra.mrb[84].mxu1 %v17874_v9  ;;  %11889 = vmatpush1.bf16.msra.mxu0 %v16240_v61  ;;  %v16255_v9 = vld [vmem:[%s16929_s29 + $0x2848] ss:$16 sps:$4 sm:$0xff]   ;;  %v16317_v61 = vld [vmem:[%s16929_s29 + $0x298c] ss:$16 sps:$4 sm:$0xff]  }
 0x5f6   : > { %11930 = vmatpush1.bf16.msra.mxu1 %v16243_v47  ;;  %11890 = vmatprep.subr.bf16.mxu0 %v16248_v16  ;;  %v16312_v47 = vld [vmem:[%s16929_s29 + $0x2788] ss:$16 sps:$4 sm:$0xff]  }
 0x5f7   : > { %11931 = vmatprep.subr.bf16.mxu1 %v16251_v62  ;;  %11920 = vmatprep.mubr.bf16.mxu0 %v17798_v30  ;;  %v16261_v30 = vld [vmem:[%s16929_s29 + $0x2868] ss:$16 sps:$4 sm:$0xff]   ;;  %v16320_v62 = vld [vmem:[%s16929_s29 + $0x27ac] ss:$16 sps:$4 sm:$0xff]  }
 0x5f8   : > { %11961 = vmatprep.mubr.bf16.mxu1 %v17890_v21  ;;  %v16266_v21 = vld [vmem:[%s16929_s29 + $0x268c] ss:$16 sps:$4 sm:$0xff]   ;;  %v16315_v16 = vld [vmem:[%s16929_s29 + $0x2988] ss:$16 sps:$4 sm:$0xff]  }
 0x5f9   : > { %11891 = vmatpush1.bf16.msra.mxu0 %v16246_v50  ;;  %v16323_v50 = vld [vmem:[%s16929_s29 + $0x29ac] ss:$16 sps:$4 sm:$0xff]  }
 0x5fa   : > { %11932 = vmatpush1.bf16.msra.mxu1 %v16249_v52  ;;  %11892 = vmatprep.subr.bf16.mxu0 %v16254_v37  ;;  %v16318_v52 = vld [vmem:[%s16929_s29 + $0x27a8] ss:$16 sps:$4 sm:$0xff]  }
 0x5fb   : > { %11933 = vmatprep.subr.bf16.mxu1 %v16257_v42  ;;  %v16321_v37 = vld [vmem:[%s16929_s29 + $0x29a8] ss:$16 sps:$4 sm:$0xff]   ;;  %v16326_v42 = vld [vmem:[%s16929_s29 + $0x27cc] ss:$16 sps:$4 sm:$0xff]  }
 0x5fd   : > { %11893 = vmatpush1.bf16.msra.mxu0 %v16252_v20  ;;  %v16329_v20 = vld [vmem:[%s16929_s29 + $0x29cc] ss:$16 sps:$4 sm:$0xff]  }
 0x5fe   : > { %11934 = vmatpush1.bf16.msra.mxu1 %v16255_v9  ;;  %11894 = vmatprep.subr.bf16.mxu0 %v16260_v59  ;;  %v16324_v9 = vld [vmem:[%s16929_s29 + $0x27c8] ss:$16 sps:$4 sm:$0xff]  }
 0x5ff   : > { %11935 = vmatprep.subr.bf16.mxu1 %v16263_v43  ;;  %v16327_v59 = vld [vmem:[%s16929_s29 + $0x29c8] ss:$16 sps:$4 sm:$0xff]   ;;  %v16332_v43 = vld [vmem:[%s16929_s29 + $0x27ec] ss:$16 sps:$4 sm:$0xff]  }
 0x601   : > { %11895 = vmatpush1.bf16.msra.mxu0 %v16258_v55  ;;  %v16335_v55 = vld [vmem:[%s16929_s29 + $0x29ec] ss:$16 sps:$4 sm:$0xff]  }
 0x602   : > { %11936 = vmatpush1.bf16.msra.mxu1 %v16261_v30  ;;  %11896 = vmatprep.subr.bf16.mxu0 %v16266_v21  ;;  %v16330_v30 = vld [vmem:[%s16929_s29 + $0x27e8] ss:$16 sps:$4 sm:$0xff]  }
 0x603   : > { %11937 = vmatprep.subr.bf16.mxu1 %v16269_v32  ;;  %v16333_v21 = vld [vmem:[%s16929_s29 + $0x29e8] ss:$16 sps:$4 sm:$0xff]   ;;  %v16338_v32 = vld [vmem:[%s16929_s29 + $0x2a0c] ss:$16 sps:$4 sm:$0xff]  }
 0x605   : > { %11897 = vmatpush1.bf16.msra.mxu0 %v16264_v22  ;;  %v16341_v22 = vld [vmem:[%s16929_s29 + $0x2c0c] ss:$16 sps:$4 sm:$0xff]  }
 0x606   : > { %11938 = vmatpush1.bf16.msra.mxu1 %v16267_v31  ;;  %11898 = vmatprep.subr.bf16.mxu0 %v16272_v2  ;;  %v16336_v31 = vld [vmem:[%s16929_s29 + $0x2a08] ss:$16 sps:$4 sm:$0xff]  }
 0x607   : > { %11939 = vmatprep.subr.bf16.mxu1 %v16275_v53  ;;  %v11594_v54 = vpop.f32.mrb[72].mxu0  ;;  %v16339_v2 = vld [vmem:[%s16929_s29 + $0x2c08] ss:$16 sps:$4 sm:$0xff]   ;;  %v16344_v53 = vld [vmem:[%s16929_s29 + $0x2a2c] ss:$16 sps:$4 sm:$0xff]  }
 0x608   : > { %v11635_v3 = vpop.f32.mrb[72].mxu1  ;;  %v11595_v13 = vadd.f32 %v11594_v54, %v18779_v34  ;;  %v11596_v48 = vpop.f32.mrb[73].mxu0  ;;  %v16284_v34 = vld [vmem:[%s16929_s29 + $0x26ec] ss:$16 sps:$4 sm:$0xff]  }
 0x609   : > { %v11637_v0 = vpop.f32.mrb[73].mxu1  ;;  %v11597_v38 = vadd.f32 %v11596_v48, %v18783_v27  ;;  %v11598_v25 = vpop.f32.mrb[74].mxu0  ;;  %11899 = vmatpush1.bf16.msra.mxu0 %v16270_v7  ;;  %v16287_v27 = vld [vmem:[%s16929_s29 + $0x28ec] ss:$16 sps:$4 sm:$0xff]  }
 0x60a   : > { %v11639_v63 = vpop.f32.mrb[74].mxu1  ;;  %11940 = vmatpush1.bf16.msra.mxu1 %v16273_v18  ;;  %v18853_v56 = vadd.f32 %v11635_v3, %v11595_v13  ;;  %v11599_v35 = vpop.f32.mrb[75].mxu0  ;;  %11900 = vmatprep.subr.bf16.mxu0 %v16278_v5  ;;  %v16347_v7 = vld [vmem:[%s16929_s29 + $0x2c2c] ss:$16 sps:$4 sm:$0xff]   ;;  %v16342_v18 = vld [vmem:[%s16929_s29 + $0x2a28] ss:$16 sps:$4 sm:$0xff]  }
 0x60b   : > { %v11640_v40 = vpop.f32.mrb[75].mxu1  ;;  %11941 = vmatprep.subr.bf16.mxu1 %v16281_v23  ;;  %v18857_v60 = vadd.f32 %v11637_v0, %v11597_v38  ;;  %v16345_v5 = vld [vmem:[%s16929_s29 + $0x2c28] ss:$16 sps:$4 sm:$0xff]   ;;  %v16350_v23 = vld [vmem:[%s16929_s29 + $0x2a4c] ss:$16 sps:$4 sm:$0xff]  }
 0x60c   : > { %v16353_v54 = vld [vmem:[%s16929_s29 + $0x2c4c] ss:$16 sps:$4 sm:$0xff]   ;;  %v16354_v38 = vld [vmem:[%s16929_s29 + $0x2a68] ss:$16 sps:$4 sm:$0xff]  }
 0x60d   : > { %11901 = vmatpush1.bf16.msra.mxu0 %v16276_v45  ;;  %v19122_v3 = vld [vmem:[#allocation10_spill] sm:$0xff]  ;;  %v19123_v13 = vld [vmem:[#allocation12_spill] sm:$0xff] }
 0x60e   : > { %11942 = vmatpush1.bf16.msra.mxu1 %v16279_v11  ;;  %11902 = vmatprep.subr.bf16.mxu0 %v16284_v34  ;;  %v16356_v48 = vld [vmem:[%s16929_s29 + $0x2a6c] ss:$16 sps:$4 sm:$0xff]   ;;  %v16357_v25 = vld [vmem:[%s16929_s29 + $0x2c68] ss:$16 sps:$4 sm:$0xff]  }
 0x60f   : > { %11943 = vmatprep.subr.bf16.mxu1 %v16287_v27  ;;  %v16359_v0 = vld [vmem:[%s16929_s29 + $0x2c6c] ss:$16 sps:$4 sm:$0xff]   ;;  %v16360_v11 = vld [vmem:[%s16929_s29 + $0x2a88] ss:$16 sps:$4 sm:$0xff]  }
 0x610   : > { %v16362_v63 = vld [vmem:[%s16929_s29 + $0x2a8c] ss:$16 sps:$4 sm:$0xff]   ;;  %v16363_v35 = vld [vmem:[%s16929_s29 + $0x2c88] ss:$16 sps:$4 sm:$0xff]  }
 0x611   : > { %11903 = vmatpush1.bf16.msra.mxu0 %v16282_v39  ;;  %v16365_v45 = vld [vmem:[%s16929_s29 + $0x2c8c] ss:$16 sps:$4 sm:$0xff]   ;;  %v16366_v27 = vld [vmem:[%s16929_s29 + $0x2aa8] ss:$16 sps:$4 sm:$0xff]  }
 0x612   : > { %11944 = vmatpush1.bf16.msra.mxu1 %v16285_v46  ;;  %11904 = vmatprep.subr.bf16.mxu0 %v16290_v1  ;;  %v16368_v40 = vld [vmem:[%s16929_s29 + $0x2aac] ss:$16 sps:$4 sm:$0xff]   ;;  %v16369_v39 = vld [vmem:[%s16929_s29 + $0x2ca8] ss:$16 sps:$4 sm:$0xff]  }
 0x613   : > { %11945 = vmatprep.subr.bf16.mxu1 %v16293_v26  ;;  %v16371_v34 = vld [vmem:[%s16929_s29 + $0x2cac] ss:$16 sps:$4 sm:$0xff]  }
 0x614   : > { %v16374_v46 = vld [vmem:[%s16929_s29 + $0x2acc] ss:$16 sps:$4 sm:$0xff]  }
 0x615   : > { %11905 = vmatpush1.bf16.msra.mxu0 %v16288_v33  ;;  %v16377_v1 = vld [vmem:[%s16929_s29 + $0x2ccc] ss:$16 sps:$4 sm:$0xff]  }
 0x616   : > { %11946 = vmatpush1.bf16.msra.mxu1 %v16291_v6  ;;  %11906 = vmatprep.subr.bf16.mxu0 %v16296_v28 }
 0x617   : > { %11947 = vmatprep.subr.bf16.mxu1 %v16299_v19 }
 0x619   : > { %11907 = vmatpush1.bf16.msra.mxu0 %v16294_v51 }
 0x61a   : > { %11948 = vmatpush1.bf16.msra.mxu1 %v16297_v24  ;;  %11908 = vmatprep.subr.bf16.mxu0 %v16302_v41 }
 0x61b   : > { %11949 = vmatprep.subr.bf16.mxu1 %v16305_v4  ;;  %v16372_v4 = vld [vmem:[%s16929_s29 + $0x2ac8] ss:$16 sps:$4 sm:$0xff]  }
 0x61d   : > { %11909 = vmatpush1.bf16.msra.mxu0 %v16300_v29  ;;  %v16375_v29 = vld [vmem:[%s16929_s29 + $0x2cc8] ss:$16 sps:$4 sm:$0xff]  }
 0x61e   : > { %11950 = vmatpush1.bf16.msra.mxu1 %v16303_v17  ;;  %11910 = vmatprep.subr.bf16.mxu0 %v16308_v8 }
 0x61f   : > { %11951 = vmatprep.subr.bf16.mxu1 %v16311_v57 }
 0x621   : > { %11911 = vmatpush1.bf16.msra.mxu0 %v16306_v14 }
 0x622   : > { %11952 = vmatpush1.bf16.msra.mxu1 %v16309_v49  ;;  %11912 = vmatprep.subr.bf16.mxu0 %v16314_v44  ;;  %v16378_v49 = vld [vmem:[%s16929_s29 + $0x2ae8] ss:$16 sps:$4 sm:$0xff]  }
 0x623   : > { %11953 = vmatprep.subr.bf16.mxu1 %v16317_v61  ;;  %v16381_v44 = vld [vmem:[%s16929_s29 + $0x2ce8] ss:$16 sps:$4 sm:$0xff]   ;;  %v16386_v61 = vld [vmem:[%s16929_s29 + $0x2b0c] ss:$16 sps:$4 sm:$0xff]  }
 0x625   : > { %11913 = vmatpush1.bf16.msra.mxu0 %v16312_v47  ;;  %v16389_v47 = vld [vmem:[%s16929_s29 + $0x2d0c] ss:$16 sps:$4 sm:$0xff]  }
 0x626   : > { %11954 = vmatpush1.bf16.msra.mxu1 %v16315_v16  ;;  %11914 = vmatprep.subr.bf16.mxu0 %v16320_v62  ;;  %v16384_v16 = vld [vmem:[%s16929_s29 + $0x2b08] ss:$16 sps:$4 sm:$0xff]  }
 0x627   : > { %11955 = vmatprep.subr.bf16.mxu1 %v16323_v50  ;;  %v16387_v62 = vld [vmem:[%s16929_s29 + $0x2d08] ss:$16 sps:$4 sm:$0xff]   ;;  %v16392_v50 = vld [vmem:[%s16929_s29 + $0x2b2c] ss:$16 sps:$4 sm:$0xff]  }
 0x629   : > { %11915 = vmatpush1.bf16.msra.mxu0 %v16318_v52  ;;  %v16395_v52 = vld [vmem:[%s16929_s29 + $0x2d2c] ss:$16 sps:$4 sm:$0xff]  }
 0x62a   : > { %11956 = vmatpush1.bf16.msra.mxu1 %v16321_v37  ;;  %11916 = vmatprep.subr.bf16.mxu0 %v16326_v42  ;;  %v16390_v37 = vld [vmem:[%s16929_s29 + $0x2b28] ss:$16 sps:$4 sm:$0xff]  }
 0x62b   : > { %11957 = vmatprep.subr.bf16.mxu1 %v16329_v20  ;;  %v16393_v42 = vld [vmem:[%s16929_s29 + $0x2d28] ss:$16 sps:$4 sm:$0xff]   ;;  %v16398_v20 = vld [vmem:[%s16929_s29 + $0x2b4c] ss:$16 sps:$4 sm:$0xff]  }
 0x62d   : > { %11917 = vmatpush1.bf16.msra.mxu0 %v16324_v9  ;;  %v16401_v9 = vld [vmem:[%s16929_s29 + $0x2d4c] ss:$16 sps:$4 sm:$0xff]  }
 0x62e   : > { %11958 = vmatpush1.bf16.msra.mxu1 %v16327_v59  ;;  %11918 = vmatprep.subr.bf16.mxu0 %v16332_v43  ;;  %v16396_v59 = vld [vmem:[%s16929_s29 + $0x2b48] ss:$16 sps:$4 sm:$0xff]  }
 0x62f   : > { %11959 = vmatprep.subr.bf16.mxu1 %v16335_v55  ;;  %v16399_v43 = vld [vmem:[%s16929_s29 + $0x2d48] ss:$16 sps:$4 sm:$0xff]   ;;  %v16404_v55 = vld [vmem:[%s16929_s29 + $0x2b6c] ss:$16 sps:$4 sm:$0xff]  }
 0x631   : > { %11919 = vmatpush1.bf16.msra.mxu0 %v16330_v30  ;;  %v16407_v30 = vld [vmem:[%s16929_s29 + $0x2d6c] ss:$16 sps:$4 sm:$0xff]  }
 0x632   : > { %11960 = vmatpush1.bf16.msra.mxu1 %v16333_v21  ;;  %11970 = vmatprep.subr.bf16.mxu0 %v16338_v32  ;;  %v16402_v21 = vld [vmem:[%s16929_s29 + $0x2b68] ss:$16 sps:$4 sm:$0xff]  }
 0x633   : > { %12011 = vmatprep.subr.bf16.mxu1 %v16341_v22  ;;  %v16405_v32 = vld [vmem:[%s16929_s29 + $0x2d68] ss:$16 sps:$4 sm:$0xff]   ;;  %v16410_v22 = vld [vmem:[%s16929_s29 + $0x2b8c] ss:$16 sps:$4 sm:$0xff]  }
 0x634   : > { %11921 = vmatmul.mubr.bf16.vlgmr.msra.gmra.mrb[88].mxu0 %v17878_v58  ;;  %v16348_v58 = vld [vmem:[%s16929_s29 + $0x2a48] ss:$16 sps:$4 sm:$0xff]  }
 0x635   : > { %11962 = vmatmul.mubr.bf16.vlgmr.msra.gmra.mrb[88].mxu1 %v17973_v12  ;;  %11971 = vmatpush1.bf16.msra.mxu0 %v16336_v31  ;;  %v16351_v12 = vld [vmem:[%s16929_s29 + $0x2c48] ss:$16 sps:$4 sm:$0xff]   ;;  %v16413_v31 = vld [vmem:[%s16929_s29 + $0x2d8c] ss:$16 sps:$4 sm:$0xff]  }
 0x636   : > { %12012 = vmatpush1.bf16.msra.mxu1 %v16339_v2  ;;  %11972 = vmatprep.subr.bf16.mxu0 %v16344_v53  ;;  %v16408_v2 = vld [vmem:[%s16929_s29 + $0x2b88] ss:$16 sps:$4 sm:$0xff]  }
 0x637   : > { %12013 = vmatprep.subr.bf16.mxu1 %v16347_v7  ;;  %12002 = vmatprep.mubr.bf16.mxu0 %v19122_v3  ;;  %v16411_v53 = vld [vmem:[%s16929_s29 + $0x2d88] ss:$16 sps:$4 sm:$0xff]   ;;  %v16416_v7 = vld [vmem:[%s16929_s29 + $0x2bac] ss:$16 sps:$4 sm:$0xff]  }
 0x638   : > { %12043 = vmatprep.mubr.bf16.mxu1 %v19123_v13  ;;  %v16425_v3 = vld [vmem:[%s16929_s29 + $0x2dcc] ss:$16 sps:$4 sm:$0xff]   ;;  %v16420_v13 = vld [vmem:[%s16929_s29 + $0x2bc8] ss:$16 sps:$4 sm:$0xff]  }
 0x639   : > { %11973 = vmatpush1.bf16.msra.mxu0 %v16342_v18  ;;  %v16419_v18 = vld [vmem:[%s16929_s29 + $0x2dac] ss:$16 sps:$4 sm:$0xff]  }
 0x63a   : > { %12014 = vmatpush1.bf16.msra.mxu1 %v16345_v5  ;;  %11974 = vmatprep.subr.bf16.mxu0 %v16350_v23  ;;  %v16414_v5 = vld [vmem:[%s16929_s29 + $0x2ba8] ss:$16 sps:$4 sm:$0xff]  }
 0x63b   : > { %12015 = vmatprep.subr.bf16.mxu1 %v16353_v54  ;;  %v16417_v23 = vld [vmem:[%s16929_s29 + $0x2da8] ss:$16 sps:$4 sm:$0xff]   ;;  %v16422_v54 = vld [vmem:[%s16929_s29 + $0x2bcc] ss:$16 sps:$4 sm:$0xff]  }
 0x63d   : > { %11975 = vmatpush1.bf16.msra.mxu0 %v16348_v58  ;;  %v16423_v58 = vld [vmem:[%s16929_s29 + $0x2dc8] ss:$16 sps:$4 sm:$0xff]  }
 0x63e   : > { %12016 = vmatpush1.bf16.msra.mxu1 %v16351_v12  ;;  %11976 = vmatprep.subr.bf16.mxu0 %v16356_v48  ;;  %v16428_v12 = vld [vmem:[%s16929_s29 + $0x2bec] ss:$16 sps:$4 sm:$0xff]  }
 0x63f   : > { %12017 = vmatprep.subr.bf16.mxu1 %v16359_v0  ;;  %v16431_v48 = vld [vmem:[%s16929_s29 + $0x2dec] ss:$16 sps:$4 sm:$0xff]   ;;  %v16426_v0 = vld [vmem:[%s16929_s29 + $0x2be8] ss:$16 sps:$4 sm:$0xff]  }
 0x641   : > { %11977 = vmatpush1.bf16.msra.mxu0 %v16354_v38  ;;  %v16429_v38 = vld [vmem:[%s16929_s29 + $0x2de8] ss:$16 sps:$4 sm:$0xff]  }
 0x642   : > { %12018 = vmatpush1.bf16.msra.mxu1 %v16357_v25  ;;  %11978 = vmatprep.subr.bf16.mxu0 %v16362_v63  ;;  %v16434_v25 = vld [vmem:[%s16929_s29 + $0x2e0c] ss:$16 sps:$4 sm:$0xff]  }
 0x643   : > { %12019 = vmatprep.subr.bf16.mxu1 %v16365_v45  ;;  %v16437_v63 = vld [vmem:[%s16929_s29 + $0x300c] ss:$16 sps:$4 sm:$0xff]   ;;  %v16432_v45 = vld [vmem:[%s16929_s29 + $0x2e08] ss:$16 sps:$4 sm:$0xff]  }
 0x645   : > { %11979 = vmatpush1.bf16.msra.mxu0 %v16360_v11  ;;  %v16435_v11 = vld [vmem:[%s16929_s29 + $0x3008] ss:$16 sps:$4 sm:$0xff]  }
 0x646   : > { %12020 = vmatpush1.bf16.msra.mxu1 %v16363_v35  ;;  %11980 = vmatprep.subr.bf16.mxu0 %v16368_v40  ;;  %v16440_v35 = vld [vmem:[%s16929_s29 + $0x2e2c] ss:$16 sps:$4 sm:$0xff]  }
 0x647   : > { %12021 = vmatprep.subr.bf16.mxu1 %v16371_v34  ;;  %v11676_v26 = vpop.f32.mrb[76].mxu0  ;;  %v16443_v40 = vld [vmem:[%s16929_s29 + $0x302c] ss:$16 sps:$4 sm:$0xff]   ;;  %v19124_v34 = vld [vmem:[#allocation11_spill] sm:$0xff] }
 0x648   : > { %v11717_v33 = vpop.f32.mrb[76].mxu1  ;;  %v11677_v6 = vadd.f32 %v11676_v26, %v18853_v56  ;;  %v11678_v28 = vpop.f32.mrb[77].mxu0  ;;  %v16380_v56 = vld [vmem:[%s16929_s29 + $0x2aec] ss:$16 sps:$4 sm:$0xff]   ;;  %v19125_v26 = vld [vmem:[#allocation13_spill] sm:$0xff] }
 0x649   : > { %v11719_v19 = vpop.f32.mrb[77].mxu1  ;;  %v11679_v51 = vadd.f32 %v11678_v28, %v18857_v60  ;;  %v11680_v24 = vpop.f32.mrb[78].mxu0  ;;  %11981 = vmatpush1.bf16.msra.mxu0 %v16366_v27  ;;  %v16383_v60 = vld [vmem:[%s16929_s29 + $0x2cec] ss:$16 sps:$4 sm:$0xff]   ;;  %v16438_v27 = vld [vmem:[%s16929_s29 + $0x2e28] ss:$16 sps:$4 sm:$0xff]  }
 0x64a   : > { %v11721_v41 = vpop.f32.mrb[78].mxu1  ;;  %12022 = vmatpush1.bf16.msra.mxu1 %v16369_v39  ;;  %v18927_v17 = vadd.f32 %v11717_v33, %v11677_v6  ;;  %v11681_v8 = vpop.f32.mrb[79].mxu0  ;;  %11982 = vmatprep.subr.bf16.mxu0 %v16374_v46  ;;  %v16441_v39 = vld [vmem:[%s16929_s29 + $0x3028] ss:$16 sps:$4 sm:$0xff]   ;;  %v16446_v46 = vld [vmem:[%s16929_s29 + $0x2e4c] ss:$16 sps:$4 sm:$0xff]  }
 0x64b   : > { %v11722_v57 = vpop.f32.mrb[79].mxu1  ;;  %12023 = vmatprep.subr.bf16.mxu1 %v16377_v1  ;;  %v18931_v14 = vadd.f32 %v11719_v19, %v11679_v51  ;;  %v16449_v1 = vld [vmem:[%s16929_s29 + $0x304c] ss:$16 sps:$4 sm:$0xff]   ;;  %v16447_v33 = vld [vmem:[%s16929_s29 + $0x3048] ss:$16 sps:$4 sm:$0xff]  }
 0x64c   : > { %v16452_v6 = vld [vmem:[%s16929_s29 + $0x2e6c] ss:$16 sps:$4 sm:$0xff]   ;;  %v16450_v19 = vld [vmem:[%s16929_s29 + $0x2e68] ss:$16 sps:$4 sm:$0xff]  }
 0x64d   : > { %11983 = vmatpush1.bf16.msra.mxu0 %v16372_v4  ;;  %v16455_v28 = vld [vmem:[%s16929_s29 + $0x306c] ss:$16 sps:$4 sm:$0xff]   ;;  %v16453_v51 = vld [vmem:[%s16929_s29 + $0x3068] ss:$16 sps:$4 sm:$0xff]  }
 0x64e   : > { %12024 = vmatpush1.bf16.msra.mxu1 %v16375_v29  ;;  %11984 = vmatprep.subr.bf16.mxu0 %v16380_v56  ;;  %v16461_v24 = vld [vmem:[%s16929_s29 + $0x308c] ss:$16 sps:$4 sm:$0xff]   ;;  %v16456_v41 = vld [vmem:[%s16929_s29 + $0x2e88] ss:$16 sps:$4 sm:$0xff]  }
 0x64f   : > { %12025 = vmatprep.subr.bf16.mxu1 %v16383_v60  ;;  %v16459_v4 = vld [vmem:[%s16929_s29 + $0x3088] ss:$16 sps:$4 sm:$0xff]   ;;  %v16464_v29 = vld [vmem:[%s16929_s29 + $0x2eac] ss:$16 sps:$4 sm:$0xff]  }
 0x650   : > { %v16467_v8 = vld [vmem:[%s16929_s29 + $0x30ac] ss:$16 sps:$4 sm:$0xff]   ;;  %v16462_v57 = vld [vmem:[%s16929_s29 + $0x2ea8] ss:$16 sps:$4 sm:$0xff]  }
 0x651   : > { %11985 = vmatpush1.bf16.msra.mxu0 %v16378_v49  ;;  %v16465_v56 = vld [vmem:[%s16929_s29 + $0x30a8] ss:$16 sps:$4 sm:$0xff]   ;;  %v16470_v60 = vld [vmem:[%s16929_s29 + $0x2ecc] ss:$16 sps:$4 sm:$0xff]  }
 0x652   : > { %12026 = vmatpush1.bf16.msra.mxu1 %v16381_v44  ;;  %11986 = vmatprep.subr.bf16.mxu0 %v16386_v61  ;;  %v16473_v49 = vld [vmem:[%s16929_s29 + $0x30cc] ss:$16 sps:$4 sm:$0xff]  }
 0x653   : > { %12027 = vmatprep.subr.bf16.mxu1 %v16389_v47 }
 0x655   : > { %11987 = vmatpush1.bf16.msra.mxu0 %v16384_v16 }
 0x656   : > { %12028 = vmatpush1.bf16.msra.mxu1 %v16387_v62  ;;  %11988 = vmatprep.subr.bf16.mxu0 %v16392_v50 }
 0x657   : > { %12029 = vmatprep.subr.bf16.mxu1 %v16395_v52 }
 0x659   : > { %11989 = vmatpush1.bf16.msra.mxu0 %v16390_v37 }
 0x65a   : > { %12030 = vmatpush1.bf16.msra.mxu1 %v16393_v42  ;;  %11990 = vmatprep.subr.bf16.mxu0 %v16398_v20  ;;  %v16468_v42 = vld [vmem:[%s16929_s29 + $0x2ec8] ss:$16 sps:$4 sm:$0xff]  }
 0x65b   : > { %12031 = vmatprep.subr.bf16.mxu1 %v16401_v9  ;;  %v16471_v20 = vld [vmem:[%s16929_s29 + $0x30c8] ss:$16 sps:$4 sm:$0xff]  }
 0x65d   : > { %11991 = vmatpush1.bf16.msra.mxu0 %v16396_v59 }
 0x65e   : > { %12032 = vmatpush1.bf16.msra.mxu1 %v16399_v43  ;;  %11992 = vmatprep.subr.bf16.mxu0 %v16404_v55 }
 0x65f   : > { %12033 = vmatprep.subr.bf16.mxu1 %v16407_v30  ;;  %v16474_v30 = vld [vmem:[%s16929_s29 + $0x2ee8] ss:$16 sps:$4 sm:$0xff]  }
 0x661   : > { %11993 = vmatpush1.bf16.msra.mxu0 %v16402_v21  ;;  %v16477_v21 = vld [vmem:[%s16929_s29 + $0x30e8] ss:$16 sps:$4 sm:$0xff]  }
 0x662   : > { %12034 = vmatpush1.bf16.msra.mxu1 %v16405_v32  ;;  %11994 = vmatprep.subr.bf16.mxu0 %v16410_v22  ;;  %v16482_v32 = vld [vmem:[%s16929_s29 + $0x2f0c] ss:$16 sps:$4 sm:$0xff]  }
 0x663   : > { %12035 = vmatprep.subr.bf16.mxu1 %v16413_v31  ;;  %v16485_v22 = vld [vmem:[%s16929_s29 + $0x310c] ss:$16 sps:$4 sm:$0xff]   ;;  %v16480_v31 = vld [vmem:[%s16929_s29 + $0x2f08] ss:$16 sps:$4 sm:$0xff]  }
 0x665   : > { %11995 = vmatpush1.bf16.msra.mxu0 %v16408_v2  ;;  %v16483_v2 = vld [vmem:[%s16929_s29 + $0x3108] ss:$16 sps:$4 sm:$0xff]  }
 0x666   : > { %12036 = vmatpush1.bf16.msra.mxu1 %v16411_v53  ;;  %11996 = vmatprep.subr.bf16.mxu0 %v16416_v7  ;;  %v16488_v53 = vld [vmem:[%s16929_s29 + $0x2f2c] ss:$16 sps:$4 sm:$0xff]  }
 0x667   : > { %12037 = vmatprep.subr.bf16.mxu1 %v16419_v18  ;;  %v16491_v7 = vld [vmem:[%s16929_s29 + $0x312c] ss:$16 sps:$4 sm:$0xff]   ;;  %v16486_v18 = vld [vmem:[%s16929_s29 + $0x2f28] ss:$16 sps:$4 sm:$0xff]  }
 0x669   : > { %11997 = vmatpush1.bf16.msra.mxu0 %v16414_v5  ;;  %v16489_v5 = vld [vmem:[%s16929_s29 + $0x3128] ss:$16 sps:$4 sm:$0xff]  }
 0x66a   : > { %12038 = vmatpush1.bf16.msra.mxu1 %v16417_v23  ;;  %11998 = vmatprep.subr.bf16.mxu0 %v16422_v54  ;;  %v16494_v23 = vld [vmem:[%s16929_s29 + $0x2f4c] ss:$16 sps:$4 sm:$0xff]  }
 0x66b   : > { %12039 = vmatprep.subr.bf16.mxu1 %v16425_v3  ;;  %v16497_v54 = vld [vmem:[%s16929_s29 + $0x314c] ss:$16 sps:$4 sm:$0xff]   ;;  %v16492_v3 = vld [vmem:[%s16929_s29 + $0x2f48] ss:$16 sps:$4 sm:$0xff]  }
 0x66d   : > { %11999 = vmatpush1.bf16.msra.mxu0 %v16420_v13  ;;  %v16495_v13 = vld [vmem:[%s16929_s29 + $0x3148] ss:$16 sps:$4 sm:$0xff]  }
 0x66e   : > { %12040 = vmatpush1.bf16.msra.mxu1 %v16423_v58  ;;  %12000 = vmatprep.subr.bf16.mxu0 %v16428_v12  ;;  %v16500_v58 = vld [vmem:[%s16929_s29 + $0x2f6c] ss:$16 sps:$4 sm:$0xff]  }
 0x66f   : > { %12041 = vmatprep.subr.bf16.mxu1 %v16431_v48  ;;  %v16503_v12 = vld [vmem:[%s16929_s29 + $0x316c] ss:$16 sps:$4 sm:$0xff]   ;;  %v16498_v48 = vld [vmem:[%s16929_s29 + $0x2f68] ss:$16 sps:$4 sm:$0xff]  }
 0x671   : > { %12001 = vmatpush1.bf16.msra.mxu0 %v16426_v0  ;;  %v16501_v0 = vld [vmem:[%s16929_s29 + $0x3168] ss:$16 sps:$4 sm:$0xff]  }
 0x672   : > { %12042 = vmatpush1.bf16.msra.mxu1 %v16429_v38  ;;  %12052 = vmatprep.subr.bf16.mxu0 %v16434_v25  ;;  %v16506_v38 = vld [vmem:[%s16929_s29 + $0x2f8c] ss:$16 sps:$4 sm:$0xff]  }
 0x673   : > { %12093 = vmatprep.subr.bf16.mxu1 %v16437_v63  ;;  %v16509_v25 = vld [vmem:[%s16929_s29 + $0x318c] ss:$16 sps:$4 sm:$0xff]   ;;  %v16504_v63 = vld [vmem:[%s16929_s29 + $0x2f88] ss:$16 sps:$4 sm:$0xff]  }
 0x674   : > { %12003 = vmatmul.mubr.bf16.vlgmr.msra.gmra.mrb[92].mxu0 %v19124_v34  ;;  %v16513_v34 = vld [vmem:[%s16929_s29 + $0x31a8] ss:$16 sps:$4 sm:$0xff]  }
 0x675   : > { %12044 = vmatmul.mubr.bf16.vlgmr.msra.gmra.mrb[92].mxu1 %v18069_v15  ;;  %12053 = vmatpush1.bf16.msra.mxu0 %v16432_v45  ;;  %v16444_v15 = vld [vmem:[%s16929_s29 + $0x2e48] ss:$16 sps:$4 sm:$0xff]  }
 0x676   : > { %12094 = vmatpush1.bf16.msra.mxu1 %v16435_v11  ;;  %12054 = vmatprep.subr.bf16.mxu0 %v16440_v35  ;;  %v16507_v45 = vld [vmem:[%s16929_s29 + $0x3188] ss:$16 sps:$4 sm:$0xff]   ;;  %v16512_v11 = vld [vmem:[%s16929_s29 + $0x2fac] ss:$16 sps:$4 sm:$0xff]  }
 0x677   : > { %12095 = vmatprep.subr.bf16.mxu1 %v16443_v40  ;;  %12084 = vmatprep.mubr.bf16.mxu0 %v19125_v26  ;;  %v16515_v35 = vld [vmem:[%s16929_s29 + $0x31ac] ss:$16 sps:$4 sm:$0xff]   ;;  %v16510_v40 = vld [vmem:[%s16929_s29 + $0x2fa8] ss:$16 sps:$4 sm:$0xff]  }
 0x678   : > { %12125 = vmatprep.mubr.bf16.mxu1 %v18079_v36  ;;  %v16458_v36 = vld [vmem:[%s16929_s29 + $0x2e8c] ss:$16 sps:$4 sm:$0xff]  }
 0x679   : > { %12055 = vmatpush1.bf16.msra.mxu0 %v16438_v27  ;;  %v16518_v27 = vld [vmem:[%s16929_s29 + $0x2fcc] ss:$16 sps:$4 sm:$0xff]  }
 0x67a   : > { %12096 = vmatpush1.bf16.msra.mxu1 %v16441_v39  ;;  %12056 = vmatprep.subr.bf16.mxu0 %v16446_v46  ;;  %v16521_v39 = vld [vmem:[%s16929_s29 + $0x31cc] ss:$16 sps:$4 sm:$0xff]   ;;  %v16516_v46 = vld [vmem:[%s16929_s29 + $0x2fc8] ss:$16 sps:$4 sm:$0xff]  }
 0x67b   : > { %12097 = vmatprep.subr.bf16.mxu1 %v16449_v1  ;;  %v16519_v1 = vld [vmem:[%s16929_s29 + $0x31c8] ss:$16 sps:$4 sm:$0xff]   ;;  %v16524_v26 = vld [vmem:[%s16929_s29 + $0x2fec] ss:$16 sps:$4 sm:$0xff]  }
 0x67d   : > { %12057 = vmatpush1.bf16.msra.mxu0 %v16444_v15  ;;  %v16527_v15 = vld [vmem:[%s16929_s29 + $0x31ec] ss:$16 sps:$4 sm:$0xff]  }
 0x67e   : > { %12098 = vmatpush1.bf16.msra.mxu1 %v16447_v33  ;;  %12058 = vmatprep.subr.bf16.mxu0 %v16452_v6  ;;  %v16522_v33 = vld [vmem:[%s16929_s29 + $0x2fe8] ss:$16 sps:$4 sm:$0xff]  }
 0x67f   : > { %12099 = vmatprep.subr.bf16.mxu1 %v16455_v28  ;;  %v16525_v6 = vld [vmem:[%s16929_s29 + $0x31e8] ss:$16 sps:$4 sm:$0xff]  }
 0x680   : > { %v19126_v28 = vld [vmem:[#allocation14_spill] sm:$0xff] }
 0x681   : > { %12059 = vmatpush1.bf16.msra.mxu0 %v16450_v19 }
 0x682   : > { %12100 = vmatpush1.bf16.msra.mxu1 %v16453_v51  ;;  %12060 = vmatprep.subr.bf16.mxu0 %v16458_v36 }
 0x683   : > { %12101 = vmatprep.subr.bf16.mxu1 %v16461_v24 }
 0x685   : > { %12061 = vmatpush1.bf16.msra.mxu0 %v16456_v41 }
 0x686   : > { %12102 = vmatpush1.bf16.msra.mxu1 %v16459_v4  ;;  %12062 = vmatprep.subr.bf16.mxu0 %v16464_v29 }
 0x687   : > { %12103 = vmatprep.subr.bf16.mxu1 %v16467_v8  ;;  %v11758_v44 = vpop.f32.mrb[80].mxu0 }
 0x688   : > { %v11799_v61 = vpop.f32.mrb[80].mxu1  ;;  %v11759_v47 = vadd.f32 %v11758_v44, %v18927_v17  ;;  %v11760_v16 = vpop.f32.mrb[81].mxu0  ;;  %v16476_v17 = vld [vmem:[%s16929_s29 + $0x2eec] ss:$16 sps:$4 sm:$0xff]  }
 0x689   : > { %v11801_v62 = vpop.f32.mrb[81].mxu1  ;;  %v11761_v50 = vadd.f32 %v11760_v16, %v18931_v14  ;;  %v11762_v52 = vpop.f32.mrb[82].mxu0  ;;  %12063 = vmatpush1.bf16.msra.mxu0 %v16462_v57  ;;  %v16479_v14 = vld [vmem:[%s16929_s29 + $0x30ec] ss:$16 sps:$4 sm:$0xff]  }
 0x68a   : > { %v11803_v37 = vpop.f32.mrb[82].mxu1  ;;  %12104 = vmatpush1.bf16.msra.mxu1 %v16465_v56  ;;  %v19001_v9 = vadd.f32 %v11799_v61, %v11759_v47  ;;  %v11763_v59 = vpop.f32.mrb[83].mxu0  ;;  %12064 = vmatprep.subr.bf16.mxu0 %v16470_v60 }
 0x68b   : > { %v11804_v43 = vpop.f32.mrb[83].mxu1  ;;  %12105 = vmatprep.subr.bf16.mxu1 %v16473_v49  ;;  %v19005_v55 = vadd.f32 %v11801_v62, %v11761_v50 }
 0x68d   : > { %12065 = vmatpush1.bf16.msra.mxu0 %v16468_v42 }
 0x68e   : > { %12106 = vmatpush1.bf16.msra.mxu1 %v16471_v20  ;;  %12066 = vmatprep.subr.bf16.mxu0 %v16476_v17 }
 0x68f   : > { %12107 = vmatprep.subr.bf16.mxu1 %v16479_v14 }
 0x691   : > { %12067 = vmatpush1.bf16.msra.mxu0 %v16474_v30 }
 0x692   : > { %12108 = vmatpush1.bf16.msra.mxu1 %v16477_v21  ;;  %12068 = vmatprep.subr.bf16.mxu0 %v16482_v32 }
 0x693   : > { %12109 = vmatprep.subr.bf16.mxu1 %v16485_v22 }
 0x695   : > { %12069 = vmatpush1.bf16.msra.mxu0 %v16480_v31 }
 0x696   : > { %12110 = vmatpush1.bf16.msra.mxu1 %v16483_v2  ;;  %12070 = vmatprep.subr.bf16.mxu0 %v16488_v53 }
 0x697   : > { %12111 = vmatprep.subr.bf16.mxu1 %v16491_v7 }
 0x699   : > { %12071 = vmatpush1.bf16.msra.mxu0 %v16486_v18 }
 0x69a   : > { %12112 = vmatpush1.bf16.msra.mxu1 %v16489_v5  ;;  %12072 = vmatprep.subr.bf16.mxu0 %v16494_v23 }
 0x69b   : > { %12113 = vmatprep.subr.bf16.mxu1 %v16497_v54 }
 0x69d   : > { %12073 = vmatpush1.bf16.msra.mxu0 %v16492_v3  ;;  %v282_v3 = vld [vmem:[#allocation2 + $0x10] sm:$0xff] }
 0x69e   : > { %12114 = vmatpush1.bf16.msra.mxu1 %v16495_v13  ;;  %12074 = vmatprep.subr.bf16.mxu0 %v16500_v58 }
 0x69f   : > { %12115 = vmatprep.subr.bf16.mxu1 %v16503_v12 }
 0x6a1   : > { %12075 = vmatpush1.bf16.msra.mxu0 %v16498_v48 }
 0x6a2   : > { %12116 = vmatpush1.bf16.msra.mxu1 %v16501_v0  ;;  %12076 = vmatprep.subr.bf16.mxu0 %v16506_v38  ;;  %v283_v0 = vld [vmem:[#allocation2 + $0x18] sm:$0xff] }
 0x6a3   : > { %12117 = vmatprep.subr.bf16.mxu1 %v16509_v25 }
 0x6a5   : > { %12077 = vmatpush1.bf16.msra.mxu0 %v16504_v63 }
 0x6a6   : > { %12118 = vmatpush1.bf16.msra.mxu1 %v16507_v45  ;;  %12078 = vmatprep.subr.bf16.mxu0 %v16512_v11 }
 0x6a7   : > { %12119 = vmatprep.subr.bf16.mxu1 %v16515_v35  ;;  %v12152_v35 = vlaneseq (!%p13967_p3) }
 0x6a9   : > { %12079 = vmatpush1.bf16.msra.mxu0 %v16510_v40  ;;  %v12153_v40 = vshrl.u32 (!%p13967_p3), %v12152_v35, 7 }
 0x6aa   : > { %12120 = vmatpush1.bf16.msra.mxu1 %v16513_v34  ;;  %12080 = vmatprep.subr.bf16.mxu0 %v16518_v27  ;;  %v12150_v34 = vld [vmem:[%s224_s6] sm:$0xf] (!%p13967_p3) }
 0x6ab   : > { %12121 = vmatprep.subr.bf16.mxu1 %v16521_v39  ;;  %v12146_v27 = vld [vmem:[#allocation2] sm:$0xff] (!%p13967_p3)  ;;  %v12154_v39 = vsub.s32 (!%p13967_p3), 0, %v12153_v40 }
 0x6ad   : > { %12081 = vmatpush1.bf16.msra.mxu0 %v16516_v46  ;;  %v12158_v46 = vsub.s32 (!%p13967_p3), 1, %v12153_v40 }
 0x6ae   : > { %12122 = vmatpush1.bf16.msra.mxu1 %v16519_v1  ;;  %12082 = vmatprep.subr.bf16.mxu0 %v16524_v26  ;;  %v12162_v1 = vsub.s32 (!%p13967_p3), 2, %v12153_v40  ;;  %v12166_v26 = vsub.s32 (!%p13967_p3), 3, %v12153_v40 }
 0x6af   : > { %12123 = vmatprep.subr.bf16.mxu1 %v16527_v15  ;;  %v12147_v15 = vld [vmem:[#allocation2 + $0x8] sm:$0xff] (!%p13967_p3) }
 0x6b1   : > { %12083 = vmatpush1.bf16.msra.mxu0 %v16522_v33 }
 0x6b2   : > { %12124 = vmatpush1.bf16.msra.mxu1 %v16525_v6 }
 0x6b4   : > { %12085 = vmatmul.mubr.bf16.vlgmr.msra.gmra.mrb[96].mxu0 %v19126_v28  ;;  %v12155_v28 = vrot.slane (!%p13967_p3), %v12150_v34, %v12154_v39 }
 0x6b5   : > { %12126 = vmatmul.mubr.bf16.vlgmr.msra.gmra.mrb[96].mxu1 %v18155_v10 }
 0x6c7   : > { %v11840_v19 = vpop.f32.mrb[84].mxu0 }
 0x6c8   : > { %v11881_v51 = vpop.f32.mrb[84].mxu1  ;;  %v11841_v36 = vadd.f32 %v11840_v19, %v19001_v9  ;;  %v11842_v24 = vpop.f32.mrb[85].mxu0  ;;  %v12159_v19 = vrot.slane (!%p13967_p3), %v12150_v34, %v12158_v46 }
 0x6c9   : > { %v11883_v41 = vpop.f32.mrb[85].mxu1  ;;  %v11843_v4 = vadd.f32 %v11842_v24, %v19005_v55  ;;  %v11844_v29 = vpop.f32.mrb[86].mxu0  ;;  %v12172_v24 = vadd.f32 (!%p13967_p3), %v12155_v28, %v12146_v27 }
 0x6ca   : > { %v11885_v8 = vpop.f32.mrb[86].mxu1  ;;  %v11882_v57 = vadd.f32 %v11881_v51, %v11841_v36  ;;  %v11845_v56 = vpop.f32.mrb[87].mxu0  ;;  %v12163_v51 = vrot.slane (!%p13967_p3), %v12150_v34, %v12162_v1  ;;  %v12167_v36 = vrot.slane (!%p13967_p3), %v12150_v34, %v12166_v26 }
 0x6cb   : > { %v11886_v60 = vpop.f32.mrb[87].mxu1  ;;  %v11884_v49 = vadd.f32 %v11883_v41, %v11843_v4  ;;  %v12173_v41 = vadd.f32 (!%p13967_p3), %v12159_v19, %v12147_v15  ;;  %v12176_v8 = vmax.f32 (!%p13967_p3), %v12172_v24, 0.0 }
 0x6cd   : > { %12180 = vst [vmem:[%s16948_s8] sm:$0xff] (!%p13967_p3), %v12176_v8 }
 0x707   : > { %v11922_v44 = vpop.f32.mrb[88].mxu0 }
 0x708   : > { %v11963_v61 = vpop.f32.mrb[88].mxu1  ;;  %v11923_v47 = vadd.f32 %v11922_v44, %v11882_v57  ;;  %v11924_v16 = vpop.f32.mrb[89].mxu0  ;;  %v12177_v57 = vmax.f32 (!%p13967_p3), %v12173_v41, 0.0 }
 0x709   : > { %v11965_v62 = vpop.f32.mrb[89].mxu1  ;;  %v11925_v10 = vadd.f32 %v11924_v16, %v11884_v49  ;;  %v11926_v50 = vpop.f32.mrb[90].mxu0 }
 0x70a   : > { %v11967_v52 = vpop.f32.mrb[90].mxu1  ;;  %v11964_v37 = vadd.f32 %v11963_v61, %v11923_v47  ;;  %v11927_v42 = vpop.f32.mrb[91].mxu0  ;;  %12181 = vst [vmem:[%s16948_s8 + $0x8] sm:$0xff] (!%p13967_p3), %v12177_v57 }
 0x70b   : > { %v11968_v20 = vpop.f32.mrb[91].mxu1  ;;  %v11966_v9 = vadd.f32 %v11965_v62, %v11925_v10 }
 0x747   : > { %v12004_v59 = vpop.f32.mrb[92].mxu0 }
 0x748   : > { %v12045_v43 = vpop.f32.mrb[92].mxu1  ;;  %v12005_v17 = vadd.f32 %v12004_v59, %v11964_v37  ;;  %v12006_v14 = vpop.f32.mrb[93].mxu0 }
 0x749   : > { %v12047_v55 = vpop.f32.mrb[93].mxu1  ;;  %v12007_v30 = vadd.f32 %v12006_v14, %v11966_v9  ;;  %v12008_v21 = vpop.f32.mrb[94].mxu0 }
 0x74a   : > { %v12049_v32 = vpop.f32.mrb[94].mxu1  ;;  %v12046_v22 = vadd.f32 %v12045_v43, %v12005_v17  ;;  %v12009_v31 = vpop.f32.mrb[95].mxu0 }
 0x74b   : > { %v12050_v2 = vpop.f32.mrb[95].mxu1  ;;  %v12048_v53 = vadd.f32 %v12047_v55, %v12007_v30 }
 0x787   : > { %v12086_v7 = vpop.f32.mrb[96].mxu0 }
 0x788   : > { %v12127_v18 = vpop.f32.mrb[96].mxu1  ;;  %v12087_v5 = vadd.f32 %v12086_v7, %v12046_v22  ;;  %v12088_v23 = vpop.f32.mrb[97].mxu0 }
 0x789   : > { %v12129_v54 = vpop.f32.mrb[97].mxu1  ;;  %v12089_v13 = vadd.f32 %v12088_v23, %v12048_v53  ;;  %v12090_v58 = vpop.f32.mrb[98].mxu0  ;;  %12145 = sbr.rel (%p13967_p3) target bundleno = 1948 (0x79c), region = 48 }
 0x78a   : > { %v12131_v12 = vpop.f32.mrb[98].mxu1  ;;  %v12128_v48 = vadd.f32 %v12127_v18, %v12087_v5  ;;  %v12091_v38 = vpop.f32.mrb[99].mxu0 }
 0x78b   : > { %v12132_v25 = vpop.f32.mrb[99].mxu1  ;;  %v12130_v63 = vadd.f32 %v12129_v54, %v12089_v13 }
 0x78c   : > { %v12136_v45 = vadd.f32 %v12128_v48, %v282_v3 }
 0x78d   : > { %v12137_v11 = vadd.f32 %v12130_v63, %v283_v0 }
 0x78e   : > { %12140 = vst [vmem:[#allocation2 + $0x10] sm:$0xff] %v12136_v45 }
 0x78f   : > { %12141 = vst [vmem:[#allocation2 + $0x18] sm:$0xff] %v12137_v11 }
 0x795   : > { %v12148_v33 = vld [vmem:[#allocation2 + $0x10] sm:$0xff] }
 0x796   : > { %v12149_v6 = vld [vmem:[#allocation2 + $0x18] sm:$0xff]  ;;  %v12174_v4 = vadd.f32 %v12163_v51, %v12148_v33 }
 0x797   : > { %v12175_v29 = vadd.f32 %v12167_v36, %v12149_v6 }
 0x798   : > { %v12178_v56 = vmax.f32 %v12174_v4, 0.0 }
 0x799   : > { %v12179_v60 = vmax.f32 %v12175_v29, 0.0 }
 0x79a   : > { %12182 = vst [vmem:[%s16948_s8 + $0x10] sm:$0xff] %v12178_v56 }
 0x79b   : > { %12183 = vst [vmem:[%s16948_s8 + $0x18] sm:$0xff] %v12179_v60 }
 0x79c PF: > { %s19_s22 = sadd.s32 1, %s16682_s22   ;;  %s19127_s29 = sld [smem:[#allocation9_spill]] }
 0x79d   : > { %p16_p11 = scmp.ge.s32.totalorder %s19_s22, 10   ;;  %s19128_s12 = smov %s16646_s13 }
 0x79e   : > { %s19129_s13 = smov %s16650_s14  ;;  %s19130_s14 = smov %s16878_s10 }
 0x79f   : > { %s19131_s15 = smov %s16658_s16  ;;  %s19132_s16 = smov %s16662_s17 }
 0x7a0   : > { %s19133_s17 = smov %s16883_s28  ;;  %s19134_s18 = smov %s16674_s20 }
 0x7a1   : > { %s19135_s19 = smov %s16678_s21  ;;  %s19136_s20 = smov %s19139_s23 }
 0x7a2   : > { %s19137_s21 = smov %s19127_s29  ;;  %18 = sbr.rel (!%p16_p11) target bundleno = 11 (0xb), region = 96 }
 0x7a9   :  { %12206 = vsyncpa [#allocation4], 1 }
 0x7aa   :  { %12208 = vsyncpa [#allocation4 + $0x1], 1 }
 0x7ab   :  { %12209 = vsyncpa [#allocation6], 1 }
 0x7ac   :  { %12211 = vsyncpa [#allocation6 + $0x1], 1 }

</bundles_post_ra>
